<compile_context>
chip_gen: v5e
topology: v5e:2x2
jax: 0.10.0
libtpu: 0.0.40
codegen_flags: <defaults>
</compile_context>

<pallas_src>
import functools
import math

import numpy as np
import jax
import jax.numpy as jnp
from jax import lax
from jax.experimental import pallas as pl
from jax.experimental.pallas import tpu as pltpu


# ----------------------------------------------------------------------------
# Pallas kernel: TB windows -> (TB, N, Cp) block per grid step.
# ----------------------------------------------------------------------------
def _window_attn_kernel(x_ref, wqkv_ref, qkvb_ref, scale_ref, bias_ref,
                        pw_ref, pb_ref, o_ref, acc_ref, *,
                        num_heads, head_dim, c_orig):
    TB, N, Cp = x_ref.shape
    M = TB * N
    mxu_dtype = wqkv_ref.dtype

    x = x_ref[...].reshape(M, Cp)                                    # (M, Cp)

    # Fused QKV projection: one MXU matmul (bf16 operands, f32 accumulation).
    # Bias layout matches torch.cat((q_bias, zeros_like(v_bias), v_bias)).
    qkv = (jnp.dot(x, wqkv_ref[...], preferred_element_type=jnp.float32)
           + qkvb_ref[...])                                          # (M, 3Cp) f32

    # Zero the padded lanes of the pre-projection accumulator so the padded
    # (zero) proj-weight rows never multiply stale VMEM (NaN * 0 risk).
    if Cp > c_orig:
        acc_ref[:, c_orig:] = jnp.zeros((M, Cp - c_orig), acc_ref.dtype)

    for h in range(num_heads):      # static unroll; per-head work is TB-batched
        lo = h * head_dim
        qh = qkv[:, lo:lo + head_dim].reshape(TB, N, head_dim)
        kh = qkv[:, Cp + lo:Cp + lo + head_dim].reshape(TB, N, head_dim)
        vh = qkv[:, 2 * Cp + lo:2 * Cp + lo + head_dim].reshape(TB, N, head_dim)

        # F.normalize(dim=-1, eps=1e-12): 1/max(||q||,1e-12) == rsqrt(max(||q||^2,1e-24)).
        # exp(clamp(logit_scale)) is precomputed on the host (SMEM scalar) and
        # folded into the q-normalization.
        qn = qh * (lax.rsqrt(jnp.maximum(jnp.sum(qh * qh, -1, keepdims=True), 1e-24))
                   * scale_ref[h])
        kn = kh * lax.rsqrt(jnp.maximum(jnp.sum(kh * kh, -1, keepdims=True), 1e-24))

        # Cosine-attention logits kept f32 (small contraction; accurate softmax input).
        attn = jnp.einsum("bnd,bmd->bnm", qn, kn,
                          preferred_element_type=jnp.float32)        # (TB, N, N)
        attn = attn + bias_ref[h][None].astype(jnp.float32)

        # numerically stable softmax; reciprocal on the EUP
        m = jnp.max(attn, axis=-1, keepdims=True)
        p = jnp.exp(attn - m)
        p = p * pl.reciprocal(jnp.sum(p, axis=-1, keepdims=True), approx=True)
        # TODO(synk): attn_drop / proj_drop omitted (p=0.0 / inference no-op).

        pv = jnp.einsum("bnm,bmd->bnd",
                        p.astype(mxu_dtype), vh.astype(mxu_dtype),
                        preferred_element_type=jnp.float32)          # (TB, N, hd)
        # Scratch accumulator write at the head's static lane offset.
        acc_ref[:, lo:lo + head_dim] = pv.reshape(M, head_dim).astype(acc_ref.dtype)

    out = (jnp.dot(acc_ref[...], pw_ref[...], preferred_element_type=jnp.float32)
           + pb_ref[...])                                            # (M, Cp) f32
    o_ref[...] = out.reshape(TB, N, Cp).astype(o_ref.dtype)


# ----------------------------------------------------------------------------
# Generation-aware planning helpers
# ----------------------------------------------------------------------------
def _round_up(v, m):
    return ((v + m - 1) // m) * m


def _chip_plan():
    """Best-effort per-generation VMEM / TensorCore planning."""
    phys = 64 * 2 ** 20                 # conservative (v7x-like) if query fails
    try:
        info = pltpu.get_tpu_info()
        phys = int(getattr(info, "vmem_capacity_bytes", phys))
    except Exception:
        pass
    kind = ""
    try:
        kind = jax.devices()[0].device_kind.lower()
    except Exception:
        pass
    if phys <= 64 * 2 ** 20:
        # v7x-like: 64 MiB VMEM per TC, two TensorCores share the "parallel" grid.
        return dict(phys=phys, budget=int(phys * 0.70),
                    default_scoped=32 * 2 ** 20, dual_core=True)
    # v5e / v6e: 128 MiB physical VMEM, single TensorCore.
    scoped = 16 * 2 ** 20 if ("v5 lite" in kind or "v5e" in kind) else 32 * 2 ** 20
    return dict(phys=phys, budget=int(phys * 0.75),
                default_scoped=scoped, dual_core=False)


def _vmem_bytes(tb, N, Cp, H, head_dim, mxu_bytes, bias_bytes, const_bufs=2):
    """VMEM estimate including in-kernel intermediates, not just tiles + consts."""
    M = tb * N
    io_tiles = 2 * M * Cp * (mxu_bytes + 4)          # double-buffered x in + f32 out
    consts = const_bufs * (Cp * 3 * Cp * mxu_bytes + 3 * Cp * 4
                           + H * N * N * bias_bytes + Cp * Cp * mxu_bytes + Cp * 4)
    scratch = M * Cp * mxu_bytes                     # pre-proj accumulator
    inter = (M * 3 * Cp * 4                          # qkv (f32)
             + 2 * tb * N * N * 4                    # attn + p (f32, per head)
             + 6 * tb * N * head_dim * 4             # q/k/v, qn/kn, pv (f32)
             + M * Cp * 4)                           # proj matmul f32 result
    return int((io_tiles + consts + scratch + inter) * 1.25)


def _pick_block_windows(B_, N, Cp, H, head_dim, mxu_bytes, bias_bytes, plan):
    # >= 1024 projection rows per grid step (85%+ HBM roofline, useful MXU M),
    # subject to the (intermediate-aware) VMEM budget.
    tb = max(1, min(B_, max(1, 1024 // N)))
    while tb > 1 and _vmem_bytes(tb, N, Cp, H, head_dim,
                                 mxu_bytes, bias_bytes) > plan["budget"]:
        tb = max(1, tb // 2)
    if plan["dual_core"]:
        # v7x only: keep >= 2 grid steps so "parallel" feeds both TensorCores.
        while tb > 1 and -(-B_ // tb) < 2:
            tb = max(1, tb // 2)
    return tb


# ----------------------------------------------------------------------------
# Wrapper
# ----------------------------------------------------------------------------
def window_attention(x, params, num_heads, mxu_dtype=jnp.bfloat16):
    """mask=None path of WindowAttention.forward.

    mxu_dtype: operand dtype for the MXU matmuls (accumulation is always f32).
    """
    B_, N, C = x.shape
    H = num_heads
    head_dim = C // num_heads
    out_dtype = x.dtype
    Cp = _round_up(C, 128)                          # lane-dense channel pad
    pad_c = Cp - C
    mxu_bytes = jnp.dtype(mxu_dtype).itemsize
    bias_bytes = mxu_bytes

    # --- host-side (parameter-only) preprocessing: free layout plumbing -------
    def pad2(w):
        return jnp.pad(w, ((0, Cp - w.shape[0]), (0, Cp - w.shape[1])))

    wqkv_t = jnp.concatenate([pad2(params["wq"].T), pad2(params["wk"].T),
                              pad2(params["wv"].T)], axis=1).astype(mxu_dtype)
    qkvb = jnp.concatenate([jnp.pad(params["q_bias"], (0, pad_c)),
                            jnp.zeros((Cp,), jnp.float32),
                            jnp.pad(params["v_bias"], (0, pad_c))]
                           ).reshape(1, 3 * Cp).astype(jnp.float32)
    pw_t = pad2(params["proj_w"].T).astype(mxu_dtype)
    pb = jnp.pad(params["proj_b"], (0, pad_c)).reshape(1, Cp).astype(jnp.float32)
    # exp(clamp(logit_scale, max=log(1/0.01))) -- hoisted out of the kernel.
    scale = jnp.exp(jnp.minimum(params["logit_scale"].reshape(H),
                                math.log(100.0))).astype(jnp.float32)     # (H,)
    bias = params["rel_pos_bias"].astype(mxu_dtype)                       # (H, N, N)

    plan = _chip_plan()
    tb = _pick_block_windows(B_, N, Cp, H, head_dim, mxu_bytes, bias_bytes, plan)
    grid_b = -(-B_ // tb)
    if plan["dual_core"] and grid_b > 1 and grid_b % 2 == 1:
        grid_b += 1                                  # even split across v7x TCs
    B_pad = grid_b * tb

    x_p = x
    if B_pad != B_ or pad_c:
        x_p = jnp.pad(x, ((0, B_pad - B_), (0, 0), (0, pad_c)))
    x_p = x_p.astype(mxu_dtype)

    kernel = functools.partial(_window_attn_kernel, num_heads=H,
                               head_dim=head_dim, c_orig=C)

    vmem_need = _vmem_bytes(tb, N, Cp, H, head_dim, mxu_bytes, bias_bytes)
    cp_kwargs = dict(dimension_semantics=("parallel",))
    if vmem_need > plan["default_scoped"]:           # v5e scoped default is 16 MiB
        cp_kwargs["vmem_limit_bytes"] = int(min(plan["phys"] * 3 // 4,
                                                vmem_need * 3 // 2))

    def make_specs(single_buffer_consts):
        ck = ({"pipeline_mode": pl.Buffered(buffer_count=1)}
              if single_buffer_consts else {})
        return [
            pl.BlockSpec((tb, N, Cp), lambda b: (b, 0, 0)),          # x: TB windows
            # Constant index_map -> fetched once; single-buffered when supported.
            pl.BlockSpec((Cp, 3 * Cp), lambda b: (0, 0), **ck),      # fused qkv W^T
            pl.BlockSpec((1, 3 * Cp), lambda b: (0, 0), **ck),       # fused qkv bias
            pl.BlockSpec(memory_space=pltpu.MemorySpace.SMEM),       # logit scale (H,)
            pl.BlockSpec((H, N, N), lambda b: (0, 0, 0), **ck),      # rel-pos bias
            pl.BlockSpec((Cp, Cp), lambda b: (0, 0), **ck),          # proj W^T
            pl.BlockSpec((1, Cp), lambda b: (0, 0), **ck),           # proj bias
        ]

    def run(single_buffer_consts):
        return pl.pallas_call(
            kernel,
            out_shape=jax.ShapeDtypeStruct((B_pad, N, Cp), out_dtype),
            grid=(grid_b,),
            in_specs=make_specs(single_buffer_consts),
            out_specs=pl.BlockSpec((tb, N, Cp), lambda b: (b, 0, 0)),
            scratch_shapes=[pltpu.VMEM((tb * N, Cp), mxu_dtype)],    # pre-proj acc
            compiler_params=pltpu.CompilerParams(**cp_kwargs),
        )(x_p, wqkv_t, qkvb, scale, bias, pw_t, pb)

    try:
        out = run(True)     # constants single-buffered (reclaims VMEM on v7x)
    except Exception:
        out = run(False)    # fallback: build without BlockSpec pipeline_mode

    return out[:B_, :, :C]


# ----------------------------------------------------------------------------
# Static buffers (same construction as the PyTorch __init__)
# ----------------------------------------------------------------------------
def make_relative_coords_table(Wh, Ww):
    rch = np.arange(-(Wh - 1), Wh, dtype=np.float32)
    rcw = np.arange(-(Ww - 1), Ww, dtype=np.float32)
    table = np.stack(np.meshgrid(rch, rcw, indexing="ij"))           # (2, 2Wh-1, 2Ww-1)
    table = table.transpose(1, 2, 0)[None].copy()                    # (1, 2Wh-1, 2Ww-1, 2)
    table[..., 0] /= (Wh - 1)
    table[..., 1] /= (Ww - 1)
    table *= 8.0
    table = np.sign(table) * np.log2(np.abs(table) + 1.0) / np.log2(8.0)
    return table.astype(np.float32)


def make_relative_position_index(Wh, Ww):
    coords = np.stack(np.meshgrid(np.arange(Wh), np.arange(Ww), indexing="ij"))
    coords_flatten = coords.reshape(2, -1)                           # (2, N)
    rel = coords_flatten[:, :, None] - coords_flatten[:, None, :]    # (2, N, N)
    rel = rel.transpose(1, 2, 0).copy()
    rel[:, :, 0] += Wh - 1
    rel[:, :, 1] += Ww - 1
    rel[:, :, 0] *= 2 * Ww - 1
    return rel.sum(-1).astype(np.int32)                              # (N, N)


# ----------------------------------------------------------------------------
# Deterministic parameter init + parameter-only bias precompute (glue)
# ----------------------------------------------------------------------------
def init_params(key, dim, num_heads, window_size):
    Wh, Ww = window_size
    N = Wh * Ww
    ks = jax.random.split(key, 8)
    std = 1.0 / math.sqrt(dim)

    wqkv = jax.random.normal(ks[0], (3 * dim, dim), jnp.float32) * std
    params = {
        "wq": wqkv[:dim],
        "wk": wqkv[dim:2 * dim],
        "wv": wqkv[2 * dim:],
        "q_bias": jax.random.normal(ks[1], (dim,), jnp.float32) * 0.02,
        "v_bias": jax.random.normal(ks[2], (dim,), jnp.float32) * 0.02,
        "proj_w": jax.random.normal(ks[3], (dim, dim), jnp.float32) * std,
        "proj_b": jax.random.normal(ks[4], (dim,), jnp.float32) * 0.02,
        "logit_scale": jnp.log(10.0 * jnp.ones((num_heads, 1, 1), jnp.float32)),
    }

    # cpb_mlp: Linear(2, 512) + ReLU + Linear(512, H, bias=False) -- parameter-only,
    # so the continuous relative-position bias is precomputed on the host.
    w1 = jax.random.normal(ks[5], (512, 2), jnp.float32) * 0.5
    b1 = jax.random.normal(ks[6], (512,), jnp.float32) * 0.02
    w2 = jax.random.normal(ks[7], (num_heads, 512), jnp.float32) * 0.05

    table = jnp.asarray(make_relative_coords_table(Wh, Ww)).reshape(-1, 2)
    rpi = make_relative_position_index(Wh, Ww)

    hidden = jax.nn.relu(table @ w1.T + b1)
    bias_table = hidden @ w2.T                                       # ((2Wh-1)(2Ww-1), H)
    rpb = bias_table[rpi.reshape(-1)].reshape(N, N, num_heads)
    rpb = jnp.transpose(rpb, (2, 0, 1))                              # (H, N, N)
    params["rel_pos_bias"] = 16.0 * jax.nn.sigmoid(rpb)
    return params


# ----------------------------------------------------------------------------
# Pure-JAX reference (for correctness check)
# ----------------------------------------------------------------------------
def reference(x, params, num_heads):
    B_, N, C = x.shape
    hd = C // num_heads
    with jax.default_matmul_precision("float32"):
        q = x @ params["wq"].T + params["q_bias"]
        k = x @ params["wk"].T
        v = x @ params["wv"].T + params["v_bias"]

        def split(t):
            return t.reshape(B_, N, num_heads, hd).transpose(0, 2, 1, 3)

        q, k, v = split(q), split(k), split(v)
        qn = q / jnp.maximum(jnp.linalg.norm(q, axis=-1, keepdims=True), 1e-12)
        kn = k / jnp.maximum(jnp.linalg.norm(k, axis=-1, keepdims=True), 1e-12)
        attn = jnp.einsum("bhnd,bhmd->bhnm", qn, kn)
        scale = jnp.exp(jnp.minimum(params["logit_scale"].reshape(num_heads, 1, 1),
                                    jnp.log(100.0)))
        attn = attn * scale[None] + params["rel_pos_bias"][None]
        attn = jax.nn.softmax(attn, axis=-1)
        out = jnp.einsum("bhnm,bhmd->bhnd", attn, v)
        out = out.transpose(0, 2, 1, 3).reshape(B_, N, C)
        return out @ params["proj_w"].T + params["proj_b"]


if __name__ == "__main__":
    dim, num_heads = 32, 4
    window_size = (4, 4)
    N = window_size[0] * window_size[1]
    B_ = 8                                  # num_windows * batch

    key = jax.random.PRNGKey(0)
    kx, kp = jax.random.split(key)
    x = jax.random.normal(kx, (B_, N, dim), jnp.float32)
    params = init_params(kp, dim, num_heads, window_size)

    # Default perf config: bf16 MXU operands, f32 accumulation / softmax.
    out_bf16 = jax.block_until_ready(window_attention(x, params, num_heads))
    # Exact f32 path: tight numerical check of the kernel math.
    out_f32 = jax.block_until_ready(
        window_attention(x, params, num_heads, mxu_dtype=jnp.float32))

    assert out_bf16.shape == (B_, N, dim) and out_f32.shape == (B_, N, dim)

    ref = reference(x, params, num_heads)
    np.testing.assert_allclose(np.asarray(out_f32), np.asarray(ref),
                               atol=1e-2, rtol=1e-2)

    # For the bf16 path, compare against a reference evaluated with the same
    # operand quantization (x / qkv / proj weights / rel-pos bias rounded to
    # bf16), so the check isolates kernel correctness from the intended
    # precision reduction of the MXU operands.
    def _q(a):
        return a.astype(jnp.bfloat16).astype(jnp.float32)
    params_q = dict(params)
    for kname in ("wq", "wk", "wv", "proj_w", "rel_pos_bias"):
        params_q[kname] = _q(params[kname])
    ref_q = reference(_q(x), params_q, num_heads)
    np.testing.assert_allclose(np.asarray(out_bf16), np.asarray(ref_q),
                               atol=3e-2, rtol=3e-2)

    print("KERNEL_OK")
</pallas_src>

<mosaic_0001>
module attributes {stable_mosaic.version = 11 : i64} {
  func.func @_window_attn_kernel(%arg0: i32, %arg1: memref<4x16x128xbf16, #tpu.memory_space<vmem>>, %arg2: memref<128x384xbf16, #tpu.memory_space<vmem>>, %arg3: memref<1x384xf32, #tpu.memory_space<vmem>>, %arg4: memref<4xf32, #tpu.memory_space<smem>>, %arg5: memref<4x16x16xbf16, #tpu.memory_space<vmem>>, %arg6: memref<128x128xbf16, #tpu.memory_space<vmem>>, %arg7: memref<1x128xf32, #tpu.memory_space<vmem>>, %arg8: memref<4x16x128xf32, #tpu.memory_space<vmem>>, %arg9: memref<64x128xbf16, #tpu.memory_space<vmem>>) attributes {dimension_semantics = [#tpu.dimension_semantics<parallel>], iteration_bounds = array<i64: 2>, scalar_prefetch = 0 : i64, scratch_operands = 1 : i64, tpu.core_type = #tpu.core_type<tc>, window_params = [{transform_indices = @transform_0, window_bounds = array<i64: 4, 16, 128>}, {pipeline_mode = #tpu.pipeline_mode<synchronous>, transform_indices = @transform_1, window_bounds = array<i64: 128, 384>}, {pipeline_mode = #tpu.pipeline_mode<synchronous>, transform_indices = @transform_2, window_bounds = array<i64: 1, 384>}, {transform_indices = @transform_3, window_bounds = array<i64: 4>}, {pipeline_mode = #tpu.pipeline_mode<synchronous>, transform_indices = @transform_4, window_bounds = array<i64: 4, 16, 16>}, {pipeline_mode = #tpu.pipeline_mode<synchronous>, transform_indices = @transform_5, window_bounds = array<i64: 128, 128>}, {pipeline_mode = #tpu.pipeline_mode<synchronous>, transform_indices = @transform_6, window_bounds = array<i64: 1, 128>}, {transform_indices = @transform_7, window_bounds = array<i64: 4, 16, 128>}]} {
    %c0 = arith.constant 0 : index
    %c0_0 = arith.constant 0 : index
    %c0_1 = arith.constant 0 : index
    %0 = vector.load %arg1[%c0, %c0_0, %c0_1] : memref<4x16x128xbf16, #tpu.memory_space<vmem>>, vector<4x16x128xbf16>
    %1 = vector.shape_cast %0 : vector<4x16x128xbf16> to vector<64x128xbf16>
    %c0_2 = arith.constant 0 : index
    %c0_3 = arith.constant 0 : index
    %2 = vector.load %arg2[%c0_2, %c0_3] : memref<128x384xbf16, #tpu.memory_space<vmem>>, vector<128x384xbf16>
    %cst = arith.constant dense<0.000000e+00> : vector<64x384xf32>
    %3 = tpu.matmul %1, %2, %cst {dimension_numbers = #tpu.dot_dimension_numbers<[1], [0], [0], [1], [0, 0, 1, 1], [], []>} : vector<64x128xbf16>, vector<128x384xbf16>, vector<64x384xf32> -> vector<64x384xf32>
    %c0_4 = arith.constant 0 : index
    %c0_5 = arith.constant 0 : index
    %4 = vector.load %arg3[%c0_4, %c0_5] : memref<1x384xf32, #tpu.memory_space<vmem>>, vector<1x384xf32>
    %5 = vector.broadcast %4 : vector<1x384xf32> to vector<64x384xf32>
    %6 = arith.addf %3, %5 : vector<64x384xf32>
    %cst_6 = arith.constant 0.000000e+00 : bf16
    %7 = vector.broadcast %cst_6 : bf16 to vector<64x96xbf16>
    %c0_7 = arith.constant 0 : index
    %c32 = arith.constant 32 : index
    %8 = vector.load %arg9[%c0_7, %c32] : memref<64x128xbf16, #tpu.memory_space<vmem>>, vector<64x96xbf16>
    tpu.vector_store %arg9[%c0_7, %c32], %7 {strides = array<i32>} : memref<64x128xbf16, #tpu.memory_space<vmem>>, vector<64x96xbf16>,
    %9 = vector.extract_strided_slice %6 {offsets = [0, 0], sizes = [64, 8], strides = [1, 1]} : vector<64x384xf32> to vector<64x8xf32>
    %10 = vector.shape_cast %9 : vector<64x8xf32> to vector<4x16x8xf32>
    %11 = vector.extract_strided_slice %6 {offsets = [0, 128], sizes = [64, 8], strides = [1, 1]} : vector<64x384xf32> to vector<64x8xf32>
    %12 = vector.shape_cast %11 : vector<64x8xf32> to vector<4x16x8xf32>
    %13 = vector.extract_strided_slice %6 {offsets = [0, 256], sizes = [64, 8], strides = [1, 1]} : vector<64x384xf32> to vector<64x8xf32>
    %14 = vector.shape_cast %13 : vector<64x8xf32> to vector<4x16x8xf32>
    %15 = arith.mulf %10, %10 : vector<4x16x8xf32>
    %cst_8 = arith.constant dense<0.000000e+00> : vector<4x16xf32>
    %16 = vector.multi_reduction <add>, %15, %cst_8 [2] : vector<4x16x8xf32> to vector<4x16xf32>
    %17 = vector.shape_cast %16 : vector<4x16xf32> to vector<4x16x1xf32>
    %cst_9 = arith.constant 1.000000e-24 : f32
    %18 = vector.broadcast %cst_9 : f32 to vector<4x16x1xf32>
    %19 = arith.maximumf %17, %18 : vector<4x16x1xf32>
    %20 = math.rsqrt %19 : vector<4x16x1xf32>
    %c0_10 = arith.constant 0 : index
    %21 = memref.load %arg4[%c0_10] : memref<4xf32, #tpu.memory_space<smem>>
    %22 = vector.broadcast %21 : f32 to vector<4x16x1xf32>
    %23 = arith.mulf %20, %22 : vector<4x16x1xf32>
    %24 = vector.broadcast %23 : vector<4x16x1xf32> to vector<4x16x8xf32>
    %25 = arith.mulf %10, %24 : vector<4x16x8xf32>
    %26 = arith.mulf %12, %12 : vector<4x16x8xf32>
    %cst_11 = arith.constant dense<0.000000e+00> : vector<4x16xf32>
    %27 = vector.multi_reduction <add>, %26, %cst_11 [2] : vector<4x16x8xf32> to vector<4x16xf32>
    %28 = vector.shape_cast %27 : vector<4x16xf32> to vector<4x16x1xf32>
    %cst_12 = arith.constant 1.000000e-24 : f32
    %29 = vector.broadcast %cst_12 : f32 to vector<4x16x1xf32>
    %30 = arith.maximumf %28, %29 : vector<4x16x1xf32>
    %31 = math.rsqrt %30 : vector<4x16x1xf32>
    %32 = vector.broadcast %31 : vector<4x16x1xf32> to vector<4x16x8xf32>
    %33 = arith.mulf %12, %32 : vector<4x16x8xf32>
    "tpu.trace_start"() <{level = 10 : i32, message = "bnd,bmd->bnm"}> : () -> ()
    %cst_13 = arith.constant dense<0.000000e+00> : vector<4x16x16xf32>
    %34 = tpu.matmul %25, %33, %cst_13 {dimension_numbers = #tpu.dot_dimension_numbers<[2], [2], [1], [1], [0, 0, 0, 1, 1, 1], [0], [0]>} : vector<4x16x8xf32>, vector<4x16x8xf32>, vector<4x16x16xf32> -> vector<4x16x16xf32>
    "tpu.trace_stop"() : () -> ()
    %c0_14 = arith.constant 0 : index
    %c0_15 = arith.constant 0 : index
    %c0_16 = arith.constant 0 : index
    %35 = vector.load %arg5[%c0_14, %c0_15, %c0_16] : memref<4x16x16xbf16, #tpu.memory_space<vmem>>, vector<1x16x16xbf16>
    %36 = vector.shape_cast %35 : vector<1x16x16xbf16> to vector<16x16xbf16>
    %37 = vector.shape_cast %36 : vector<16x16xbf16> to vector<1x16x16xbf16>
    %38 = arith.extf %37 : vector<1x16x16xbf16> to vector<1x16x16xf32>
    %39 = vector.broadcast %38 : vector<1x16x16xf32> to vector<4x16x16xf32>
    %40 = arith.addf %34, %39 : vector<4x16x16xf32>
    %cst_17 = arith.constant dense<0xFF800000> : vector<4x16xf32>
    %41 = vector.multi_reduction <maximumf>, %40, %cst_17 [2] : vector<4x16x16xf32> to vector<4x16xf32>
    %42 = vector.shape_cast %41 : vector<4x16xf32> to vector<4x16x1xf32>
    %43 = vector.broadcast %42 : vector<4x16x1xf32> to vector<4x16x16xf32>
    %44 = arith.subf %40, %43 : vector<4x16x16xf32>
    %45 = math.exp %44 : vector<4x16x16xf32>
    %cst_18 = arith.constant dense<0.000000e+00> : vector<4x16xf32>
    %46 = vector.multi_reduction <add>, %45, %cst_18 [2] : vector<4x16x16xf32> to vector<4x16xf32>
    %47 = vector.shape_cast %46 : vector<4x16xf32> to vector<4x16x1xf32>
    %48 = tpu.reciprocal %47 {approx = true} : vector<4x16x1xf32> -> vector<4x16x1xf32>
    %49 = vector.broadcast %48 : vector<4x16x1xf32> to vector<4x16x16xf32>
    %50 = arith.mulf %45, %49 : vector<4x16x16xf32>
    %51 = arith.truncf %50 : vector<4x16x16xf32> to vector<4x16x16xbf16>
    %52 = arith.truncf %14 : vector<4x16x8xf32> to vector<4x16x8xbf16>
    "tpu.trace_start"() <{level = 10 : i32, message = "bnm,bmd->bnd"}> : () -> ()
    %cst_19 = arith.constant dense<0.000000e+00> : vector<4x16x8xf32>
    %53 = tpu.matmul %51, %52, %cst_19 {dimension_numbers = #tpu.dot_dimension_numbers<[2], [1], [1], [2], [0, 0, 0, 1, 1, 2], [0], [0]>} : vector<4x16x16xbf16>, vector<4x16x8xbf16>, vector<4x16x8xf32> -> vector<4x16x8xf32>
    "tpu.trace_stop"() : () -> ()
    %54 = vector.shape_cast %53 : vector<4x16x8xf32> to vector<64x8xf32>
    %55 = arith.truncf %54 : vector<64x8xf32> to vector<64x8xbf16>
    %c0_20 = arith.constant 0 : index
    %c0_21 = arith.constant 0 : index
    %56 = vector.load %arg9[%c0_20, %c0_21] : memref<64x128xbf16, #tpu.memory_space<vmem>>, vector<64x8xbf16>
    tpu.vector_store %arg9[%c0_20, %c0_21], %55 {strides = array<i32>} : memref<64x128xbf16, #tpu.memory_space<vmem>>, vector<64x8xbf16>,
    %57 = vector.extract_strided_slice %6 {offsets = [0, 8], sizes = [64, 8], strides = [1, 1]} : vector<64x384xf32> to vector<64x8xf32>
    %58 = vector.shape_cast %57 : vector<64x8xf32> to vector<4x16x8xf32>
    %59 = vector.extract_strided_slice %6 {offsets = [0, 136], sizes = [64, 8], strides = [1, 1]} : vector<64x384xf32> to vector<64x8xf32>
    %60 = vector.shape_cast %59 : vector<64x8xf32> to vector<4x16x8xf32>
    %61 = vector.extract_strided_slice %6 {offsets = [0, 264], sizes = [64, 8], strides = [1, 1]} : vector<64x384xf32> to vector<64x8xf32>
    %62 = vector.shape_cast %61 : vector<64x8xf32> to vector<4x16x8xf32>
    %63 = arith.mulf %58, %58 : vector<4x16x8xf32>
    %cst_22 = arith.constant dense<0.000000e+00> : vector<4x16xf32>
    %64 = vector.multi_reduction <add>, %63, %cst_22 [2] : vector<4x16x8xf32> to vector<4x16xf32>
    %65 = vector.shape_cast %64 : vector<4x16xf32> to vector<4x16x1xf32>
    %cst_23 = arith.constant 1.000000e-24 : f32
    %66 = vector.broadcast %cst_23 : f32 to vector<4x16x1xf32>
    %67 = arith.maximumf %65, %66 : vector<4x16x1xf32>
    %68 = math.rsqrt %67 : vector<4x16x1xf32>
    %c1 = arith.constant 1 : index
    %69 = memref.load %arg4[%c1] : memref<4xf32, #tpu.memory_space<smem>>
    %70 = vector.broadcast %69 : f32 to vector<4x16x1xf32>
    %71 = arith.mulf %68, %70 : vector<4x16x1xf32>
    %72 = vector.broadcast %71 : vector<4x16x1xf32> to vector<4x16x8xf32>
    %73 = arith.mulf %58, %72 : vector<4x16x8xf32>
    %74 = arith.mulf %60, %60 : vector<4x16x8xf32>
    %cst_24 = arith.constant dense<0.000000e+00> : vector<4x16xf32>
    %75 = vector.multi_reduction <add>, %74, %cst_24 [2] : vector<4x16x8xf32> to vector<4x16xf32>
    %76 = vector.shape_cast %75 : vector<4x16xf32> to vector<4x16x1xf32>
    %cst_25 = arith.constant 1.000000e-24 : f32
    %77 = vector.broadcast %cst_25 : f32 to vector<4x16x1xf32>
    %78 = arith.maximumf %76, %77 : vector<4x16x1xf32>
    %79 = math.rsqrt %78 : vector<4x16x1xf32>
    %80 = vector.broadcast %79 : vector<4x16x1xf32> to vector<4x16x8xf32>
    %81 = arith.mulf %60, %80 : vector<4x16x8xf32>
    "tpu.trace_start"() <{level = 10 : i32, message = "bnd,bmd->bnm"}> : () -> ()
    %cst_26 = arith.constant dense<0.000000e+00> : vector<4x16x16xf32>
    %82 = tpu.matmul %73, %81, %cst_26 {dimension_numbers = #tpu.dot_dimension_numbers<[2], [2], [1], [1], [0, 0, 0, 1, 1, 1], [0], [0]>} : vector<4x16x8xf32>, vector<4x16x8xf32>, vector<4x16x16xf32> -> vector<4x16x16xf32>
    "tpu.trace_stop"() : () -> ()
    %c1_27 = arith.constant 1 : index
    %c0_28 = arith.constant 0 : index
    %c0_29 = arith.constant 0 : index
    %83 = vector.load %arg5[%c1_27, %c0_28, %c0_29] : memref<4x16x16xbf16, #tpu.memory_space<vmem>>, vector<1x16x16xbf16>
    %84 = vector.shape_cast %83 : vector<1x16x16xbf16> to vector<16x16xbf16>
    %85 = vector.shape_cast %84 : vector<16x16xbf16> to vector<1x16x16xbf16>
    %86 = arith.extf %85 : vector<1x16x16xbf16> to vector<1x16x16xf32>
    %87 = vector.broadcast %86 : vector<1x16x16xf32> to vector<4x16x16xf32>
    %88 = arith.addf %82, %87 : vector<4x16x16xf32>
    %cst_30 = arith.constant dense<0xFF800000> : vector<4x16xf32>
    %89 = vector.multi_reduction <maximumf>, %88, %cst_30 [2] : vector<4x16x16xf32> to vector<4x16xf32>
    %90 = vector.shape_cast %89 : vector<4x16xf32> to vector<4x16x1xf32>
    %91 = vector.broadcast %90 : vector<4x16x1xf32> to vector<4x16x16xf32>
    %92 = arith.subf %88, %91 : vector<4x16x16xf32>
    %93 = math.exp %92 : vector<4x16x16xf32>
    %cst_31 = arith.constant dense<0.000000e+00> : vector<4x16xf32>
    %94 = vector.multi_reduction <add>, %93, %cst_31 [2] : vector<4x16x16xf32> to vector<4x16xf32>
    %95 = vector.shape_cast %94 : vector<4x16xf32> to vector<4x16x1xf32>
    %96 = tpu.reciprocal %95 {approx = true} : vector<4x16x1xf32> -> vector<4x16x1xf32>
    %97 = vector.broadcast %96 : vector<4x16x1xf32> to vector<4x16x16xf32>
    %98 = arith.mulf %93, %97 : vector<4x16x16xf32>
    %99 = arith.truncf %98 : vector<4x16x16xf32> to vector<4x16x16xbf16>
    %100 = arith.truncf %62 : vector<4x16x8xf32> to vector<4x16x8xbf16>
    "tpu.trace_start"() <{level = 10 : i32, message = "bnm,bmd->bnd"}> : () -> ()
    %cst_32 = arith.constant dense<0.000000e+00> : vector<4x16x8xf32>
    %101 = tpu.matmul %99, %100, %cst_32 {dimension_numbers = #tpu.dot_dimension_numbers<[2], [1], [1], [2], [0, 0, 0, 1, 1, 2], [0], [0]>} : vector<4x16x16xbf16>, vector<4x16x8xbf16>, vector<4x16x8xf32> -> vector<4x16x8xf32>
    "tpu.trace_stop"() : () -> ()
    %102 = vector.shape_cast %101 : vector<4x16x8xf32> to vector<64x8xf32>
    %103 = arith.truncf %102 : vector<64x8xf32> to vector<64x8xbf16>
    %c0_33 = arith.constant 0 : index
    %c8 = arith.constant 8 : index
    %104 = vector.load %arg9[%c0_33, %c8] : memref<64x128xbf16, #tpu.memory_space<vmem>>, vector<64x8xbf16>
    tpu.vector_store %arg9[%c0_33, %c8], %103 {strides = array<i32>} : memref<64x128xbf16, #tpu.memory_space<vmem>>, vector<64x8xbf16>,
    %105 = vector.extract_strided_slice %6 {offsets = [0, 16], sizes = [64, 8], strides = [1, 1]} : vector<64x384xf32> to vector<64x8xf32>
    %106 = vector.shape_cast %105 : vector<64x8xf32> to vector<4x16x8xf32>
    %107 = vector.extract_strided_slice %6 {offsets = [0, 144], sizes = [64, 8], strides = [1, 1]} : vector<64x384xf32> to vector<64x8xf32>
    %108 = vector.shape_cast %107 : vector<64x8xf32> to vector<4x16x8xf32>
    %109 = vector.extract_strided_slice %6 {offsets = [0, 272], sizes = [64, 8], strides = [1, 1]} : vector<64x384xf32> to vector<64x8xf32>
    %110 = vector.shape_cast %109 : vector<64x8xf32> to vector<4x16x8xf32>
    %111 = arith.mulf %106, %106 : vector<4x16x8xf32>
    %cst_34 = arith.constant dense<0.000000e+00> : vector<4x16xf32>
    %112 = vector.multi_reduction <add>, %111, %cst_34 [2] : vector<4x16x8xf32> to vector<4x16xf32>
    %113 = vector.shape_cast %112 : vector<4x16xf32> to vector<4x16x1xf32>
    %cst_35 = arith.constant 1.000000e-24 : f32
    %114 = vector.broadcast %cst_35 : f32 to vector<4x16x1xf32>
    %115 = arith.maximumf %113, %114 : vector<4x16x1xf32>
    %116 = math.rsqrt %115 : vector<4x16x1xf32>
    %c2 = arith.constant 2 : index
    %117 = memref.load %arg4[%c2] : memref<4xf32, #tpu.memory_space<smem>>
    %118 = vector.broadcast %117 : f32 to vector<4x16x1xf32>
    %119 = arith.mulf %116, %118 : vector<4x16x1xf32>
    %120 = vector.broadcast %119 : vector<4x16x1xf32> to vector<4x16x8xf32>
    %121 = arith.mulf %106, %120 : vector<4x16x8xf32>
    %122 = arith.mulf %108, %108 : vector<4x16x8xf32>
    %cst_36 = arith.constant dense<0.000000e+00> : vector<4x16xf32>
    %123 = vector.multi_reduction <add>, %122, %cst_36 [2] : vector<4x16x8xf32> to vector<4x16xf32>
    %124 = vector.shape_cast %123 : vector<4x16xf32> to vector<4x16x1xf32>
    %cst_37 = arith.constant 1.000000e-24 : f32
    %125 = vector.broadcast %cst_37 : f32 to vector<4x16x1xf32>
    %126 = arith.maximumf %124, %125 : vector<4x16x1xf32>
    %127 = math.rsqrt %126 : vector<4x16x1xf32>
    %128 = vector.broadcast %127 : vector<4x16x1xf32> to vector<4x16x8xf32>
    %129 = arith.mulf %108, %128 : vector<4x16x8xf32>
    "tpu.trace_start"() <{level = 10 : i32, message = "bnd,bmd->bnm"}> : () -> ()
    %cst_38 = arith.constant dense<0.000000e+00> : vector<4x16x16xf32>
    %130 = tpu.matmul %121, %129, %cst_38 {dimension_numbers = #tpu.dot_dimension_numbers<[2], [2], [1], [1], [0, 0, 0, 1, 1, 1], [0], [0]>} : vector<4x16x8xf32>, vector<4x16x8xf32>, vector<4x16x16xf32> -> vector<4x16x16xf32>
    "tpu.trace_stop"() : () -> ()
    %c2_39 = arith.constant 2 : index
    %c0_40 = arith.constant 0 : index
    %c0_41 = arith.constant 0 : index
    %131 = vector.load %arg5[%c2_39, %c0_40, %c0_41] : memref<4x16x16xbf16, #tpu.memory_space<vmem>>, vector<1x16x16xbf16>
    %132 = vector.shape_cast %131 : vector<1x16x16xbf16> to vector<16x16xbf16>
    %133 = vector.shape_cast %132 : vector<16x16xbf16> to vector<1x16x16xbf16>
    %134 = arith.extf %133 : vector<1x16x16xbf16> to vector<1x16x16xf32>
    %135 = vector.broadcast %134 : vector<1x16x16xf32> to vector<4x16x16xf32>
    %136 = arith.addf %130, %135 : vector<4x16x16xf32>
    %cst_42 = arith.constant dense<0xFF800000> : vector<4x16xf32>
    %137 = vector.multi_reduction <maximumf>, %136, %cst_42 [2] : vector<4x16x16xf32> to vector<4x16xf32>
    %138 = vector.shape_cast %137 : vector<4x16xf32> to vector<4x16x1xf32>
    %139 = vector.broadcast %138 : vector<4x16x1xf32> to vector<4x16x16xf32>
    %140 = arith.subf %136, %139 : vector<4x16x16xf32>
    %141 = math.exp %140 : vector<4x16x16xf32>
    %cst_43 = arith.constant dense<0.000000e+00> : vector<4x16xf32>
    %142 = vector.multi_reduction <add>, %141, %cst_43 [2] : vector<4x16x16xf32> to vector<4x16xf32>
    %143 = vector.shape_cast %142 : vector<4x16xf32> to vector<4x16x1xf32>
    %144 = tpu.reciprocal %143 {approx = true} : vector<4x16x1xf32> -> vector<4x16x1xf32>
    %145 = vector.broadcast %144 : vector<4x16x1xf32> to vector<4x16x16xf32>
    %146 = arith.mulf %141, %145 : vector<4x16x16xf32>
    %147 = arith.truncf %146 : vector<4x16x16xf32> to vector<4x16x16xbf16>
    %148 = arith.truncf %110 : vector<4x16x8xf32> to vector<4x16x8xbf16>
    "tpu.trace_start"() <{level = 10 : i32, message = "bnm,bmd->bnd"}> : () -> ()
    %cst_44 = arith.constant dense<0.000000e+00> : vector<4x16x8xf32>
    %149 = tpu.matmul %147, %148, %cst_44 {dimension_numbers = #tpu.dot_dimension_numbers<[2], [1], [1], [2], [0, 0, 0, 1, 1, 2], [0], [0]>} : vector<4x16x16xbf16>, vector<4x16x8xbf16>, vector<4x16x8xf32> -> vector<4x16x8xf32>
    "tpu.trace_stop"() : () -> ()
    %150 = vector.shape_cast %149 : vector<4x16x8xf32> to vector<64x8xf32>
    %151 = arith.truncf %150 : vector<64x8xf32> to vector<64x8xbf16>
    %c0_45 = arith.constant 0 : index
    %c16 = arith.constant 16 : index
    %152 = vector.load %arg9[%c0_45, %c16] : memref<64x128xbf16, #tpu.memory_space<vmem>>, vector<64x8xbf16>
    tpu.vector_store %arg9[%c0_45, %c16], %151 {strides = array<i32>} : memref<64x128xbf16, #tpu.memory_space<vmem>>, vector<64x8xbf16>,
    %153 = vector.extract_strided_slice %6 {offsets = [0, 24], sizes = [64, 8], strides = [1, 1]} : vector<64x384xf32> to vector<64x8xf32>
    %154 = vector.shape_cast %153 : vector<64x8xf32> to vector<4x16x8xf32>
    %155 = vector.extract_strided_slice %6 {offsets = [0, 152], sizes = [64, 8], strides = [1, 1]} : vector<64x384xf32> to vector<64x8xf32>
    %156 = vector.shape_cast %155 : vector<64x8xf32> to vector<4x16x8xf32>
    %157 = vector.extract_strided_slice %6 {offsets = [0, 280], sizes = [64, 8], strides = [1, 1]} : vector<64x384xf32> to vector<64x8xf32>
    %158 = vector.shape_cast %157 : vector<64x8xf32> to vector<4x16x8xf32>
    %159 = arith.mulf %154, %154 : vector<4x16x8xf32>
    %cst_46 = arith.constant dense<0.000000e+00> : vector<4x16xf32>
    %160 = vector.multi_reduction <add>, %159, %cst_46 [2] : vector<4x16x8xf32> to vector<4x16xf32>
    %161 = vector.shape_cast %160 : vector<4x16xf32> to vector<4x16x1xf32>
    %cst_47 = arith.constant 1.000000e-24 : f32
    %162 = vector.broadcast %cst_47 : f32 to vector<4x16x1xf32>
    %163 = arith.maximumf %161, %162 : vector<4x16x1xf32>
    %164 = math.rsqrt %163 : vector<4x16x1xf32>
    %c3 = arith.constant 3 : index
    %165 = memref.load %arg4[%c3] : memref<4xf32, #tpu.memory_space<smem>>
    %166 = vector.broadcast %165 : f32 to vector<4x16x1xf32>
    %167 = arith.mulf %164, %166 : vector<4x16x1xf32>
    %168 = vector.broadcast %167 : vector<4x16x1xf32> to vector<4x16x8xf32>
    %169 = arith.mulf %154, %168 : vector<4x16x8xf32>
    %170 = arith.mulf %156, %156 : vector<4x16x8xf32>
    %cst_48 = arith.constant dense<0.000000e+00> : vector<4x16xf32>
    %171 = vector.multi_reduction <add>, %170, %cst_48 [2] : vector<4x16x8xf32> to vector<4x16xf32>
    %172 = vector.shape_cast %171 : vector<4x16xf32> to vector<4x16x1xf32>
    %cst_49 = arith.constant 1.000000e-24 : f32
    %173 = vector.broadcast %cst_49 : f32 to vector<4x16x1xf32>
    %174 = arith.maximumf %172, %173 : vector<4x16x1xf32>
    %175 = math.rsqrt %174 : vector<4x16x1xf32>
    %176 = vector.broadcast %175 : vector<4x16x1xf32> to vector<4x16x8xf32>
    %177 = arith.mulf %156, %176 : vector<4x16x8xf32>
    "tpu.trace_start"() <{level = 10 : i32, message = "bnd,bmd->bnm"}> : () -> ()
    %cst_50 = arith.constant dense<0.000000e+00> : vector<4x16x16xf32>
    %178 = tpu.matmul %169, %177, %cst_50 {dimension_numbers = #tpu.dot_dimension_numbers<[2], [2], [1], [1], [0, 0, 0, 1, 1, 1], [0], [0]>} : vector<4x16x8xf32>, vector<4x16x8xf32>, vector<4x16x16xf32> -> vector<4x16x16xf32>
    "tpu.trace_stop"() : () -> ()
    %c3_51 = arith.constant 3 : index
    %c0_52 = arith.constant 0 : index
    %c0_53 = arith.constant 0 : index
    %179 = vector.load %arg5[%c3_51, %c0_52, %c0_53] : memref<4x16x16xbf16, #tpu.memory_space<vmem>>, vector<1x16x16xbf16>
    %180 = vector.shape_cast %179 : vector<1x16x16xbf16> to vector<16x16xbf16>
    %181 = vector.shape_cast %180 : vector<16x16xbf16> to vector<1x16x16xbf16>
    %182 = arith.extf %181 : vector<1x16x16xbf16> to vector<1x16x16xf32>
    %183 = vector.broadcast %182 : vector<1x16x16xf32> to vector<4x16x16xf32>
    %184 = arith.addf %178, %183 : vector<4x16x16xf32>
    %cst_54 = arith.constant dense<0xFF800000> : vector<4x16xf32>
    %185 = vector.multi_reduction <maximumf>, %184, %cst_54 [2] : vector<4x16x16xf32> to vector<4x16xf32>
    %186 = vector.shape_cast %185 : vector<4x16xf32> to vector<4x16x1xf32>
    %187 = vector.broadcast %186 : vector<4x16x1xf32> to vector<4x16x16xf32>
    %188 = arith.subf %184, %187 : vector<4x16x16xf32>
    %189 = math.exp %188 : vector<4x16x16xf32>
    %cst_55 = arith.constant dense<0.000000e+00> : vector<4x16xf32>
    %190 = vector.multi_reduction <add>, %189, %cst_55 [2] : vector<4x16x16xf32> to vector<4x16xf32>
    %191 = vector.shape_cast %190 : vector<4x16xf32> to vector<4x16x1xf32>
    %192 = tpu.reciprocal %191 {approx = true} : vector<4x16x1xf32> -> vector<4x16x1xf32>
    %193 = vector.broadcast %192 : vector<4x16x1xf32> to vector<4x16x16xf32>
    %194 = arith.mulf %189, %193 : vector<4x16x16xf32>
    %195 = arith.truncf %194 : vector<4x16x16xf32> to vector<4x16x16xbf16>
    %196 = arith.truncf %158 : vector<4x16x8xf32> to vector<4x16x8xbf16>
    "tpu.trace_start"() <{level = 10 : i32, message = "bnm,bmd->bnd"}> : () -> ()
    %cst_56 = arith.constant dense<0.000000e+00> : vector<4x16x8xf32>
    %197 = tpu.matmul %195, %196, %cst_56 {dimension_numbers = #tpu.dot_dimension_numbers<[2], [1], [1], [2], [0, 0, 0, 1, 1, 2], [0], [0]>} : vector<4x16x16xbf16>, vector<4x16x8xbf16>, vector<4x16x8xf32> -> vector<4x16x8xf32>
    "tpu.trace_stop"() : () -> ()
    %198 = vector.shape_cast %197 : vector<4x16x8xf32> to vector<64x8xf32>
    %199 = arith.truncf %198 : vector<64x8xf32> to vector<64x8xbf16>
    %c0_57 = arith.constant 0 : index
    %c24 = arith.constant 24 : index
    %200 = vector.load %arg9[%c0_57, %c24] : memref<64x128xbf16, #tpu.memory_space<vmem>>, vector<64x8xbf16>
    tpu.vector_store %arg9[%c0_57, %c24], %199 {strides = array<i32>} : memref<64x128xbf16, #tpu.memory_space<vmem>>, vector<64x8xbf16>,
    %c0_58 = arith.constant 0 : index
    %c0_59 = arith.constant 0 : index
    %201 = vector.load %arg9[%c0_58, %c0_59] : memref<64x128xbf16, #tpu.memory_space<vmem>>, vector<64x128xbf16>
    %c0_60 = arith.constant 0 : index
    %c0_61 = arith.constant 0 : index
    %202 = vector.load %arg6[%c0_60, %c0_61] : memref<128x128xbf16, #tpu.memory_space<vmem>>, vector<128x128xbf16>
    %cst_62 = arith.constant dense<0.000000e+00> : vector<64x128xf32>
    %203 = tpu.matmul %201, %202, %cst_62 {dimension_numbers = #tpu.dot_dimension_numbers<[1], [0], [0], [1], [0, 0, 1, 1], [], []>} : vector<64x128xbf16>, vector<128x128xbf16>, vector<64x128xf32> -> vector<64x128xf32>
    %c0_63 = arith.constant 0 : index
    %c0_64 = arith.constant 0 : index
    %204 = vector.load %arg7[%c0_63, %c0_64] : memref<1x128xf32, #tpu.memory_space<vmem>>, vector<1x128xf32>
    %205 = vector.broadcast %204 : vector<1x128xf32> to vector<64x128xf32>
    %206 = arith.addf %203, %205 : vector<64x128xf32>
    %207 = vector.shape_cast %206 : vector<64x128xf32> to vector<4x16x128xf32>
    %c0_65 = arith.constant 0 : index
    %c0_66 = arith.constant 0 : index
    %c0_67 = arith.constant 0 : index
    %208 = vector.load %arg8[%c0_65, %c0_66, %c0_67] : memref<4x16x128xf32, #tpu.memory_space<vmem>>, vector<4x16x128xf32>
    tpu.vector_store %arg8[%c0_65, %c0_66, %c0_67], %207 {strides = array<i32>} : memref<4x16x128xf32, #tpu.memory_space<vmem>>, vector<4x16x128xf32>,
    return
  }
  func.func @transform_0(%arg0: i32) -> (i32, i32, i32) {
    %c0_i32 = arith.constant 0 : i32
    %c0_i32_0 = arith.constant 0 : i32
    %c0_i32_1 = arith.constant 0 : i32
    return %arg0, %c0_i32, %c0_i32_0 : i32, i32, i32
  }
  func.func @transform_1(%arg0: i32) -> (i32, i32) {
    %c0_i32 = arith.constant 0 : i32
    %c0_i32_0 = arith.constant 0 : i32
    %c0_i32_1 = arith.constant 0 : i32
    return %c0_i32, %c0_i32_0 : i32, i32
  }
  func.func @transform_2(%arg0: i32) -> (i32, i32) {
    %c0_i32 = arith.constant 0 : i32
    %c0_i32_0 = arith.constant 0 : i32
    %c0_i32_1 = arith.constant 0 : i32
    return %c0_i32, %c0_i32_0 : i32, i32
  }
  func.func @transform_3(%arg0: i32) -> i32 {
    %c0_i32 = arith.constant 0 : i32
    %c0_i32_0 = arith.constant 0 : i32
    return %c0_i32 : i32
  }
  func.func @transform_4(%arg0: i32) -> (i32, i32, i32) {
    %c0_i32 = arith.constant 0 : i32
    %c0_i32_0 = arith.constant 0 : i32
    %c0_i32_1 = arith.constant 0 : i32
    %c0_i32_2 = arith.constant 0 : i32
    return %c0_i32, %c0_i32_0, %c0_i32_1 : i32, i32, i32
  }
  func.func @transform_5(%arg0: i32) -> (i32, i32) {
    %c0_i32 = arith.constant 0 : i32
    %c0_i32_0 = arith.constant 0 : i32
    %c0_i32_1 = arith.constant 0 : i32
    return %c0_i32, %c0_i32_0 : i32, i32
  }
  func.func @transform_6(%arg0: i32) -> (i32, i32) {
    %c0_i32 = arith.constant 0 : i32
    %c0_i32_0 = arith.constant 0 : i32
    %c0_i32_1 = arith.constant 0 : i32
    return %c0_i32, %c0_i32_0 : i32, i32
  }
  func.func @transform_7(%arg0: i32) -> (i32, i32, i32) {
    %c0_i32 = arith.constant 0 : i32
    %c0_i32_0 = arith.constant 0 : i32
    %c0_i32_1 = arith.constant 0 : i32
    return %arg0, %c0_i32, %c0_i32_0 : i32, i32, i32
  }
}

module attributes {stable_mosaic.version = 11 : i64} {
  func.func @_window_attn_kernel(%arg0: i32, %arg1: memref<4x16x128xbf16, #tpu.memory_space<vmem>>, %arg2: memref<128x384xbf16, #tpu.memory_space<vmem>>, %arg3: memref<1x384xf32, #tpu.memory_space<vmem>>, %arg4: memref<4xf32, #tpu.memory_space<smem>>, %arg5: memref<4x16x16xbf16, #tpu.memory_space<vmem>>, %arg6: memref<128x128xbf16, #tpu.memory_space<vmem>>, %arg7: memref<1x128xf32, #tpu.memory_space<vmem>>, %arg8: memref<4x16x128xf32, #tpu.memory_space<vmem>>, %arg9: memref<64x128xbf16, #tpu.memory_space<vmem>>) attributes {dimension_semantics = [#tpu.dimension_semantics<parallel>], iteration_bounds = array<i64: 2>, scalar_prefetch = 0 : i64, scratch_operands = 1 : i64, tpu.core_type = #tpu.core_type<tc>, window_params = [{transform_indices = @transform_0, window_bounds = array<i64: 4, 16, 128>}, {pipeline_mode = #tpu.pipeline_mode<synchronous>, transform_indices = @transform_1, window_bounds = array<i64: 128, 384>}, {pipeline_mode = #tpu.pipeline_mode<synchronous>, transform_indices = @transform_2, window_bounds = array<i64: 1, 384>}, {transform_indices = @transform_3, window_bounds = array<i64: 4>}, {pipeline_mode = #tpu.pipeline_mode<synchronous>, transform_indices = @transform_4, window_bounds = array<i64: 4, 16, 16>}, {pipeline_mode = #tpu.pipeline_mode<synchronous>, transform_indices = @transform_5, window_bounds = array<i64: 128, 128>}, {pipeline_mode = #tpu.pipeline_mode<synchronous>, transform_indices = @transform_6, window_bounds = array<i64: 1, 128>}, {transform_indices = @transform_7, window_bounds = array<i64: 4, 16, 128>}]} {
    %c0 = arith.constant 0 : index
    %c0_0 = arith.constant 0 : index
    %c0_1 = arith.constant 0 : index
    %0 = vector.load %arg1[%c0, %c0_0, %c0_1] : memref<4x16x128xbf16, #tpu.memory_space<vmem>>, vector<4x16x128xbf16>
    %1 = vector.shape_cast %0 : vector<4x16x128xbf16> to vector<64x128xbf16>
    %c0_2 = arith.constant 0 : index
    %c0_3 = arith.constant 0 : index
    %2 = vector.load %arg2[%c0_2, %c0_3] : memref<128x384xbf16, #tpu.memory_space<vmem>>, vector<128x384xbf16>
    %cst = arith.constant dense<0.000000e+00> : vector<64x384xf32>
    %3 = tpu.matmul %1, %2, %cst {dimension_numbers = #tpu.dot_dimension_numbers<[1], [0], [0], [1], [0, 0, 1, 1], [], []>} : vector<64x128xbf16>, vector<128x384xbf16>, vector<64x384xf32> -> vector<64x384xf32>
    %c0_4 = arith.constant 0 : index
    %c0_5 = arith.constant 0 : index
    %4 = vector.load %arg3[%c0_4, %c0_5] : memref<1x384xf32, #tpu.memory_space<vmem>>, vector<1x384xf32>
    %5 = vector.broadcast %4 : vector<1x384xf32> to vector<64x384xf32>
    %6 = arith.addf %3, %5 : vector<64x384xf32>
    %cst_6 = arith.constant 0.000000e+00 : bf16
    %7 = vector.broadcast %cst_6 : bf16 to vector<64x96xbf16>
    %c0_7 = arith.constant 0 : index
    %c32 = arith.constant 32 : index
    %8 = vector.load %arg9[%c0_7, %c32] : memref<64x128xbf16, #tpu.memory_space<vmem>>, vector<64x96xbf16>
    tpu.vector_store %arg9[%c0_7, %c32], %7 {strides = array<i32>} : memref<64x128xbf16, #tpu.memory_space<vmem>>, vector<64x96xbf16>,
    %9 = vector.extract_strided_slice %6 {offsets = [0, 0], sizes = [64, 8], strides = [1, 1]} : vector<64x384xf32> to vector<64x8xf32>
    %10 = vector.shape_cast %9 : vector<64x8xf32> to vector<4x16x8xf32>
    %11 = vector.extract_strided_slice %6 {offsets = [0, 128], sizes = [64, 8], strides = [1, 1]} : vector<64x384xf32> to vector<64x8xf32>
    %12 = vector.shape_cast %11 : vector<64x8xf32> to vector<4x16x8xf32>
    %13 = vector.extract_strided_slice %6 {offsets = [0, 256], sizes = [64, 8], strides = [1, 1]} : vector<64x384xf32> to vector<64x8xf32>
    %14 = vector.shape_cast %13 : vector<64x8xf32> to vector<4x16x8xf32>
    %15 = arith.mulf %10, %10 : vector<4x16x8xf32>
    %cst_8 = arith.constant dense<0.000000e+00> : vector<4x16xf32>
    %16 = vector.multi_reduction <add>, %15, %cst_8 [2] : vector<4x16x8xf32> to vector<4x16xf32>
    %17 = vector.shape_cast %16 : vector<4x16xf32> to vector<4x16x1xf32>
    %cst_9 = arith.constant 1.000000e-24 : f32
    %18 = vector.broadcast %cst_9 : f32 to vector<4x16x1xf32>
    %19 = arith.maximumf %17, %18 : vector<4x16x1xf32>
    %20 = math.rsqrt %19 : vector<4x16x1xf32>
    %c0_10 = arith.constant 0 : index
    %21 = memref.load %arg4[%c0_10] : memref<4xf32, #tpu.memory_space<smem>>
    %22 = vector.broadcast %21 : f32 to vector<4x16x1xf32>
    %23 = arith.mulf %20, %22 : vector<4x16x1xf32>
    %24 = vector.broadcast %23 : vector<4x16x1xf32> to vector<4x16x8xf32>
    %25 = arith.mulf %10, %24 : vector<4x16x8xf32>
    %26 = arith.mulf %12, %12 : vector<4x16x8xf32>
    %cst_11 = arith.constant dense<0.000000e+00> : vector<4x16xf32>
    %27 = vector.multi_reduction <add>, %26, %cst_11 [2] : vector<4x16x8xf32> to vector<4x16xf32>
    %28 = vector.shape_cast %27 : vector<4x16xf32> to vector<4x16x1xf32>
    %cst_12 = arith.constant 1.000000e-24 : f32
    %29 = vector.broadcast %cst_12 : f32 to vector<4x16x1xf32>
    %30 = arith.maximumf %28, %29 : vector<4x16x1xf32>
    %31 = math.rsqrt %30 : vector<4x16x1xf32>
    %32 = vector.broadcast %31 : vector<4x16x1xf32> to vector<4x16x8xf32>
    %33 = arith.mulf %12, %32 : vector<4x16x8xf32>
    "tpu.trace_start"() <{level = 10 : i32, message = "bnd,bmd->bnm"}> : () -> ()
    %cst_13 = arith.constant dense<0.000000e+00> : vector<4x16x16xf32>
    %34 = tpu.matmul %25, %33, %cst_13 {dimension_numbers = #tpu.dot_dimension_numbers<[2], [2], [1], [1], [0, 0, 0, 1, 1, 1], [0], [0]>} : vector<4x16x8xf32>, vector<4x16x8xf32>, vector<4x16x16xf32> -> vector<4x16x16xf32>
    "tpu.trace_stop"() : () -> ()
    %c0_14 = arith.constant 0 : index
    %c0_15 = arith.constant 0 : index
    %c0_16 = arith.constant 0 : index
    %35 = vector.load %arg5[%c0_14, %c0_15, %c0_16] : memref<4x16x16xbf16, #tpu.memory_space<vmem>>, vector<1x16x16xbf16>
    %36 = vector.shape_cast %35 : vector<1x16x16xbf16> to vector<16x16xbf16>
    %37 = vector.shape_cast %36 : vector<16x16xbf16> to vector<1x16x16xbf16>
    %38 = arith.extf %37 : vector<1x16x16xbf16> to vector<1x16x16xf32>
    %39 = vector.broadcast %38 : vector<1x16x16xf32> to vector<4x16x16xf32>
    %40 = arith.addf %34, %39 : vector<4x16x16xf32>
    %cst_17 = arith.constant dense<0xFF800000> : vector<4x16xf32>
    %41 = vector.multi_reduction <maximumf>, %40, %cst_17 [2] : vector<4x16x16xf32> to vector<4x16xf32>
    %42 = vector.shape_cast %41 : vector<4x16xf32> to vector<4x16x1xf32>
    %43 = vector.broadcast %42 : vector<4x16x1xf32> to vector<4x16x16xf32>
    %44 = arith.subf %40, %43 : vector<4x16x16xf32>
    %45 = math.exp %44 : vector<4x16x16xf32>
    %cst_18 = arith.constant dense<0.000000e+00> : vector<4x16xf32>
    %46 = vector.multi_reduction <add>, %45, %cst_18 [2] : vector<4x16x16xf32> to vector<4x16xf32>
    %47 = vector.shape_cast %46 : vector<4x16xf32> to vector<4x16x1xf32>
    %48 = tpu.reciprocal %47 {approx = true} : vector<4x16x1xf32> -> vector<4x16x1xf32>
    %49 = vector.broadcast %48 : vector<4x16x1xf32> to vector<4x16x16xf32>
    %50 = arith.mulf %45, %49 : vector<4x16x16xf32>
    %51 = arith.truncf %50 : vector<4x16x16xf32> to vector<4x16x16xbf16>
    %52 = arith.truncf %14 : vector<4x16x8xf32> to vector<4x16x8xbf16>
    "tpu.trace_start"() <{level = 10 : i32, message = "bnm,bmd->bnd"}> : () -> ()
    %cst_19 = arith.constant dense<0.000000e+00> : vector<4x16x8xf32>
    %53 = tpu.matmul %51, %52, %cst_19 {dimension_numbers = #tpu.dot_dimension_numbers<[2], [1], [1], [2], [0, 0, 0, 1, 1, 2], [0], [0]>} : vector<4x16x16xbf16>, vector<4x16x8xbf16>, vector<4x16x8xf32> -> vector<4x16x8xf32>
    "tpu.trace_stop"() : () -> ()
    %54 = vector.shape_cast %53 : vector<4x16x8xf32> to vector<64x8xf32>
    %55 = arith.truncf %54 : vector<64x8xf32> to vector<64x8xbf16>
    %c0_20 = arith.constant 0 : index
    %c0_21 = arith.constant 0 : index
    %56 = vector.load %arg9[%c0_20, %c0_21] : memref<64x128xbf16, #tpu.memory_space<vmem>>, vector<64x8xbf16>
    tpu.vector_store %arg9[%c0_20, %c0_21], %55 {strides = array<i32>} : memref<64x128xbf16, #tpu.memory_space<vmem>>, vector<64x8xbf16>,
    %57 = vector.extract_strided_slice %6 {offsets = [0, 8], sizes = [64, 8], strides = [1, 1]} : vector<64x384xf32> to vector<64x8xf32>
    %58 = vector.shape_cast %57 : vector<64x8xf32> to vector<4x16x8xf32>
    %59 = vector.extract_strided_slice %6 {offsets = [0, 136], sizes = [64, 8], strides = [1, 1]} : vector<64x384xf32> to vector<64x8xf32>
    %60 = vector.shape_cast %59 : vector<64x8xf32> to vector<4x16x8xf32>
    %61 = vector.extract_strided_slice %6 {offsets = [0, 264], sizes = [64, 8], strides = [1, 1]} : vector<64x384xf32> to vector<64x8xf32>
    %62 = vector.shape_cast %61 : vector<64x8xf32> to vector<4x16x8xf32>
    %63 = arith.mulf %58, %58 : vector<4x16x8xf32>
    %cst_22 = arith.constant dense<0.000000e+00> : vector<4x16xf32>
    %64 = vector.multi_reduction <add>, %63, %cst_22 [2] : vector<4x16x8xf32> to vector<4x16xf32>
    %65 = vector.shape_cast %64 : vector<4x16xf32> to vector<4x16x1xf32>
    %cst_23 = arith.constant 1.000000e-24 : f32
    %66 = vector.broadcast %cst_23 : f32 to vector<4x16x1xf32>
    %67 = arith.maximumf %65, %66 : vector<4x16x1xf32>
    %68 = math.rsqrt %67 : vector<4x16x1xf32>
    %c1 = arith.constant 1 : index
    %69 = memref.load %arg4[%c1] : memref<4xf32, #tpu.memory_space<smem>>
    %70 = vector.broadcast %69 : f32 to vector<4x16x1xf32>
    %71 = arith.mulf %68, %70 : vector<4x16x1xf32>
    %72 = vector.broadcast %71 : vector<4x16x1xf32> to vector<4x16x8xf32>
    %73 = arith.mulf %58, %72 : vector<4x16x8xf32>
    %74 = arith.mulf %60, %60 : vector<4x16x8xf32>
    %cst_24 = arith.constant dense<0.000000e+00> : vector<4x16xf32>
    %75 = vector.multi_reduction <add>, %74, %cst_24 [2] : vector<4x16x8xf32> to vector<4x16xf32>
    %76 = vector.shape_cast %75 : vector<4x16xf32> to vector<4x16x1xf32>
    %cst_25 = arith.constant 1.000000e-24 : f32
    %77 = vector.broadcast %cst_25 : f32 to vector<4x16x1xf32>
    %78 = arith.maximumf %76, %77 : vector<4x16x1xf32>
    %79 = math.rsqrt %78 : vector<4x16x1xf32>
    %80 = vector.broadcast %79 : vector<4x16x1xf32> to vector<4x16x8xf32>
    %81 = arith.mulf %60, %80 : vector<4x16x8xf32>
    "tpu.trace_start"() <{level = 10 : i32, message = "bnd,bmd->bnm"}> : () -> ()
    %cst_26 = arith.constant dense<0.000000e+00> : vector<4x16x16xf32>
    %82 = tpu.matmul %73, %81, %cst_26 {dimension_numbers = #tpu.dot_dimension_numbers<[2], [2], [1], [1], [0, 0, 0, 1, 1, 1], [0], [0]>} : vector<4x16x8xf32>, vector<4x16x8xf32>, vector<4x16x16xf32> -> vector<4x16x16xf32>
    "tpu.trace_stop"() : () -> ()
    %c1_27 = arith.constant 1 : index
    %c0_28 = arith.constant 0 : index
    %c0_29 = arith.constant 0 : index
    %83 = vector.load %arg5[%c1_27, %c0_28, %c0_29] : memref<4x16x16xbf16, #tpu.memory_space<vmem>>, vector<1x16x16xbf16>
    %84 = vector.shape_cast %83 : vector<1x16x16xbf16> to vector<16x16xbf16>
    %85 = vector.shape_cast %84 : vector<16x16xbf16> to vector<1x16x16xbf16>
    %86 = arith.extf %85 : vector<1x16x16xbf16> to vector<1x16x16xf32>
    %87 = vector.broadcast %86 : vector<1x16x16xf32> to vector<4x16x16xf32>
    %88 = arith.addf %82, %87 : vector<4x16x16xf32>
    %cst_30 = arith.constant dense<0xFF800000> : vector<4x16xf32>
    %89 = vector.multi_reduction <maximumf>, %88, %cst_30 [2] : vector<4x16x16xf32> to vector<4x16xf32>
    %90 = vector.shape_cast %89 : vector<4x16xf32> to vector<4x16x1xf32>
    %91 = vector.broadcast %90 : vector<4x16x1xf32> to vector<4x16x16xf32>
    %92 = arith.subf %88, %91 : vector<4x16x16xf32>
    %93 = math.exp %92 : vector<4x16x16xf32>
    %cst_31 = arith.constant dense<0.000000e+00> : vector<4x16xf32>
    %94 = vector.multi_reduction <add>, %93, %cst_31 [2] : vector<4x16x16xf32> to vector<4x16xf32>
    %95 = vector.shape_cast %94 : vector<4x16xf32> to vector<4x16x1xf32>
    %96 = tpu.reciprocal %95 {approx = true} : vector<4x16x1xf32> -> vector<4x16x1xf32>
    %97 = vector.broadcast %96 : vector<4x16x1xf32> to vector<4x16x16xf32>
    %98 = arith.mulf %93, %97 : vector<4x16x16xf32>
    %99 = arith.truncf %98 : vector<4x16x16xf32> to vector<4x16x16xbf16>
    %100 = arith.truncf %62 : vector<4x16x8xf32> to vector<4x16x8xbf16>
    "tpu.trace_start"() <{level = 10 : i32, message = "bnm,bmd->bnd"}> : () -> ()
    %cst_32 = arith.constant dense<0.000000e+00> : vector<4x16x8xf32>
    %101 = tpu.matmul %99, %100, %cst_32 {dimension_numbers = #tpu.dot_dimension_numbers<[2], [1], [1], [2], [0, 0, 0, 1, 1, 2], [0], [0]>} : vector<4x16x16xbf16>, vector<4x16x8xbf16>, vector<4x16x8xf32> -> vector<4x16x8xf32>
    "tpu.trace_stop"() : () -> ()
    %102 = vector.shape_cast %101 : vector<4x16x8xf32> to vector<64x8xf32>
    %103 = arith.truncf %102 : vector<64x8xf32> to vector<64x8xbf16>
    %c0_33 = arith.constant 0 : index
    %c8 = arith.constant 8 : index
    %104 = vector.load %arg9[%c0_33, %c8] : memref<64x128xbf16, #tpu.memory_space<vmem>>, vector<64x8xbf16>
    tpu.vector_store %arg9[%c0_33, %c8], %103 {strides = array<i32>} : memref<64x128xbf16, #tpu.memory_space<vmem>>, vector<64x8xbf16>,
    %105 = vector.extract_strided_slice %6 {offsets = [0, 16], sizes = [64, 8], strides = [1, 1]} : vector<64x384xf32> to vector<64x8xf32>
    %106 = vector.shape_cast %105 : vector<64x8xf32> to vector<4x16x8xf32>
    %107 = vector.extract_strided_slice %6 {offsets = [0, 144], sizes = [64, 8], strides = [1, 1]} : vector<64x384xf32> to vector<64x8xf32>
    %108 = vector.shape_cast %107 : vector<64x8xf32> to vector<4x16x8xf32>
    %109 = vector.extract_strided_slice %6 {offsets = [0, 272], sizes = [64, 8], strides = [1, 1]} : vector<64x384xf32> to vector<64x8xf32>
    %110 = vector.shape_cast %109 : vector<64x8xf32> to vector<4x16x8xf32>
    %111 = arith.mulf %106, %106 : vector<4x16x8xf32>
    %cst_34 = arith.constant dense<0.000000e+00> : vector<4x16xf32>
    %112 = vector.multi_reduction <add>, %111, %cst_34 [2] : vector<4x16x8xf32> to vector<4x16xf32>
    %113 = vector.shape_cast %112 : vector<4x16xf32> to vector<4x16x1xf32>
    %cst_35 = arith.constant 1.000000e-24 : f32
    %114 = vector.broadcast %cst_35 : f32 to vector<4x16x1xf32>
    %115 = arith.maximumf %113, %114 : vector<4x16x1xf32>
    %116 = math.rsqrt %115 : vector<4x16x1xf32>
    %c2 = arith.constant 2 : index
    %117 = memref.load %arg4[%c2] : memref<4xf32, #tpu.memory_space<smem>>
    %118 = vector.broadcast %117 : f32 to vector<4x16x1xf32>
    %119 = arith.mulf %116, %118 : vector<4x16x1xf32>
    %120 = vector.broadcast %119 : vector<4x16x1xf32> to vector<4x16x8xf32>
    %121 = arith.mulf %106, %120 : vector<4x16x8xf32>
    %122 = arith.mulf %108, %108 : vector<4x16x8xf32>
    %cst_36 = arith.constant dense<0.000000e+00> : vector<4x16xf32>
    %123 = vector.multi_reduction <add>, %122, %cst_36 [2] : vector<4x16x8xf32> to vector<4x16xf32>
    %124 = vector.shape_cast %123 : vector<4x16xf32> to vector<4x16x1xf32>
    %cst_37 = arith.constant 1.000000e-24 : f32
    %125 = vector.broadcast %cst_37 : f32 to vector<4x16x1xf32>
    %126 = arith.maximumf %124, %125 : vector<4x16x1xf32>
    %127 = math.rsqrt %126 : vector<4x16x1xf32>
    %128 = vector.broadcast %127 : vector<4x16x1xf32> to vector<4x16x8xf32>
    %129 = arith.mulf %108, %128 : vector<4x16x8xf32>
    "tpu.trace_start"() <{level = 10 : i32, message = "bnd,bmd->bnm"}> : () -> ()
    %cst_38 = arith.constant dense<0.000000e+00> : vector<4x16x16xf32>
    %130 = tpu.matmul %121, %129, %cst_38 {dimension_numbers = #tpu.dot_dimension_numbers<[2], [2], [1], [1], [0, 0, 0, 1, 1, 1], [0], [0]>} : vector<4x16x8xf32>, vector<4x16x8xf32>, vector<4x16x16xf32> -> vector<4x16x16xf32>
    "tpu.trace_stop"() : () -> ()
    %c2_39 = arith.constant 2 : index
    %c0_40 = arith.constant 0 : index
    %c0_41 = arith.constant 0 : index
    %131 = vector.load %arg5[%c2_39, %c0_40, %c0_41] : memref<4x16x16xbf16, #tpu.memory_space<vmem>>, vector<1x16x16xbf16>
    %132 = vector.shape_cast %131 : vector<1x16x16xbf16> to vector<16x16xbf16>
    %133 = vector.shape_cast %132 : vector<16x16xbf16> to vector<1x16x16xbf16>
    %134 = arith.extf %133 : vector<1x16x16xbf16> to vector<1x16x16xf32>
    %135 = vector.broadcast %134 : vector<1x16x16xf32> to vector<4x16x16xf32>
    %136 = arith.addf %130, %135 : vector<4x16x16xf32>
    %cst_42 = arith.constant dense<0xFF800000> : vector<4x16xf32>
    %137 = vector.multi_reduction <maximumf>, %136, %cst_42 [2] : vector<4x16x16xf32> to vector<4x16xf32>
    %138 = vector.shape_cast %137 : vector<4x16xf32> to vector<4x16x1xf32>
    %139 = vector.broadcast %138 : vector<4x16x1xf32> to vector<4x16x16xf32>
    %140 = arith.subf %136, %139 : vector<4x16x16xf32>
    %141 = math.exp %140 : vector<4x16x16xf32>
    %cst_43 = arith.constant dense<0.000000e+00> : vector<4x16xf32>
    %142 = vector.multi_reduction <add>, %141, %cst_43 [2] : vector<4x16x16xf32> to vector<4x16xf32>
    %143 = vector.shape_cast %142 : vector<4x16xf32> to vector<4x16x1xf32>
    %144 = tpu.reciprocal %143 {approx = true} : vector<4x16x1xf32> -> vector<4x16x1xf32>
    %145 = vector.broadcast %144 : vector<4x16x1xf32> to vector<4x16x16xf32>
    %146 = arith.mulf %141, %145 : vector<4x16x16xf32>
    %147 = arith.truncf %146 : vector<4x16x16xf32> to vector<4x16x16xbf16>
    %148 = arith.truncf %110 : vector<4x16x8xf32> to vector<4x16x8xbf16>
    "tpu.trace_start"() <{level = 10 : i32, message = "bnm,bmd->bnd"}> : () -> ()
    %cst_44 = arith.constant dense<0.000000e+00> : vector<4x16x8xf32>
    %149 = tpu.matmul %147, %148, %cst_44 {dimension_numbers = #tpu.dot_dimension_numbers<[2], [1], [1], [2], [0, 0, 0, 1, 1, 2], [0], [0]>} : vector<4x16x16xbf16>, vector<4x16x8xbf16>, vector<4x16x8xf32> -> vector<4x16x8xf32>
    "tpu.trace_stop"() : () -> ()
    %150 = vector.shape_cast %149 : vector<4x16x8xf32> to vector<64x8xf32>
    %151 = arith.truncf %150 : vector<64x8xf32> to vector<64x8xbf16>
    %c0_45 = arith.constant 0 : index
    %c16 = arith.constant 16 : index
    %152 = vector.load %arg9[%c0_45, %c16] : memref<64x128xbf16, #tpu.memory_space<vmem>>, vector<64x8xbf16>
    tpu.vector_store %arg9[%c0_45, %c16], %151 {strides = array<i32>} : memref<64x128xbf16, #tpu.memory_space<vmem>>, vector<64x8xbf16>,
    %153 = vector.extract_strided_slice %6 {offsets = [0, 24], sizes = [64, 8], strides = [1, 1]} : vector<64x384xf32> to vector<64x8xf32>
    %154 = vector.shape_cast %153 : vector<64x8xf32> to vector<4x16x8xf32>
    %155 = vector.extract_strided_slice %6 {offsets = [0, 152], sizes = [64, 8], strides = [1, 1]} : vector<64x384xf32> to vector<64x8xf32>
    %156 = vector.shape_cast %155 : vector<64x8xf32> to vector<4x16x8xf32>
    %157 = vector.extract_strided_slice %6 {offsets = [0, 280], sizes = [64, 8], strides = [1, 1]} : vector<64x384xf32> to vector<64x8xf32>
    %158 = vector.shape_cast %157 : vector<64x8xf32> to vector<4x16x8xf32>
    %159 = arith.mulf %154, %154 : vector<4x16x8xf32>
    %cst_46 = arith.constant dense<0.000000e+00> : vector<4x16xf32>
    %160 = vector.multi_reduction <add>, %159, %cst_46 [2] : vector<4x16x8xf32> to vector<4x16xf32>
    %161 = vector.shape_cast %160 : vector<4x16xf32> to vector<4x16x1xf32>
    %cst_47 = arith.constant 1.000000e-24 : f32
    %162 = vector.broadcast %cst_47 : f32 to vector<4x16x1xf32>
    %163 = arith.maximumf %161, %162 : vector<4x16x1xf32>
    %164 = math.rsqrt %163 : vector<4x16x1xf32>
    %c3 = arith.constant 3 : index
    %165 = memref.load %arg4[%c3] : memref<4xf32, #tpu.memory_space<smem>>
    %166 = vector.broadcast %165 : f32 to vector<4x16x1xf32>
    %167 = arith.mulf %164, %166 : vector<4x16x1xf32>
    %168 = vector.broadcast %167 : vector<4x16x1xf32> to vector<4x16x8xf32>
    %169 = arith.mulf %154, %168 : vector<4x16x8xf32>
    %170 = arith.mulf %156, %156 : vector<4x16x8xf32>
    %cst_48 = arith.constant dense<0.000000e+00> : vector<4x16xf32>
    %171 = vector.multi_reduction <add>, %170, %cst_48 [2] : vector<4x16x8xf32> to vector<4x16xf32>
    %172 = vector.shape_cast %171 : vector<4x16xf32> to vector<4x16x1xf32>
    %cst_49 = arith.constant 1.000000e-24 : f32
    %173 = vector.broadcast %cst_49 : f32 to vector<4x16x1xf32>
    %174 = arith.maximumf %172, %173 : vector<4x16x1xf32>
    %175 = math.rsqrt %174 : vector<4x16x1xf32>
    %176 = vector.broadcast %175 : vector<4x16x1xf32> to vector<4x16x8xf32>
    %177 = arith.mulf %156, %176 : vector<4x16x8xf32>
    "tpu.trace_start"() <{level = 10 : i32, message = "bnd,bmd->bnm"}> : () -> ()
    %cst_50 = arith.constant dense<0.000000e+00> : vector<4x16x16xf32>
    %178 = tpu.matmul %169, %177, %cst_50 {dimension_numbers = #tpu.dot_dimension_numbers<[2], [2], [1], [1], [0, 0, 0, 1, 1, 1], [0], [0]>} : vector<4x16x8xf32>, vector<4x16x8xf32>, vector<4x16x16xf32> -> vector<4x16x16xf32>
    "tpu.trace_stop"() : () -> ()
    %c3_51 = arith.constant 3 : index
    %c0_52 = arith.constant 0 : index
    %c0_53 = arith.constant 0 : index
    %179 = vector.load %arg5[%c3_51, %c0_52, %c0_53] : memref<4x16x16xbf16, #tpu.memory_space<vmem>>, vector<1x16x16xbf16>
    %180 = vector.shape_cast %179 : vector<1x16x16xbf16> to vector<16x16xbf16>
    %181 = vector.shape_cast %180 : vector<16x16xbf16> to vector<1x16x16xbf16>
    %182 = arith.extf %181 : vector<1x16x16xbf16> to vector<1x16x16xf32>
    %183 = vector.broadcast %182 : vector<1x16x16xf32> to vector<4x16x16xf32>
    %184 = arith.addf %178, %183 : vector<4x16x16xf32>
    %cst_54 = arith.constant dense<0xFF800000> : vector<4x16xf32>
    %185 = vector.multi_reduction <maximumf>, %184, %cst_54 [2] : vector<4x16x16xf32> to vector<4x16xf32>
    %186 = vector.shape_cast %185 : vector<4x16xf32> to vector<4x16x1xf32>
    %187 = vector.broadcast %186 : vector<4x16x1xf32> to vector<4x16x16xf32>
    %188 = arith.subf %184, %187 : vector<4x16x16xf32>
    %189 = math.exp %188 : vector<4x16x16xf32>
    %cst_55 = arith.constant dense<0.000000e+00> : vector<4x16xf32>
    %190 = vector.multi_reduction <add>, %189, %cst_55 [2] : vector<4x16x16xf32> to vector<4x16xf32>
    %191 = vector.shape_cast %190 : vector<4x16xf32> to vector<4x16x1xf32>
    %192 = tpu.reciprocal %191 {approx = true} : vector<4x16x1xf32> -> vector<4x16x1xf32>
    %193 = vector.broadcast %192 : vector<4x16x1xf32> to vector<4x16x16xf32>
    %194 = arith.mulf %189, %193 : vector<4x16x16xf32>
    %195 = arith.truncf %194 : vector<4x16x16xf32> to vector<4x16x16xbf16>
    %196 = arith.truncf %158 : vector<4x16x8xf32> to vector<4x16x8xbf16>
    "tpu.trace_start"() <{level = 10 : i32, message = "bnm,bmd->bnd"}> : () -> ()
    %cst_56 = arith.constant dense<0.000000e+00> : vector<4x16x8xf32>
    %197 = tpu.matmul %195, %196, %cst_56 {dimension_numbers = #tpu.dot_dimension_numbers<[2], [1], [1], [2], [0, 0, 0, 1, 1, 2], [0], [0]>} : vector<4x16x16xbf16>, vector<4x16x8xbf16>, vector<4x16x8xf32> -> vector<4x16x8xf32>
    "tpu.trace_stop"() : () -> ()
    %198 = vector.shape_cast %197 : vector<4x16x8xf32> to vector<64x8xf32>
    %199 = arith.truncf %198 : vector<64x8xf32> to vector<64x8xbf16>
    %c0_57 = arith.constant 0 : index
    %c24 = arith.constant 24 : index
    %200 = vector.load %arg9[%c0_57, %c24] : memref<64x128xbf16, #tpu.memory_space<vmem>>, vector<64x8xbf16>
    tpu.vector_store %arg9[%c0_57, %c24], %199 {strides = array<i32>} : memref<64x128xbf16, #tpu.memory_space<vmem>>, vector<64x8xbf16>,
    %c0_58 = arith.constant 0 : index
    %c0_59 = arith.constant 0 : index
    %201 = vector.load %arg9[%c0_58, %c0_59] : memref<64x128xbf16, #tpu.memory_space<vmem>>, vector<64x128xbf16>
    %c0_60 = arith.constant 0 : index
    %c0_61 = arith.constant 0 : index
    %202 = vector.load %arg6[%c0_60, %c0_61] : memref<128x128xbf16, #tpu.memory_space<vmem>>, vector<128x128xbf16>
    %cst_62 = arith.constant dense<0.000000e+00> : vector<64x128xf32>
    %203 = tpu.matmul %201, %202, %cst_62 {dimension_numbers = #tpu.dot_dimension_numbers<[1], [0], [0], [1], [0, 0, 1, 1], [], []>} : vector<64x128xbf16>, vector<128x128xbf16>, vector<64x128xf32> -> vector<64x128xf32>
    %c0_63 = arith.constant 0 : index
    %c0_64 = arith.constant 0 : index
    %204 = vector.load %arg7[%c0_63, %c0_64] : memref<1x128xf32, #tpu.memory_space<vmem>>, vector<1x128xf32>
    %205 = vector.broadcast %204 : vector<1x128xf32> to vector<64x128xf32>
    %206 = arith.addf %203, %205 : vector<64x128xf32>
    %207 = vector.shape_cast %206 : vector<64x128xf32> to vector<4x16x128xf32>
    %c0_65 = arith.constant 0 : index
    %c0_66 = arith.constant 0 : index
    %c0_67 = arith.constant 0 : index
    %208 = vector.load %arg8[%c0_65, %c0_66, %c0_67] : memref<4x16x128xf32, #tpu.memory_space<vmem>>, vector<4x16x128xf32>
    tpu.vector_store %arg8[%c0_65, %c0_66, %c0_67], %207 {strides = array<i32>} : memref<4x16x128xf32, #tpu.memory_space<vmem>>, vector<4x16x128xf32>,
    return
  }
  func.func @transform_0(%arg0: i32) -> (i32, i32, i32) {
    %c0_i32 = arith.constant 0 : i32
    %c0_i32_0 = arith.constant 0 : i32
    %c0_i32_1 = arith.constant 0 : i32
    return %arg0, %c0_i32, %c0_i32_0 : i32, i32, i32
  }
  func.func @transform_1(%arg0: i32) -> (i32, i32) {
    %c0_i32 = arith.constant 0 : i32
    %c0_i32_0 = arith.constant 0 : i32
    %c0_i32_1 = arith.constant 0 : i32
    return %c0_i32, %c0_i32_0 : i32, i32
  }
  func.func @transform_2(%arg0: i32) -> (i32, i32) {
    %c0_i32 = arith.constant 0 : i32
    %c0_i32_0 = arith.constant 0 : i32
    %c0_i32_1 = arith.constant 0 : i32
    return %c0_i32, %c0_i32_0 : i32, i32
  }
  func.func @transform_3(%arg0: i32) -> i32 {
    %c0_i32 = arith.constant 0 : i32
    %c0_i32_0 = arith.constant 0 : i32
    return %c0_i32 : i32
  }
  func.func @transform_4(%arg0: i32) -> (i32, i32, i32) {
    %c0_i32 = arith.constant 0 : i32
    %c0_i32_0 = arith.constant 0 : i32
    %c0_i32_1 = arith.constant 0 : i32
    %c0_i32_2 = arith.constant 0 : i32
    return %c0_i32, %c0_i32_0, %c0_i32_1 : i32, i32, i32
  }
  func.func @transform_5(%arg0: i32) -> (i32, i32) {
    %c0_i32 = arith.constant 0 : i32
    %c0_i32_0 = arith.constant 0 : i32
    %c0_i32_1 = arith.constant 0 : i32
    return %c0_i32, %c0_i32_0 : i32, i32
  }
  func.func @transform_6(%arg0: i32) -> (i32, i32) {
    %c0_i32 = arith.constant 0 : i32
    %c0_i32_0 = arith.constant 0 : i32
    %c0_i32_1 = arith.constant 0 : i32
    return %c0_i32, %c0_i32_0 : i32, i32
  }
  func.func @transform_7(%arg0: i32) -> (i32, i32, i32) {
    %c0_i32 = arith.constant 0 : i32
    %c0_i32_0 = arith.constant 0 : i32
    %c0_i32_1 = arith.constant 0 : i32
    return %arg0, %c0_i32, %c0_i32_0 : i32, i32, i32
  }
}

</mosaic_0001>

<bundles_post_ra>
// kernel: tpu_custom_call.1
= control target key start
LH: loop header
LB: loop body
LE: loop exit
PB: predicated region body
PF: predicated region fallthrough
CT: control target
= control target key end

     0   :  { %s6451_s0 = inlined_call_operand.hbm [shape: bf16[8,16,128], index: 0, kind: input, shape index: {}]   ;;  %s6452_s1 = inlined_call_operand.hbm [shape: bf16[128,384], index: 1, kind: input, shape index: {}]   ;;  %s6453_s2 = inlined_call_operand.hbm [shape: f32[1,384], index: 2, kind: input, shape index: {}]   ;;  %s6454_s3 = inlined_call_operand.vmem [shape: f32[4], index: 3, kind: input, shape index: {}]   ;;  %s6455_s4 = inlined_call_operand.hbm [shape: bf16[4,16,16], index: 4, kind: input, shape index: {}]   ;;  %s6456_s5 = inlined_call_operand.hbm [shape: bf16[128,128], index: 5, kind: input, shape index: {}]   ;;  %s6457_s6 = inlined_call_operand.vmem [shape: f32[1,128], index: 6, kind: input, shape index: {}]   ;;  %s6458_s7 = inlined_call_operand.hbm [shape: f32[8,16,128], index: 7, kind: output, shape index: {}]  }
   0x1   :  { %6478 = sst [smem:[#allocation38_spill]] %s6452_s1 }
   0x2   :  { %12 = vsyncpa [#allocation4], 0 }
   0x3   :  { %14 = vsyncpa [#allocation4 + $0x1], 0 }
   0x4   :  { %15 = vsyncpa [#allocation8], 0 }
   0x5   :  { %16 = vsyncpa [#allocation6], 0 }
   0x6   :  { %17 = vsyncpa [#allocation12], 0 }
   0x7   :  { %18 = vsyncpa [#allocation5], 0 }
   0x8   :  { %20 = vsyncpa [#allocation5 + $0x1], 0  ;;  %s4781_s24 = smov 0   ;;  %s4783_s25 = smov 0  }
   0x9   :  { %s4785_s26 = smov 0   ;;  %s4787_s27 = smov 0  }
   0xa LB: > { %s6479_s1 = sld [smem:[#allocation38_spill]]  ;;  %s4805_s8 = sadd.s32 4294967295, %s4722_s27   ;;  %s4722_s27 = sphi %s4787_s27, %s6549_s27   ;;  %s4718_s26 = sphi %s4785_s26, %s6548_s26   ;;  %s4714_s25 = sphi %s4783_s25, %s6547_s25   ;;  %s4710_s24 = sphi %s4781_s24, %s6546_s24  }
   0xb   : > { %p3776_p0 = scmp.ge.s32.totalorder %s4722_s27, 1  ;;  %p47_p1 = scmp.eq.s32.totalorder %s4805_s8, 0 }
   0xc   : > { %p209_p2 = scmp.lt.s32.totalorder %s4722_s27, 3  ;;  %s4724_s10 = smov [#allocation7]  }
   0xd   : > { %s222_s11 = sshll.u32 %s4724_s10, 4  ;;  %s256_s14 = sshll.u32 %s6455_s4, 4  ;;  %s223_s11 = int_to_ptr.vmem [resolvable:$true] %s222_s11  ;;  %s257_s14 = int_to_ptr.hbm [resolvable:$true] %s256_s14 }
   0xe   : > { %p4810_p3 = pnand %p3776_p0, %p209_p2  ;;  %s4725_s16 = smov [#allocation11]  }
   0xf   : > { %s258_s17 = sshll.u32 %s4725_s16, 4  ;;  %s4726_s18 = smov 192   ;;  %s259_s17 = int_to_ptr.vmem [resolvable:$true] %s258_s17 }
  0x10   : > { %s220_s30 = sshll.u32 %s6479_s1, 4  ;;  %p4136_p4 = pneg %p4810_p3  ;;  %s221_s30 = int_to_ptr.hbm [resolvable:$true] %s220_s30 }
  0x11   : > { %s4727_s19 = smov 12   ;;  %s6459_s20 = smov 64  }
  0x12   : > { %p4822_p6 = pnand %p4136_p4, %p47_p1  ;;  %s6460_s21 = smov 4  }
  0x13   : > { %s235_s28 = sshll.u32 %s6453_s2, 4  ;;  %s4730_s29 = smov [#allocation9]   ;;  %s236_s28 = int_to_ptr.hbm [resolvable:$true] %s235_s28 }
  0x14   : > { %4139 = dma.hbm_to_vmem [thread:$0]  (!%p4822_p6), %s221_s30, 3072, %s223_s11, [#allocation8], %s4726_s18, %s4726_s18, %s4727_s19  }
  0x15   : > { %4148 = dma.hbm_to_vmem [thread:$0]  (!%p4822_p6), %s257_s14, 512, %s259_s17, [#allocation12], %s6459_s20, %s6459_s20, %s6460_s21  }
  0x16   : > { %s237_s10 = sshll.u32 %s4730_s29, 4  ;;  %s247_s12 = sshll.u32 %s6454_s3, 4  ;;  %s238_s10 = int_to_ptr.vmem [resolvable:$true] %s237_s10  ;;  %s248_s12 = int_to_ptr.vmem [resolvable:$true] %s247_s12 }
  0x17   : > { %4142 = dma.hbm_to_vmem [thread:$0]  (!%p4822_p6), %s236_s28, 48, %s238_s10, [#allocation8]  }
  0x18   : > { %s4731_s13 = smov [#allocation10]   ;;  %s270_s17 = sshll.u32 %s6456_s5, 4  ;;  %s271_s17 = int_to_ptr.hbm [resolvable:$true] %s270_s17 }
  0x19   : > { %4145 = dma.vmem_to_smem (!%p4822_p6), %s248_s12, 16, %s4731_s13, [#allocation6]  }
  0x1a   : > { %s4732_s18 = smov [#allocation13]   ;;  %s3775_s22 = sadd.s32 4294967294, %s4722_s27  }
  0x1b   : > { %s272_s19 = sshll.u32 %s4732_s18, 4  ;;  %s4853_s23 = sadd.s32 1, %s4722_s27   ;;  %s273_s19 = int_to_ptr.vmem [resolvable:$true] %s272_s19 }
  0x1c   : > { %4151 = dma.hbm_to_vmem [thread:$0]  (!%p4822_p6), %s271_s17, 1024, %s273_s19, [#allocation12], %s6459_s20, %s6459_s20, %s6460_s21  }
  0x1d   : > { %s33_s28 = sadd.s32 1, %s4718_s26  ;;  %s30_s29 = ssub.s32 %s4722_s27, %s4853_s23 }
  0x1e   : > { %p40_p7 = scmp.ne.s32.totalorder %s4718_s26, %s4714_s25  ;;  %p31_p8 = scmp.eq.s32.totalorder %s30_s29, 0 }
  0x1f   : > { %p41_p9 = scmp.eq.s32.totalorder %s4722_s27, 0  ;;  %p46_p10 = scmp.ne.s32.totalorder %s4714_s25, %s4710_s24 }
  0x20   : > { %p196_p11 = scmp.eq.s32.totalorder %s4805_s8, 1  ;;  %p202_p0 = scmp.eq.s32.totalorder %s3775_s22, 1 }
  0x21   : > { %s4865_s10 = scalar_select %p31_p8, %s4718_s26, %s33_s28  }
  0x22   : > { %p4869_p12 = por %p47_p1, %p46_p10  ;;  %p4873_p13 = por %p196_p11, %p40_p7 }
  0x23   : > { %p42_p2 = por %p41_p9, %p40_p7  ;;  %s289_s11 = sand.u32 1, %s4718_s26  }
  0x24   : > { %p4878_p4 = por %p202_p0, %p46_p10  ;;  %p4165_p6 = scmp.lt.s32.totalorder %s4722_s27, 2 }
  0x25   : > { %s3783_s13 = sshll.u32 %s289_s11, 5  ;;  %s4045_s14 = sshll.u32 %s4722_s27, 5 }
  0x26   : > { %s299_s18 = scalar_lea.hbm %s6451_s0, %s4045_s14  ;;  %s293_s28 = scalar_lea.vmem [#allocation3], %s3783_s13 }
  0x27   : > { %s300_s19 = sshll.u32 %s299_s18, 4  ;;  %s302_s29 = sshll.u32 %s293_s28, 4  ;;  %s301_s19 = int_to_ptr.hbm [resolvable:$true] %s300_s19  ;;  %s303_s29 = int_to_ptr.vmem [resolvable:$true] %s302_s29 }
  0x28   : > { %p4887_p8 = pnand %p4165_p6, %p42_p2  ;;  %s290_s20 = scalar_lea.sflag [#allocation4], %s289_s11 }
  0x29   : > { %s4614_s21 = sshra.s32 %s301_s19, 4  ;;  %s4621_s13 = scalar_lea.hbm %s6451_s0, 64  ;;  %s4615_s21 = int_to_ptr.hbm [resolvable:$true] %s4614_s21 }
  0x2a   : > { %s4616_s1 = scalar_lea.hbm %s4615_s21, 32  ;;  %p4618_p9 = pneg %p4887_p8 }
  0x2b   : > { %p4617_p7 = scmp.ne.s32.totalorder %s4615_s21, %s4616_s1  ;;  %p4622_p0 = scmp.lt.s32.totalorder %s4615_s21, %s6451_s0 }
  0x2c   : > { %p4623_p2 = scmp.lt.s32.totalorder %s4621_s13, %s4616_s1 }
  0x2d   : > { %p4619_p10 = pnand %p4618_p9, %p4617_p7 }
  0x2e   : > { %p4624_p6 = por %p4623_p2, %p4622_p0 }
  0x2f   : > { %p4620_p11 = pneg %p4619_p10 }
  0x31   : > { %p4625_p5 = pnand %p4624_p6, %p4620_p11 }
  0x33   : > { %4628 = shalt.err (!%p4625_p5)
}
  0x34   : > { %s6486_s11 = smov 4   ;;  %s6487_s28 = smov 64  }
  0x35   : > { %4155 = dma.hbm_to_vmem [thread:$0]  (!%p4887_p8), %s301_s19, 512, %s303_s29, %s290_s20, %s6487_s28, %s6487_s28, %s6486_s11  }
  0x36   : > { %314 = sbr.rel (%p4810_p3) target bundleno = 3018 (0xbca), region = 48 }
  0x3b   : > { %s4907_s14 = sand.u32 1, %s4714_s25  }
  0x3c   : > { %s3788_s21 = sshll.u32 %s4907_s14, 5  ;;  %s317_s1 = scalar_lea.sflag [#allocation4], %s4907_s14 }
  0x3d   : > { %s4911_s16 = scalar_lea.vmem [#allocation3], %s3788_s21 }
  0x3e   : > { %4689 = dma.done.wait (%p4869_p12), %s317_s1, 512  }
  0x3f   : > { %4691 = vsyncadd (%p4869_p12), %s317_s1, 4294966784 }
  0x40   : > { %4693 = dma.done.wait (%p47_p1), [#allocation8], 3120  }
  0x41   : > { %4695 = vsyncadd (%p47_p1), [#allocation8], 4294964176 }
  0x42   : > { %4697 = dma.done.wait (%p47_p1), [#allocation6], 16  }
  0x43   : > { %4699 = vsyncadd (%p47_p1), [#allocation6], 4294967280 }
  0x44   : > { %4701 = dma.done.wait (%p47_p1), [#allocation12], 1536  }
  0x45   : > { %4703 = vsyncadd (%p47_p1), [#allocation12], 4294965760 }
  0x46   : > { %351 = sfence }
  0x47   : > { %v3897_v0 = vld [vmem:[#allocation7 + $0xa8] sm:$0xf]  ;;  %v4072_v1 = vld [vmem:[#allocation7 + $0xb0] sm:$0xf0]  ;;  %v4071_v2 = vld [vmem:[#allocation7 + $0xac] sm:$0xf] }
  0x48   : > { %v3898_v3 = vor.u32 %v4072_v1, %v3897_v0  ;;  %v3899_v4 = vld [vmem:[#allocation7 + $0xb4] sm:$0xf0]  ;;  %v3885_v5 = vld [vmem:[#allocation7 + $0x90] sm:$0xf]  ;;  %v4069_v6 = vld [vmem:[#allocation7 + $0x98] sm:$0xf0] }
  0x49   : > { %v3902_v7 = vor.u32 %v4071_v2, %v3899_v4  ;;  %v4068_v8 = vld [vmem:[#allocation7 + $0x94] sm:$0xf]  ;;  %v3887_v9 = vld [vmem:[#allocation7 + $0x9c] sm:$0xf0]  ;;  %v3886_v10 = vor.u32 %v4069_v6, %v3885_v5  ;;  %v3873_v12 = vld [vmem:[#allocation7 + $0x78] sm:$0xf] }
  0x4a   : > { %581 = vmatpush.bf16.msra.mxu0 %v3898_v3  ;;  %v3890_v11 = vor.u32 %v4068_v8, %v3887_v9  ;;  %v4066_v13 = vld [vmem:[#allocation7 + $0x80] sm:$0xf0]  ;;  %v4065_v14 = vld [vmem:[#allocation7 + $0x7c] sm:$0xf]  ;;  %v3875_v15 = vld [vmem:[#allocation7 + $0x84] sm:$0xf0] }
  0x4b   : > { %610 = vmatpush.bf16.msra.mxu1 %v3902_v7  ;;  %v3874_v16 = vor.u32 %v4066_v13, %v3873_v12  ;;  %v3878_v17 = vor.u32 %v4065_v14, %v3875_v15  ;;  %v3861_v18 = vld [vmem:[#allocation7 + $0x60] sm:$0xf]  ;;  %v4063_v19 = vld [vmem:[#allocation7 + $0x68] sm:$0xf0]  ;;  %v4062_v20 = vld [vmem:[#allocation7 + $0x64] sm:$0xf] }
  0x4c   : > { %v3863_v21 = vld [vmem:[#allocation7 + $0x6c] sm:$0xf0]  ;;  %v3862_v22 = vor.u32 %v4063_v19, %v3861_v18  ;;  %v3849_v24 = vld [vmem:[#allocation7 + $0x48] sm:$0xf]  ;;  %v4060_v25 = vld [vmem:[#allocation7 + $0x50] sm:$0xf0] }
  0x4d   : > { %v3866_v23 = vor.u32 %v4062_v20, %v3863_v21  ;;  %v4059_v26 = vld [vmem:[#allocation7 + $0x4c] sm:$0xf]  ;;  %v3851_v27 = vld [vmem:[#allocation7 + $0x54] sm:$0xf0]  ;;  %v3850_v28 = vor.u32 %v4060_v25, %v3849_v24  ;;  %v3837_v30 = vld [vmem:[#allocation7 + $0x30] sm:$0xf] }
  0x4e   : > { %582 = vmatpush.bf16.msra.mxu0 %v3886_v10  ;;  %v3854_v29 = vor.u32 %v4059_v26, %v3851_v27  ;;  %v4057_v31 = vld [vmem:[#allocation7 + $0x38] sm:$0xf0]  ;;  %v4056_v32 = vld [vmem:[#allocation7 + $0x34] sm:$0xf]  ;;  %v3839_v33 = vld [vmem:[#allocation7 + $0x3c] sm:$0xf0] }
  0x4f   : > { %611 = vmatpush.bf16.msra.mxu1 %v3890_v11  ;;  %v3838_v34 = vor.u32 %v4057_v31, %v3837_v30  ;;  %v3842_v35 = vor.u32 %v4056_v32, %v3839_v33  ;;  %v3825_v36 = vld [vmem:[#allocation7 + $0x18] sm:$0xf]  ;;  %v4054_v37 = vld [vmem:[#allocation7 + $0x20] sm:$0xf0]  ;;  %v4053_v38 = vld [vmem:[#allocation7 + $0x1c] sm:$0xf] }
  0x50   : > { %v3827_v39 = vld [vmem:[#allocation7 + $0x24] sm:$0xf0]  ;;  %v3826_v40 = vor.u32 %v4054_v37, %v3825_v36  ;;  %v3813_v42 = vld [vmem:[#allocation7] sm:$0xf]  ;;  %v4051_v43 = vld [vmem:[#allocation7 + $0x8] sm:$0xf0] }
  0x51   : > { %v3830_v41 = vor.u32 %v4053_v38, %v3827_v39  ;;  %v4050_v44 = vld [vmem:[#allocation7 + $0x4] sm:$0xf]  ;;  %v3815_v45 = vld [vmem:[#allocation7 + $0xc] sm:$0xf0]  ;;  %v3814_v46 = vor.u32 %v4051_v43, %v3813_v42  ;;  %v4935_v49 = vld [vmem:[%s4911_s16 + $0x8] sm:$0xff]  ;;  %s4733_s9 = smov 120  }
  0x52   : > { %583 = vmatpush.bf16.msra.mxu0 %v3874_v16  ;;  %v3818_v47 = vor.u32 %v4050_v44, %v3815_v45  ;;  %v4930_v48 = vld [vmem:[%s4911_s16] sm:$0xff]  ;;  %v4940_v50 = vld [vmem:[%s4911_s16 + $0x10] sm:$0xff]  ;;  %v4945_v51 = vld [vmem:[%s4911_s16 + $0x18] sm:$0xff]  ;;  %s4734_s20 = smov 112   ;;  %vm685_vm0 = vcmask 64512   ;;  %s798_s15 = sld [smem:[#allocation10]] }
  0x53   : > { %612 = vmatpush.bf16.msra.mxu1 %v3878_v17  ;;  %v421_v52 = vld [vmem:[#allocation9] sm:$0x7]  ;;  %s3927_s19 = sld [smem:[#allocation10 + $0x1]]  ;;  %s4736_s22 = smov 104  }
  0x54   : > { %v4949_v53 = vperm.slane %v421_v52, 0  ;;  %v4951_v54 = vperm.slane %v421_v52, 1  ;;  %s3948_s29 = sld [smem:[#allocation10 + $0x2]]  ;;  %s4737_s17 = smov 8  }
  0x55   : > { %s3969_s13 = sld [smem:[#allocation10 + $0x3]]  ;;  %s4738_s18 = smov 16  }
  0x56   : > { %584 = vmatpush.bf16.msra.mxu0 %v3862_v22  ;;  %s4739_s11 = smov 24   ;;  %s3794_s28 = sshll.u32 %s4907_s14, 6 }
  0x57   : > { %613 = vmatpush.bf16.msra.mxu1 %v3866_v23  ;;  %s377_s16 = scalar_lea.vmem [#allocation14], %s3794_s28  ;;  %s4664_s21 = scalar_lea.hbm %s6458_s7, 128 }
  0x5a   : > { %585 = vmatpush.bf16.msra.mxu0 %v3850_v28 }
  0x5b   : > { %614 = vmatpush.bf16.msra.mxu1 %v3854_v29 }
  0x5e   : > { %586 = vmatpush.bf16.msra.mxu0 %v3838_v34 }
  0x5f   : > { %615 = vmatpush.bf16.msra.mxu1 %v3842_v35 }
  0x62   : > { %587 = vmatpush.bf16.msra.mxu0 %v3826_v40 }
  0x63   : > { %616 = vmatpush.bf16.msra.mxu1 %v3830_v41 }
  0x66   : > { %588 = vmatpush.bf16.msra.mxu0 %v3814_v46 }
  0x67   : > { %617 = vmatpush.bf16.msra.mxu1 %v3818_v47 }
  0x69   : > { %589 = vmatmul.bf16.vlgmr.msra.gmra.mxu0 %v4930_v48 }
  0x6a   : > { %618 = vmatmul.bf16.vlgmr.msra.gmra.mxu1 %v4930_v48 }
  0x79   : > { %594 = vmatmul.bf16.gmra.mxu0 %v4935_v49 }
  0x7a   : > { %623 = vmatmul.bf16.gmra.mxu1 %v4935_v49 }
  0x89   : > { %599 = vmatmul.bf16.gmra.mxu0 %v4940_v50 }
  0x8a   : > { %628 = vmatmul.bf16.gmra.mxu1 %v4940_v50 }
  0x99   : > { %604 = vmatmul.bf16.gmra.mxu0 %v4945_v51 }
  0x9a   : > { %633 = vmatmul.bf16.gmra.mxu1 %v4945_v51 }
  0xe6   : > { %v590_v55 = vpop.f32.mrf.mxu0 }
  0xe7   : > { %v4954_v56 = vadd.f32 %v590_v55, %v4949_v53  ;;  %v619_v57 = vpop.f32.mrf.mxu1 }
  0xe8   : > { %v4957_v58 = vadd.f32 %v619_v57, %v4951_v54 }
  0xe9   : > { %v4961_v59 = vmul.f32 %v4954_v56, %v4954_v56 }
  0xea   : > { %v4965_v60 = vmul.f32 %v4957_v58, %v4957_v58 }
  0xeb   : > { %6488 = vst [vmem:[#allocation20_spill] sm:$0xff] %v4961_v59  ;;  %1330 = vrot.lane.b32.xlu0 %v4961_v59, %s4733_s9  ;;  %v686_v4 = vsel %vm685_vm0, %v4961_v59, 0.0 }
  0xec   : > { %6489 = vst [vmem:[#allocation21_spill] sm:$0xff] %v4965_v60  ;;  %2212 = vrot.lane.b32.xlu1 %v4965_v60, %s4734_s20  ;;  %1492 = vrot.lane.b32.xlu2 %v4965_v60, %s4733_s9  ;;  %v824_v3 = vsel %vm685_vm0, %v4965_v60, 0.0 }
  0xee   : > { %v592_v63 = vpop.f32.mrf.mxu0 }
  0xef   : > { %v621_v61 = vpop.f32.mrf.mxu1  ;;  %v4985_v1 = vadd.f32 %v592_v63, %v4949_v53 }
  0xf0   : > { %v4974_v62 = vadd.f32 %v621_v61, %v4951_v54 }
  0xf1   : > { %v4989_v2 = vmul.f32 %v4985_v1, %v4985_v1 }
  0xf2   : > { %v4978_v0 = vmul.f32 %v4974_v62, %v4974_v62 }
  0xf3   : > { %2058 = vrot.lane.b32.xlu0 %v4961_v59, %s4734_s20  ;;  %6491 = vst [vmem:[#allocation23_spill] sm:$0xff] %v4989_v2  ;;  %v689_v8 = vsel %vm685_vm0, %v4989_v2, 0.0 }
  0xf4   : > { %6490 = vst [vmem:[#allocation22_spill] sm:$0xff] %v4978_v0  ;;  %2214 = vrot.lane.b32.xlu2 %v4978_v0, %s4734_s20  ;;  %v827_v5 = vsel %vm685_vm0, %v4978_v0, 0.0 }
  0xf6   : > { %v595_v10 = vpop.f32.mrf.mxu0 }
  0xf7   : > { %v624_v6 = vpop.f32.mrf.mxu1  ;;  %v5015_v11 = vadd.f32 %v595_v10, %v4949_v53 }
  0xf8   : > { %v5000_v7 = vadd.f32 %v624_v6, %v4951_v54 }
  0xf9   : > { %v5019_v12 = vmul.f32 %v5015_v11, %v5015_v11 }
  0xfa   : > { %v5006_v9 = vmul.f32 %v5000_v7, %v5000_v7 }
  0xfb   : > { %6493 = vst [vmem:[#allocation25_spill] sm:$0xff] %v5019_v12  ;;  %v692_v19 = vsel %vm685_vm0, %v5019_v12, 0.0 }
  0xfc   : > { %2060 = vrot.lane.b32.xlu2 %v4989_v2, %s4734_s20  ;;  %6492 = vst [vmem:[#allocation24_spill] sm:$0xff] %v5006_v9  ;;  %v830_v17 = vsel %vm685_vm0, %v5006_v9, 0.0 }
  0xfe   : > { %v597_v16 = vpop.f32.mrf.mxu0 }
  0xff   : > { %v626_v13 = vpop.f32.mrf.mxu1  ;;  %v5059_v30 = vadd.f32 %v597_v16, %v4949_v53 }
 0x100   : > { %v5024_v14 = vadd.f32 %v626_v13, %v4951_v54 }
 0x101   : > { %v5066_v32 = vmul.f32 %v5059_v30, %v5059_v30 }
 0x102   : > { %v5028_v15 = vmul.f32 %v5024_v14, %v5024_v14 }
 0x103   : > { %6495 = vst [vmem:[#allocation27_spill] sm:$0xff] %v5066_v32 }
 0x104   : > { %6494 = vst [vmem:[#allocation26_spill] sm:$0xff] %v5028_v15  ;;  %v833_v21 = vsel %vm685_vm0, %v5028_v15, 0.0 }
 0x106   : > { %v600_v18 = vpop.f32.mrf.mxu0 }
 0x107   : > { %v629_v20 = vpop.f32.mrf.mxu1  ;;  %v5039_v22 = vadd.f32 %v600_v18, %v4949_v53 }
 0x108   : > { %v5048_v26 = vadd.f32 %v629_v20, %v4951_v54 }
 0x109   : > { %v5043_v23 = vmul.f32 %v5039_v22, %v5039_v22 }
 0x10a   : > { %v5052_v27 = vmul.f32 %v5048_v26, %v5048_v26 }
 0x10b   : > { %v698_v24 = vsel %vm685_vm0, %v5043_v23, 0.0 }
 0x10c   : > { %v836_v29 = vsel %vm685_vm0, %v5052_v27, 0.0 }
 0x10e   : > { %v602_v40 = vpop.f32.mrf.mxu0 }
 0x10f   : > { %v631_v25 = vpop.f32.mrf.mxu1  ;;  %v5092_v41 = vadd.f32 %v602_v40, %v4949_v53 }
 0x110   : > { %v5062_v31 = vadd.f32 %v631_v25, %v4951_v54 }
 0x111   : > { %v5102_v45 = vmul.f32 %v5092_v41, %v5092_v41 }
 0x112   : > { %v5072_v33 = vmul.f32 %v5062_v31, %v5062_v31 }
 0x113   : > { %6499 = vst [vmem:[#allocation31_spill] sm:$0xff] %v5102_v45 }
 0x114   : > { %6496 = vst [vmem:[#allocation28_spill] sm:$0xff] %v5072_v33 }
 0x116   : > { %825 = vadd.xlane.f32.xlu1 %v824_v3  ;;  %v5108_v18 = vpop.f32.mrf.mxu0 }
 0x117   : > { %v5054_v28 = vpop.f32.mrf.mxu1 }
 0x11d   : > { %687 = vadd.xlane.f32.xlu0 %v686_v4 }
 0x11f   : > { %v636_v35 = vpop.f32.mrf.mxu1 }
 0x120   : > { %v5081_v37 = vadd.f32 %v636_v35, %v4951_v54 }
 0x122   : > { %v5089_v39 = vmul.f32 %v5081_v37, %v5081_v37 }
 0x124   : > { %6497 = vst [vmem:[#allocation29_spill] sm:$0xff] %v5089_v39 }
 0x125   : > { %828 = vadd.xlane.f32.xlu2 %v827_v5 }
 0x12d   : > { %690 = vadd.xlane.f32.xlu2 %v689_v8 }
 0x12f   : > { %1494 = vrot.lane.b32.xlu1 %v4978_v0, %s4733_s9 }
 0x131   : > { %1496 = vrot.lane.b32.xlu0 %v5006_v9, %s4733_s9 }
 0x137   : > { %1332 = vrot.lane.b32.xlu1 %v4989_v2, %s4733_s9 }
 0x145   : > { %1334 = vrot.lane.b32.xlu2 %v5019_v12, %s4733_s9 }
 0x146   : > { %v5076_v36 = vpop.permute.xlu2 %1492 }
 0x14d   : > { %1498 = vrot.lane.b32.xlu2 %v5028_v15, %s4733_s9 }
 0x14e   : > { %v5098_v43 = vpop.permute.xlu2 %2214 }
 0x156   : > { %v5106_v47 = vpop.permute.xlu2 %2060 }
 0x157   : > { %6500 = vst [vmem:[#allocation32_spill] sm:$0xff] %v5106_v47 }
 0x15b   : > { %831 = vadd.xlane.f32.xlu0 %v830_v17 }
 0x15d   : > { %v5074_v34 = vpop.permute.xlu0 %1330 }
 0x15e   : > { %v5083_v38 = vpop.permute.xlu1 %2212 }
 0x161   : > { %693 = vadd.xlane.f32.xlu1 %v692_v19 }
 0x163   : > { %834 = vadd.xlane.f32.xlu0 %v833_v21 }
 0x165   : > { %v5094_v42 = vpop.permute.xlu0 %2058 }
 0x166   : > { %6498 = vst [vmem:[#allocation30_spill] sm:$0xff] %v5094_v42 }
 0x16b   : > { %699 = vadd.xlane.f32.xlu0 %v698_v24 }
 0x176   : > { %837 = vadd.xlane.f32.xlu2 %v836_v29 }
 0x17a   : > { %1336 = vrot.lane.b32.xlu1 %v5066_v32, %s4733_s9 }
 0x17f   : > { %2222 = vrot.lane.b32.xlu0 %v5072_v33, %s4734_s20 }
 0x182   : > { %2218 = vrot.lane.b32.xlu1 %v5028_v15, %s4734_s20 }
 0x187   : > { %1506 = vrot.lane.b32.xlu0 %v5089_v39, %s4733_s9 }
 0x189   : > { %v826_v44 = vpop.xlane.xlu1 %825 }
 0x18a   : > { %v848_v46 = vmax.f32 %v826_v44, 1e-24 }
 0x18c   : > { %4222 = vrsqrt.f32 %v848_v46  ;;  %vm862_vm8 = vweird.f32 %v848_v46 }
 0x18e   : > { %1340 = vrot.lane.b32.xlu2 %v5102_v45, %s4733_s9 }
 0x190   : > { %v688_v52 = vpop.xlane.xlu0 %687 }
 0x191   : > { %v710_v55 = vmax.f32 %v688_v52, 1e-24  ;;  %v839_v52 = vsel %vm685_vm0, %v5072_v33, 0.0 }
 0x192   : > { %v4223_v57 = vpop.eup %4222 }
 0x193   : > { %4224 = vrsqrt.f32 %v710_v55  ;;  %v857_v4 = vmul.f32 %v4223_v57, %v848_v46  ;;  %vm724_vm1 = vweird.f32 %v710_v55  ;;  %vm863_vm4 = vweird.f32 %v4223_v57 }
 0x194   : > { %vm864_vm9 = vmor %vm862_vm8, %vm863_vm4 }
 0x195   : > { %v858_v8 = vmul.f32 %v4223_v57, %v857_v4 }
 0x197   : > { %v859_v19 = vmul.f32 0.5, %v858_v8  ;;  %v607_v8 = vpop.f32.mrf.mxu0 }
 0x198   : > { %v829_v61 = vpop.xlane.xlu2 %828 }
 0x199   : > { %v4225_v63 = vpop.eup %4224  ;;  %v849_v3 = vmax.f32 %v829_v61, 1e-24  ;;  %v860_v25 = vsub.f32 1.5, %v859_v19 }
 0x19a   : > { %v719_v5 = vmul.f32 %v4225_v63, %v710_v55  ;;  %vm725_vm2 = vweird.f32 %v4225_v63 }
 0x19b   : > { %4226 = vrsqrt.f32 %v849_v3  ;;  %vm5110_vm5 = vmor %vm724_vm1, %vm725_vm2  ;;  %vm872_vm6 = vweird.f32 %v849_v3 }
 0x19c   : > { %v720_v6 = vmul.f32 %v4225_v63, %v719_v5  ;;  %v861_v5 = vmul.f32 %v4223_v57, %v860_v25  ;;  %v5125_v25 = vadd.f32 %v607_v8, %v4949_v53 }
 0x19e   : > { %v721_v16 = vmul.f32 0.5, %v720_v6  ;;  %v695_v6 = vsel %vm685_vm0, %v5066_v32, 0.0 }
 0x1a0   : > { %v691_v10 = vpop.xlane.xlu2 %690  ;;  %v722_v24 = vsub.f32 1.5, %v721_v16 }
 0x1a1   : > { %v4227_v13 = vpop.eup %4226  ;;  %v711_v17 = vmax.f32 %v691_v10, 1e-24 }
 0x1a2   : > { %v867_v20 = vmul.f32 %v4227_v13, %v849_v3  ;;  %vm873_vm3 = vweird.f32 %v4227_v13  ;;  %v723_v44 = vmul.f32 %v4225_v63, %v722_v24  ;;  %v5120_v3 = vstv %s798_s15 }
 0x1a3   : > { %4228 = vrsqrt.f32 %v711_v17  ;;  %vm874_vm7 = vmor %vm872_vm6, %vm873_vm3  ;;  %v865_v24 = vsel %vm864_vm9, %v4223_v57, %v861_v5  ;;  %vm734_vm11 = vweird.f32 %v711_v17  ;;  %v5137_v57 = vadd.f32 %v5054_v28, %v4951_v54  ;;  %v5150_v54 = vpop.permute.xlu1 %1494  ;;  %v1497_v8 = vpop.permute.xlu0 %1496 }
 0x1a4   : > { %v868_v21 = vmul.f32 %v4227_v13, %v867_v20  ;;  %v727_v16 = vsel %vm5110_vm5, %v4225_v63, %v723_v44  ;;  %v936_v63 = vmul.f32 %v865_v24, %v4957_v58 }
 0x1a5   : > { %v5148_v5 = vmul.f32 %v5137_v57, %v5137_v57 }
 0x1a6   : > { %v869_v29 = vmul.f32 0.5, %v868_v21  ;;  %v845_v21 = vsel %vm685_vm0, %v5089_v39, 0.0 }
 0x1a7   : > { %6504 = vst [vmem:[#allocation34_spill] sm:$0xff] %v5148_v5 }
 0x1a8   : > { %v870_v35 = vsub.f32 1.5, %v869_v29 }
 0x1a9   : > { %v4229_v40 = vpop.eup %4228 }
 0x1aa   : > { %v729_v61 = vmul.f32 %v4229_v40, %v711_v17  ;;  %v871_v4 = vmul.f32 %v4227_v13, %v870_v35  ;;  %vm735_vm10 = vweird.f32 %v4229_v40  ;;  %v5132_v35 = vmul.f32 %v5125_v25, %v5125_v25 }
 0x1ab   : > { %vm736_vm12 = vmor %vm734_vm11, %vm735_vm10 }
 0x1ac   : > { %v730_v55 = vmul.f32 %v4229_v40, %v729_v61  ;;  %696 = vadd.xlane.f32.xlu1 %v695_v6  ;;  %v875_v10 = vsel %vm874_vm7, %v4227_v13, %v871_v4  ;;  %v800_v13 = vmul.f32 %v5120_v3, %v727_v16  ;;  %6503 = vst [vmem:[#allocation33_spill] sm:$0xff] %v5132_v35  ;;  %v707_v4 = vsel %vm685_vm0, %v5132_v35, 0.0  ;;  %v5161_v16 = vpop.permute.xlu2 %1334 }
 0x1ad   : > { %v937_v19 = vmul.f32 %v875_v10, %v4974_v62  ;;  %v1354_v6 = vsel %vm685_vm0, %v5074_v34, 0.0 }
 0x1ae   : > { %v731_v20 = vmul.f32 0.5, %v730_v55  ;;  %v808_v44 = vmul.f32 %v800_v13, %v4954_v56  ;;  %v1333_v55 = vpop.permute.xlu1 %1332 }
 0x1af   : > { %3907 = vmatpush.xpose.msk.msrb.mxu0 %vm685_vm0, %v937_v19  ;;  %v1357_v10 = vsel %vm685_vm0, %v1333_v55, 0.0 }
 0x1b0   : > { %v732_v46 = vsub.f32 1.5, %v731_v20  ;;  %v1522_v20 = vsel %vm685_vm0, %v1497_v8, 0.0 }
 0x1b1   : > { %846 = vadd.xlane.f32.xlu0 %v845_v21 }
 0x1b2   : > { %v733_v29 = vmul.f32 %v4229_v40, %v732_v46 }
 0x1b3   : > { %3908 = vmatpush.xpose.msk.msrb.mxu0 %vm685_vm0, %v936_v63 }
 0x1b4   : > { %v737_v61 = vsel %vm736_vm12, %v4229_v40, %v733_v29  ;;  %v842_v40 = vsel %vm685_vm0, %v5148_v5, 0.0  ;;  %v1499_v46 = vpop.permute.xlu2 %1498 }
 0x1b5   : > { %v801_v17 = vmul.f32 %v5120_v3, %v737_v61 }
 0x1b6   : > { %3909 = vmatmul.msk.f32.vlgmr.msrb.gmra.mxu0 %vm685_vm0, %v808_v44 }
 0x1b7   : > { %840 = vadd.xlane.f32.xlu2 %v839_v52  ;;  %v809_v28 = vmul.f32 %v801_v17, %v4985_v1  ;;  %v1525_v52 = vsel %vm685_vm0, %v1499_v46, 0.0 }
 0x1b9   : > { %708 = vadd.xlane.f32.xlu0 %v707_v4 }
 0x1be   : > { %3910 = vmatmul.msk.f32.gmra.mxu0 %vm685_vm0, %v809_v28 }
 0x1bf   : > { %843 = vadd.xlane.f32.xlu2 %v842_v40 }
 0x1c1   : > { %1355 = vadd.xlane.f32.xlu0 %v1354_v6 }
 0x1c5   : > { %1500 = vrot.lane.b32.xlu1 %v5052_v27, %s4733_s9 }
 0x1c9   : > { %1358 = vadd.xlane.f32.xlu0 %v1357_v10 }
 0x1cd   : > { %1338 = vrot.lane.b32.xlu1 %v5043_v23, %s4733_s9 }
 0x1ce   : > { %v832_v19 = vpop.xlane.xlu0 %831 }
 0x1cf   : > { %v850_v21 = vmax.f32 %v832_v19, 1e-24 }
 0x1d1   : > { %4230 = vrsqrt.f32 %v850_v21  ;;  %1523 = vadd.xlane.f32.xlu0 %v1522_v20  ;;  %vm882_vm15 = vweird.f32 %v850_v21 }
 0x1d4   : > { %v694_v34 = vpop.xlane.xlu1 %693 }
 0x1d5   : > { %v712_v24 = vmax.f32 %v694_v34, 1e-24  ;;  %1502 = vrot.lane.b32.xlu1 %v5072_v33, %s4733_s9 }
 0x1d6   : > { %v835_v13 = vpop.xlane.xlu0 %834 }
 0x1d7   : > { %v4231_v63 = vpop.eup %4230  ;;  %4232 = vrsqrt.f32 %v712_v24  ;;  %1344 = vrot.lane.b32.xlu2 %v5132_v35, %s4733_s9  ;;  %v851_v29 = vmax.f32 %v835_v13, 1e-24  ;;  %vm744_vm4 = vweird.f32 %v712_v24 }
 0x1d8   : > { %v877_v44 = vmul.f32 %v4231_v63, %v850_v21  ;;  %vm883_vm1 = vweird.f32 %v4231_v63 }
 0x1d9   : > { %4234 = vrsqrt.f32 %v851_v29  ;;  %1526 = vadd.xlane.f32.xlu0 %v1525_v52  ;;  %vm892_vm13 = vweird.f32 %v851_v29  ;;  %vm884_vm5 = vmor %vm882_vm15, %vm883_vm1 }
 0x1da   : > { %v878_v61 = vmul.f32 %v4231_v63, %v877_v44 }
 0x1dc   : > { %v879_v40 = vmul.f32 0.5, %v878_v61 }
 0x1dd   : > { %v4233_v4 = vpop.eup %4232 }
 0x1de   : > { %v739_v17 = vmul.f32 %v4233_v4, %v712_v24  ;;  %v880_v19 = vsub.f32 1.5, %v879_v40  ;;  %vm745_vm2 = vweird.f32 %v4233_v4  ;;  %v701_v24 = vsel %vm685_vm0, %v5102_v45, 0.0 }
 0x1df   : > { %v4235_v28 = vpop.eup %4234  ;;  %vm746_vm6 = vmor %vm744_vm4, %vm745_vm2 }
 0x1e0   : > { %v740_v6 = vmul.f32 %v4233_v4, %v739_v17  ;;  %v887_v8 = vmul.f32 %v4235_v28, %v851_v29  ;;  %vm893_vm14 = vweird.f32 %v4235_v28  ;;  %v881_v52 = vmul.f32 %v4231_v63, %v880_v19 }
 0x1e1   : > { %vm894_vm3 = vmor %vm892_vm13, %vm893_vm14  ;;  %v5190_v19 = vadd.f32 %v5108_v18, %v4949_v53 }
 0x1e2   : > { %v741_v55 = vmul.f32 0.5, %v740_v6  ;;  %v888_v10 = vmul.f32 %v4235_v28, %v887_v8  ;;  %v885_v29 = vsel %vm884_vm5, %v4231_v63, %v881_v52  ;;  %v700_v63 = vpop.xlane.xlu0 %699 }
 0x1e3   : > { %v938_v21 = vmul.f32 %v885_v29, %v5000_v7 }
 0x1e4   : > { %v742_v20 = vsub.f32 1.5, %v741_v55  ;;  %v889_v34 = vmul.f32 0.5, %v888_v10 }
 0x1e6   : > { %v890_v13 = vsub.f32 1.5, %v889_v34  ;;  %v743_v46 = vmul.f32 %v4233_v4, %v742_v20 }
 0x1e8   : > { %v891_v44 = vmul.f32 %v4235_v28, %v890_v13  ;;  %v747_v6 = vsel %vm746_vm6, %v4233_v4, %v743_v46  ;;  %v1516_v4 = vsel %vm685_vm0, %v5076_v36, 0.0  ;;  %v5198_v36 = vmul.f32 %v5190_v19, %v5190_v19 }
 0x1e9   : > { %v802_v40 = vmul.f32 %v5120_v3, %v747_v6  ;;  %v838_v20 = vpop.xlane.xlu2 %837  ;;  %v5200_v13 = vmax.f32 %v700_v63, 1e-24 }
 0x1ea   : > { %v895_v61 = vsel %vm894_vm3, %v4235_v28, %v891_v44  ;;  %6507 = vst [vmem:[#allocation37_spill] sm:$0xff] %v5198_v36  ;;  %v5202_v44 = vmax.f32 %v838_v20, 1e-24 }
 0x1eb   : > { %v939_v17 = vmul.f32 %v895_v61, %v5024_v14  ;;  %v810_v8 = vmul.f32 %v802_v40, %v5015_v11  ;;  %4236 = vrsqrt.f32 %v5200_v13  ;;  %vm764_vm10 = vweird.f32 %v5200_v13 }
 0x1ec   : > { %v5182_v28 = vpop.permute.xlu1 %1336  ;;  %vm902_vm15 = vweird.f32 %v5202_v44 }
 0x1ed   : > { %3911 = vmatpush.xpose.msk.msra.mxu3 %vm685_vm0, %v939_v17 }
 0x1f1   : > { %3912 = vmatpush.xpose.msk.msra.mxu3 %vm685_vm0, %v938_v21  ;;  %v5184_v55 = vpop.permute.xlu0 %2222  ;;  %v5206_v53 = vpop.permute.xlu2 %1340 }
 0x1f2   : > { %6505 = vst [vmem:[#allocation35_spill] sm:$0xff] %v5184_v55  ;;  %v5212_v17 = vpop.eup %4236 }
 0x1f3   : > { %vm765_vm11 = vweird.f32 %v5212_v17 }
 0x1f4   : > { %3913 = vmatmul.msk.f32.vlgmr.msra.gmra.mxu3 %vm685_vm0, %v810_v8  ;;  %v5186_v10 = vpop.permute.xlu1 %2218  ;;  %v759_v8 = vmul.f32 %v5212_v17, %v5200_v13  ;;  %vm5242_vm14 = vmor %vm764_vm10, %vm765_vm11  ;;  %v3869_v13 = vld [vmem:[#allocation7 + $0x68] sm:$0xf] }
 0x1f5   : > { %6506 = vst [vmem:[#allocation36_spill] sm:$0xff] %v5186_v10 }
 0x1f6   : > { %v760_v15 = vmul.f32 %v5212_v17, %v759_v8 }
 0x1f8   : > { %v761_v10 = vmul.f32 0.5, %v760_v15 }
 0x1f9   : > { %v5194_v34 = vpop.permute.xlu0 %1506 }
 0x1fa   : > { %v762_v45 = vsub.f32 1.5, %v761_v10 }
 0x1ff   : > { %702 = vadd.xlane.f32.xlu1 %v701_v24 }
 0x200   : > { %1517 = vadd.xlane.f32.xlu2 %v1516_v4 }
 0x218   : > { %1504 = vrot.lane.b32.xlu1 %v5148_v5, %s4733_s9 }
 0x21f   : > { %v697_v46 = vpop.xlane.xlu1 %696 }
 0x220   : > { %v713_v52 = vmax.f32 %v697_v46, 1e-24  ;;  %1342 = vrot.lane.b32.xlu1 %v5198_v36, %s4733_s9 }
 0x222   : > { %4238 = vrsqrt.f32 %v713_v52  ;;  %vm754_vm8 = vweird.f32 %v713_v52 }
 0x223   : > { %4240 = vrsqrt.f32 %v5202_v44 }
 0x224   : > { %v847_v18 = vpop.xlane.xlu0 %846 }
 0x225   : > { %v5210_v61 = vmax.f32 %v847_v18, 1e-24 }
 0x227   : > { %4242 = vrsqrt.f32 %v5210_v61  ;;  %vm932_vm2 = vweird.f32 %v5210_v61 }
 0x228   : > { %v4239_v6 = vpop.eup %4238 }
 0x229   : > { %v749_v29 = vmul.f32 %v4239_v6, %v713_v52  ;;  %v5215_v40 = vpop.eup %4240  ;;  %vm755_vm7 = vweird.f32 %v4239_v6  ;;  %v4070_v52 = vld [vmem:[#allocation7 + $0xa0] sm:$0xf0] }
 0x22a   : > { %v841_v21 = vpop.xlane.xlu2 %840  ;;  %v897_v20 = vmul.f32 %v5215_v40, %v5202_v44  ;;  %vm756_vm9 = vmor %vm754_vm8, %vm755_vm7  ;;  %vm903_vm1 = vweird.f32 %v5215_v40 }
 0x22b   : > { %v750_v24 = vmul.f32 %v4239_v6, %v749_v29  ;;  %v853_v4 = vmax.f32 %v841_v21, 1e-24  ;;  %v3905_v29 = vld [vmem:[#allocation7 + $0xb0] sm:$0xf]  ;;  %v4073_v21 = vld [vmem:[#allocation7 + $0xb8] sm:$0xf0]  ;;  %vm5259_vm5 = vmor %vm902_vm15, %vm903_vm1 }
 0x22c   : > { %v898_v60 = vmul.f32 %v5215_v40, %v897_v20  ;;  %v3906_v55 = vor.u32 %v4073_v21, %v3905_v29 }
 0x22d   : > { %v5219_v63 = vpop.eup %4242  ;;  %v751_v46 = vmul.f32 0.5, %v750_v24  ;;  %4244 = vrsqrt.f32 %v853_v4  ;;  %vm912_vm12 = vweird.f32 %v853_v4 }
 0x22e   : > { %v927_v18 = vmul.f32 %v5219_v63, %v5210_v61  ;;  %639 = vmatpush.bf16.msra.mxu2 %v3906_v55  ;;  %vm933_vm3 = vweird.f32 %v5219_v63  ;;  %v3833_v61 = vld [vmem:[#allocation7 + $0x20] sm:$0xf] }
 0x22f   : > { %v752_v2 = vsub.f32 1.5, %v751_v46  ;;  %v899_v46 = vmul.f32 0.5, %v898_v60  ;;  %v3881_v60 = vld [vmem:[#allocation7 + $0x80] sm:$0xf]  ;;  %vm5266_vm6 = vmor %vm932_vm2, %vm933_vm3 }
 0x230   : > { %v928_v0 = vmul.f32 %v5219_v63, %v927_v18 }
 0x231   : > { %v753_v33 = vmul.f32 %v4239_v6, %v752_v2  ;;  %v3893_v2 = vld [vmem:[#allocation7 + $0x98] sm:$0xf] }
 0x232   : > { %v844_v59 = vpop.xlane.xlu2 %843  ;;  %v929_v20 = vmul.f32 0.5, %v928_v0  ;;  %v3894_v21 = vor.u32 %v4070_v52, %v3893_v2  ;;  %v4067_v0 = vld [vmem:[#allocation7 + $0x88] sm:$0xf0] }
 0x233   : > { %v4245_v24 = vpop.eup %4244  ;;  %v5228_v47 = vmax.f32 %v844_v59, 1e-24  ;;  %v757_v42 = vsel %vm756_vm9, %v4239_v6, %v753_v33  ;;  %v900_v33 = vsub.f32 1.5, %v899_v46  ;;  %v3882_v55 = vor.u32 %v4067_v0, %v3881_v60  ;;  %v4064_v46 = vld [vmem:[#allocation7 + $0x70] sm:$0xf0] }
 0x234   : > { %v907_v5 = vmul.f32 %v4245_v24, %v853_v4  ;;  %v803_v8 = vmul.f32 %v5120_v3, %v757_v42  ;;  %vm913_vm13 = vweird.f32 %v4245_v24  ;;  %v930_v42 = vsub.f32 1.5, %v929_v20  ;;  %640 = vmatpush.bf16.msra.mxu2 %v3894_v21  ;;  %v3857_v0 = vld [vmem:[#allocation7 + $0x50] sm:$0xf] }
 0x235   : > { %4246 = vrsqrt.f32 %v5228_v47  ;;  %v763_v6 = vmul.f32 %v5212_v17, %v762_v45  ;;  %vm5253_vm4 = vmor %vm912_vm12, %vm913_vm13  ;;  %v901_v52 = vmul.f32 %v5215_v40, %v900_v33  ;;  %vm922_vm7 = vweird.f32 %v5228_v47  ;;  %v4058_v45 = vld [vmem:[#allocation7 + $0x40] sm:$0xf0] }
 0x236   : > { %v908_v39 = vmul.f32 %v4245_v24, %v907_v5  ;;  %v811_v29 = vmul.f32 %v803_v8, %v5059_v30  ;;  %v931_v44 = vmul.f32 %v5219_v63, %v930_v42  ;;  %v4061_v42 = vld [vmem:[#allocation7 + $0x58] sm:$0xf0] }
 0x237   : > { %v1501_v18 = vpop.permute.xlu1 %1500  ;;  %v767_v4 = vsel %vm5242_vm14, %v5212_v17, %v763_v6  ;;  %v905_v17 = vsel %vm5259_vm5, %v5215_v40, %v901_v52  ;;  %v3845_v40 = vld [vmem:[#allocation7 + $0x38] sm:$0xf] }
 0x238   : > { %v909_v59 = vmul.f32 0.5, %v908_v39  ;;  %v1528_v15 = vsel %vm685_vm0, %v1501_v18, 0.0  ;;  %3914 = vmatmul.msk.f32.gmra.mxu3 %vm685_vm0, %v811_v29  ;;  %641 = vmatpush.bf16.msra.mxu2 %v3882_v55  ;;  %v3870_v18 = vor.u32 %v4064_v46, %v3869_v13  ;;  %v804_v6 = vmul.f32 %v5120_v3, %v767_v4  ;;  %v4052_v29 = vld [vmem:[#allocation7 + $0x10] sm:$0xf0] }
 0x239   : > { %1529 = vadd.xlane.f32.xlu0 %v1528_v15 }
 0x23a   : > { %v910_v5 = vsub.f32 1.5, %v909_v59 }
 0x23b   : > { %v4247_v10 = vpop.eup %4246 }
 0x23c   : > { %v917_v8 = vmul.f32 %v4247_v10, %v5228_v47  ;;  %v911_v2 = vmul.f32 %v4245_v24, %v910_v5  ;;  %vm923_vm8 = vweird.f32 %v4247_v10  ;;  %v935_v5 = vsel %vm5266_vm6, %v5219_v63, %v931_v44  ;;  %642 = vmatpush.bf16.msra.mxu2 %v3870_v18  ;;  %v4055_v18 = vld [vmem:[#allocation7 + $0x28] sm:$0xf0] }
 0x23d   : > { %vm924_vm9 = vmor %vm922_vm7, %vm923_vm8  ;;  %v943_v13 = vmul.f32 %v935_v5, %v5081_v37  ;;  %v1537_v47 = vsel %vm685_vm0, %v5194_v34, 0.0  ;;  %v3846_v44 = vor.u32 %v4058_v45, %v3845_v40  ;;  %v3834_v4 = vor.u32 %v4055_v18, %v3833_v61  ;;  %v3821_v34 = vld [vmem:[#allocation7 + $0x8] sm:$0xf] }
 0x23e   : > { %v918_v20 = vmul.f32 %v4247_v10, %v917_v8  ;;  %v915_v59 = vsel %vm5253_vm4, %v4245_v24, %v911_v2  ;;  %v3858_v24 = vor.u32 %v4061_v42, %v3857_v0  ;;  %v940_v8 = vmul.f32 %v905_v17, %v5048_v26  ;;  %v5308_v17 = vpop.permute.xlu2 %1344 }
 0x23f   : > { %v1339_v21 = vpop.permute.xlu1 %1338  ;;  %v941_v60 = vmul.f32 %v915_v59, %v5062_v31  ;;  %v812_v2 = vmul.f32 %v804_v6, %v5039_v22  ;;  %v1519_v59 = vsel %vm685_vm0, %v5150_v54, 0.0  ;;  %v5310_v54 = vpop.xlane.xlu0 %708 }
 0x240   : > { %v919_v15 = vmul.f32 0.5, %v918_v20  ;;  %v1366_v33 = vsel %vm685_vm0, %v1339_v21, 0.0  ;;  %643 = vmatpush.bf16.msra.mxu2 %v3858_v24  ;;  %v3822_v21 = vor.u32 %v4052_v29, %v3821_v34 }
 0x241   : > { %1367 = vadd.xlane.f32.xlu0 %v1366_v33  ;;  %3915 = vmatpush.xpose.msk.msrb.mxu3 %vm685_vm0, %v941_v60  ;;  %v1363_v33 = vsel %vm685_vm0, %v5182_v28, 0.0  ;;  %v1369_v60 = vsel %vm685_vm0, %v5206_v53, 0.0 }
 0x242   : > { %v920_v55 = vsub.f32 1.5, %v919_v15  ;;  %v1360_v15 = vsel %vm685_vm0, %v5161_v16, 0.0 }
 0x244   : > { %v921_v39 = vmul.f32 %v4247_v10, %v920_v55  ;;  %644 = vmatpush.bf16.msra.mxu2 %v3846_v44 }
 0x245   : > { %3916 = vmatpush.xpose.msk.msrb.mxu3 %vm685_vm0, %v940_v8 }
 0x246   : > { %v925_v63 = vsel %vm924_vm9, %v4247_v10, %v921_v39  ;;  %v704_v10 = vsel %vm685_vm0, %v5198_v36, 0.0 }
 0x247   : > { %v1503_v46 = vpop.permute.xlu1 %1502  ;;  %v942_v52 = vmul.f32 %v925_v63, %v5137_v57  ;;  %v1356_v16 = vpop.xlane.xlu0 %1355 }
 0x248   : > { %v1531_v20 = vsel %vm685_vm0, %v1503_v46, 0.0  ;;  %3917 = vmatmul.msk.f32.vlgmr.msrb.gmra.mxu3 %vm685_vm0, %v812_v2  ;;  %645 = vmatpush.bf16.msra.mxu2 %v3834_v4  ;;  %v1378_v55 = vmax.f32 %v1356_v16, 1e-24  ;;  %v1375_v16 = vsel %vm685_vm0, %v5308_v17, 0.0 }
 0x249   : > { %3919 = vmatpush.xpose.msk.msra.mxu3 %vm685_vm0, %v943_v13  ;;  %1532 = vadd.xlane.f32.xlu2 %v1531_v20 }
 0x24a   : > { %1538 = vadd.xlane.f32.xlu0 %v1537_v47  ;;  %705 = vadd.xlane.f32.xlu1 %v704_v10  ;;  %vm1392_vm2 = vweird.f32 %v1378_v55 }
 0x24c   : > { %646 = vmatpush.bf16.msra.mxu2 %v3822_v21 }
 0x24d   : > { %3920 = vmatpush.xpose.msk.msra.mxu3 %vm685_vm0, %v942_v52 }
 0x24f   : > { %647 = vmatmul.bf16.vlgmr.msra.gmra.mxu2 %v4930_v48  ;;  %v1359_v8 = vpop.xlane.xlu0 %1358 }
 0x250   : > { %v1379_v63 = vmax.f32 %v1359_v8, 1e-24 }
 0x252   : > { %1520 = vadd.xlane.f32.xlu1 %v1519_v59  ;;  %vm1402_vm5 = vweird.f32 %v1379_v63 }
 0x25a   : > { %1361 = vadd.xlane.f32.xlu1 %v1360_v15 }
 0x25f   : > { %652 = vmatmul.bf16.gmra.mxu2 %v4935_v49 }
 0x262   : > { %1364 = vadd.xlane.f32.xlu1 %v1363_v33 }
 0x26a   : > { %1370 = vadd.xlane.f32.xlu1 %v1369_v60 }
 0x26f   : > { %657 = vmatmul.bf16.gmra.mxu2 %v4940_v50 }
 0x272   : > { %v703_v0 = vpop.xlane.xlu1 %702 }
 0x273   : > { %v715_v48 = vmax.f32 %v703_v0, 1e-24  ;;  %v1518_v42 = vpop.xlane.xlu2 %1517 }
 0x274   : > { %v1540_v5 = vmax.f32 %v1518_v42, 1e-24 }
 0x275   : > { %4248 = vrsqrt.f32 %v715_v48  ;;  %vm774_vm12 = vweird.f32 %v715_v48 }
 0x276   : > { %4250 = vrsqrt.f32 %v1540_v5  ;;  %vm1554_vm14 = vweird.f32 %v1540_v5 }
 0x277   : > { %4252 = vrsqrt.f32 %v1378_v55 }
 0x278   : > { %4254 = vrsqrt.f32 %v1379_v63 }
 0x27b   : > { %v4249_v28 = vpop.eup %4248 }
 0x27c   : > { %v4251_v49 = vpop.eup %4250  ;;  %v769_v24 = vmul.f32 %v4249_v28, %v715_v48  ;;  %vm775_vm10 = vweird.f32 %v4249_v28 }
 0x27d   : > { %v1549_v6 = vmul.f32 %v4251_v49, %v1540_v5  ;;  %vm1555_vm11 = vweird.f32 %v4251_v49  ;;  %v4253_v47 = vpop.eup %4252  ;;  %vm776_vm13 = vmor %vm774_vm12, %vm775_vm10  ;;  %v1524_v5 = vpop.xlane.xlu0 %1523 }
 0x27e   : > { %v770_v53 = vmul.f32 %v4249_v28, %v769_v24  ;;  %vm1556_vm15 = vmor %vm1554_vm14, %vm1555_vm11  ;;  %v1387_v10 = vmul.f32 %v4253_v47, %v1378_v55  ;;  %v4255_v21 = vpop.eup %4254  ;;  %vm1393_vm1 = vweird.f32 %v4253_v47  ;;  %v5323_v24 = vstv %s3927_s19 }
 0x27f   : > { %v1550_v39 = vmul.f32 %v4251_v49, %v1549_v6  ;;  %662 = vmatmul.bf16.gmra.mxu2 %v4945_v51  ;;  %v1397_v59 = vmul.f32 %v4255_v21, %v1379_v63  ;;  %vm1394_vm3 = vmor %vm1392_vm2, %vm1393_vm1  ;;  %vm1403_vm4 = vweird.f32 %v4255_v21 }
 0x280   : > { %v771_v40 = vmul.f32 0.5, %v770_v53  ;;  %v1388_v29 = vmul.f32 %v4253_v47, %v1387_v10  ;;  %vm1404_vm6 = vmor %vm1402_vm5, %vm1403_vm4 }
 0x281   : > { %v1551_v45 = vmul.f32 0.5, %v1550_v39  ;;  %v1398_v0 = vmul.f32 %v4255_v21, %v1397_v59 }
 0x282   : > { %v772_v13 = vsub.f32 1.5, %v771_v40  ;;  %v1389_v51 = vmul.f32 0.5, %v1388_v29 }
 0x283   : > { %v1552_v46 = vsub.f32 1.5, %v1551_v45  ;;  %v1399_v42 = vmul.f32 0.5, %v1398_v0 }
 0x284   : > { %v773_v2 = vmul.f32 %v4249_v28, %v772_v13  ;;  %v1390_v60 = vsub.f32 1.5, %v1389_v51 }
 0x285   : > { %v1553_v50 = vmul.f32 %v4251_v49, %v1552_v46  ;;  %v1527_v8 = vpop.xlane.xlu0 %1526  ;;  %v717_v46 = vmax.f32 %v5310_v54, 1e-24 }
 0x286   : > { %v777_v52 = vsel %vm776_vm13, %v4249_v28, %v773_v2  ;;  %v1391_v48 = vmul.f32 %v4253_v47, %v1390_v60  ;;  %v1400_v28 = vsub.f32 1.5, %v1399_v42  ;;  %v5346_v0 = vmax.f32 %v1527_v8, 1e-24 }
 0x287   : > { %v1557_v44 = vsel %vm1556_vm15, %v4251_v49, %v1553_v50  ;;  %v805_v20 = vmul.f32 %v5120_v3, %v777_v52  ;;  %v5332_v52 = vmax.f32 %v1524_v5, 1e-24  ;;  %vm794_vm11 = vweird.f32 %v717_v46 }
 0x288   : > { %v1628_v61 = vmul.f32 %v1557_v44, %v4957_v58  ;;  %v1395_v49 = vsel %vm1394_vm3, %v4253_v47, %v1391_v48  ;;  %v1401_v53 = vmul.f32 %v4255_v21, %v1400_v28 }
 0x289   : > { %v813_v18 = vmul.f32 %v805_v20, %v5092_v41  ;;  %v1468_v6 = vmul.f32 %v5323_v24, %v1395_v49  ;;  %vm1574_vm3 = vweird.f32 %v5332_v52 }
 0x28a   : > { %v1505_v4 = vpop.permute.xlu1 %1504  ;;  %1649 = vrot.lane.b32.xlu0 %v1628_v61, %s4733_s9  ;;  %v1405_v55 = vsel %vm1404_vm6, %v4255_v21, %v1401_v53 }
 0x28b   : > { %3918 = vmatmul.msk.f32.gmra.mxu3 %vm685_vm0, %v813_v18  ;;  %v1534_v34 = vsel %vm685_vm0, %v1505_v4, 0.0  ;;  %v1476_v39 = vmul.f32 %v1468_v6, %v4954_v56  ;;  %v1469_v40 = vmul.f32 %v5323_v24, %v1405_v55 }
 0x28c   : > { %1535 = vadd.xlane.f32.xlu1 %v1534_v34 }
 0x28d   : > { %v1477_v17 = vmul.f32 %v1469_v40, %v4985_v1 }
 0x292   : > { %v1343_v15 = vpop.permute.xlu1 %1342 }
 0x293   : > { %v1372_v33 = vsel %vm685_vm0, %v1343_v15, 0.0 }
 0x294   : > { %1373 = vadd.xlane.f32.xlu2 %v1372_v33 }
 0x29c   : > { %1376 = vadd.xlane.f32.xlu2 %v1375_v16 }
 0x2a5   : > { %1643 = vrot.lane.b32.xlu1 %v1476_v39, %s4733_s9 }
 0x2ac   : > { %v1530_v45 = vpop.xlane.xlu0 %1529 }
 0x2ad   : > { %v1544_v13 = vmax.f32 %v1530_v45, 1e-24  ;;  %1645 = vrot.lane.b32.xlu1 %v1477_v17, %s4733_s9 }
 0x2af   : > { %4256 = vrsqrt.f32 %v1544_v13  ;;  %vm1594_vm8 = vweird.f32 %v1544_v13 }
 0x2b0   : > { %4258 = vrsqrt.f32 %v717_v46 }
 0x2b1   : > { %4260 = vrsqrt.f32 %v5332_v52 }
 0x2b4   : > { %v1368_v18 = vpop.xlane.xlu0 %1367 }
 0x2b5   : > { %v4257_v2 = vpop.eup %4256  ;;  %v5338_v29 = vmax.f32 %v1368_v18, 1e-24 }
 0x2b6   : > { %v1589_v63 = vmul.f32 %v4257_v2, %v1544_v13  ;;  %vm1595_vm7 = vweird.f32 %v4257_v2  ;;  %v5334_v10 = vpop.eup %4258 }
 0x2b7   : > { %vm1596_vm9 = vmor %vm1594_vm8, %vm1595_vm7  ;;  %v789_v54 = vmul.f32 %v5334_v10, %v717_v46  ;;  %v5343_v15 = vpop.eup %4260  ;;  %vm795_vm12 = vweird.f32 %v5334_v10 }
 0x2b8   : > { %v1590_v47 = vmul.f32 %v4257_v2, %v1589_v63  ;;  %v1569_v5 = vmul.f32 %v5343_v15, %v5332_v52  ;;  %vm5363_vm15 = vmor %vm794_vm11, %vm795_vm12  ;;  %vm1575_vm5 = vweird.f32 %v5343_v15  ;;  %vm1432_vm11 = vweird.f32 %v5338_v29 }
 0x2b9   : > { %v790_v51 = vmul.f32 %v5334_v10, %v789_v54  ;;  %vm5390_vm6 = vmor %vm1574_vm3, %vm1575_vm5 }
 0x2ba   : > { %v1591_v50 = vmul.f32 0.5, %v1590_v47  ;;  %v1570_v55 = vmul.f32 %v5343_v15, %v1569_v5 }
 0x2bb   : > { %v791_v42 = vmul.f32 0.5, %v790_v51 }
 0x2bc   : > { %v1592_v44 = vsub.f32 1.5, %v1591_v50  ;;  %v1571_v50 = vmul.f32 0.5, %v1570_v55 }
 0x2bd   : > { %v706_v20 = vpop.xlane.xlu1 %705  ;;  %v792_v6 = vsub.f32 1.5, %v791_v42 }
 0x2be   : > { %v716_v61 = vmax.f32 %v706_v20, 1e-24  ;;  %v1593_v4 = vmul.f32 %v4257_v2, %v1592_v44 }
 0x2bf   : > { %v793_v47 = vmul.f32 %v5334_v10, %v792_v6 }
 0x2c0   : > { %4262 = vrsqrt.f32 %v716_v61  ;;  %v1597_v34 = vsel %vm1596_vm9, %v4257_v2, %v1593_v4  ;;  %vm784_vm13 = vweird.f32 %v716_v61 }
 0x2c1   : > { %v1632_v21 = vmul.f32 %v1597_v34, %v5048_v26  ;;  %4264 = vrsqrt.f32 %v5338_v29 }
 0x2c3   : > { %1735 = vrot.lane.b32.xlu1 %v1632_v21, %s4733_s9 }
 0x2c5   : > { %v1521_v59 = vpop.xlane.xlu1 %1520 }
 0x2c6   : > { %v1541_v33 = vmax.f32 %v1521_v59, 1e-24  ;;  %v4263_v60 = vpop.eup %4262  ;;  %v1572_v59 = vsub.f32 1.5, %v1571_v50 }
 0x2c7   : > { %v779_v48 = vmul.f32 %v4263_v60, %v716_v61  ;;  %v5350_v28 = vpop.eup %4264  ;;  %vm785_vm10 = vweird.f32 %v4263_v60 }
 0x2c8   : > { %4266 = vrsqrt.f32 %v1541_v33  ;;  %v1427_v17 = vmul.f32 %v5350_v28, %v5338_v29  ;;  %vm786_vm14 = vmor %vm784_vm13, %vm785_vm10  ;;  %vm1564_vm2 = vweird.f32 %v1541_v33  ;;  %vm1433_vm8 = vweird.f32 %v5350_v28 }
 0x2c9   : > { %v780_v16 = vmul.f32 %v4263_v60, %v779_v48  ;;  %4268 = vrsqrt.f32 %v5346_v0  ;;  %v797_v48 = vsel %vm5363_vm15, %v5334_v10, %v793_v47  ;;  %vm1434_vm12 = vmor %vm1432_vm11, %vm1433_vm8 }
 0x2ca   : > { %v1428_v20 = vmul.f32 %v5350_v28, %v1427_v17  ;;  %v807_v10 = vmul.f32 %v5120_v3, %v797_v48  ;;  %v4478_v17 = vld [vmem:[#allocation9] sm:$0x7] }
 0x2cb   : > { %v781_v49 = vmul.f32 0.5, %v780_v16 }
 0x2cc   : > { %v1429_v42 = vmul.f32 0.5, %v1428_v20  ;;  %v815_v46 = vmul.f32 %v807_v10, %v5125_v25 }
 0x2cd   : > { %v1362_v53 = vpop.xlane.xlu1 %1361  ;;  %v782_v40 = vsub.f32 1.5, %v781_v49 }
 0x2ce   : > { %v4267_v39 = vpop.eup %4266  ;;  %v5354_v8 = vmax.f32 %v1362_v53, 1e-24 }
 0x2cf   : > { %v1559_v45 = vmul.f32 %v4267_v39, %v1541_v33  ;;  %v783_v13 = vmul.f32 %v4263_v60, %v782_v40  ;;  %v5360_v63 = vpop.eup %4268  ;;  %vm1565_vm1 = vweird.f32 %v4267_v39  ;;  %v1573_v40 = vmul.f32 %v5343_v15, %v1572_v59 }
 0x2d0   : > { %4270 = vrsqrt.f32 %v5354_v8  ;;  %v1579_v61 = vmul.f32 %v5360_v63, %v5346_v0  ;;  %vm1566_vm4 = vmor %vm1564_vm2, %vm1565_vm1  ;;  %vm1412_vm9 = vweird.f32 %v5354_v8  ;;  %vm1585_vm13 = vweird.f32 %v5360_v63 }
 0x2d1   : > { %v1560_v2 = vmul.f32 %v4267_v39, %v1559_v45  ;;  %v787_v44 = vsel %vm786_vm14, %v4263_v60, %v783_v13  ;;  %v5386_v45 = vperm.slane %v4478_v17, 2  ;;  %v1430_v13 = vsub.f32 1.5, %v1429_v42 }
 0x2d2   : > { %v806_v18 = vmul.f32 %v5120_v3, %v787_v44  ;;  %v1580_v49 = vmul.f32 %v5360_v63, %v1579_v61  ;;  %v648_v55 = vpop.f32.mrf.mxu2  ;;  %v1577_v52 = vsel %vm5390_vm6, %v5343_v15, %v1573_v40  ;;  %vm1584_vm14 = vweird.f32 %v5346_v0 }
 0x2d3   : > { %v1561_v4 = vmul.f32 0.5, %v1560_v2  ;;  %v649_v3 = vadd.f32 %v648_v55, %v5386_v45  ;;  %v1630_v15 = vmul.f32 %v1577_v52, %v5000_v7  ;;  %vm1586_vm15 = vmor %vm1584_vm14, %vm1585_vm13 }
 0x2d4   : > { %v814_v21 = vmul.f32 %v806_v18, %v5190_v19 }
 0x2d5   : > { %v1562_v54 = vsub.f32 1.5, %v1561_v4  ;;  %v1365_v34 = vpop.xlane.xlu1 %1364  ;;  %v1431_v4 = vmul.f32 %v5350_v28, %v1430_v13 }
 0x2d6   : > { %v4271_v51 = vpop.eup %4270  ;;  %v5372_v60 = vmax.f32 %v1365_v34, 1e-24  ;;  %3921 = vmatmul.msk.f32.vlgmr.msra.gmra.mxu3 %vm685_vm0, %v814_v21  ;;  %v1185_v34 = vpack.c.bf16 %v649_v3, %v649_v3 }
 0x2d7   : > { %v1407_v5 = vmul.f32 %v4271_v51, %v5354_v8  ;;  %v1563_v16 = vmul.f32 %v4267_v39, %v1562_v54  ;;  %vm1413_vm7 = vweird.f32 %v4271_v51 }
 0x2d8   : > { %4272 = vrsqrt.f32 %v5372_v60  ;;  %vm1414_vm10 = vmor %vm1412_vm9, %vm1413_vm7  ;;  %v1200_v29 = vunpack.c.l.b16 %v1185_v34  ;;  %vm1422_vm2 = vweird.f32 %v5372_v60  ;;  %vm1088_vm7 = vcmask 130048  }
 0x2d9   : > { %v1408_v6 = vmul.f32 %v4271_v51, %v1407_v5  ;;  %v1567_v53 = vsel %vm1566_vm4, %v4267_v39, %v1563_v16  ;;  %v1581_v39 = vmul.f32 0.5, %v1580_v49  ;;  %v1435_v49 = vsel %vm1434_vm12, %v5350_v28, %v1431_v4 }
 0x2da   : > { %v1629_v33 = vmul.f32 %v1567_v53, %v4974_v62  ;;  %v650_v42 = vpop.f32.mrf.mxu2 }
 0x2db   : > { %v1409_v2 = vmul.f32 0.5, %v1408_v6  ;;  %v1582_v21 = vsub.f32 1.5, %v1581_v39  ;;  %v651_v5 = vadd.f32 %v650_v42, %v5386_v45 }
 0x2dc   : > { %1651 = vrot.lane.b32.xlu2 %v1629_v33, %s4733_s9  ;;  %v1472_v33 = vmul.f32 %v5323_v24, %v1435_v49 }
 0x2dd   : > { %v1410_v50 = vsub.f32 1.5, %v1409_v2  ;;  %v1371_v44 = vpop.xlane.xlu1 %1370  ;;  %v1186_v53 = vpack.c.bf16 %v651_v5, %v651_v5  ;;  %v1583_v10 = vmul.f32 %v5360_v63, %v1582_v21 }
 0x2de   : > { %v4273_v20 = vpop.eup %4272  ;;  %v1383_v18 = vmax.f32 %v1371_v44, 1e-24  ;;  %3922 = vmatmul.msk.f32.gmra.mxu3 %vm685_vm0, %v815_v46  ;;  %v1480_v39 = vmul.f32 %v1472_v33, %v5039_v22 }
 0x2df   : > { %v1411_v61 = vmul.f32 %v4271_v51, %v1410_v50  ;;  %v1417_v54 = vmul.f32 %v4273_v20, %v5372_v60  ;;  %v1201_v40 = vunpack.c.l.b16 %v1186_v53  ;;  %vm1423_vm1 = vweird.f32 %v4273_v20 }
 0x2e0   : > { %4274 = vrsqrt.f32 %v1383_v18  ;;  %v1587_v47 = vsel %vm1586_vm15, %v5360_v63, %v1583_v10  ;;  %vm1424_vm3 = vmor %vm1422_vm2, %vm1423_vm1  ;;  %vm1442_vm5 = vweird.f32 %v1383_v18 }
 0x2e1   : > { %v1418_v59 = vmul.f32 %v4273_v20, %v1417_v54  ;;  %v1415_v48 = vsel %vm1414_vm10, %v4271_v51, %v1411_v61  ;;  %v5419_v17 = vpack.c.b16 %v1201_v40, %v1200_v29  ;;  %v1631_v0 = vmul.f32 %v1587_v47, %v5024_v14  ;;  %v977_v29 = vpop.f32.mrf.mxu0  ;;  %v4089_v47 = vld [vmem:[#allocation11] sm:$0xff]  }
 0x2e2   : > { %v1470_v8 = vmul.f32 %v5323_v24, %v1415_v48  ;;  %v653_v3 = vpop.f32.mrf.mxu2 }
 0x2e3   : > { %v1419_v16 = vmul.f32 0.5, %v1418_v59  ;;  %1214 = vmatpush.bf16.msrb.mxu3 %v5419_v17  ;;  %v654_v54 = vadd.f32 %v653_v3, %v5386_v45  ;;  %v1539_v3 = vpop.xlane.xlu0 %1538 }
 0x2e4   : > { %1692 = vrot.lane.b32.xlu2 %v1630_v15, %s4733_s9  ;;  %v1478_v6 = vmul.f32 %v1470_v8, %v5015_v11  ;;  %v1533_v8 = vpop.xlane.xlu2 %1532 }
 0x2e5   : > { %v1420_v51 = vsub.f32 1.5, %v1419_v16  ;;  %v5441_v33 = vmax.f32 %v1533_v8, 1e-24 }
 0x2e6   : > { %v4275_v55 = vpop.eup %4274  ;;  %1686 = vrot.lane.b32.xlu0 %v1478_v6, %s4733_s9 }
 0x2e7   : > { %v1437_v28 = vmul.f32 %v4275_v55, %v1383_v18  ;;  %v1421_v13 = vmul.f32 %v4273_v20, %v1420_v51  ;;  %vm1443_vm4 = vweird.f32 %v4275_v55  ;;  %vm1604_vm12 = vweird.f32 %v5441_v33 }
 0x2e8   : > { %vm1444_vm6 = vmor %vm1442_vm5, %vm1443_vm4 }
 0x2e9   : > { %v1438_v2 = vmul.f32 %v4275_v55, %v1437_v28  ;;  %v1425_v46 = vsel %vm1424_vm3, %v4273_v20, %v1421_v13  ;;  %v1187_v20 = vpack.c.bf16 %v654_v54, %v654_v54 }
 0x2ea   : > { %v1471_v63 = vmul.f32 %v5323_v24, %v1425_v46  ;;  %v655_v61 = vpop.f32.mrf.mxu2  ;;  %v5450_v46 = vmax.f32 %v1539_v3, 1e-24 }
 0x2eb   : > { %v1439_v50 = vmul.f32 0.5, %v1438_v2  ;;  %v656_v18 = vadd.f32 %v655_v61, %v5386_v45  ;;  %v1228_v48 = vunpack.c.l.b16 %v1187_v20 }
 0x2ec   : > { %1729 = vrot.lane.b32.xlu2 %v1480_v39, %s4733_s9  ;;  %v1479_v34 = vmul.f32 %v1471_v63, %v5059_v30  ;;  %v5447_v39 = vunpack.c.h.bf16 %v4089_v47  ;;  %vm1624_vm14 = vweird.f32 %v5450_v46 }
 0x2ed   : > { %v1440_v44 = vsub.f32 1.5, %v1439_v50  ;;  %v1188_v42 = vpack.c.bf16 %v656_v18, %v656_v18 }
 0x2ee   : > { %1694 = vrot.lane.b32.xlu0 %v1631_v0, %s4733_s9 }
 0x2ef   : > { %v1441_v52 = vmul.f32 %v4275_v55, %v1440_v44  ;;  %v1229_v15 = vunpack.c.l.b16 %v1188_v42  ;;  %v980_v44 = vpop.f32.mrf.mxu0 }
 0x2f0   : > { %v5455_v61 = vadd.f32 %v5447_v39, %v980_v44 }
 0x2f1   : > { %v1445_v4 = vsel %vm1444_vm6, %v4275_v55, %v1441_v52  ;;  %v5436_v5 = vpack.c.b16 %v1229_v15, %v1228_v48 }
 0x2f2   : > { %v1473_v60 = vmul.f32 %v5323_v24, %v1445_v4  ;;  %v658_v59 = vpop.f32.mrf.mxu2  ;;  %v1092_v42 = vsel %vm1088_vm7, %v5455_v61, -inf }
 0x2f3   : > { %v659_v16 = vadd.f32 %v658_v59, %v5386_v45  ;;  %1242 = vmatpush.bf16.msra.mxu3 %v5436_v5 }
 0x2f4   : > { %v1481_v21 = vmul.f32 %v1473_v60, %v5092_v41 }
 0x2f5   : > { %v1189_v53 = vpack.c.bf16 %v659_v16, %v659_v16 }
 0x2f6   : > { %1688 = vrot.lane.b32.xlu0 %v1479_v34, %s4733_s9  ;;  %1731 = vrot.lane.b32.xlu1 %v1481_v21, %s4733_s9 }
 0x2f7   : > { %v1256_v10 = vunpack.c.l.b16 %v1189_v53 }
 0x2fa   : > { %v660_v49 = vpop.f32.mrf.mxu2 }
 0x2fb   : > { %v661_v6 = vadd.f32 %v660_v49, %v5386_v45 }
 0x2fd   : > { %v1190_v51 = vpack.c.bf16 %v661_v6, %v661_v6  ;;  %v5466_v6 = vunpack.c.l.bf16 %v4089_v47 }
 0x2ff   : > { %v1257_v55 = vunpack.c.l.b16 %v1190_v51  ;;  %v1536_v50 = vpop.xlane.xlu1 %1535 }
 0x300   : > { %v5452_v52 = vmax.f32 %v1536_v50, 1e-24 }
 0x301   : > { %v5443_v13 = vpack.c.b16 %v1257_v55, %v1256_v10 }
 0x302   : > { %v663_v2 = vpop.f32.mrf.mxu2  ;;  %vm1614_vm3 = vweird.f32 %v5452_v52 }
 0x303   : > { %1270 = vmatpush.bf16.msra.mxu0 %v5443_v13  ;;  %v664_v0 = vadd.f32 %v663_v2, %v5386_v45  ;;  %v5472_v2 = vadd.f32 %v5466_v6, %v977_v29 }
 0x305   : > { %v1191_v60 = vpack.c.bf16 %v664_v0, %v664_v0 }
 0x307   : > { %v1374_v40 = vpop.xlane.xlu2 %1373  ;;  %v1284_v15 = vunpack.c.l.b16 %v1191_v60 }
 0x308   : > { %v1384_v28 = vmax.f32 %v1374_v40, 1e-24 }
 0x30a   : > { %4276 = vrsqrt.f32 %v1384_v28  ;;  %v665_v21 = vpop.f32.mrf.mxu2  ;;  %vm1452_vm9 = vweird.f32 %v1384_v28 }
 0x30b   : > { %4278 = vrsqrt.f32 %v5441_v33  ;;  %v666_v18 = vadd.f32 %v665_v21, %v5386_v45  ;;  %v1089_v21 = vsel %vm1088_vm7, %v5472_v2, -inf }
 0x30c   : > { %4280 = vrsqrt.f32 %v5450_v46 }
 0x30d   : > { %4282 = vrsqrt.f32 %v5452_v52  ;;  %v1192_v8 = vpack.c.bf16 %v666_v18, %v666_v18 }
 0x30f   : > { %v1377_v63 = vpop.xlane.xlu2 %1376  ;;  %v1285_v49 = vunpack.c.l.b16 %v1192_v8 }
 0x310   : > { %v4277_v4 = vpop.eup %4276  ;;  %v5458_v20 = vmax.f32 %v1377_v63, 1e-24 }
 0x311   : > { %v4279_v54 = vpop.eup %4278  ;;  %v1447_v34 = vmul.f32 %v4277_v4, %v1384_v28  ;;  %vm1453_vm8 = vweird.f32 %v4277_v4  ;;  %v5468_v10 = vpack.c.b16 %v1285_v49, %v1284_v15 }
 0x312   : > { %v1599_v48 = vmul.f32 %v4279_v54, %v5441_v33  ;;  %4284 = vrsqrt.f32 %v5458_v20  ;;  %v4281_v45 = vpop.eup %4280  ;;  %vm1454_vm10 = vmor %vm1452_vm9, %vm1453_vm8  ;;  %vm1605_vm11 = vweird.f32 %v4279_v54  ;;  %vm1462_vm6 = vweird.f32 %v5458_v20 }
 0x313   : > { %v1448_v59 = vmul.f32 %v4277_v4, %v1447_v34  ;;  %v4283_v55 = vpop.eup %4282  ;;  %1298 = vmatpush.bf16.msrb.mxu1 %v5468_v10  ;;  %v1619_v3 = vmul.f32 %v4281_v45, %v5450_v46  ;;  %vm1606_vm13 = vmor %vm1604_vm12, %vm1605_vm11  ;;  %vm1625_vm15 = vweird.f32 %v4281_v45 }
 0x314   : > { %v1600_v51 = vmul.f32 %v4279_v54, %v1599_v48  ;;  %v1609_v44 = vmul.f32 %v4283_v55, %v5452_v52  ;;  %vm1626_vm1 = vmor %vm1624_vm14, %vm1625_vm15  ;;  %vm1615_vm2 = vweird.f32 %v4283_v55 }
 0x315   : > { %v1449_v16 = vmul.f32 0.5, %v1448_v59  ;;  %1093 = vmax.xlane.f32.xlu2 %v1092_v42  ;;  %v1620_v34 = vmul.f32 %v4281_v45, %v1619_v3  ;;  %vm1616_vm5 = vmor %vm1614_vm3, %vm1615_vm2 }
 0x316   : > { %v1601_v0 = vmul.f32 0.5, %v1600_v51  ;;  %v1610_v29 = vmul.f32 %v4283_v55, %v1609_v44 }
 0x317   : > { %v1450_v53 = vsub.f32 1.5, %v1449_v16 }
 0x318   : > { %v4285_v47 = vpop.eup %4284  ;;  %v1602_v18 = vsub.f32 1.5, %v1601_v0  ;;  %v1611_v48 = vmul.f32 0.5, %v1610_v29 }
 0x319   : > { %v1451_v40 = vmul.f32 %v4277_v4, %v1450_v53  ;;  %v1457_v28 = vmul.f32 %v4285_v47, %v5458_v20  ;;  %vm1463_vm4 = vweird.f32 %v4285_v47 }
 0x31a   : > { %v1603_v42 = vmul.f32 %v4279_v54, %v1602_v18  ;;  %v1612_v16 = vsub.f32 1.5, %v1611_v48  ;;  %vm1464_vm8 = vmor %vm1462_vm6, %vm1463_vm4 }
 0x31b   : > { %v1455_v50 = vsel %vm1454_vm10, %v4277_v4, %v1451_v40  ;;  %v1621_v4 = vmul.f32 0.5, %v1620_v34  ;;  %v1458_v59 = vmul.f32 %v4285_v47, %v1457_v28 }
 0x31c   : > { %v1474_v63 = vmul.f32 %v5323_v24, %v1455_v50  ;;  %v1607_v49 = vsel %vm1606_vm13, %v4279_v54, %v1603_v42  ;;  %v1613_v3 = vmul.f32 %v4283_v55, %v1612_v16 }
 0x31d   : > { %v1622_v15 = vsub.f32 1.5, %v1621_v4  ;;  %v1459_v8 = vmul.f32 0.5, %v1458_v59  ;;  %v1633_v51 = vmul.f32 %v1607_v49, %v5062_v31  ;;  %v5537_v49 = vpop.permute.xlu1 %1643 }
 0x31e   : > { %v1482_v60 = vmul.f32 %v1474_v63, %v5190_v19  ;;  %v1617_v0 = vsel %vm1616_vm5, %v4283_v55, %v1613_v3 }
 0x31f   : > { %v1460_v53 = vsub.f32 1.5, %v1459_v8  ;;  %v1623_v40 = vmul.f32 %v4281_v45, %v1622_v15  ;;  %v1634_v54 = vmul.f32 %v1617_v0, %v5137_v57 }
 0x320   : > { %1090 = vmax.xlane.f32.xlu0 %v1089_v21  ;;  %1772 = vrot.lane.b32.xlu1 %v1482_v60, %s4733_s9  ;;  %v1650_v60 = vpop.permute.xlu0 %1649 }
 0x321   : > { %v1461_v33 = vmul.f32 %v4285_v47, %v1460_v53  ;;  %v1627_v50 = vsel %vm1626_vm1, %v4281_v45, %v1623_v40  ;;  %v1012_v45 = vpop.f32.mrf.mxu3 }
 0x322   : > { %v1635_v46 = vmul.f32 %v1627_v50, %v5081_v37  ;;  %v5502_v21 = vadd.f32 %v5466_v6, %v1012_v45 }
 0x323   : > { %v1465_v44 = vsel %vm1464_vm8, %v4285_v47, %v1461_v33  ;;  %v2239_v47 = vsel %vm685_vm0, %v5098_v43, 0.0 }
 0x324   : > { %v1475_v52 = vmul.f32 %v5323_v24, %v1465_v44  ;;  %v2236_v24 = vsel %vm685_vm0, %v5083_v38, 0.0  ;;  %v1095_v4 = vsel %vm1088_vm7, %v5502_v21, -inf  ;;  %v6521_v44 = vld [vmem:[#allocation29_spill] sm:$0xff] }
 0x325   : > { %v5543_v40 = vpop.permute.xlu1 %1645 }
 0x326   : > { %v1483_v55 = vmul.f32 %v1475_v52, %v5125_v25 }
 0x328   : > { %2062 = vrot.lane.b32.xlu1 %v5019_v12, %s4734_s20 }
 0x329   : > { %v1015_v20 = vpop.f32.mrf.mxu3 }
 0x32a   : > { %v5512_v59 = vadd.f32 %v5447_v39, %v1015_v20 }
 0x32c   : > { %v1098_v42 = vsel %vm1088_vm7, %v5512_v59, -inf }
 0x32d   : > { %1737 = vrot.lane.b32.xlu2 %v1633_v51, %s4733_s9 }
 0x331   : > { %v1047_v34 = vpop.f32.mrf.mxu3 }
 0x332   : > { %v5515_v43 = vadd.f32 %v5466_v6, %v1047_v34 }
 0x334   : > { %1780 = vrot.lane.b32.xlu0 %v1635_v46, %s4733_s9  ;;  %v1101_v38 = vsel %vm1088_vm7, %v5515_v43, -inf  ;;  %v6520_v46 = vld [vmem:[#allocation31_spill] sm:$0xff] }
 0x335   : > { %1778 = vrot.lane.b32.xlu2 %v1634_v54, %s4733_s9  ;;  %v1736_v50 = vpop.permute.xlu1 %1735 }
 0x336   : > { %v1652_v63 = vpop.permute.xlu2 %1651 }
 0x337   : > { %3928 = vmatpush.xpose.msk.msra.mxu1 %vm685_vm0, %v1652_v63 }
 0x339   : > { %v1050_v28 = vpop.f32.mrf.mxu3 }
 0x33a   : > { %v5555_v63 = vadd.f32 %v5447_v39, %v1050_v28  ;;  %v6523_v28 = vld [vmem:[#allocation30_spill] sm:$0xff] }
 0x33b   : > { %3929 = vmatpush.xpose.msk.msra.mxu1 %vm685_vm0, %v1650_v60 }
 0x33c   : > { %1774 = vrot.lane.b32.xlu0 %v1483_v55, %s4733_s9  ;;  %v1104_v45 = vsel %vm1088_vm7, %v5555_v63, -inf  ;;  %v6522_v55 = vld [vmem:[#allocation34_spill] sm:$0xff] }
 0x33e   : > { %v5523_v15 = vpop.permute.xlu2 %1692 }
 0x352   : > { %2240 = vadd.xlane.f32.xlu1 %v2239_v47 }
 0x358   : > { %v5525_v8 = vpop.permute.xlu0 %1686 }
 0x359   : > { %v1082_v18 = vpop.f32.mrf.mxu3 }
 0x35a   : > { %2237 = vadd.xlane.f32.xlu1 %v2236_v24  ;;  %v5507_v29 = vadd.f32 %v5466_v6, %v1082_v18  ;;  %v5533_v6 = vpop.permute.xlu2 %1729  ;;  %v2082_v24 = vsel %vm685_vm0, %v6523_v28, 0.0 }
 0x35c   : > { %v1107_v48 = vsel %vm1088_vm7, %v5507_v29, -inf }
 0x35e   : > { %1096 = vmax.xlane.f32.xlu2 %v1095_v4  ;;  %v6524_v4 = vld [vmem:[#allocation32_spill] sm:$0xff] }
 0x360   : > { %v5535_v16 = vpop.permute.xlu0 %1694 }
 0x361   : > { %v1085_v60 = vpop.f32.mrf.mxu3 }
 0x362   : > { %1108 = vmax.xlane.f32.xlu1 %v1107_v48  ;;  %v5566_v20 = vadd.f32 %v5447_v39, %v1085_v60  ;;  %v2085_v48 = vsel %vm685_vm0, %v6524_v4, 0.0 }
 0x364   : > { %v1110_v34 = vsel %vm1088_vm7, %v5566_v20, -inf }
 0x366   : > { %1102 = vmax.xlane.f32.xlu2 %v1101_v38  ;;  %1099 = vmax.xlane.f32.xlu0 %v1098_v42 }
 0x368   : > { %v5541_v51 = vpop.permute.xlu0 %1688  ;;  %v5579_v38 = vpop.permute.xlu1 %1731 }
 0x37a   : > { %2220 = vrot.lane.b32.xlu0 %v5052_v27, %s4734_s20 }
 0x37b   : > { %2072 = vrot.lane.b32.xlu1 %v5132_v35, %s4734_s20 }
 0x37e   : > { %2216 = vrot.lane.b32.xlu2 %v5006_v9, %s4734_s20 }
 0x386   : > { %2066 = vrot.lane.b32.xlu2 %v5043_v23, %s4734_s20 }
 0x388   : > { %v1094_v53 = vpop.xlane.xlu2 %1093 }
 0x389   : > { %v1114_v47 = vsub.f32 %v5455_v61, %v1094_v53 }
 0x38b   : > { %v1123_v18 = vmul.f32 1.442695, %v1114_v47 }
 0x38e   : > { %2064 = vrot.lane.b32.xlu2 %v5066_v32, %s4734_s20 }
 0x390   : > { %v1738_v3 = vpop.permute.xlu2 %1737 }
 0x391   : > { %3936 = vmatpush.xpose.msk.msrb.mxu0 %vm685_vm0, %v1738_v3 }
 0x392   : > { %v5585_v61 = vpop.permute.xlu1 %1772 }
 0x393   : > { %v1091_v33 = vpop.xlane.xlu0 %1090 }
 0x394   : > { %v1113_v0 = vsub.f32 %v5472_v2, %v1091_v33 }
 0x395   : > { %3937 = vmatpush.xpose.msk.msrb.mxu0 %vm685_vm0, %v1736_v50 }
 0x396   : > { %2068 = vrot.lane.b32.xlu2 %v6520_v46, %s4734_s20  ;;  %v1121_v54 = vmul.f32 1.442695, %v1113_v0 }
 0x398   : > { %4286 = vpow2.f32 %v1121_v54  ;;  %v5587_v53 = vpop.permute.xlu2 %1778 }
 0x399   : > { %4288 = vpow2.f32 %v1123_v18 }
 0x39a   : > { %v2063_v54 = vpop.permute.xlu1 %2062 }
 0x39b   : > { %v2088_v60 = vsel %vm685_vm0, %v2063_v54, 0.0 }
 0x39e   : > { %2226 = vrot.lane.b32.xlu2 %v6521_v44, %s4734_s20  ;;  %v5557_v52 = vpop.eup %4286 }
 0x39f   : > { %v1137_v2 = vsel %vm1088_vm7, %v5557_v52, 0.0  ;;  %v5577_v39 = vpop.eup %4288 }
 0x3a0   : > { %v1140_v42 = vsel %vm1088_vm7, %v5577_v39, 0.0 }
 0x3a4   : > { %1105 = vmax.xlane.f32.xlu0 %v1104_v45 }
 0x3a5   : > { %1138 = vadd.xlane.f32.xlu1 %v1137_v2 }
 0x3a6   : > { %2224 = vrot.lane.b32.xlu2 %v6522_v55, %s4734_s20  ;;  %v5583_v3 = vpop.permute.xlu0 %1780 }
 0x3ac   : > { %1111 = vmax.xlane.f32.xlu0 %v1110_v34 }
 0x3ae   : > { %2070 = vrot.lane.b32.xlu2 %v5198_v36, %s4734_s20  ;;  %v5589_v33 = vpop.permute.xlu0 %1774 }
 0x3b4   : > { %2083 = vadd.xlane.f32.xlu0 %v2082_v24 }
 0x3bc   : > { %2086 = vadd.xlane.f32.xlu0 %v2085_v48 }
 0x3c4   : > { %1141 = vadd.xlane.f32.xlu0 %v1140_v42 }
 0x3d1   : > { %v1097_v50 = vpop.xlane.xlu2 %1096 }
 0x3d2   : > { %v1115_v0 = vsub.f32 %v5502_v21, %v1097_v50 }
 0x3d4   : > { %v1125_v45 = vmul.f32 1.442695, %v1115_v0 }
 0x3d6   : > { %4290 = vpow2.f32 %v1125_v45 }
 0x3d7   : > { %2089 = vadd.xlane.f32.xlu2 %v2088_v60  ;;  %v5612_v60 = vpop.xlane.xlu1 %2240 }
 0x3d9   : > { %v1103_v2 = vpop.xlane.xlu2 %1102  ;;  %v1100_v34 = vpop.xlane.xlu0 %1099 }
 0x3da   : > { %v1117_v47 = vsub.f32 %v5515_v43, %v1103_v2  ;;  %v1116_v28 = vsub.f32 %v5512_v59, %v1100_v34 }
 0x3dc   : > { %v5595_v24 = vpop.eup %4290  ;;  %v1129_v18 = vmul.f32 1.442695, %v1117_v47  ;;  %v1127_v4 = vmul.f32 1.442695, %v1116_v28 }
 0x3dd   : > { %v1143_v48 = vsel %vm1088_vm7, %v5595_v24, 0.0 }
 0x3de   : > { %4292 = vpow2.f32 %v1129_v18  ;;  %1144 = vadd.xlane.f32.xlu0 %v1143_v48 }
 0x3df   : > { %4294 = vpow2.f32 %v1127_v4  ;;  %v2238_v28 = vpop.xlane.xlu1 %2237 }
 0x3e0   : > { %v2260_v18 = vmax.f32 %v2238_v28, 1e-24 }
 0x3e1   : > { %v5599_v21 = vpop.permute.xlu2 %2216 }
 0x3e2   : > { %4296 = vrsqrt.f32 %v2260_v18  ;;  %vm2274_vm10 = vweird.f32 %v2260_v18 }
 0x3e4   : > { %v5601_v42 = vpop.eup %4292 }
 0x3e5   : > { %v5603_v50 = vpop.eup %4294  ;;  %v1149_v43 = vsel %vm1088_vm7, %v5601_v42, 0.0 }
 0x3e6   : > { %1150 = vadd.xlane.f32.xlu0 %v1149_v43  ;;  %v1146_v59 = vsel %vm1088_vm7, %v5603_v50, 0.0 }
 0x3e7   : > { %1147 = vadd.xlane.f32.xlu1 %v1146_v59  ;;  %v1109_v36 = vpop.xlane.xlu1 %1108 }
 0x3e8   : > { %v4297_v43 = vpop.eup %4296 }
 0x3e9   : > { %v2067_v0 = vpop.permute.xlu2 %2066  ;;  %vm2275_vm9 = vweird.f32 %v4297_v43 }
 0x3ea   : > { %v2094_v54 = vsel %vm685_vm0, %v2067_v0, 0.0  ;;  %v2269_v0 = vmul.f32 %v4297_v43, %v2260_v18  ;;  %vm2276_vm11 = vmor %vm2274_vm10, %vm2275_vm9  ;;  %vm668_vm10 = vcmask 1043712  }
 0x3eb   : > { %2095 = vadd.xlane.f32.xlu2 %v2094_v54 }
 0x3ec   : > { %v5618_v59 = vpop.permute.xlu0 %2220  ;;  %v2270_v54 = vmul.f32 %v4297_v43, %v2269_v0 }
 0x3f1   : > { %v5610_v45 = vpop.permute.xlu2 %2064 }
 0x3f9   : > { %v2069_v2 = vpop.permute.xlu2 %2068 }
 0x3fa   : > { %v2097_v34 = vsel %vm685_vm0, %v2069_v2, 0.0  ;;  %v2271_v2 = vmul.f32 0.5, %v2270_v54 }
 0x3fb   : > { %2098 = vadd.xlane.f32.xlu2 %v2097_v34  ;;  %v1119_v34 = vsub.f32 %v5507_v29, %v1109_v36  ;;  %v2073_v36 = vpop.permute.xlu1 %2072 }
 0x3fc   : > { %v2272_v28 = vsub.f32 1.5, %v2271_v2 }
 0x3fd   : > { %v1133_v35 = vmul.f32 1.442695, %v1119_v34  ;;  %v2242_v34 = vsel %vm685_vm0, %v5599_v21, 0.0 }
 0x3fe   : > { %v2273_v12 = vmul.f32 %v4297_v43, %v2272_v28  ;;  %v6525_v28 = vld [vmem:[#allocation36_spill] sm:$0xff] }
 0x401   : > { %v5615_v47 = vpop.permute.xlu2 %2226 }
 0x409   : > { %v2225_v4 = vpop.permute.xlu2 %2224 }
 0x40a   : > { %v2254_v48 = vsel %vm685_vm0, %v2225_v4, 0.0 }
 0x40b   : > { %2255 = vadd.xlane.f32.xlu2 %v2254_v48 }
 0x417   : > { %v1106_v55 = vpop.xlane.xlu0 %1105 }
 0x418   : > { %v1118_v32 = vsub.f32 %v5555_v63, %v1106_v55 }
 0x41a   : > { %v1131_v44 = vmul.f32 1.442695, %v1118_v32  ;;  %v2277_v32 = vsel %vm2276_vm11, %v4297_v43, %v2273_v12  ;;  %v1139_v12 = vpop.xlane.xlu1 %1138 }
 0x41c   : > { %4298 = vpow2.f32 %v1131_v44 }
 0x41d   : > { %4300 = vpow2.f32 %v1133_v35  ;;  %v2348_v35 = vmul.f32 %v2277_v32, %v4957_v58 }
 0x41f   : > { %v1112_v46 = vpop.xlane.xlu0 %1111 }
 0x420   : > { %v1120_v4 = vsub.f32 %v5566_v20, %v1112_v46 }
 0x422   : > { %v5623_v48 = vpop.eup %4298  ;;  %v1135_v9 = vmul.f32 1.442695, %v1120_v4  ;;  %v2245_v4 = vsel %vm685_vm0, %v6525_v28, 0.0 }
 0x423   : > { %1914 = vrot.lane.b32.xlu2 %v5419_v17, %s4733_s9  ;;  %v1152_v63 = vsel %vm1088_vm7, %v5623_v48, 0.0  ;;  %v5629_v46 = vpop.eup %4300 }
 0x424   : > { %4302 = vpow2.f32 %v1135_v9  ;;  %1153 = vadd.xlane.f32.xlu1 %v1152_v63  ;;  %v1155_v20 = vsel %vm1088_vm7, %v5629_v46, 0.0 }
 0x427   : > { %v2084_v29 = vpop.xlane.xlu0 %2083 }
 0x428   : > { %v2106_v44 = vmax.f32 %v2084_v29, 1e-24 }
 0x42a   : > { %v5632_v55 = vpop.eup %4302  ;;  %4304 = vrsqrt.f32 %v2106_v44  ;;  %vm2120_vm13 = vweird.f32 %v2106_v44 }
 0x42b   : > { %2369 = vrot.lane.b32.xlu2 %v2348_v35, %s4734_s20  ;;  %v1158_v9 = vsel %vm1088_vm7, %v5632_v55, 0.0  ;;  %4306 = vrcp.f32 %v1139_v12  ;;  %v2103_v12 = vsel %vm685_vm0, %v2073_v36, 0.0 }
 0x42c   : > { %1156 = vadd.xlane.f32.xlu1 %v1155_v20  ;;  %1159 = vadd.xlane.f32.xlu0 %v1158_v9  ;;  %v5645_v9 = vstv %s3948_s29  ;;  %s3649_s29 = sshll.u32 %s377_s16, 4  ;;  %s3650_s29 = int_to_ptr.vmem [resolvable:$true] %s3649_s29 }
 0x42f   : > { %v2087_v18 = vpop.xlane.xlu0 %2086 }
 0x430   : > { %v4305_v43 = vpop.eup %4304  ;;  %v2107_v2 = vmax.f32 %v2087_v18, 1e-24  ;;  %v6526_v18 = vld [vmem:[#allocation35_spill] sm:$0xff] }
 0x431   : > { %v2115_v0 = vmul.f32 %v4305_v43, %v2106_v44  ;;  %vm2121_vm12 = vweird.f32 %v4305_v43  ;;  %v4307_v35 = vpop.eup %4306 }
 0x432   : > { %4308 = vrsqrt.f32 %v2107_v2  ;;  %vm2122_vm14 = vmor %vm2120_vm13, %vm2121_vm12  ;;  %v1169_v21 = vmul.f32 %v4307_v35, %v5557_v52  ;;  %vm2130_vm1 = vweird.f32 %v2107_v2 }
 0x433   : > { %v2116_v54 = vmul.f32 %v4305_v43, %v2115_v0  ;;  %1964 = vrot.lane.b32.xlu2 %v5443_v13, %s4733_s9  ;;  %v2251_v0 = vsel %vm685_vm0, %v6526_v18, 0.0 }
 0x434   : > { %2243 = vadd.xlane.f32.xlu1 %v2242_v34  ;;  %2246 = vadd.xlane.f32.xlu0 %v2245_v4  ;;  %v1177_v44 = vpack.c.bf16 %v1169_v21, %v1169_v21  ;;  %v2091_v21 = vsel %vm685_vm0, %v5610_v45, 0.0 }
 0x435   : > { %v2117_v63 = vmul.f32 0.5, %v2116_v54 }
 0x436   : > { %v1195_v36 = vunpack.c.l.b16 %v1177_v44 }
 0x437   : > { %v2118_v32 = vsub.f32 1.5, %v2117_v63  ;;  %v1142_v29 = vpop.xlane.xlu0 %1141 }
 0x438   : > { %4310 = vrcp.f32 %v1142_v29  ;;  %v4309_v28 = vpop.eup %4308 }
 0x439   : > { %v2119_v20 = vmul.f32 %v4305_v43, %v2118_v32  ;;  %v2125_v29 = vmul.f32 %v4309_v28, %v2107_v2  ;;  %vm2131_vm15 = vweird.f32 %v4309_v28 }
 0x43a   : > { %vm2132_vm2 = vmor %vm2130_vm1, %vm2131_vm15 }
 0x43b   : > { %v2123_v34 = vsel %vm2122_vm14, %v4305_v43, %v2119_v20  ;;  %v2248_v43 = vsel %vm685_vm0, %v5618_v59, 0.0  ;;  %v2126_v20 = vmul.f32 %v4309_v28, %v2125_v29  ;;  %v2071_v59 = vpop.permute.xlu2 %2070 }
 0x43c   : > { %2104 = vadd.xlane.f32.xlu1 %v2103_v12  ;;  %2252 = vadd.xlane.f32.xlu0 %v2251_v0  ;;  %v2196_v54 = vmul.f32 %v5645_v9, %v2123_v34  ;;  %v2100_v29 = vsel %vm685_vm0, %v2071_v59, 0.0 }
 0x43d   : > { %v2127_v18 = vmul.f32 0.5, %v2126_v20 }
 0x43e   : > { %v4311_v4 = vpop.eup %4310  ;;  %v2204_v63 = vmul.f32 %v2196_v54, %v4954_v56 }
 0x43f   : > { %v1170_v32 = vmul.f32 %v4311_v4, %v5577_v39  ;;  %v2261_v39 = vmax.f32 %v5612_v60, 1e-24  ;;  %v2128_v0 = vsub.f32 1.5, %v2127_v18 }
 0x440   : > { %2363 = vrot.lane.b32.xlu2 %v2204_v63, %s4734_s20 }
 0x441   : > { %v1178_v52 = vpack.c.bf16 %v1170_v32, %v1170_v32  ;;  %4312 = vrsqrt.f32 %v2261_v39  ;;  %v2129_v34 = vmul.f32 %v4309_v28, %v2128_v0  ;;  %vm2284_vm4 = vweird.f32 %v2261_v39 }
 0x443   : > { %v1196_v35 = vunpack.c.l.b16 %v1178_v52  ;;  %v2133_v60 = vsel %vm2132_vm2, %v4309_v28, %v2129_v34 }
 0x444   : > { %2249 = vadd.xlane.f32.xlu0 %v2248_v43  ;;  %v2197_v63 = vmul.f32 %v5645_v9, %v2133_v60 }
 0x445   : > { %v1197_v12 = vpack.c.b16 %v1196_v35, %v1195_v36 }
 0x447   : > { %3923 = vmatmul.msk.bf16.vlgmr.msrb.gmra.mxu3 %vm1088_vm7, %v1197_v12  ;;  %v4313_v4 = vpop.eup %4312 }
 0x448   : > { %3932 = vmatpush.xpose.msk.msrb.mxu3 %vm685_vm0, %v5535_v16  ;;  %v2257_v16 = vsel %vm685_vm0, %v5615_v47, 0.0  ;;  %v2205_v47 = vmul.f32 %v2197_v63, %v4985_v1  ;;  %vm2285_vm3 = vweird.f32 %v4313_v4 }
 0x449   : > { %vm2286_vm5 = vmor %vm2284_vm4, %vm2285_vm3 }
 0x44a   : > { %v5669_v45 = vpop.xlane.xlu2 %2089 }
 0x44c   : > { %3933 = vmatpush.xpose.msk.msrb.mxu3 %vm685_vm0, %v5523_v15  ;;  %2092 = vadd.xlane.f32.xlu0 %v2091_v21  ;;  %v2279_v15 = vmul.f32 %v4313_v4, %v2261_v39 }
 0x44e   : > { %v2280_v2 = vmul.f32 %v4313_v4, %v2279_v15 }
 0x450   : > { %v2281_v36 = vmul.f32 0.5, %v2280_v2 }
 0x451   : > { %v1145_v54 = vpop.xlane.xlu0 %1144 }
 0x452   : > { %4314 = vrcp.f32 %v1145_v54  ;;  %v2282_v18 = vsub.f32 1.5, %v2281_v36 }
 0x454   : > { %2258 = vadd.xlane.f32.xlu0 %v2257_v16  ;;  %v2283_v54 = vmul.f32 %v4313_v4, %v2282_v18 }
 0x455   : > { %1939 = vrot.lane.b32.xlu1 %v5436_v5, %s4733_s9 }
 0x458   : > { %v4315_v32 = vpop.eup %4314 }
 0x459   : > { %v1171_v28 = vmul.f32 %v4315_v32, %v5595_v24  ;;  %v2287_v24 = vsel %vm2286_vm5, %v4313_v4, %v2283_v54 }
 0x45a   : > { %v1148_v44 = vpop.xlane.xlu1 %1147 }
 0x45b   : > { %4316 = vrcp.f32 %v1148_v44  ;;  %v1179_v20 = vpack.c.bf16 %v1171_v28, %v1171_v28 }
 0x45c   : > { %2101 = vadd.xlane.f32.xlu0 %v2100_v29 }
 0x45d   : > { %2365 = vrot.lane.b32.xlu1 %v2205_v47, %s4734_s20  ;;  %v1223_v0 = vunpack.c.l.b16 %v1179_v20 }
 0x45e   : > { %v2096_v52 = vpop.xlane.xlu2 %2095 }
 0x45f   : > { %v2110_v35 = vmax.f32 %v2096_v52, 1e-24  ;;  %v1151_v52 = vpop.xlane.xlu0 %1150 }
 0x461   : > { %v4317_v43 = vpop.eup %4316  ;;  %4318 = vrsqrt.f32 %v2110_v35  ;;  %vm2160_vm8 = vweird.f32 %v2110_v35 }
 0x462   : > { %v1172_v12 = vmul.f32 %v4317_v43, %v5603_v50  ;;  %v2349_v50 = vmul.f32 %v2287_v24, %v4974_v62  ;;  %4320 = vrcp.f32 %v1151_v52 }
 0x464   : > { %v1180_v21 = vpack.c.bf16 %v1172_v12, %v1172_v12 }
 0x466   : > { %v1224_v34 = vunpack.c.l.b16 %v1180_v21 }
 0x467   : > { %v4319_v59 = vpop.eup %4318 }
 0x468   : > { %v1225_v16 = vpack.c.b16 %v1224_v34, %v1223_v0  ;;  %v2155_v60 = vmul.f32 %v4319_v59, %v2110_v35  ;;  %vm2161_vm6 = vweird.f32 %v4319_v59  ;;  %v4321_v35 = vpop.eup %4320 }
 0x469   : > { %vm2162_vm9 = vmor %vm2160_vm8, %vm2161_vm6  ;;  %v1173_v43 = vmul.f32 %v4321_v35, %v5601_v42 }
 0x46a   : > { %v2156_v15 = vmul.f32 %v4319_v59, %v2155_v60  ;;  %3924 = vmatmul.msk.bf16.vlgmr.msra.gmra.mxu3 %vm1088_vm7, %v1225_v16 }
 0x46b   : > { %v1181_v18 = vpack.c.bf16 %v1173_v43, %v1173_v43 }
 0x46c   : > { %v2157_v63 = vmul.f32 0.5, %v2156_v15 }
 0x46e   : > { %v2158_v44 = vsub.f32 1.5, %v2157_v63  ;;  %v2099_v47 = vpop.xlane.xlu2 %2098 }
 0x470   : > { %v2159_v32 = vmul.f32 %v4319_v59, %v2158_v44  ;;  %2371 = vrot.lane.b32.xlu0 %v2349_v50, %s4734_s20 }
 0x472   : > { %v2163_v2 = vsel %vm2162_vm9, %v4319_v59, %v2159_v32 }
 0x473   : > { %v2200_v29 = vmul.f32 %v5645_v9, %v2163_v2  ;;  %v5698_v2 = vmax.f32 %v2099_v47, 1e-24 }
 0x475   : > { %v2208_v39 = vmul.f32 %v2200_v29, %v5039_v22 }
 0x477   : > { %2449 = vrot.lane.b32.xlu2 %v2208_v39, %s4734_s20 }
 0x47a   : > { %3934 = vmatmul.msk.f32.vlgmr.msrb.gmra.mxu3 %vm685_vm0, %v5525_v8 }
 0x47e   : > { %v5685_v4 = vpop.xlane.xlu2 %2255 }
 0x482   : > { %3935 = vmatmul.msk.f32.gmra.mxu3 %vm685_vm0, %v5541_v51  ;;  %v1251_v51 = vunpack.c.l.b16 %v1181_v18 }
 0x486   : > { %v1915_v28 = vpop.permute.xlu2 %1914 }
 0x487   : > { %1927 = vmatpush.bf16.msrb.mxu2 %v1915_v28 }
 0x48e   : > { %v5690_v20 = vpop.permute.xlu2 %2369 }
 0x496   : > { %v1965_v60 = vpop.permute.xlu2 %1964 }
 0x497   : > { %v1154_v36 = vpop.xlane.xlu1 %1153 }
 0x498   : > { %4322 = vrcp.f32 %v1154_v36 }
 0x49e   : > { %v4323_v12 = vpop.eup %4322 }
 0x49f   : > { %v1174_v8 = vmul.f32 %v4323_v12, %v5623_v48  ;;  %v1157_v21 = vpop.xlane.xlu1 %1156  ;;  %v1160_v0 = vpop.xlane.xlu0 %1159 }
 0x4a0   : > { %4324 = vrcp.f32 %v1157_v21 }
 0x4a1   : > { %v1182_v34 = vpack.c.bf16 %v1174_v8, %v1174_v8  ;;  %4326 = vrcp.f32 %v1160_v0  ;;  %v5717_v8 = vmax.f32 %v5669_v45, 1e-24 }
 0x4a3   : > { %v1252_v59 = vunpack.c.l.b16 %v1182_v34 }
 0x4a5   : > { %v1253_v54 = vpack.c.b16 %v1252_v59, %v1251_v51 }
 0x4a6   : > { %v4325_v16 = vpop.eup %4324 }
 0x4a7   : > { %v4327_v15 = vpop.eup %4326  ;;  %v1175_v24 = vmul.f32 %v4325_v16, %v5629_v46  ;;  %v2244_v42 = vpop.xlane.xlu1 %2243  ;;  %3925 = vmatmul.msk.bf16.vlgmr.msra.gmra.mxu0 %vm1088_vm7, %v1253_v54 }
 0x4a8   : > { %v2247_v63 = vpop.xlane.xlu0 %2246  ;;  %v1176_v44 = vmul.f32 %v4327_v15, %v5632_v55  ;;  %1977 = vmatpush.bf16.msra.mxu0 %v1965_v60  ;;  %v5696_v32 = vmax.f32 %v2244_v42, 1e-24  ;;  %v4735_v55 = vmov 0  }
 0x4a9   : > { %v2263_v48 = vmax.f32 %v2247_v63, 1e-24  ;;  %v1183_v50 = vpack.c.bf16 %v1175_v24, %v1175_v24  ;;  %669 = vst.msk [vmem:[#allocation2] sm:$0xf] %vm668_vm10, %v4735_v55 }
 0x4aa   : > { %v1184_v29 = vpack.c.bf16 %v1176_v44, %v1176_v44  ;;  %670 = vst.msk [vmem:[#allocation2 + $0x4] sm:$0xf] %vm668_vm10, %v4735_v55  ;;  %vm2294_vm9 = vweird.f32 %v5696_v32 }
 0x4ab   : > { %4328 = vrsqrt.f32 %v2263_v48  ;;  %v1279_v39 = vunpack.c.l.b16 %v1183_v50  ;;  %671 = vst.msk [vmem:[#allocation2 + $0x8] sm:$0xf] %vm668_vm10, %v4735_v55  ;;  %vm2304_vm12 = vweird.f32 %v2263_v48 }
 0x4ac   : > { %v1280_v28 = vunpack.c.l.b16 %v1184_v29  ;;  %4330 = vrsqrt.f32 %v5696_v32  ;;  %672 = vst.msk [vmem:[#allocation2 + $0xc] sm:$0xf] %vm668_vm10, %v4735_v55 }
 0x4ad   : > { %4332 = vrsqrt.f32 %v5698_v2  ;;  %673 = vst.msk [vmem:[#allocation2 + $0x10] sm:$0xf] %vm668_vm10, %v4735_v55 }
 0x4ae   : > { %v1281_v46 = vpack.c.b16 %v1280_v28, %v1279_v39  ;;  %674 = vst.msk [vmem:[#allocation2 + $0x14] sm:$0xf] %vm668_vm10, %v4735_v55 }
 0x4af   : > { %v2105_v52 = vpop.xlane.xlu1 %2104  ;;  %675 = vst.msk [vmem:[#allocation2 + $0x18] sm:$0xf] %vm668_vm10, %v4735_v55 }
 0x4b0   : > { %v2253_v36 = vpop.xlane.xlu0 %2252  ;;  %v5703_v35 = vmax.f32 %v2105_v52, 1e-24  ;;  %3926 = vmatmul.msk.bf16.vlgmr.msrb.gmra.mxu1 %vm1088_vm7, %v1281_v46  ;;  %676 = vst.msk [vmem:[#allocation2 + $0x1c] sm:$0xf] %vm668_vm10, %v4735_v55 }
 0x4b1   : > { %v5706_v47 = vmax.f32 %v2253_v36, 1e-24  ;;  %v4329_v43 = vpop.eup %4328  ;;  %3940 = vmatpush.xpose.msk.msrb.mxu1 %vm685_vm0, %v5583_v3 }
 0x4b2   : > { %v2299_v12 = vmul.f32 %v4329_v43, %v2263_v48  ;;  %4334 = vrsqrt.f32 %v5703_v35  ;;  %v5714_v18 = vpop.eup %4330  ;;  %vm2305_vm11 = vweird.f32 %v4329_v43  ;;  %vm2190_vm1 = vweird.f32 %v5703_v35 }
 0x4b3   : > { %4336 = vrsqrt.f32 %v5706_v47  ;;  %v5721_v21 = vpop.eup %4332  ;;  %v2289_v3 = vmul.f32 %v5714_v18, %v5696_v32  ;;  %vm2306_vm13 = vmor %vm2304_vm12, %vm2305_vm11  ;;  %vm2324_vm3 = vweird.f32 %v5706_v47  ;;  %vm2295_vm5 = vweird.f32 %v5714_v18 }
 0x4b4   : > { %v2300_v0 = vmul.f32 %v4329_v43, %v2299_v12  ;;  %4338 = vrsqrt.f32 %v5717_v8  ;;  %v2165_v45 = vmul.f32 %v5721_v21, %v5698_v2  ;;  %vm2171_vm8 = vweird.f32 %v5721_v21  ;;  %vm5788_vm11 = vmor %vm2294_vm9, %vm2295_vm5 }
 0x4b5   : > { %3941 = vmatpush.xpose.msk.msrb.mxu1 %vm685_vm0, %v5587_v53  ;;  %v5736_v53 = vmax.f32 %v5685_v4, 1e-24  ;;  %v2290_v24 = vmul.f32 %v5714_v18, %v2289_v3 }
 0x4b6   : > { %v2301_v34 = vmul.f32 0.5, %v2300_v0  ;;  %v2166_v4 = vmul.f32 %v5721_v21, %v2165_v45 }
 0x4b7   : > { %3938 = vmatmul.msk.f32.vlgmr.msrb.gmra.mxu0 %vm685_vm0, %v5533_v6  ;;  %v2291_v28 = vmul.f32 0.5, %v2290_v24  ;;  %vm2334_vm5 = vweird.f32 %v5736_v53 }
 0x4b8   : > { %v2250_v51 = vpop.xlane.xlu0 %2249  ;;  %v4335_v59 = vpop.eup %4334  ;;  %v2302_v54 = vsub.f32 1.5, %v2301_v34  ;;  %v2167_v12 = vmul.f32 0.5, %v2166_v4 }
 0x4b9   : > { %v5738_v16 = vmax.f32 %v2250_v51, 1e-24  ;;  %v4337_v60 = vpop.eup %4336  ;;  %v2185_v15 = vmul.f32 %v4335_v59, %v5703_v35  ;;  %vm2191_vm14 = vweird.f32 %v4335_v59 }
 0x4ba   : > { %v2319_v42 = vmul.f32 %v4337_v60, %v5706_v47  ;;  %v2303_v6 = vmul.f32 %v4329_v43, %v2302_v54  ;;  %v5746_v29 = vpop.eup %4338  ;;  %vm2325_vm15 = vweird.f32 %v4337_v60  ;;  %vm2192_vm2 = vmor %vm2190_vm1, %vm2191_vm14  ;;  %v2168_v24 = vsub.f32 1.5, %v2167_v12 }
 0x4bb   : > { %4340 = vrsqrt.f32 %v5738_v16  ;;  %v2186_v63 = vmul.f32 %v4335_v59, %v2185_v15  ;;  %v2135_v3 = vmul.f32 %v5746_v29, %v5717_v8  ;;  %vm2326_vm4 = vmor %vm2324_vm3, %vm2325_vm15  ;;  %vm2314_vm10 = vweird.f32 %v5738_v16 }
 0x4bc   : > { %4342 = vrsqrt.f32 %v5736_v53  ;;  %v2320_v44 = vmul.f32 %v4337_v60, %v2319_v42  ;;  %v2307_v50 = vsel %vm2306_vm13, %v4329_v43, %v2303_v6  ;;  %vm1313_vm13 = vcmask 60416  }
 0x4bd   : > { %v2187_v48 = vmul.f32 0.5, %v2186_v63  ;;  %v2351_v39 = vmul.f32 %v2307_v50, %v5024_v14  ;;  %vm2170_vm14 = vweird.f32 %v5698_v2  ;;  %vm2141_vm1 = vweird.f32 %v5746_v29 }
 0x4be   : > { %v2321_v46 = vmul.f32 0.5, %v2320_v44  ;;  %v2136_v44 = vmul.f32 %v5746_v29, %v2135_v3  ;;  %vm5801_vm15 = vmor %vm2170_vm14, %vm2171_vm8 }
 0x4bf   : > { %v2188_v52 = vsub.f32 1.5, %v2187_v48  ;;  %2414 = vrot.lane.b32.xlu1 %v2351_v39, %s4734_s20  ;;  %3939 = vmatmul.msk.f32.gmra.mxu0 %vm685_vm0, %v5579_v38  ;;  %v2292_v38 = vsub.f32 1.5, %v2291_v28  ;;  %v2169_v39 = vmul.f32 %v5721_v21, %v2168_v24 }
 0x4c0   : > { %v2093_v36 = vpop.xlane.xlu0 %2092  ;;  %v2322_v0 = vsub.f32 1.5, %v2321_v46  ;;  %3930 = vmatmul.msk.f32.vlgmr.msra.gmra.mxu1 %vm685_vm0, %v5537_v49  ;;  %v2137_v32 = vmul.f32 0.5, %v2136_v44 }
 0x4c1   : > { %v4341_v55 = vpop.eup %4340  ;;  %v5754_v43 = vmax.f32 %v2093_v36, 1e-24  ;;  %v2189_v34 = vmul.f32 %v4335_v59, %v2188_v52  ;;  %v2293_v50 = vmul.f32 %v5714_v18, %v2292_v38 }
 0x4c2   : > { %v2309_v45 = vmul.f32 %v4341_v55, %v5738_v16  ;;  %v5760_v51 = vpop.eup %4342  ;;  %v2323_v49 = vmul.f32 %v4337_v60, %v2322_v0  ;;  %vm2315_vm6 = vweird.f32 %v4341_v55  ;;  %v2138_v2 = vsub.f32 1.5, %v2137_v32 }
 0x4c3   : > { %4344 = vrsqrt.f32 %v5754_v43  ;;  %v2193_v15 = vsel %vm2192_vm2, %v4335_v59, %v2189_v34  ;;  %v2329_v35 = vmul.f32 %v5760_v51, %v5736_v53  ;;  %v2297_v3 = vsel %vm5788_vm11, %v5714_v18, %v2293_v50  ;;  %vm2316_vm12 = vmor %vm2314_vm10, %vm2315_vm6 }
 0x4c4   : > { %v2310_v54 = vmul.f32 %v4341_v55, %v2309_v45  ;;  %v2327_v42 = vsel %vm2326_vm4, %v4337_v60, %v2323_v49  ;;  %v2203_v6 = vmul.f32 %v5645_v9, %v2193_v15  ;;  %v2350_v18 = vmul.f32 %v2297_v3, %v5000_v7 }
 0x4c5   : > { %v2353_v4 = vmul.f32 %v2327_v42, %v5062_v31  ;;  %v2330_v46 = vmul.f32 %v5760_v51, %v2329_v35  ;;  %v6531_v42 = vld [vmem:[#allocation20_spill] sm:$0xff]  ;;  %v2139_v35 = vmul.f32 %v5746_v29, %v2138_v2  ;;  %vm2140_vm2 = vweird.f32 %v5717_v8 }
 0x4c6   : > { %v2311_v63 = vmul.f32 0.5, %v2310_v54  ;;  %v2211_v47 = vmul.f32 %v2203_v6, %v5125_v25  ;;  %v2173_v54 = vsel %vm5801_vm15, %v5721_v21, %v2169_v39  ;;  %vm2142_vm3 = vmor %vm2140_vm2, %vm2141_vm1  ;;  %vm2335_vm4 = vweird.f32 %v5760_v51 }
 0x4c7   : > { %2457 = vrot.lane.b32.xlu1 %v2353_v4, %s4734_s20  ;;  %v1940_v28 = vpop.permute.xlu1 %1939  ;;  %v2331_v49 = vmul.f32 0.5, %v2330_v46  ;;  %v2201_v21 = vmul.f32 %v5645_v9, %v2173_v54  ;;  %v2143_v39 = vsel %vm2142_vm3, %v5746_v29, %v2139_v35  ;;  %vm2336_vm6 = vmor %vm2334_vm5, %vm2335_vm4  ;;  %vm2150_vm9 = vweird.f32 %v5754_v43  ;;  %v6534_v35 = vld [vmem:[#allocation21_spill] sm:$0xff] }
 0x4c8   : > { %v2312_v48 = vsub.f32 1.5, %v2311_v63  ;;  %v2259_v59 = vpop.xlane.xlu0 %2258  ;;  %3931 = vmatmul.msk.f32.gmra.mxu1 %vm685_vm0, %v5543_v40  ;;  %2494 = vrot.lane.b32.xlu2 %v2211_v47, %s4734_s20 }
 0x4c9   : > { %v5774_v60 = vpop.eup %4344  ;;  %v5784_v52 = vmax.f32 %v2259_v59, 1e-24  ;;  %1952 = vmatpush.bf16.msra.mxu3 %v1940_v28  ;;  %v2332_v6 = vsub.f32 1.5, %v2331_v49  ;;  %v2198_v28 = vmul.f32 %v5645_v9, %v2143_v39 }
 0x4ca   : > { %v2313_v12 = vmul.f32 %v4341_v55, %v2312_v48  ;;  %v2145_v40 = vmul.f32 %v5774_v60, %v5754_v43  ;;  %v1216_v0 = vpop.f32.mrf.mxu3  ;;  %vm2151_vm8 = vweird.f32 %v5774_v60 }
 0x4cb   : > { %v1305_v16 = vpack.c.bf16 %v1216_v0, %v1216_v0  ;;  %4346 = vrsqrt.f32 %v5784_v52  ;;  %v2333_v50 = vmul.f32 %v5760_v51, %v2332_v6  ;;  %vm2152_vm10 = vmor %vm2150_vm9, %vm2151_vm8  ;;  %v2206_v32 = vmul.f32 %v2198_v28, %v5015_v11 }
 0x4cc   : > { %v2317_v34 = vsel %vm2316_vm12, %v4341_v55, %v2313_v12  ;;  %v2146_v55 = vmul.f32 %v5774_v60, %v2145_v40  ;;  %vm2344_vm12 = vweird.f32 %v5784_v52 }
 0x4cd   : > { %v2352_v38 = vmul.f32 %v2317_v34, %v5048_v26  ;;  %1314 = vst.msk [vmem:[#allocation2] sm:$0xf] %vm1313_vm13, %v1305_v16  ;;  %v2337_v46 = vsel %vm2336_vm6, %v5760_v51, %v2333_v50 }
 0x4ce   : > { %v2147_v63 = vmul.f32 0.5, %v2146_v55  ;;  %v2354_v53 = vmul.f32 %v2337_v46, %v5137_v57 }
 0x4cf   : > { %2455 = vrot.lane.b32.xlu0 %v2352_v38, %s4734_s20  ;;  %2412 = vrot.lane.b32.xlu1 %v2350_v18, %s4734_s20  ;;  %v6532_v38 = vld [vmem:[#allocation22_spill] sm:$0xff]  ;;  %v5876_v28 = vpop.permute.xlu1 %2365 }
 0x4d0   : > { %v2102_v15 = vpop.xlane.xlu0 %2101  ;;  %3942 = vmatmul.msk.f32.vlgmr.msrb.gmra.mxu1 %vm685_vm0, %v5585_v61  ;;  %2778 = vrot.lane.b32.xlu2 %v6531_v42, %s4736_s22  ;;  %v2209_v61 = vmul.f32 %v2201_v21, %v5092_v41  ;;  %v2148_v48 = vsub.f32 1.5, %v2147_v63  ;;  %v4093_v63 = vld [vmem:[#allocation11 + $0x8] sm:$0xff]  }
 0x4d1   : > { %v2112_v24 = vmax.f32 %v2102_v15, 1e-24  ;;  %v4347_v44 = vpop.eup %4346  ;;  %v6533_v15 = vld [vmem:[#allocation28_spill] sm:$0xff]  ;;  %v4094_v50 = vunpack.c.l.bf16 %v4093_v63 }
 0x4d2   : > { %v1218_v4 = vpop.f32.mrf.mxu3  ;;  %v2339_v59 = vmul.f32 %v4347_v44, %v5784_v52  ;;  %v2149_v36 = vmul.f32 %v5774_v60, %v2148_v48  ;;  %vm2345_vm11 = vweird.f32 %v4347_v44 }
 0x4d3   : > { %4348 = vrsqrt.f32 %v2112_v24  ;;  %v1306_v47 = vpack.c.bf16 %v1218_v4, %v1218_v4  ;;  %vm2346_vm14 = vmor %vm2344_vm12, %vm2345_vm11  ;;  %vm2180_vm1 = vweird.f32 %v2112_v24  ;;  %v4095_v4 = vunpack.c.h.bf16 %v4093_v63 }
 0x4d4   : > { %v2340_v12 = vmul.f32 %v4347_v44, %v2339_v59 }
 0x4d5   : > { %1315 = vst.msk [vmem:[#allocation2 + $0x4] sm:$0xf] %vm1313_vm13, %v1306_v47 }
 0x4d6   : > { %v2341_v40 = vmul.f32 0.5, %v2340_v12 }
 0x4d7   : > { %2451 = vrot.lane.b32.xlu0 %v2209_v61, %s4734_s20  ;;  %1989 = vrot.lane.b32.xlu1 %v5468_v10, %s4733_s9  ;;  %v6535_v61 = vld [vmem:[#allocation23_spill] sm:$0xff]  ;;  %s4087_s9 = sshll.u32 %s4805_s8, 6 }
 0x4d8   : > { %3943 = vmatmul.msk.f32.gmra.mxu1 %vm685_vm0, %v5589_v33  ;;  %v2153_v33 = vsel %vm2152_vm10, %v5774_v60, %v2149_v36  ;;  %v2342_v3 = vsub.f32 1.5, %v2341_v40  ;;  %s3648_s19 = scalar_lea.hbm %s6458_s7, %s4087_s9 }
 0x4d9   : > { %v4349_v8 = vpop.eup %4348  ;;  %v2199_v51 = vmul.f32 %v5645_v9, %v2153_v33 }
 0x4da   : > { %v2175_v29 = vmul.f32 %v4349_v8, %v2112_v24  ;;  %v2343_v49 = vmul.f32 %v4347_v44, %v2342_v3  ;;  %vm2181_vm15 = vweird.f32 %v4349_v8 }
 0x4db   : > { %v2207_v43 = vmul.f32 %v2199_v51, %v5059_v30  ;;  %vm2182_vm2 = vmor %vm2180_vm1, %vm2181_vm15 }
 0x4dc   : > { %v2176_v0 = vmul.f32 %v4349_v8, %v2175_v29  ;;  %v2347_v18 = vsel %vm2346_vm14, %v4347_v44, %v2343_v49 }
 0x4dd   : > { %v2355_v2 = vmul.f32 %v2347_v18, %v5081_v37 }
 0x4de   : > { %v2177_v16 = vmul.f32 0.5, %v2176_v0 }
 0x4df   : > { %2498 = vrot.lane.b32.xlu0 %v2354_v53, %s4734_s20  ;;  %2406 = vrot.lane.b32.xlu1 %v2206_v32, %s4734_s20 }
 0x4e0   : > { %v2178_v45 = vsub.f32 1.5, %v2177_v16 }
 0x4e2   : > { %v2372_v34 = vpop.permute.xlu0 %2371  ;;  %v2179_v60 = vmul.f32 %v4349_v8, %v2178_v45 }
 0x4e3   : > { %3949 = vmatpush.xpose.msk.msra.mxu2 %vm685_vm0, %v2372_v34 }
 0x4e4   : > { %v2183_v42 = vsel %vm2182_vm2, %v4349_v8, %v2179_v60 }
 0x4e7   : > { %2934 = vrot.lane.b32.xlu0 %v6532_v38, %s4736_s22  ;;  %2408 = vrot.lane.b32.xlu1 %v2207_v43, %s4734_s20 }
 0x4e8   : > { %3950 = vmatpush.xpose.msk.msra.mxu2 %vm685_vm0, %v5690_v20  ;;  %v2202_v20 = vmul.f32 %v5645_v9, %v2183_v42 }
 0x4ea   : > { %v2210_v21 = vmul.f32 %v2202_v20, %v5190_v19 }
 0x4ed   : > { %v1244_v54 = vpop.f32.mrf.mxu3 }
 0x4ee   : > { %v1307_v55 = vpack.c.bf16 %v1244_v54, %v1244_v54 }
 0x4ef   : > { %2942 = vrot.lane.b32.xlu0 %v6533_v15, %s4736_s22  ;;  %2500 = vrot.lane.b32.xlu1 %v2355_v2, %s4734_s20 }
 0x4f0   : > { %1316 = vst.msk [vmem:[#allocation2 + $0x8] sm:$0xf] %vm1313_vm13, %v1307_v55 }
 0x4f5   : > { %v1246_v52 = vpop.f32.mrf.mxu3 }
 0x4f6   : > { %v1308_v6 = vpack.c.bf16 %v1246_v52, %v1246_v52 }
 0x4f7   : > { %2492 = vrot.lane.b32.xlu1 %v2210_v21, %s4734_s20 }
 0x4f8   : > { %1317 = vst.msk [vmem:[#allocation2 + $0xc] sm:$0xf] %vm1313_vm13, %v1308_v6 }
 0x4fd   : > { %v1721_v24 = vpop.f32.mrf.mxu3 }
 0x4fe   : > { %v5871_v48 = vadd.f32 %v4094_v50, %v1721_v24 }
 0x4ff   : > { %2932 = vrot.lane.b32.xlu1 %v6534_v35, %s4736_s22 }
 0x500   : > { %v1819_v59 = vsel %vm1088_vm7, %v5871_v48, -inf }
 0x505   : > { %v1724_v44 = vpop.f32.mrf.mxu3 }
 0x506   : > { %v5865_v47 = vadd.f32 %v4095_v4, %v1724_v44  ;;  %v5913_v44 = vpop.permute.xlu2 %2363 }
 0x507   : > { %2780 = vrot.lane.b32.xlu1 %v6535_v61, %s4736_s22 }
 0x508   : > { %v1822_v9 = vsel %vm1088_vm7, %v5865_v47, -inf }
 0x509   : > { %1823 = vmax.xlane.f32.xlu2 %v1822_v9 }
 0x519   : > { %1820 = vmax.xlane.f32.xlu0 %v1819_v59 }
 0x524   : > { %v1272_v39 = vpop.f32.mrf.mxu0 }
 0x525   : > { %v1309_v8 = vpack.c.bf16 %v1272_v39, %v1272_v39 }
 0x527   : > { %1318 = vst.msk [vmem:[#allocation2 + $0x10] sm:$0xf] %vm1313_vm13, %v1309_v8 }
 0x52c   : > { %v1274_v46 = vpop.f32.mrf.mxu0 }
 0x52d   : > { %v1310_v36 = vpack.c.bf16 %v1274_v46, %v1274_v46  ;;  %v1300_v12 = vpop.f32.mrf.mxu1 }
 0x52e   : > { %v1311_v29 = vpack.c.bf16 %v1300_v12, %v1300_v12 }
 0x52f   : > { %1319 = vst.msk [vmem:[#allocation2 + $0x14] sm:$0xf] %vm1313_vm13, %v1310_v36 }
 0x530   : > { %1320 = vst.msk [vmem:[#allocation2 + $0x18] sm:$0xf] %vm1313_vm13, %v1311_v29 }
 0x531   : > { %v2415_v53 = vpop.permute.xlu1 %2414 }
 0x532   : > { %3953 = vmatpush.xpose.msk.msrb.mxu3 %vm685_vm0, %v2415_v53 }
 0x534   : > { %v1764_v32 = vpop.f32.mrf.mxu0 }
 0x535   : > { %v1302_v40 = vpop.f32.mrf.mxu1  ;;  %v5881_v0 = vadd.f32 %v4094_v50, %v1764_v32 }
 0x536   : > { %v1312_v33 = vpack.c.bf16 %v1302_v40, %v1302_v40 }
 0x537   : > { %v1825_v51 = vsel %vm1088_vm7, %v5881_v0, -inf }
 0x538   : > { %1826 = vmax.xlane.f32.xlu1 %v1825_v51  ;;  %1321 = vst.msk [vmem:[#allocation2 + $0x1c] sm:$0xf] %vm1313_vm13, %v1312_v33 }
 0x539   : > { %v2458_v3 = vpop.permute.xlu1 %2457 }
 0x53a   : > { %3957 = vmatpush.xpose.msk.msrb.mxu0 %vm685_vm0, %v2458_v3 }
 0x53c   : > { %v1767_v16 = vpop.f32.mrf.mxu0 }
 0x53d   : > { %v1678_v34 = vpop.f32.mrf.mxu1  ;;  %v5887_v43 = vadd.f32 %v4095_v4, %v1767_v16 }
 0x53e   : > { %v5889_v45 = vadd.f32 %v4094_v50, %v1678_v34 }
 0x53f   : > { %v1828_v38 = vsel %vm1088_vm7, %v5887_v43, -inf }
 0x540   : > { %1829 = vmax.xlane.f32.xlu0 %v1828_v38  ;;  %v1813_v49 = vsel %vm1088_vm7, %v5889_v45, -inf }
 0x541   : > { %v2456_v60 = vpop.permute.xlu0 %2455  ;;  %v2413_v18 = vpop.permute.xlu1 %2412  ;;  %1814 = vmax.xlane.f32.xlu1 %v1813_v49 }
 0x542   : > { %3958 = vmatpush.xpose.msk.msrb.mxu0 %vm685_vm0, %v2456_v60  ;;  %3954 = vmatpush.xpose.msk.msrb.mxu3 %vm685_vm0, %v2413_v18 }
 0x545   : > { %v1681_v54 = vpop.f32.mrf.mxu1 }
 0x546   : > { %v5897_v2 = vadd.f32 %v4095_v4, %v1681_v54 }
 0x548   : > { %v1816_v55 = vsel %vm1088_vm7, %v5897_v2, -inf }
 0x549   : > { %v1990_v15 = vpop.permute.xlu1 %1989  ;;  %1817 = vmax.xlane.f32.xlu0 %v1816_v55  ;;  %v5915_v61 = vpop.permute.xlu0 %2451 }
 0x54a   : > { %2002 = vmatpush.bf16.msra.mxu1 %v1990_v15 }
 0x54d   : > { %v1807_v42 = vpop.f32.mrf.mxu1 }
 0x54e   : > { %v5901_v20 = vadd.f32 %v4094_v50, %v1807_v42  ;;  %v5917_v50 = vpop.permute.xlu2 %2449 }
 0x550   : > { %v1831_v52 = vsel %vm1088_vm7, %v5901_v20, -inf }
 0x551   : > { %1832 = vmax.xlane.f32.xlu2 %v1831_v52  ;;  %v5905_v21 = vpop.permute.xlu1 %2406  ;;  %v2499_v59 = vpop.permute.xlu0 %2498 }
 0x555   : > { %v1810_v6 = vpop.f32.mrf.mxu1 }
 0x556   : > { %v5907_v24 = vadd.f32 %v4095_v4, %v1810_v6  ;;  %v5921_v4 = vpop.permute.xlu2 %2494 }
 0x558   : > { %v1834_v35 = vsel %vm1088_vm7, %v5907_v24, -inf }
 0x559   : > { %1835 = vmax.xlane.f32.xlu0 %v1834_v35  ;;  %v5911_v63 = vpop.permute.xlu1 %2408  ;;  %v5925_v8 = vpop.permute.xlu0 %2934 }
 0x55e   : > { %v5923_v39 = vpop.permute.xlu2 %2778 }
 0x561   : > { %v2501_v9 = vpop.permute.xlu1 %2500  ;;  %v5928_v29 = vpop.permute.xlu0 %2942 }
 0x562   : > { %3961 = vmatpush.xpose.msk.msrb.mxu1 %vm685_vm0, %v2501_v9 }
 0x566   : > { %3962 = vmatpush.xpose.msk.msrb.mxu1 %vm685_vm0, %v2499_v59 }
 0x569   : > { %v5935_v3 = vpop.permute.xlu1 %2492 }
 0x571   : > { %v2933_v34 = vpop.permute.xlu1 %2932 }
 0x579   : > { %v5941_v38 = vpop.permute.xlu1 %2780 }
 0x57c   : > { %v1824_v46 = vpop.xlane.xlu2 %1823 }
 0x57d   : > { %v1840_v36 = vsub.f32 %v5865_v47, %v1824_v46 }
 0x57f   : > { %v1851_v12 = vmul.f32 1.442695, %v1840_v36 }
 0x581   : > { %4350 = vpow2.f32 %v1851_v12 }
 0x587   : > { %v5930_v53 = vpop.eup %4350 }
 0x588   : > { %v1870_v32 = vsel %vm1088_vm7, %v5930_v53, 0.0 }
 0x589   : > { %1871 = vadd.xlane.f32.xlu1 %v1870_v32 }
 0x58c   : > { %v1821_v40 = vpop.xlane.xlu0 %1820 }
 0x58d   : > { %v1839_v33 = vsub.f32 %v5871_v48, %v1821_v40 }
 0x58f   : > { %v1849_v51 = vmul.f32 1.442695, %v1839_v33 }
 0x591   : > { %4352 = vpow2.f32 %v1849_v51 }
 0x597   : > { %v5937_v16 = vpop.eup %4352 }
 0x598   : > { %v1867_v47 = vsel %vm1088_vm7, %v5937_v16, 0.0 }
 0x599   : > { %1868 = vadd.xlane.f32.xlu0 %v1867_v47 }
 0x5ab   : > { %v1827_v49 = vpop.xlane.xlu1 %1826 }
 0x5ac   : > { %v1841_v60 = vsub.f32 %v5881_v0, %v1827_v49 }
 0x5ae   : > { %v1853_v18 = vmul.f32 1.442695, %v1841_v60 }
 0x5b0   : > { %4354 = vpow2.f32 %v1853_v18 }
 0x5b3   : > { %v1830_v54 = vpop.xlane.xlu0 %1829 }
 0x5b4   : > { %v1815_v48 = vpop.xlane.xlu1 %1814  ;;  %v1842_v55 = vsub.f32 %v5887_v43, %v1830_v54 }
 0x5b5   : > { %v1837_v15 = vsub.f32 %v5889_v45, %v1815_v48  ;;  %v6536_v45 = vld [vmem:[#allocation26_spill] sm:$0xff]  ;;  %v2802_v48 = vsel %vm685_vm0, %v5923_v39, 0.0 }
 0x5b6   : > { %v5946_v42 = vpop.eup %4354  ;;  %v1855_v52 = vmul.f32 1.442695, %v1842_v55 }
 0x5b7   : > { %v1845_v6 = vmul.f32 1.442695, %v1837_v15  ;;  %v1873_v35 = vsel %vm1088_vm7, %v5946_v42, 0.0 }
 0x5b8   : > { %4356 = vpow2.f32 %v1855_v52  ;;  %1874 = vadd.xlane.f32.xlu0 %v1873_v35  ;;  %v2971_v35 = vsel %vm685_vm0, %v5928_v29, 0.0  ;;  %v6540_v29 = vld [vmem:[#allocation33_spill] sm:$0xff] }
 0x5b9   : > { %4358 = vpow2.f32 %v1845_v6 }
 0x5bc   : > { %v1818_v46 = vpop.xlane.xlu0 %1817 }
 0x5bd   : > { %v1838_v36 = vsub.f32 %v5897_v2, %v1818_v46 }
 0x5be   : > { %v5950_v9 = vpop.eup %4356 }
 0x5bf   : > { %v5952_v0 = vpop.eup %4358  ;;  %v1876_v59 = vsel %vm1088_vm7, %v5950_v9, 0.0  ;;  %v1847_v12 = vmul.f32 1.442695, %v1838_v36 }
 0x5c0   : > { %v1861_v43 = vsel %vm1088_vm7, %v5952_v0, 0.0  ;;  %1877 = vadd.xlane.f32.xlu1 %v1876_v59  ;;  %v6537_v59 = vld [vmem:[#allocation25_spill] sm:$0xff] }
 0x5c1   : > { %1862 = vadd.xlane.f32.xlu2 %v1861_v43  ;;  %4360 = vpow2.f32 %v1847_v12  ;;  %v6538_v12 = vld [vmem:[#allocation24_spill] sm:$0xff] }
 0x5c4   : > { %v1833_v32 = vpop.xlane.xlu2 %1832 }
 0x5c5   : > { %v1843_v40 = vsub.f32 %v5901_v20, %v1833_v32  ;;  %v6541_v32 = vld [vmem:[#allocation29_spill] sm:$0xff] }
 0x5c7   : > { %v1857_v51 = vmul.f32 1.442695, %v1843_v40  ;;  %v5967_v49 = vpop.eup %4360 }
 0x5c8   : > { %v1864_v60 = vsel %vm1088_vm7, %v5967_v49, 0.0 }
 0x5c9   : > { %4362 = vpow2.f32 %v1857_v51 }
 0x5cc   : > { %2940 = vrot.lane.b32.xlu0 %v5052_v27, %s4736_s22  ;;  %v1836_v33 = vpop.xlane.xlu0 %1835 }
 0x5cd   : > { %v1844_v47 = vsub.f32 %v5907_v24, %v1836_v33  ;;  %v2956_v24 = vsel %vm685_vm0, %v2933_v34, 0.0  ;;  %v6543_v33 = vld [vmem:[#allocation34_spill] sm:$0xff] }
 0x5cf   : > { %v1859_v27 = vmul.f32 1.442695, %v1844_v47 }
 0x5d1   : > { %4364 = vpow2.f32 %v1859_v27 }
 0x5d9   : > { %2938 = vrot.lane.b32.xlu2 %v6536_v45, %s4736_s22  ;;  %2786 = vrot.lane.b32.xlu1 %v5043_v23, %s4736_s22  ;;  %v5971_v23 = vpop.eup %4362 }
 0x5da   : > { %v1879_v2 = vsel %vm1088_vm7, %v5971_v23, 0.0  ;;  %v5975_v18 = vpop.eup %4364 }
 0x5db   : > { %v1882_v20 = vsel %vm1088_vm7, %v5975_v18, 0.0 }
 0x5f6   : > { %1865 = vadd.xlane.f32.xlu0 %v1864_v60 }
 0x5fc   : > { %v1872_v54 = vpop.xlane.xlu1 %1871 }
 0x5fd   : > { %4366 = vrcp.f32 %v1872_v54 }
 0x5fe   : > { %1880 = vadd.xlane.f32.xlu0 %v1879_v2 }
 0x602   : > { %1883 = vadd.xlane.f32.xlu2 %v1882_v20  ;;  %v6544_v20 = vld [vmem:[#allocation37_spill] sm:$0xff] }
 0x603   : > { %2957 = vadd.xlane.f32.xlu1 %v2956_v24  ;;  %v4367_v15 = vpop.eup %4366 }
 0x604   : > { %v1896_v52 = vmul.f32 %v4367_v15, %v5930_v53  ;;  %v6539_v53 = vld [vmem:[#allocation31_spill] sm:$0xff] }
 0x606   : > { %v1904_v34 = vpack.c.bf16 %v1896_v52, %v1896_v52 }
 0x608   : > { %v1937_v46 = vunpack.c.l.b16 %v1904_v34 }
 0x60b   : > { %2803 = vadd.xlane.f32.xlu1 %v2802_v48 }
 0x60c   : > { %v1869_v55 = vpop.xlane.xlu0 %1868 }
 0x60d   : > { %4368 = vrcp.f32 %v1869_v55 }
 0x612   : > { %2782 = vrot.lane.b32.xlu0 %v6537_v59, %s4736_s22 }
 0x613   : > { %v4369_v6 = vpop.eup %4368  ;;  %2972 = vadd.xlane.f32.xlu1 %v2971_v35  ;;  %v2959_v35 = vsel %vm685_vm0, %v5925_v8, 0.0 }
 0x614   : > { %v1895_v43 = vmul.f32 %v4369_v6, %v5937_v16  ;;  %v6542_v16 = vld [vmem:[#allocation27_spill] sm:$0xff] }
 0x616   : > { %v1903_v45 = vpack.c.bf16 %v1895_v43, %v1895_v43  ;;  %v2805_v43 = vsel %vm685_vm0, %v5941_v38, 0.0 }
 0x618   : > { %v1936_v39 = vunpack.c.l.b16 %v1903_v45 }
 0x61a   : > { %v1938_v36 = vpack.c.b16 %v1937_v46, %v1936_v39  ;;  %2936 = vrot.lane.b32.xlu2 %v6538_v12, %s4736_s22  ;;  %2788 = vrot.lane.b32.xlu0 %v6539_v53, %s4736_s22 }
 0x61c   : > { %3945 = vmatmul.msk.bf16.vlgmr.msra.gmra.mxu3 %vm1088_vm7, %v1938_v36 }
 0x622   : > { %2792 = vrot.lane.b32.xlu2 %v6540_v29, %s4736_s22  ;;  %2946 = vrot.lane.b32.xlu0 %v6541_v32, %s4736_s22 }
 0x62a   : > { %2784 = vrot.lane.b32.xlu0 %v6542_v16, %s4736_s22 }
 0x62b   : > { %v1875_v40 = vpop.xlane.xlu0 %1874 }
 0x62c   : > { %3955 = vmatmul.msk.f32.vlgmr.msrb.gmra.mxu3 %vm685_vm0, %v5905_v21  ;;  %4370 = vrcp.f32 %v1875_v40 }
 0x632   : > { %2944 = vrot.lane.b32.xlu0 %v6543_v33, %s4736_s22  ;;  %v4371_v47 = vpop.eup %4370 }
 0x633   : > { %v1878_v51 = vpop.xlane.xlu1 %1877  ;;  %v1897_v60 = vmul.f32 %v4371_v47, %v5946_v42 }
 0x634   : > { %3956 = vmatmul.msk.f32.gmra.mxu3 %vm685_vm0, %v5911_v63  ;;  %v1863_v27 = vpop.xlane.xlu2 %1862  ;;  %4372 = vrcp.f32 %v1878_v51 }
 0x635   : > { %v1905_v24 = vpack.c.bf16 %v1897_v60, %v1897_v60  ;;  %4374 = vrcp.f32 %v1863_v27 }
 0x637   : > { %v1961_v15 = vunpack.c.l.b16 %v1905_v24 }
 0x63a   : > { %v4373_v2 = vpop.eup %4372  ;;  %2790 = vrot.lane.b32.xlu0 %v6544_v20, %s4736_s22 }
 0x63b   : > { %v1898_v21 = vmul.f32 %v4373_v2, %v5950_v9  ;;  %v4375_v34 = vpop.eup %4374 }
 0x63c   : > { %v2939_v54 = vpop.permute.xlu2 %2938  ;;  %v1893_v45 = vmul.f32 %v4375_v34, %v5952_v0 }
 0x63d   : > { %v1906_v48 = vpack.c.bf16 %v1898_v21, %v1898_v21  ;;  %v2965_v55 = vsel %vm685_vm0, %v2939_v54, 0.0 }
 0x63e   : > { %2966 = vadd.xlane.f32.xlu1 %v2965_v55  ;;  %v2941_v9 = vpop.permute.xlu0 %2940 }
 0x63f   : > { %v1962_v52 = vunpack.c.l.b16 %v1906_v48  ;;  %v2968_v36 = vsel %vm685_vm0, %v2941_v9, 0.0 }
 0x641   : > { %v1963_v63 = vpack.c.b16 %v1962_v52, %v1961_v15 }
 0x643   : > { %3946 = vmatmul.msk.bf16.vlgmr.msra.gmra.mxu0 %vm1088_vm7, %v1963_v63 }
 0x64b   : > { %v2787_v6 = vpop.permute.xlu1 %2786 }
 0x64c   : > { %v2814_v42 = vsel %vm685_vm0, %v2787_v6, 0.0 }
 0x64d   : > { %2815 = vadd.xlane.f32.xlu1 %v2814_v42 }
 0x653   : > { %3959 = vmatmul.msk.f32.vlgmr.msrb.gmra.mxu0 %vm685_vm0, %v5917_v50  ;;  %v1901_v50 = vpack.c.bf16 %v1893_v45, %v1893_v45 }
 0x655   : > { %v1911_v12 = vunpack.c.l.b16 %v1901_v50 }
 0x65b   : > { %3960 = vmatmul.msk.f32.gmra.mxu0 %vm685_vm0, %v5915_v61 }
 0x664   : > { %2960 = vadd.xlane.f32.xlu0 %v2959_v35 }
 0x669   : > { %v1866_v59 = vpop.xlane.xlu0 %1865 }
 0x66a   : > { %4376 = vrcp.f32 %v1866_v59 }
 0x66c   : > { %2806 = vadd.xlane.f32.xlu0 %v2805_v43 }
 0x670   : > { %v4377_v46 = vpop.eup %4376 }
 0x671   : > { %v1894_v39 = vmul.f32 %v4377_v46, %v5967_v49  ;;  %v1881_v61 = vpop.xlane.xlu0 %1880 }
 0x672   : > { %4378 = vrcp.f32 %v1881_v61 }
 0x673   : > { %v1902_v8 = vpack.c.bf16 %v1894_v39, %v1894_v39 }
 0x674   : > { %2969 = vadd.xlane.f32.xlu0 %v2968_v36 }
 0x675   : > { %v1912_v53 = vunpack.c.l.b16 %v1902_v8  ;;  %v1884_v29 = vpop.xlane.xlu2 %1883 }
 0x676   : > { %4380 = vrcp.f32 %v1884_v29  ;;  %v2958_v54 = vpop.xlane.xlu1 %2957 }
 0x677   : > { %v1913_v32 = vpack.c.b16 %v1912_v53, %v1911_v12  ;;  %v2980_v36 = vmax.f32 %v2958_v54, 1e-24 }
 0x678   : > { %v4379_v16 = vpop.eup %4378 }
 0x679   : > { %v1899_v38 = vmul.f32 %v4379_v16, %v5971_v23  ;;  %3944 = vmatmul.msk.bf16.vlgmr.msrb.gmra.mxu2 %vm1088_vm7, %v1913_v32  ;;  %vm2994_vm14 = vweird.f32 %v2980_v36 }
 0x67b   : > { %v1907_v40 = vpack.c.bf16 %v1899_v38, %v1899_v38 }
 0x67c   : > { %v4381_v0 = vpop.eup %4380 }
 0x67d   : > { %v1900_v49 = vmul.f32 %v4381_v0, %v5975_v18  ;;  %v2937_v33 = vpop.permute.xlu2 %2936  ;;  %v1986_v27 = vunpack.c.l.b16 %v1907_v40 }
 0x67e   : > { %v2962_v51 = vsel %vm685_vm0, %v2937_v33, 0.0  ;;  %v2804_v15 = vpop.xlane.xlu1 %2803 }
 0x67f   : > { %v1908_v47 = vpack.c.bf16 %v1900_v49, %v1900_v49  ;;  %2963 = vadd.xlane.f32.xlu0 %v2962_v51  ;;  %v2826_v53 = vmax.f32 %v2804_v15, 1e-24 }
 0x681   : > { %v1987_v60 = vunpack.c.l.b16 %v1908_v47  ;;  %vm2840_vm2 = vweird.f32 %v2826_v53 }
 0x683   : > { %v1988_v2 = vpack.c.b16 %v1987_v60, %v1986_v27 }
 0x684   : > { %v2783_v20 = vpop.permute.xlu0 %2782 }
 0x685   : > { %3947 = vmatmul.msk.bf16.vlgmr.msra.gmra.mxu1 %vm1088_vm7, %v1988_v2  ;;  %v2808_v24 = vsel %vm685_vm0, %v2783_v20, 0.0  ;;  %v2793_v9 = vpop.permute.xlu2 %2792 }
 0x686   : > { %2809 = vadd.xlane.f32.xlu1 %v2808_v24 }
 0x689   : > { %3951 = vmatmul.msk.f32.vlgmr.msra.gmra.mxu2 %vm685_vm0, %v5913_v44 }
 0x68c   : > { %v2789_v23 = vpop.permute.xlu0 %2788 }
 0x68d   : > { %v2817_v18 = vsel %vm685_vm0, %v2789_v23, 0.0 }
 0x68e   : > { %2818 = vadd.xlane.f32.xlu0 %v2817_v18 }
 0x691   : > { %3952 = vmatmul.msk.f32.gmra.mxu2 %vm685_vm0, %v5876_v28  ;;  %v2973_v28 = vpop.xlane.xlu1 %2972 }
 0x692   : > { %v2985_v60 = vmax.f32 %v2973_v28, 1e-24 }
 0x694   : > { %v2947_v21 = vpop.permute.xlu0 %2946 }
 0x695   : > { %3963 = vmatmul.msk.f32.vlgmr.msrb.gmra.mxu1 %vm685_vm0, %v5935_v3  ;;  %v2977_v48 = vsel %vm685_vm0, %v2947_v21, 0.0 }
 0x696   : > { %2978 = vadd.xlane.f32.xlu1 %v2977_v48 }
 0x69c   : > { %v2785_v55 = vpop.permute.xlu0 %2784 }
 0x69d   : > { %3964 = vmatmul.msk.f32.gmra.mxu1 %vm685_vm0, %v5921_v4  ;;  %v2811_v44 = vsel %vm685_vm0, %v2785_v55, 0.0  ;;  %v2823_v4 = vsel %vm685_vm0, %v2793_v9, 0.0 }
 0x69e   : > { %2812 = vadd.xlane.f32.xlu0 %v2811_v44 }
 0x6a4   : > { %v2945_v52 = vpop.permute.xlu0 %2944 }
 0x6a5   : > { %v2974_v63 = vsel %vm685_vm0, %v2945_v52, 0.0 }
 0x6a6   : > { %2975 = vadd.xlane.f32.xlu1 %v2974_v63 }
 0x6ac   : > { %v2791_v6 = vpop.permute.xlu0 %2790 }
 0x6ad   : > { %v2820_v42 = vsel %vm685_vm0, %v2791_v6, 0.0  ;;  %v6051_v6 = vstv %s3969_s13  ;;  %s3636_s13 = scalar_lea.sflag [#allocation5], %s4907_s14 }
 0x6ae   : > { %2821 = vadd.xlane.f32.xlu2 %v2820_v42 }
 0x6b1   : > { %v2967_v3 = vpop.xlane.xlu1 %2966 }
 0x6b2   : > { %v2983_v35 = vmax.f32 %v2967_v3, 1e-24  ;;  %2684 = vrot.lane.b32.xlu0 %v5443_v13, %s4734_s20 }
 0x6b4   : > { %4382 = vrsqrt.f32 %v2983_v35  ;;  %vm3024_vm3 = vweird.f32 %v2983_v35 }
 0x6b6   : > { %2824 = vadd.xlane.f32.xlu2 %v2823_v4 }
 0x6ba   : > { %v4383_v59 = vpop.eup %4382 }
 0x6bb   : > { %v3019_v34 = vmul.f32 %v4383_v59, %v2983_v35  ;;  %vm3025_vm13 = vweird.f32 %v4383_v59 }
 0x6bc   : > { %vm3026_vm4 = vmor %vm3024_vm3, %vm3025_vm13 }
 0x6bd   : > { %v3020_v43 = vmul.f32 %v4383_v59, %v3019_v34 }
 0x6bf   : > { %v3021_v45 = vmul.f32 0.5, %v3020_v43 }
 0x6c1   : > { %v3022_v46 = vsub.f32 1.5, %v3021_v45 }
 0x6c3   : > { %v3023_v50 = vmul.f32 %v4383_v59, %v3022_v46 }
 0x6c5   : > { %v3027_v39 = vsel %vm3026_vm4, %v4383_v59, %v3023_v50  ;;  %vm3044_vm4 = vweird.f32 %v2985_v60 }
 0x6c6   : > { %v3071_v61 = vmul.f32 %v3027_v39, %v5024_v14 }
 0x6c8   : > { %3134 = vrot.lane.b32.xlu0 %v3071_v61, %s4736_s22 }
 0x6ce   : > { %2634 = vrot.lane.b32.xlu2 %v5419_v17, %s4734_s20 }
 0x6d7   : > { %v2961_v8 = vpop.xlane.xlu0 %2960 }
 0x6d8   : > { %v2981_v12 = vmax.f32 %v2961_v8, 1e-24 }
 0x6da   : > { %4384 = vrsqrt.f32 %v2981_v12  ;;  %vm3004_vm6 = vweird.f32 %v2981_v12 }
 0x6db   : > { %4386 = vrsqrt.f32 %v2980_v36 }
 0x6dc   : > { %4388 = vrsqrt.f32 %v2826_v53 }
 0x6df   : > { %v2807_v29 = vpop.xlane.xlu0 %2806 }
 0x6e0   : > { %v4385_v32 = vpop.eup %4384  ;;  %v2827_v16 = vmax.f32 %v2807_v29, 1e-24 }
 0x6e1   : > { %v4387_v38 = vpop.eup %4386  ;;  %v2999_v0 = vmul.f32 %v4385_v32, %v2981_v12  ;;  %vm3005_vm5 = vweird.f32 %v4385_v32  ;;  %v6064_v12 = vpop.f32.mrf.mxu3 }
 0x6e2   : > { %4390 = vrsqrt.f32 %v2827_v16  ;;  %v2989_v14 = vmul.f32 %v4387_v38, %v2980_v36  ;;  %v4389_v33 = vpop.eup %4388  ;;  %vm3006_vm8 = vmor %vm3004_vm6, %vm3005_vm5  ;;  %vm2850_vm10 = vweird.f32 %v2827_v16  ;;  %vm2995_vm12 = vweird.f32 %v4387_v38 }
 0x6e3   : > { %v3000_v40 = vmul.f32 %v4385_v32, %v2999_v0  ;;  %v2835_v2 = vmul.f32 %v4389_v33, %v2826_v53  ;;  %4392 = vrsqrt.f32 %v2985_v60  ;;  %vm2996_vm15 = vmor %vm2994_vm14, %vm2995_vm12  ;;  %vm2841_vm1 = vweird.f32 %v4389_v33  ;;  %v4097_v0 = vld [vmem:[#allocation11 + $0x10] sm:$0xff]  }
 0x6e4   : > { %v2990_v27 = vmul.f32 %v4387_v38, %v2989_v14  ;;  %vm2842_vm13 = vmor %vm2840_vm2, %vm2841_vm1 }
 0x6e5   : > { %v3001_v49 = vmul.f32 0.5, %v3000_v40  ;;  %v2836_v48 = vmul.f32 %v4389_v33, %v2835_v2 }
 0x6e6   : > { %v2991_v54 = vmul.f32 0.5, %v2990_v27 }
 0x6e7   : > { %v3002_v51 = vsub.f32 1.5, %v3001_v49  ;;  %v2837_v52 = vmul.f32 0.5, %v2836_v48  ;;  %v4098_v49 = vunpack.c.l.bf16 %v4097_v0 }
 0x6e8   : > { %v4391_v47 = vpop.eup %4390  ;;  %v2992_v15 = vsub.f32 1.5, %v2991_v54 }
 0x6e9   : > { %v3003_v20 = vmul.f32 %v4385_v32, %v3002_v51  ;;  %v2845_v24 = vmul.f32 %v4391_v47, %v2827_v16  ;;  %vm2851_vm9 = vweird.f32 %v4391_v47  ;;  %v4393_v28 = vpop.eup %4392  ;;  %v6070_v16 = vpop.f32.mrf.mxu0 }
 0x6ea   : > { %vm2852_vm11 = vmor %vm2850_vm10, %vm2851_vm9  ;;  %v2993_v9 = vmul.f32 %v4387_v38, %v2992_v15  ;;  %v3039_v35 = vmul.f32 %v4393_v28, %v2985_v60  ;;  %vm3045_vm3 = vweird.f32 %v4393_v28  ;;  %v6089_v60 = vpop.xlane.xlu1 %2815  ;;  %v6105_v15 = vunpack.c.h.bf16 %v4097_v0 }
 0x6eb   : > { %v3007_v23 = vsel %vm3006_vm8, %v4385_v32, %v3003_v20  ;;  %v2846_v18 = vmul.f32 %v4391_v47, %v2845_v24  ;;  %vm3046_vm5 = vmor %vm3044_vm4, %vm3045_vm3 }
 0x6ec   : > { %v3069_v21 = vmul.f32 %v3007_v23, %v4974_v62  ;;  %v2838_v62 = vsub.f32 1.5, %v2837_v52  ;;  %v2997_v59 = vsel %vm2996_vm15, %v4387_v38, %v2993_v9  ;;  %v3040_v43 = vmul.f32 %v4393_v28, %v3039_v35  ;;  %v6073_v38 = vpop.f32.mrf.mxu3 }
 0x6ed   : > { %v2847_v55 = vmul.f32 0.5, %v2846_v18  ;;  %v3068_v45 = vmul.f32 %v2997_v59, %v4957_v58 }
 0x6ee   : > { %3091 = vrot.lane.b32.xlu1 %v3069_v21, %s4736_s22  ;;  %v2839_v34 = vmul.f32 %v4389_v33, %v2838_v62  ;;  %v3041_v50 = vmul.f32 0.5, %v3040_v43 }
 0x6ef   : > { %v2848_v44 = vsub.f32 1.5, %v2847_v55 }
 0x6f0   : > { %v2843_v46 = vsel %vm2842_vm13, %v4389_v33, %v2839_v34  ;;  %v3042_v61 = vsub.f32 1.5, %v3041_v50 }
 0x6f1   : > { %v2849_v63 = vmul.f32 %v4391_v47, %v2848_v44  ;;  %v2916_v39 = vmul.f32 %v6051_v6, %v2843_v46  ;;  %v6081_v14 = vpop.f32.mrf.mxu0 }
 0x6f2   : > { %v3043_v8 = vmul.f32 %v4393_v28, %v3042_v61 }
 0x6f3   : > { %v2853_v42 = vsel %vm2852_vm11, %v4391_v47, %v2849_v63  ;;  %v2924_v36 = vmul.f32 %v2916_v39, %v4954_v56 }
 0x6f4   : > { %v2917_v3 = vmul.f32 %v6051_v6, %v2853_v42  ;;  %v3047_v58 = vsel %vm3046_vm5, %v4393_v28, %v3043_v8  ;;  %v2441_v33 = vpop.f32.mrf.mxu3 }
 0x6f5   : > { %v3073_v32 = vmul.f32 %v3047_v58, %v5062_v31  ;;  %v6083_v51 = vadd.f32 %v4098_v49, %v2441_v33 }
 0x6f6   : > { %2659 = vrot.lane.b32.xlu1 %v5436_v5, %s4734_s20  ;;  %v2925_v4 = vmul.f32 %v2917_v3, %v4985_v1  ;;  %v6061_v1 = vpop.xlane.xlu0 %2969 }
 0x6f7   : > { %v2539_v2 = vsel %vm1088_vm7, %v6083_v51, -inf }
 0x6f8   : > { %3085 = vrot.lane.b32.xlu2 %v2925_v4, %s4736_s22 }
 0x6f9   : > { %v2484_v20 = vpop.f32.mrf.mxu0  ;;  %v6099_v54 = vpop.xlane.xlu1 %2809 }
 0x6fa   : > { %v6095_v23 = vadd.f32 %v4098_v49, %v2484_v20 }
 0x6fc   : > { %v6067_v53 = vpop.f32.mrf.mxu2  ;;  %v2545_v48 = vsel %vm1088_vm7, %v6095_v23, -inf  ;;  %v2444_v59 = vpop.f32.mrf.mxu3 }
 0x6fe   : > { %3089 = vrot.lane.b32.xlu1 %v3068_v45, %s4736_s22  ;;  %v2964_v29 = vpop.xlane.xlu0 %2963  ;;  %v6117_v45 = vadd.f32 %v6105_v15, %v2444_v59 }
 0x6ff   : > { %v2982_v52 = vmax.f32 %v2964_v29, 1e-24  ;;  %v2984_v29 = vmax.f32 %v6061_v1, 1e-24 }
 0x700   : > { %v2542_v39 = vsel %vm1088_vm7, %v6117_v45, -inf }
 0x701   : > { %4394 = vrsqrt.f32 %v2982_v52  ;;  %v2487_v61 = vpop.f32.mrf.mxu0  ;;  %vm3014_vm8 = vweird.f32 %v2982_v52  ;;  %vm3034_vm15 = vweird.f32 %v2984_v29 }
 0x702   : > { %v6087_v47 = vpop.f32.mrf.mxu1  ;;  %v6122_v58 = vadd.f32 %v6105_v15, %v2487_v61 }
 0x704   : > { %v6077_v40 = vpop.f32.mrf.mxu2  ;;  %v2548_v33 = vsel %vm1088_vm7, %v6122_v58, -inf }
 0x706   : > { %3083 = vrot.lane.b32.xlu1 %v2924_v36, %s4736_s22  ;;  %v6075_v56 = vpop.xlane.xlu0 %2818 }
 0x707   : > { %v4395_v4 = vpop.eup %4394 }
 0x708   : > { %v3009_v34 = vmul.f32 %v4395_v4, %v2982_v52  ;;  %vm3015_vm6 = vweird.f32 %v4395_v4 }
 0x709   : > { %v2979_v28 = vpop.xlane.xlu1 %2978  ;;  %vm3016_vm9 = vmor %vm3014_vm8, %vm3015_vm6 }
 0x70a   : > { %v6097_v21 = vpop.f32.mrf.mxu1  ;;  %v2987_v62 = vmax.f32 %v2979_v28, 1e-24  ;;  %v3010_v46 = vmul.f32 %v4395_v4, %v3009_v34 }
 0x70c   : > { %v2398_v27 = vpop.f32.mrf.mxu2  ;;  %4396 = vrsqrt.f32 %v2987_v62  ;;  %v3011_v36 = vmul.f32 0.5, %v3010_v46  ;;  %vm3064_vm11 = vweird.f32 %v2987_v62 }
 0x70d   : > { %4398 = vrsqrt.f32 %v2984_v29 }
 0x70e   : > { %3177 = vrot.lane.b32.xlu1 %v3073_v32, %s4736_s22  ;;  %v3012_v32 = vsub.f32 1.5, %v3011_v36 }
 0x711   : > { %v6085_v31 = vpop.xlane.xlu0 %2812 }
 0x712   : > { %v2527_v3 = vpop.f32.mrf.mxu1  ;;  %v4397_v50 = vpop.eup %4396 }
 0x713   : > { %v6112_v35 = vadd.f32 %v4098_v49, %v2527_v3  ;;  %v3059_v8 = vmul.f32 %v4397_v50, %v2987_v62  ;;  %v4399_v28 = vpop.eup %4398  ;;  %vm3065_vm10 = vweird.f32 %v4397_v50 }
 0x714   : > { %v2401_v55 = vpop.f32.mrf.mxu2  ;;  %v3029_v3 = vmul.f32 %v4399_v28, %v2984_v29  ;;  %vm3066_vm12 = vmor %vm3064_vm11, %vm3065_vm10  ;;  %vm3035_vm14 = vweird.f32 %v4399_v28 }
 0x715   : > { %v6108_v63 = vadd.f32 %v6105_v15, %v2401_v55  ;;  %v2551_v43 = vsel %vm1088_vm7, %v6112_v35, -inf  ;;  %v3060_v0 = vmul.f32 %v4397_v50, %v3059_v8  ;;  %vm3036_vm1 = vmor %vm3034_vm15, %vm3035_vm14 }
 0x716   : > { %2709 = vrot.lane.b32.xlu1 %v5468_v10, %s4734_s20  ;;  %v3030_v52 = vmul.f32 %v4399_v28, %v3029_v3 }
 0x717   : > { %v2536_v42 = vsel %vm1088_vm7, %v6108_v63, -inf  ;;  %v3061_v20 = vmul.f32 0.5, %v3060_v0 }
 0x719   : > { %v3062_v55 = vsub.f32 1.5, %v3061_v20 }
 0x71a   : > { %v2530_v29 = vpop.f32.mrf.mxu1 }
 0x721   : > { %v6093_v24 = vpop.xlane.xlu2 %2821  ;;  %2540 = vmax.xlane.f32.xlu2 %v2539_v2  ;;  %v3013_v2 = vmul.f32 %v4395_v4, %v3012_v32 }
 0x724   : > { %v2685_v18 = vpop.permute.xlu0 %2684 }
 0x725   : > { %2697 = vmatpush.bf16.msra.mxu0 %v2685_v18  ;;  %v6127_v18 = vadd.f32 %v4098_v49, %v2398_v27  ;;  %v3031_v27 = vmul.f32 0.5, %v3030_v52 }
 0x727   : > { %v2533_v1 = vsel %vm1088_vm7, %v6127_v18, -inf  ;;  %v3032_v34 = vsub.f32 1.5, %v3031_v27 }
 0x729   : > { %v6103_v44 = vpop.xlane.xlu2 %2824  ;;  %2546 = vmax.xlane.f32.xlu2 %v2545_v48  ;;  %v3017_v48 = vsel %vm3016_vm9, %v4395_v4, %v3013_v2  ;;  %v6134_v4 = vpop.xlane.xlu1 %2975 }
 0x731   : > { %v2635_v9 = vpop.permute.xlu2 %2634  ;;  %2537 = vmax.xlane.f32.xlu2 %v2536_v42  ;;  %v3070_v42 = vmul.f32 %v3017_v48, %v5000_v7 }
 0x732   : > { %2647 = vmatpush.bf16.msrb.mxu2 %v2635_v9  ;;  %v3063_v9 = vmul.f32 %v4397_v50, %v3062_v55 }
 0x734   : > { %v3067_v59 = vsel %vm3066_vm12, %v4397_v50, %v3063_v9  ;;  %v2832_v9 = vmax.f32 %v6093_v24, 1e-24 }
 0x735   : > { %v3075_v49 = vmul.f32 %v3067_v59, %v5081_v37 }
 0x736   : > { %vm2900_vm13 = vweird.f32 %v2832_v9 }
 0x739   : > { %2552 = vmax.xlane.f32.xlu2 %v2551_v43  ;;  %v3033_v43 = vmul.f32 %v4399_v28, %v3032_v34 }
 0x73a   : > { %v3135_v50 = vpop.permute.xlu0 %3134 }
 0x73b   : > { %v3037_v46 = vsel %vm3036_vm1, %v4399_v28, %v3033_v43 }
 0x73c   : > { %v3072_v62 = vmul.f32 %v3037_v46, %v5048_v26  ;;  %v6148_v26 = vadd.f32 %v6105_v15, %v2530_v29 }
 0x73e   : > { %v2554_v0 = vsel %vm1088_vm7, %v6148_v26, -inf }
 0x740   : > { %2543 = vmax.xlane.f32.xlu1 %v2542_v39 }
 0x748   : > { %2549 = vmax.xlane.f32.xlu1 %v2548_v33 }
 0x750   : > { %2534 = vmax.xlane.f32.xlu1 %v2533_v1 }
 0x751   : > { %3132 = vrot.lane.b32.xlu2 %v3070_v42, %s4736_s22 }
 0x752   : > { %v6145_v32 = vpop.permute.xlu2 %3085 }
 0x759   : > { %3220 = vrot.lane.b32.xlu2 %v3075_v49, %s4736_s22 }
 0x760   : > { %v3092_v7 = vpop.permute.xlu1 %3091 }
 0x761   : > { %3970 = vmatpush.xpose.msk.msra.mxu2 %vm685_vm0, %v3092_v7 }
 0x768   : > { %v2660_v39 = vpop.permute.xlu1 %2659 }
 0x769   : > { %2672 = vmatpush.bf16.msra.mxu3 %v2660_v39  ;;  %3175 = vrot.lane.b32.xlu1 %v3072_v62, %s4736_s22 }
 0x76d   : > { %3974 = vmatpush.xpose.msk.msrb.mxu3 %vm685_vm0, %v3135_v50 }
 0x770   : > { %v3090_v37 = vpop.permute.xlu1 %3089 }
 0x771   : > { %3971 = vmatpush.xpose.msk.msra.mxu2 %vm685_vm0, %v3090_v37 }
 0x778   : > { %v6142_v61 = vpop.permute.xlu1 %3083 }
 0x780   : > { %v3178_v36 = vpop.permute.xlu1 %3177 }
 0x781   : > { %3978 = vmatpush.xpose.msk.msrb.mxu0 %vm685_vm0, %v3178_v36 }
 0x788   : > { %v2710_v8 = vpop.permute.xlu1 %2709 }
 0x789   : > { %2722 = vmatpush.bf16.msra.mxu1 %v2710_v8 }
 0x793   : > { %2555 = vmax.xlane.f32.xlu1 %v2554_v0 }
 0x794   : > { %v2541_v33 = vpop.xlane.xlu2 %2540 }
 0x795   : > { %v2559_v2 = vsub.f32 %v6083_v51, %v2541_v33  ;;  %v6180_v33 = vmax.f32 %v6089_v60, 1e-24 }
 0x797   : > { %v2569_v20 = vmul.f32 1.442695, %v2559_v2  ;;  %vm2880_vm9 = vweird.f32 %v6180_v33 }
 0x799   : > { %4400 = vpow2.f32 %v2569_v20 }
 0x79c   : > { %v2547_v48 = vpop.xlane.xlu2 %2546 }
 0x79d   : > { %v2561_v55 = vsub.f32 %v6095_v23, %v2547_v48 }
 0x79f   : > { %v6154_v28 = vpop.eup %4400  ;;  %v2573_v1 = vmul.f32 1.442695, %v2561_v55 }
 0x7a0   : > { %v2587_v42 = vsel %vm1088_vm7, %v6154_v28, 0.0 }
 0x7a1   : > { %4402 = vpow2.f32 %v2573_v1  ;;  %2588 = vadd.xlane.f32.xlu0 %v2587_v42 }
 0x7a2   : > { %4404 = vrsqrt.f32 %v2832_v9 }
 0x7a4   : > { %v2538_v15 = vpop.xlane.xlu2 %2537 }
 0x7a5   : > { %v2558_v29 = vsub.f32 %v6108_v63, %v2538_v15 }
 0x7a7   : > { %v6158_v3 = vpop.eup %4402  ;;  %v2567_v20 = vmul.f32 1.442695, %v2558_v29 }
 0x7a8   : > { %v2593_v51 = vsel %vm1088_vm7, %v6158_v3, 0.0  ;;  %v4405_v49 = vpop.eup %4404 }
 0x7a9   : > { %2594 = vadd.xlane.f32.xlu0 %v2593_v51  ;;  %v2895_v34 = vmul.f32 %v4405_v49, %v2832_v9  ;;  %vm2901_vm2 = vweird.f32 %v4405_v49 }
 0x7aa   : > { %vm2902_vm3 = vmor %vm2900_vm13, %vm2901_vm2 }
 0x7ab   : > { %v2896_v62 = vmul.f32 %v4405_v49, %v2895_v34 }
 0x7ac   : > { %v2553_v52 = vpop.xlane.xlu2 %2552 }
 0x7ad   : > { %v2563_v23 = vsub.f32 %v6112_v35, %v2553_v52  ;;  %v6171_v35 = vmax.f32 %v6099_v54, 1e-24  ;;  %v2897_v37 = vmul.f32 0.5, %v2896_v62 }
 0x7af   : > { %v2577_v59 = vmul.f32 1.442695, %v2563_v23  ;;  %v2898_v2 = vsub.f32 1.5, %v2897_v37  ;;  %vm2860_vm5 = vweird.f32 %v6171_v35 }
 0x7b1   : > { %4406 = vpow2.f32 %v2577_v59  ;;  %v2899_v1 = vmul.f32 %v4405_v49, %v2898_v2 }
 0x7b3   : > { %v2544_v27 = vpop.xlane.xlu1 %2543  ;;  %v2903_v52 = vsel %vm2902_vm3, %v4405_v49, %v2899_v1 }
 0x7b4   : > { %v2560_v43 = vsub.f32 %v6117_v45, %v2544_v27  ;;  %v3133_v7 = vpop.permute.xlu2 %3132  ;;  %v2922_v27 = vmul.f32 %v6051_v6, %v2903_v52 }
 0x7b5   : > { %3975 = vmatpush.xpose.msk.msrb.mxu3 %vm685_vm0, %v3133_v7 }
 0x7b6   : > { %v2571_v46 = vmul.f32 1.442695, %v2560_v43  ;;  %v2930_v62 = vmul.f32 %v2922_v27, %v5190_v19 }
 0x7b7   : > { %v6166_v24 = vpop.eup %4406 }
 0x7b8   : > { %4408 = vpow2.f32 %v2571_v46  ;;  %v2599_v39 = vsel %vm1088_vm7, %v6166_v24, 0.0 }
 0x7b9   : > { %2600 = vadd.xlane.f32.xlu2 %v2599_v39  ;;  %4410 = vrsqrt.f32 %v6171_v35 }
 0x7bb   : > { %v2550_v50 = vpop.xlane.xlu1 %2549 }
 0x7bc   : > { %v2562_v36 = vsub.f32 %v6122_v58, %v2550_v50  ;;  %v3221_v45 = vpop.permute.xlu2 %3220  ;;  %v6185_v58 = vmax.f32 %v6085_v31, 1e-24  ;;  %v6194_v31 = vmax.f32 %v6075_v56, 1e-24 }
 0x7bd   : > { %3982 = vmatpush.xpose.msk.msrb.mxu1 %vm685_vm0, %v3221_v45  ;;  %v2986_v45 = vmax.f32 %v6134_v4, 1e-24 }
 0x7be   : > { %v6176_v8 = vpop.eup %4408  ;;  %v2575_v0 = vmul.f32 1.442695, %v2562_v36  ;;  %vm2870_vm12 = vweird.f32 %v6185_v58  ;;  %vm2890_vm1 = vweird.f32 %v6194_v31 }
 0x7bf   : > { %v2590_v54 = vsel %vm1088_vm7, %v6176_v8, 0.0  ;;  %v4411_v48 = vpop.eup %4410  ;;  %vm3054_vm3 = vweird.f32 %v2986_v45 }
 0x7c0   : > { %4412 = vpow2.f32 %v2575_v0  ;;  %2591 = vadd.xlane.f32.xlu1 %v2590_v54  ;;  %v2855_v42 = vmul.f32 %v4411_v48, %v6171_v35  ;;  %vm2861_vm4 = vweird.f32 %v4411_v48 }
 0x7c1   : > { %4414 = vrsqrt.f32 %v6180_v33  ;;  %vm2862_vm6 = vmor %vm2860_vm5, %vm2861_vm4 }
 0x7c2   : > { %4416 = vrsqrt.f32 %v6185_v58  ;;  %v2856_v23 = vmul.f32 %v4411_v48, %v2855_v42 }
 0x7c3   : > { %v2535_v55 = vpop.xlane.xlu1 %2534  ;;  %4418 = vpow2.f32 %v2567_v20 }
 0x7c4   : > { %v2557_v63 = vsub.f32 %v6127_v18, %v2535_v55  ;;  %v2857_v43 = vmul.f32 0.5, %v2856_v23 }
 0x7c6   : > { %v6190_v60 = vpop.eup %4412  ;;  %v2565_v15 = vmul.f32 1.442695, %v2557_v63  ;;  %v2858_v37 = vsub.f32 1.5, %v2857_v43 }
 0x7c7   : > { %v2596_v51 = vsel %vm1088_vm7, %v6190_v60, 0.0  ;;  %v4415_v18 = vpop.eup %4414 }
 0x7c8   : > { %4420 = vpow2.f32 %v2565_v15  ;;  %2597 = vadd.xlane.f32.xlu1 %v2596_v51  ;;  %v4417_v59 = vpop.eup %4416  ;;  %v2875_v34 = vmul.f32 %v4415_v18, %v6180_v33  ;;  %v2859_v54 = vmul.f32 %v4411_v48, %v2858_v37  ;;  %vm2881_vm8 = vweird.f32 %v4415_v18 }
 0x7c9   : > { %4422 = vrsqrt.f32 %v6194_v31  ;;  %v6200_v9 = vpop.eup %4418  ;;  %v2865_v7 = vmul.f32 %v4417_v59, %v6185_v58  ;;  %vm2882_vm10 = vmor %vm2880_vm9, %vm2881_vm8  ;;  %vm2871_vm11 = vweird.f32 %v4417_v59  ;;  %vm2769_vm9 = vcmask 191616  }
 0x7ca   : > { %v2584_v46 = vsel %vm1088_vm7, %v6200_v9, 0.0  ;;  %v2876_v39 = vmul.f32 %v4415_v18, %v2875_v34  ;;  %4424 = vrsqrt.f32 %v2986_v45  ;;  %v2863_v19 = vsel %vm2862_vm6, %v4411_v48, %v2859_v54  ;;  %vm2872_vm14 = vmor %vm2870_vm12, %vm2871_vm11 }
 0x7cb   : > { %v2866_v36 = vmul.f32 %v4417_v59, %v2865_v7  ;;  %v2918_v51 = vmul.f32 %v6051_v6, %v2863_v19 }
 0x7cc   : > { %v2877_v29 = vmul.f32 0.5, %v2876_v39 }
 0x7cd   : > { %v2867_v2 = vmul.f32 0.5, %v2866_v36  ;;  %v2926_v48 = vmul.f32 %v2918_v51, %v5015_v11 }
 0x7ce   : > { %v6203_v56 = vpop.eup %4420  ;;  %v2878_v20 = vsub.f32 1.5, %v2877_v29 }
 0x7cf   : > { %v2581_v49 = vsel %vm1088_vm7, %v6203_v56, 0.0  ;;  %v4423_v50 = vpop.eup %4422  ;;  %v2868_v1 = vsub.f32 1.5, %v2867_v2 }
 0x7d0   : > { %2582 = vadd.xlane.f32.xlu0 %v2581_v49  ;;  %2585 = vadd.xlane.f32.xlu1 %v2584_v46  ;;  %v2885_v0 = vmul.f32 %v4423_v50, %v6194_v31  ;;  %v2879_v42 = vmul.f32 %v4415_v18, %v2878_v20  ;;  %v4425_v4 = vpop.eup %4424  ;;  %vm2891_vm15 = vweird.f32 %v4423_v50 }
 0x7d1   : > { %3212 = vrot.lane.b32.xlu2 %v2930_v62, %s4736_s22  ;;  %v2869_v52 = vmul.f32 %v4417_v59, %v2868_v1  ;;  %v3049_v35 = vmul.f32 %v4425_v4, %v2986_v45  ;;  %vm2892_vm2 = vmor %vm2890_vm1, %vm2891_vm15  ;;  %vm3055_vm13 = vweird.f32 %v4425_v4 }
 0x7d2   : > { %v2886_v55 = vmul.f32 %v4423_v50, %v2885_v0  ;;  %v2883_v23 = vsel %vm2882_vm10, %v4415_v18, %v2879_v42  ;;  %vm3056_vm4 = vmor %vm3054_vm3, %vm3055_vm13 }
 0x7d3   : > { %v2920_v34 = vmul.f32 %v6051_v6, %v2883_v23  ;;  %v2873_v43 = vsel %vm2872_vm14, %v4417_v59, %v2869_v52  ;;  %v3050_v49 = vmul.f32 %v4425_v4, %v3049_v35 }
 0x7d4   : > { %v2887_v15 = vmul.f32 0.5, %v2886_v55  ;;  %v2919_v33 = vmul.f32 %v6051_v6, %v2873_v43 }
 0x7d5   : > { %v2928_v18 = vmul.f32 %v2920_v34, %v5039_v22  ;;  %v3051_v58 = vmul.f32 0.5, %v3050_v49 }
 0x7d6   : > { %v2888_v27 = vsub.f32 1.5, %v2887_v15  ;;  %v2927_v11 = vmul.f32 %v2919_v33, %v5059_v30  ;;  %v2833_v30 = vmax.f32 %v6103_v44, 1e-24 }
 0x7d7   : > { %v3052_v62 = vsub.f32 1.5, %v3051_v58 }
 0x7d8   : > { %v2889_v7 = vmul.f32 %v4423_v50, %v2888_v27  ;;  %4426 = vrsqrt.f32 %v2833_v30  ;;  %vm2910_vm6 = vweird.f32 %v2833_v30 }
 0x7d9   : > { %v3053_v37 = vmul.f32 %v4425_v4, %v3052_v62 }
 0x7da   : > { %v2893_v46 = vsel %vm2892_vm2, %v4423_v50, %v2889_v7 }
 0x7db   : > { %v3176_v63 = vpop.permute.xlu1 %3175  ;;  %v2921_v59 = vmul.f32 %v6051_v6, %v2893_v46  ;;  %v3057_v22 = vsel %vm3056_vm4, %v4425_v4, %v3053_v37 }
 0x7dc   : > { %3979 = vmatpush.xpose.msk.msrb.mxu0 %vm685_vm0, %v3176_v63  ;;  %v3074_v31 = vmul.f32 %v3057_v22, %v5137_v57 }
 0x7dd   : > { %v2929_v39 = vmul.f32 %v2921_v59, %v5092_v41 }
 0x7de   : > { %v4427_v0 = vpop.eup %4426 }
 0x7df   : > { %v2905_v41 = vmul.f32 %v4427_v0, %v2833_v30  ;;  %vm2911_vm5 = vweird.f32 %v4427_v0 }
 0x7e0   : > { %vm2912_vm8 = vmor %vm2910_vm6, %vm2911_vm5 }
 0x7e1   : > { %v2906_v54 = vmul.f32 %v4427_v0, %v2905_v41 }
 0x7e3   : > { %v2907_v45 = vmul.f32 0.5, %v2906_v54 }
 0x7e4   : > { %3126 = vrot.lane.b32.xlu0 %v2926_v48, %s4736_s22 }
 0x7e5   : > { %v2908_v57 = vsub.f32 1.5, %v2907_v45 }
 0x7e7   : > { %v2909_v55 = vmul.f32 %v4427_v0, %v2908_v57 }
 0x7e9   : > { %3169 = vrot.lane.b32.xlu1 %v2928_v18, %s4736_s22  ;;  %v2913_v44 = vsel %vm2912_vm8, %v4427_v0, %v2909_v55 }
 0x7ec   : > { %3128 = vrot.lane.b32.xlu0 %v2927_v11, %s4736_s22 }
 0x7f1   : > { %3171 = vrot.lane.b32.xlu1 %v2929_v39, %s4736_s22 }
 0x7f9   : > { %3218 = vrot.lane.b32.xlu1 %v3074_v31, %s4736_s22 }
 0x806   : > { %v2556_v50 = vpop.xlane.xlu1 %2555 }
 0x807   : > { %v2564_v36 = vsub.f32 %v6148_v26, %v2556_v50  ;;  %v2923_v26 = vmul.f32 %v6051_v6, %v2913_v44 }
 0x809   : > { %v2579_v29 = vmul.f32 1.442695, %v2564_v36  ;;  %v2931_v19 = vmul.f32 %v2923_v26, %v5125_v25 }
 0x80b   : > { %4428 = vpow2.f32 %v2579_v29 }
 0x811   : > { %v6235_v2 = vpop.eup %4428 }
 0x812   : > { %v2602_v20 = vsel %vm1088_vm7, %v6235_v2, 0.0 }
 0x814   : > { %v2589_v1 = vpop.xlane.xlu0 %2588 }
 0x815   : > { %4430 = vrcp.f32 %v2589_v1 }
 0x816   : > { %2603 = vadd.xlane.f32.xlu0 %v2602_v20 }
 0x81b   : > { %v4431_v15 = vpop.eup %4430 }
 0x81c   : > { %v2595_v63 = vpop.xlane.xlu0 %2594  ;;  %v2615_v4 = vmul.f32 %v4431_v15, %v6154_v28 }
 0x81e   : > { %v2623_v52 = vpack.c.bf16 %v2615_v4, %v2615_v4 }
 0x820   : > { %v2656_v25 = vunpack.c.l.b16 %v2623_v52 }
 0x82a   : > { %3214 = vrot.lane.b32.xlu0 %v2931_v19, %s4736_s22 }
 0x82c   : > { %v2601_v0 = vpop.xlane.xlu2 %2600 }
 0x833   : > { %v2592_v42 = vpop.xlane.xlu1 %2591 }
 0x834   : > { %4432 = vrcp.f32 %v2592_v42 }
 0x835   : > { %4434 = vrcp.f32 %v2595_v63 }
 0x83a   : > { %v4433_v51 = vpop.eup %4432 }
 0x83b   : > { %v2616_v23 = vmul.f32 %v4433_v51, %v6176_v8  ;;  %v2598_v27 = vpop.xlane.xlu1 %2597  ;;  %v4435_v35 = vpop.eup %4434 }
 0x83c   : > { %4436 = vrcp.f32 %v2598_v27  ;;  %v2617_v48 = vmul.f32 %v4435_v35, %v6158_v3 }
 0x83d   : > { %v2624_v6 = vpack.c.bf16 %v2616_v23, %v2616_v23 }
 0x83e   : > { %v2625_v49 = vpack.c.bf16 %v2617_v48, %v2617_v48 }
 0x83f   : > { %v2657_v34 = vunpack.c.l.b16 %v2624_v6 }
 0x840   : > { %v2681_v8 = vunpack.c.l.b16 %v2625_v49 }
 0x841   : > { %v2658_v43 = vpack.c.b16 %v2657_v34, %v2656_v25 }
 0x842   : > { %v4437_v7 = vpop.eup %4436 }
 0x843   : > { %v2618_v33 = vmul.f32 %v4437_v7, %v6190_v60  ;;  %v2586_v18 = vpop.xlane.xlu1 %2585  ;;  %3966 = vmatmul.msk.bf16.vlgmr.msra.gmra.mxu3 %vm1088_vm7, %v2658_v43  ;;  %v2583_v28 = vpop.xlane.xlu0 %2582 }
 0x844   : > { %4438 = vrcp.f32 %v2586_v18 }
 0x845   : > { %v2626_v46 = vpack.c.bf16 %v2618_v33, %v2618_v33  ;;  %4440 = vrcp.f32 %v2583_v28 }
 0x846   : > { %4442 = vrcp.f32 %v2601_v0 }
 0x847   : > { %v2682_v58 = vunpack.c.l.b16 %v2626_v46 }
 0x849   : > { %v2683_v11 = vpack.c.b16 %v2682_v58, %v2681_v8 }
 0x84a   : > { %v4439_v59 = vpop.eup %4438 }
 0x84b   : > { %v4441_v62 = vpop.eup %4440  ;;  %v2614_v3 = vmul.f32 %v4439_v59, %v6200_v9  ;;  %3967 = vmatmul.msk.bf16.vlgmr.msra.gmra.mxu0 %vm1088_vm7, %v2683_v11 }
 0x84c   : > { %v2613_v39 = vmul.f32 %v4441_v62, %v6203_v56  ;;  %v4443_v54 = vpop.eup %4442 }
 0x84d   : > { %v2622_v37 = vpack.c.bf16 %v2614_v3, %v2614_v3  ;;  %v2619_v45 = vmul.f32 %v4443_v54, %v6166_v24  ;;  %v4101_v24 = vld [vmem:[#allocation11 + $0x18] sm:$0xff]  }
 0x84e   : > { %v2621_v60 = vpack.c.bf16 %v2613_v39, %v2613_v39  ;;  %v4102_v15 = vunpack.c.l.bf16 %v4101_v24  ;;  %v4103_v27 = vunpack.c.h.bf16 %v4101_v24 }
 0x84f   : > { %v2632_v22 = vunpack.c.l.b16 %v2622_v37  ;;  %v2627_v57 = vpack.c.bf16 %v2619_v45, %v2619_v45 }
 0x850   : > { %v2631_v31 = vunpack.c.l.b16 %v2621_v60 }
 0x851   : > { %v2706_v44 = vunpack.c.l.b16 %v2627_v57 }
 0x852   : > { %v2633_v30 = vpack.c.b16 %v2632_v22, %v2631_v31 }
 0x854   : > { %3965 = vmatmul.msk.bf16.vlgmr.msrb.gmra.mxu2 %vm1088_vm7, %v2633_v30 }
 0x856   : > { %v3127_v50 = vpop.permute.xlu0 %3126 }
 0x857   : > { %3976 = vmatmul.msk.f32.vlgmr.msrb.gmra.mxu3 %vm685_vm0, %v3127_v50 }
 0x85b   : > { %v3170_v36 = vpop.permute.xlu1 %3169 }
 0x85c   : > { %3980 = vmatmul.msk.f32.vlgmr.msrb.gmra.mxu0 %vm685_vm0, %v3170_v36 }
 0x85e   : > { %v3129_v29 = vpop.permute.xlu0 %3128 }
 0x85f   : > { %3977 = vmatmul.msk.f32.gmra.mxu3 %vm685_vm0, %v3129_v29 }
 0x863   : > { %v3172_v9 = vpop.permute.xlu1 %3171 }
 0x864   : > { %3972 = vmatmul.msk.f32.vlgmr.msra.gmra.mxu2 %vm685_vm0, %v6142_v61  ;;  %3981 = vmatmul.msk.f32.gmra.mxu0 %vm685_vm0, %v3172_v9 }
 0x86b   : > { %v3219_v56 = vpop.permute.xlu1 %3218 }
 0x86c   : > { %3973 = vmatmul.msk.f32.gmra.mxu2 %vm685_vm0, %v6145_v32  ;;  %3983 = vmatpush.xpose.msk.msrb.mxu1 %vm685_vm0, %v3219_v56  ;;  %v3213_v32 = vpop.permute.xlu2 %3212 }
 0x889   : > { %v2604_v41 = vpop.xlane.xlu0 %2603 }
 0x88a   : > { %4444 = vrcp.f32 %v2604_v41 }
 0x890   : > { %v4445_v20 = vpop.eup %4444 }
 0x891   : > { %v2620_v55 = vmul.f32 %v4445_v20, %v6235_v2 }
 0x893   : > { %v2628_v61 = vpack.c.bf16 %v2620_v55, %v2620_v55 }
 0x895   : > { %v2707_v26 = vunpack.c.l.b16 %v2628_v61 }
 0x897   : > { %v2708_v19 = vpack.c.b16 %v2707_v26, %v2706_v44 }
 0x899   : > { %3968 = vmatmul.msk.bf16.vlgmr.msra.gmra.mxu1 %vm1088_vm7, %v2708_v19 }
 0x89c   : > { %v3215_v1 = vpop.permute.xlu0 %3214 }
 0x8a9   : > { %3984 = vmatmul.msk.f32.vlgmr.msrb.gmra.mxu1 %vm685_vm0, %v3213_v32 }
 0x8b1   : > { %3985 = vmatmul.msk.f32.gmra.mxu1 %vm685_vm0, %v3215_v1  ;;  %vm2049_vm0 = vcmask 126016  }
 0x8c6   : > { %v6269_v4 = vpop.f32.mrf.mxu3 }
 0x8c8   : > { %v6265_v63 = vpop.f32.mrf.mxu0 }
 0x8ce   : > { %v6276_v6 = vpop.f32.mrf.mxu3 }
 0x8d0   : > { %v6267_v42 = vpop.f32.mrf.mxu0 }
 0x8d7   : > { %v6271_v2 = vpop.f32.mrf.mxu2 }
 0x8d9   : > { %v3204_v51 = vpop.f32.mrf.mxu0 }
 0x8da   : > { %v3205_v52 = vadd.f32 %v4102_v15, %v3204_v51  ;;  %v3161_v49 = vpop.f32.mrf.mxu3 }
 0x8db   : > { %v3162_v18 = vadd.f32 %v4102_v15, %v3161_v49 }
 0x8dc   : > { %v3265_v23 = vsel %vm1088_vm7, %v3205_v52, -inf }
 0x8dd   : > { %3266 = vmax.xlane.f32.xlu0 %v3265_v23  ;;  %v3259_v58 = vsel %vm1088_vm7, %v3162_v18, -inf }
 0x8df   : > { %v6274_v35 = vpop.f32.mrf.mxu2 }
 0x8e1   : > { %v3207_v25 = vpop.f32.mrf.mxu0 }
 0x8e2   : > { %v3208_v48 = vadd.f32 %v4103_v27, %v3207_v25  ;;  %v3164_v11 = vpop.f32.mrf.mxu3 }
 0x8e3   : > { %v3165_v59 = vadd.f32 %v4103_v27, %v3164_v11 }
 0x8e4   : > { %v3268_v34 = vsel %vm1088_vm7, %v3208_v48, -inf }
 0x8e5   : > { %3269 = vmax.xlane.f32.xlu2 %v3268_v34  ;;  %v3262_v62 = vsel %vm1088_vm7, %v3165_v59, -inf }
 0x8e7   : > { %v3118_v43 = vpop.f32.mrf.mxu2 }
 0x8e8   : > { %v3119_v7 = vadd.f32 %v4102_v15, %v3118_v43 }
 0x8ea   : > { %v3253_v33 = vsel %vm1088_vm7, %v3119_v7, -inf }
 0x8eb   : > { %3254 = vmax.xlane.f32.xlu1 %v3253_v33 }
 0x8ef   : > { %v3121_v28 = vpop.f32.mrf.mxu2 }
 0x8f0   : > { %v3122_v46 = vadd.f32 %v4103_v27, %v3121_v28 }
 0x8f2   : > { %v3256_v8 = vsel %vm1088_vm7, %v3122_v46, -inf }
 0x8f3   : > { %3257 = vmax.xlane.f32.xlu2 %v3256_v8  ;;  %3260 = vmax.xlane.f32.xlu1 %v3259_v58  ;;  %v2013_v58 = vpack.c.bf16 %v6070_v16, %v6070_v16 }
 0x8fb   : > { %3263 = vmax.xlane.f32.xlu2 %v3262_v62 }
 0x916   : > { %v6283_v3 = vpop.f32.mrf.mxu1 }
 0x91e   : > { %v6285_v39 = vpop.f32.mrf.mxu1 }
 0x926   : > { %v3247_v37 = vpop.f32.mrf.mxu1 }
 0x927   : > { %v3248_v60 = vadd.f32 %v4102_v15, %v3247_v37  ;;  %v2734_v37 = vpack.c.bf16 %v6267_v42, %v6267_v42  ;;  %v2010_v42 = vpack.c.bf16 %v6077_v40, %v6077_v40  ;;  %v2733_v40 = vpack.c.bf16 %v6265_v63, %v6265_v63 }
 0x929   : > { %v3271_v22 = vsel %vm1088_vm7, %v3248_v60, -inf }
 0x92a   : > { %3272 = vmax.xlane.f32.xlu0 %v3271_v22  ;;  %v2730_v22 = vpack.c.bf16 %v6274_v35, %v6274_v35  ;;  %v2016_v35 = vpack.c.bf16 %v6097_v21, %v6097_v21 }
 0x92e   : > { %v3250_v31 = vpop.f32.mrf.mxu1 }
 0x92f   : > { %v3251_v30 = vadd.f32 %v4103_v27, %v3250_v31 }
 0x931   : > { %v3274_v50 = vsel %vm1088_vm7, %v3251_v30, -inf }
 0x932   : > { %3275 = vmax.xlane.f32.xlu1 %v3274_v50 }
 0x950   : > { %v3267_v36 = vpop.xlane.xlu0 %3266 }
 0x951   : > { %v3281_v29 = vsub.f32 %v3205_v52, %v3267_v36 }
 0x953   : > { %v3293_v9 = vmul.f32 1.442695, %v3281_v29 }
 0x955   : > { %4446 = vpow2.f32 %v3293_v9 }
 0x958   : > { %v3270_v56 = vpop.xlane.xlu2 %3269 }
 0x959   : > { %v3282_v0 = vsub.f32 %v3208_v48, %v3270_v56 }
 0x95b   : > { %v6289_v41 = vpop.eup %4446  ;;  %v3295_v54 = vmul.f32 1.442695, %v3282_v0 }
 0x95c   : > { %v3313_v45 = vsel %vm1088_vm7, %v6289_v41, 0.0 }
 0x95d   : > { %4448 = vpow2.f32 %v3295_v54  ;;  %3314 = vadd.xlane.f32.xlu1 %v3313_v45 }
 0x95e   : > { %v3255_v20 = vpop.xlane.xlu1 %3254 }
 0x95f   : > { %v3277_v57 = vsub.f32 %v3119_v7, %v3255_v20 }
 0x961   : > { %v3285_v55 = vmul.f32 1.442695, %v3277_v57 }
 0x963   : > { %v6293_v61 = vpop.eup %4448  ;;  %4450 = vpow2.f32 %v3285_v55 }
 0x964   : > { %v3316_v44 = vsel %vm1088_vm7, %v6293_v61, 0.0 }
 0x965   : > { %3317 = vadd.xlane.f32.xlu2 %v3316_v44 }
 0x966   : > { %v3258_v26 = vpop.xlane.xlu2 %3257  ;;  %v3261_v19 = vpop.xlane.xlu1 %3260 }
 0x967   : > { %v3278_v32 = vsub.f32 %v3122_v46, %v3258_v26  ;;  %v3279_v1 = vsub.f32 %v3162_v18, %v3261_v19  ;;  %v2009_v18 = vpack.c.bf16 %v6067_v53, %v6067_v53 }
 0x969   : > { %v6297_v24 = vpop.eup %4450  ;;  %v3287_v15 = vmul.f32 1.442695, %v3278_v32  ;;  %v3289_v51 = vmul.f32 1.442695, %v3279_v1 }
 0x96a   : > { %v3301_v52 = vsel %vm1088_vm7, %v6297_v24, 0.0 }
 0x96b   : > { %4452 = vpow2.f32 %v3287_v15 }
 0x96c   : > { %4454 = vpow2.f32 %v3289_v51 }
 0x96d   : > { %3302 = vadd.xlane.f32.xlu2 %v3301_v52 }
 0x96e   : > { %v3264_v23 = vpop.xlane.xlu2 %3263 }
 0x96f   : > { %v3280_v27 = vsub.f32 %v3165_v59, %v3264_v23  ;;  %v2729_v59 = vpack.c.bf16 %v6271_v2, %v6271_v2  ;;  %v2732_v2 = vpack.c.bf16 %v6276_v6, %v6276_v6 }
 0x971   : > { %v6301_v25 = vpop.eup %4452  ;;  %v3291_v48 = vmul.f32 1.442695, %v3280_v27 }
 0x972   : > { %v6303_v34 = vpop.eup %4454  ;;  %v3304_v43 = vsel %vm1088_vm7, %v6301_v25, 0.0 }
 0x973   : > { %4456 = vpow2.f32 %v3291_v48  ;;  %3305 = vadd.xlane.f32.xlu0 %v3304_v43  ;;  %v3307_v7 = vsel %vm1088_vm7, %v6303_v34, 0.0 }
 0x974   : > { %3308 = vadd.xlane.f32.xlu1 %v3307_v7 }
 0x979   : > { %v6309_v49 = vpop.eup %4456 }
 0x97a   : > { %v3310_v33 = vsel %vm1088_vm7, %v6309_v49, 0.0 }
 0x97b   : > { %3311 = vadd.xlane.f32.xlu2 %v3310_v33 }
 0x987   : > { %3354 = vrot.lane.b32.xlu0 %v5419_v17, %s4736_s22 }
 0x98d   : > { %3404 = vrot.lane.b32.xlu1 %v5443_v13, %s4736_s22 }
 0x995   : > { %3429 = vrot.lane.b32.xlu1 %v5468_v10, %s4736_s22 }
 0x99d   : > { %2025 = vrot.lane.b32.xlu1 %v2009_v18, %s4737_s17  ;;  %v3273_v28 = vpop.xlane.xlu0 %3272 }
 0x99e   : > { %v3283_v46 = vsub.f32 %v3248_v60, %v3273_v28  ;;  %v2015_v60 = vpack.c.bf16 %v6087_v47, %v6087_v47  ;;  %v2011_v47 = vpack.c.bf16 %v6064_v12, %v6064_v12  ;;  %v2735_v12 = vpack.c.bf16 %v6283_v3, %v6283_v3 }
 0x9a0   : > { %v3297_v8 = vmul.f32 1.442695, %v3283_v46 }
 0x9a2   : > { %4458 = vpow2.f32 %v3297_v8 }
 0x9a5   : > { %2033 = vrot.lane.b32.xlu1 %v2013_v58, %s4737_s17  ;;  %v3276_v17 = vpop.xlane.xlu1 %3275 }
 0x9a6   : > { %v3284_v13 = vsub.f32 %v3251_v30, %v3276_v17  ;;  %v2731_v30 = vpack.c.bf16 %v6269_v4, %v6269_v4 }
 0x9a8   : > { %v6325_v11 = vpop.eup %4458  ;;  %v3299_v10 = vmul.f32 1.442695, %v3284_v13 }
 0x9a9   : > { %v3319_v53 = vsel %vm1088_vm7, %v6325_v11, 0.0 }
 0x9aa   : > { %4460 = vpow2.f32 %v3299_v10  ;;  %3320 = vadd.xlane.f32.xlu2 %v3319_v53 }
 0x9ad   : > { %2745 = vrot.lane.b32.xlu1 %v2729_v59, %s4738_s18 }
 0x9b0   : > { %v6332_v62 = vpop.eup %4460 }
 0x9b1   : > { %v3322_v16 = vsel %vm1088_vm7, %v6332_v62, 0.0 }
 0x9b2   : > { %3323 = vadd.xlane.f32.xlu0 %v3322_v16 }
 0x9b5   : > { %2755 = vrot.lane.b32.xlu1 %v2734_v37, %s4738_s18 }
 0x9bd   : > { %2037 = vrot.lane.b32.xlu1 %v2015_v60, %s4737_s17 }
 0x9c2   : > { %3379 = vrot.lane.b32.xlu2 %v5436_v5, %s4736_s22  ;;  %v2014_v5 = vpack.c.bf16 %v6081_v14, %v6081_v14  ;;  %v2012_v14 = vpack.c.bf16 %v6073_v38, %v6073_v38  ;;  %s3651_s22 = sshll.u32 %s3648_s19, 4  ;;  %s3652_s22 = int_to_ptr.hbm [resolvable:$true] %s3651_s22 }
 0x9c5   : > { %2751 = vrot.lane.b32.xlu1 %v2732_v2, %s4738_s18 }
 0x9c6   : > { %2747 = vrot.lane.b32.xlu0 %v2730_v22, %s4738_s18 }
 0x9ca   : > { %2027 = vrot.lane.b32.xlu2 %v2010_v42, %s4737_s17 }
 0x9ce   : > { %2029 = vrot.lane.b32.xlu0 %v2011_v47, %s4737_s17 }
 0x9d0   : > { %v3315_v63 = vpop.xlane.xlu1 %3314 }
 0x9d2   : > { %2035 = vrot.lane.b32.xlu2 %v2014_v5, %s4737_s17 }
 0x9d6   : > { %2039 = vrot.lane.b32.xlu0 %v2016_v35, %s4737_s17 }
 0x9d8   : > { %v3318_v6 = vpop.xlane.xlu2 %3317 }
 0x9da   : > { %2753 = vrot.lane.b32.xlu2 %v2733_v40, %s4738_s18 }
 0x9de   : > { %2757 = vrot.lane.b32.xlu0 %v2735_v12, %s4738_s18 }
 0x9e0   : > { %v3303_v31 = vpop.xlane.xlu2 %3302 }
 0x9e2   : > { %2031 = vrot.lane.b32.xlu2 %v2012_v14, %s4737_s17 }
 0x9e6   : > { %v3306_v21 = vpop.xlane.xlu0 %3305 }
 0x9e7   : > { %4462 = vrcp.f32 %v3306_v21  ;;  %v3309_v45 = vpop.xlane.xlu1 %3308 }
 0x9e8   : > { %4464 = vrcp.f32 %v3303_v31 }
 0x9e9   : > { %4466 = vrcp.f32 %v3318_v6 }
 0x9ea   : > { %2749 = vrot.lane.b32.xlu2 %v2731_v30, %s4738_s18  ;;  %4468 = vrcp.f32 %v3315_v63 }
 0x9ed   : > { %v4463_v50 = vpop.eup %4462 }
 0x9ee   : > { %v4465_v3 = vpop.eup %4464  ;;  %v3334_v36 = vmul.f32 %v4463_v50, %v6301_v25 }
 0x9ef   : > { %v3333_v38 = vmul.f32 %v4465_v3, %v6297_v24  ;;  %v4467_v29 = vpop.eup %4466 }
 0x9f0   : > { %v3342_v9 = vpack.c.bf16 %v3334_v36, %v3334_v36  ;;  %v4469_v56 = vpop.eup %4468  ;;  %v3338_v0 = vmul.f32 %v4467_v29, %v6293_v61 }
 0x9f1   : > { %v3341_v54 = vpack.c.bf16 %v3333_v38, %v3333_v38  ;;  %v3337_v4 = vmul.f32 %v4469_v56, %v6289_v41  ;;  %v3312_v41 = vpop.xlane.xlu2 %3311  ;;  %v2736_v38 = vpack.c.bf16 %v6285_v39, %v6285_v39  ;;  %v4083_v39 = vld [vmem:[#allocation13 + $0x28] sm:$0xff] }
 0x9f2   : > { %v3352_v20 = vunpack.c.l.b16 %v3342_v9  ;;  %v3346_v57 = vpack.c.bf16 %v3338_v0, %v3338_v0  ;;  %4470 = vrcp.f32 %v3312_v41 }
 0x9f3   : > { %v3351_v55 = vunpack.c.l.b16 %v3341_v54  ;;  %v3345_v26 = vpack.c.bf16 %v3337_v4, %v3337_v4  ;;  %4472 = vrcp.f32 %v3309_v45 }
 0x9f4   : > { %v3402_v32 = vunpack.c.l.b16 %v3346_v57 }
 0x9f5   : > { %v3353_v19 = vpack.c.b16 %v3352_v20, %v3351_v55  ;;  %v3401_v1 = vunpack.c.l.b16 %v3345_v26  ;;  %v4085_v55 = vld [vmem:[#allocation13 + $0x38] sm:$0xff]  ;;  %v4082_v26 = vld [vmem:[#allocation13 + $0x20] sm:$0xff] }
 0x9f7   : > { %v3403_v15 = vpack.c.b16 %v3402_v32, %v3401_v1  ;;  %v4080_v32 = vld [vmem:[#allocation13 + $0x10] sm:$0xff] }
 0x9f8   : > { %v4471_v23 = vpop.eup %4470 }
 0x9f9   : > { %v3355_v44 = vpop.permute.xlu0 %3354  ;;  %v4473_v27 = vpop.eup %4472  ;;  %v3336_v25 = vmul.f32 %v4471_v23, %v6309_v49 }
 0x9fa   : > { %3367 = vmatpush.bf16.msrb.mxu2 %v3355_v44  ;;  %v3335_v48 = vmul.f32 %v4473_v27, %v6303_v34  ;;  %v4084_v44 = vld [vmem:[#allocation13 + $0x30] sm:$0xff] }
 0x9fb   : > { %v3344_v7 = vpack.c.bf16 %v3336_v25, %v3336_v25 }
 0x9fc   : > { %v3343_v18 = vpack.c.bf16 %v3335_v48, %v3335_v48 }
 0x9fd   : > { %3986 = vmatmul.msk.bf16.vlgmr.msrb.gmra.mxu2 %vm1088_vm7, %v3353_v19  ;;  %v3377_v28 = vunpack.c.l.b16 %v3344_v7  ;;  %v4081_v19 = vld [vmem:[#allocation13 + $0x18] sm:$0xff] }
 0x9fe   : > { %v3376_v46 = vunpack.c.l.b16 %v3343_v18  ;;  %3598 = vmatpush.bf16.msra.mxu2 %v4085_v55 }
 0x9ff   : > { %v3405_v24 = vpop.permute.xlu1 %3404 }
 0xa00   : > { %3417 = vmatpush.bf16.msra.mxu0 %v3405_v24  ;;  %v3378_v13 = vpack.c.b16 %v3377_v28, %v3376_v46  ;;  %v4079_v24 = vld [vmem:[#allocation13 + $0x8] sm:$0xff]  ;;  %v4221_v28 = vld [vmem:[%s6457_s6] ss:$0 sm:$0xff] }
 0xa02   : > { %3599 = vmatpush.bf16.msra.mxu2 %v4084_v44 }
 0xa03   : > { %3988 = vmatmul.msk.bf16.vlgmr.msra.gmra.mxu0 %vm1088_vm7, %v3403_v15  ;;  %v4078_v15 = vld [vmem:[#allocation13] sm:$0xff] }
 0xa06   : > { %3600 = vmatpush.bf16.msra.mxu2 %v4083_v39 }
 0xa07   : > { %v3430_v61 = vpop.permute.xlu1 %3429 }
 0xa08   : > { %3442 = vmatpush.bf16.msra.mxu1 %v3430_v61 }
 0xa0a   : > { %3601 = vmatpush.bf16.msra.mxu2 %v4082_v26 }
 0xa0e   : > { %3602 = vmatpush.bf16.msra.mxu2 %v4081_v19 }
 0xa0f   : > { %v2026_v51 = vpop.permute.xlu1 %2025 }
 0xa10   : > { %2050 = vst.msk [vmem:[#allocation2] sm:$0xf] %vm2049_vm0, %v2026_v51 }
 0xa12   : > { %3603 = vmatpush.bf16.msra.mxu2 %v4080_v32 }
 0xa16   : > { %3604 = vmatpush.bf16.msra.mxu2 %v4079_v24 }
 0xa17   : > { %v2034_v52 = vpop.permute.xlu1 %2033 }
 0xa18   : > { %2054 = vst.msk [vmem:[#allocation2 + $0x10] sm:$0xf] %vm2049_vm0, %v2034_v52 }
 0xa1a   : > { %3605 = vmatpush.bf16.msra.mxu2 %v4078_v15 }
 0xa1d   : > { %v3321_v43 = vpop.xlane.xlu2 %3320 }
 0xa1e   : > { %4474 = vrcp.f32 %v3321_v43 }
 0xa1f   : > { %v2746_v33 = vpop.permute.xlu1 %2745 }
 0xa20   : > { %2770 = vst.msk [vmem:[#allocation2] sm:$0xf] %vm2769_vm9, %v2746_v33 }
 0xa24   : > { %v4475_v17 = vpop.eup %4474 }
 0xa25   : > { %v3380_v8 = vpop.permute.xlu2 %3379  ;;  %v3324_v58 = vpop.xlane.xlu0 %3323  ;;  %v3339_v49 = vmul.f32 %v4475_v17, %v6325_v11 }
 0xa26   : > { %4476 = vrcp.f32 %v3324_v58  ;;  %3392 = vmatpush.bf16.msra.mxu3 %v3380_v8 }
 0xa27   : > { %v2756_v10 = vpop.permute.xlu1 %2755  ;;  %v3347_v53 = vpack.c.bf16 %v3339_v49, %v3339_v49 }
 0xa29   : > { %3987 = vmatmul.msk.bf16.vlgmr.msra.gmra.mxu3 %vm1088_vm7, %v3378_v13  ;;  %v3426_v2 = vunpack.c.l.b16 %v3347_v53 }
 0xa2a   : > { %4104 = vmatpush.bf16.msrb.mxu3 %v4085_v55 }
 0xa2c   : > { %v4477_v34 = vpop.eup %4476 }
 0xa2d   : > { %v3340_v59 = vmul.f32 %v4477_v34, %v6332_v62  ;;  %v2028_v16 = vpop.permute.xlu2 %2027 }
 0xa2e   : > { %2051 = vst.msk [vmem:[#allocation2 + $0x4] sm:$0xf] %vm2049_vm0, %v2028_v16  ;;  %4105 = vmatpush.bf16.msrb.mxu3 %v4084_v44 }
 0xa2f   : > { %v3348_v37 = vpack.c.bf16 %v3340_v59, %v3340_v59  ;;  %v2038_v60 = vpop.permute.xlu1 %2037 }
 0xa30   : > { %2056 = vst.msk [vmem:[#allocation2 + $0x18] sm:$0xf] %vm2049_vm0, %v2038_v60 }
 0xa31   : > { %v3427_v22 = vunpack.c.l.b16 %v3348_v37 }
 0xa32   : > { %4106 = vmatpush.bf16.msrb.mxu3 %v4083_v39 }
 0xa33   : > { %v3428_v42 = vpack.c.b16 %v3427_v22, %v3426_v2 }
 0xa35   : > { %v2036_v47 = vpop.permute.xlu2 %2035  ;;  %3989 = vmatmul.msk.bf16.vlgmr.msra.gmra.mxu1 %vm1088_vm7, %v3428_v42  ;;  %vm3489_vm7 = vcmask 257216  }
 0xa36   : > { %2055 = vst.msk [vmem:[#allocation2 + $0x14] sm:$0xf] %vm2049_vm0, %v2036_v47  ;;  %4107 = vmatpush.bf16.msrb.mxu3 %v4082_v26 }
 0xa37   : > { %2775 = vst.msk [vmem:[#allocation2 + $0x14] sm:$0xf] %vm2769_vm9, %v2756_v10  ;;  %v2752_v40 = vpop.permute.xlu1 %2751 }
 0xa38   : > { %v2748_v11 = vpop.permute.xlu0 %2747 }
 0xa39   : > { %2771 = vst.msk [vmem:[#allocation2 + $0x4] sm:$0xf] %vm2769_vm9, %v2748_v11 }
 0xa3a   : > { %4108 = vmatpush.bf16.msrb.mxu3 %v4081_v19 }
 0xa3d   : > { %v2754_v62 = vpop.permute.xlu2 %2753 }
 0xa3e   : > { %2774 = vst.msk [vmem:[#allocation2 + $0x10] sm:$0xf] %vm2769_vm9, %v2754_v62  ;;  %4109 = vmatpush.bf16.msrb.mxu3 %v4080_v32 }
 0xa40   : > { %v2030_v5 = vpop.permute.xlu0 %2029 }
 0xa41   : > { %2052 = vst.msk [vmem:[#allocation2 + $0x8] sm:$0xf] %vm2049_vm0, %v2030_v5 }
 0xa42   : > { %4110 = vmatpush.bf16.msrb.mxu3 %v4079_v24 }
 0xa45   : > { %v2032_v35 = vpop.permute.xlu2 %2031 }
 0xa46   : > { %2053 = vst.msk [vmem:[#allocation2 + $0xc] sm:$0xf] %vm2049_vm0, %v2032_v35  ;;  %4111 = vmatpush.bf16.msrb.mxu3 %v4078_v15 }
 0xa47   : > { %2773 = vst.msk [vmem:[#allocation2 + $0xc] sm:$0xf] %vm2769_vm9, %v2752_v40 }
 0xa48   : > { %v2040_v6 = vpop.permute.xlu0 %2039 }
 0xa49   : > { %2057 = vst.msk [vmem:[#allocation2 + $0x1c] sm:$0xf] %vm2049_vm0, %v2040_v6 }
 0xa4d   : > { %v2750_v12 = vpop.permute.xlu2 %2749 }
 0xa4e   : > { %2772 = vst.msk [vmem:[#allocation2 + $0x8] sm:$0xf] %vm2769_vm9, %v2750_v12 }
 0xa50   : > { %v2758_v14 = vpop.permute.xlu0 %2757 }
 0xa51   : > { %2776 = vst.msk [vmem:[#allocation2 + $0x18] sm:$0xf] %vm2769_vm9, %v2758_v14 }
 0xa80   : > { %v3419_v31 = vpop.f32.mrf.mxu0  ;;  %v3369_v30 = vpop.f32.mrf.mxu2 }
 0xa81   : > { %v3453_v21 = vpack.c.bf16 %v3419_v31, %v3419_v31  ;;  %v3449_v50 = vpack.c.bf16 %v3369_v30, %v3369_v30 }
 0xa83   : > { %3473 = vrot.lane.b32.xlu2 %v3453_v21, %s4739_s11 }
 0xa88   : > { %v3421_v63 = vpop.f32.mrf.mxu0  ;;  %v3371_v36 = vpop.f32.mrf.mxu2 }
 0xa89   : > { %v3454_v3 = vpack.c.bf16 %v3421_v63, %v3421_v63  ;;  %v3450_v29 = vpack.c.bf16 %v3371_v36, %v3371_v36 }
 0xa8b   : > { %3475 = vrot.lane.b32.xlu1 %v3454_v3, %s4739_s11  ;;  %3465 = vrot.lane.b32.xlu2 %v3449_v50, %s4739_s11 }
 0xa93   : > { %2759 = vrot.lane.b32.xlu2 %v2736_v38, %s4738_s18  ;;  %3467 = vrot.lane.b32.xlu1 %v3450_v29, %s4739_s11  ;;  %s4658_s18 = sshra.s32 %s3652_s22, 4  ;;  %s4659_s18 = int_to_ptr.hbm [resolvable:$true] %s4658_s18 }
 0xa94   : > { %s4660_s8 = scalar_lea.hbm %s4659_s18, 64  ;;  %p4665_p12 = scmp.lt.s32.totalorder %s4659_s18, %s6458_s7 }
 0xa95   : > { %p4661_p1 = scmp.ne.s32.totalorder %s4659_s18, %s4660_s8  ;;  %p4666_p8 = scmp.lt.s32.totalorder %s4664_s21, %s4660_s8 }
 0xa97   : > { %p4662_p3 = pnand %p4661_p1, %p4873_p13  ;;  %p4667_p7 = por %p4666_p8, %p4665_p12 }
 0xa99   : > { %p4663_p5 = pneg %p4662_p3 }
 0xa9b   : > { %p4668_p9 = pnand %p4667_p7, %p4663_p5 }
 0xaac   : > { %v3394_v9 = vpop.f32.mrf.mxu3 }
 0xaad   : > { %v3451_v56 = vpack.c.bf16 %v3394_v9, %v3394_v9 }
 0xaaf   : > { %3469 = vrot.lane.b32.xlu1 %v3451_v56, %s4739_s11 }
 0xab2   : > { %v3444_v0 = vpop.f32.mrf.mxu1 }
 0xab3   : > { %v3455_v54 = vpack.c.bf16 %v3444_v0, %v3444_v0 }
 0xab4   : > { %v3396_v4 = vpop.f32.mrf.mxu3 }
 0xab5   : > { %v3452_v45 = vpack.c.bf16 %v3396_v4, %v3396_v4  ;;  %3477 = vrot.lane.b32.xlu2 %v3455_v54, %s4739_s11 }
 0xab7   : > { %3471 = vrot.lane.b32.xlu0 %v3452_v45, %s4739_s11 }
 0xaba   : > { %v3446_v20 = vpop.f32.mrf.mxu1 }
 0xabb   : > { %v3456_v57 = vpack.c.bf16 %v3446_v20, %v3446_v20 }
 0xabd   : > { %3479 = vrot.lane.b32.xlu1 %v3456_v57, %s4739_s11 }
 0xadd   : > { %v3474_v1 = vpop.permute.xlu2 %3473 }
 0xade   : > { %3494 = vst.msk [vmem:[#allocation2 + $0x10] sm:$0xf] %vm3489_vm7, %v3474_v1 }
 0xae5   : > { %v3466_v61 = vpop.permute.xlu2 %3465 }
 0xae6   : > { %3490 = vst.msk [vmem:[#allocation2] sm:$0xf] %vm3489_vm7, %v3466_v61 }
 0xaed   : > { %v2760_v41 = vpop.permute.xlu2 %2759 }
 0xaee   : > { %2777 = vst.msk [vmem:[#allocation2 + $0x1c] sm:$0xf] %vm2769_vm9, %v2760_v41 }
 0xafd   : > { %v3476_v51 = vpop.permute.xlu1 %3475 }
 0xafe   : > { %3495 = vst.msk [vmem:[#allocation2 + $0x14] sm:$0xf] %vm3489_vm7, %v3476_v51 }
 0xb05   : > { %v3468_v52 = vpop.permute.xlu1 %3467  ;;  %v4076_v23 = vld [vmem:[#allocation2 + $0x10] sm:$0xff] }
 0xb06   : > { %3491 = vst.msk [vmem:[#allocation2 + $0x4] sm:$0xf] %vm3489_vm7, %v3468_v52  ;;  %3616 = vmatmul.bf16.vlgmr.msrb.gmra.mxu3 %v4076_v23 }
 0xb0d   : > { %v4074_v27 = vld [vmem:[#allocation2] sm:$0xff] }
 0xb0e   : > { %3606 = vmatmul.bf16.vlgmr.msra.gmra.mxu2 %v4074_v27 }
 0xb0f   : > { %v3478_v25 = vpop.permute.xlu2 %3477 }
 0xb10   : > { %3496 = vst.msk [vmem:[#allocation2 + $0x18] sm:$0xf] %vm3489_vm7, %v3478_v25 }
 0xb21   : > { %v3470_v48 = vpop.permute.xlu1 %3469 }
 0xb22   : > { %3492 = vst.msk [vmem:[#allocation2 + $0x8] sm:$0xf] %vm3489_vm7, %v3470_v48 }
 0xb29   : > { %v3472_v43 = vpop.permute.xlu0 %3471 }
 0xb2a   : > { %3493 = vst.msk [vmem:[#allocation2 + $0xc] sm:$0xf] %vm3489_vm7, %v3472_v43 }
 0xb2f   : > { %v3480_v7 = vpop.permute.xlu1 %3479 }
 0xb30   : > { %3497 = vst.msk [vmem:[#allocation2 + $0x1c] sm:$0xf] %vm3489_vm7, %v3480_v7 }
 0xb31   : > { %v4075_v33 = vld [vmem:[#allocation2 + $0x8] sm:$0xff] }
 0xb32   : > { %3611 = vmatmul.bf16.gmra.mxu2 %v4075_v33 }
 0xb37   : > { %v4077_v18 = vld [vmem:[#allocation2 + $0x18] sm:$0xff] }
 0xb38   : > { %3621 = vmatmul.bf16.gmra.mxu3 %v4077_v18 }
 0xb89   : > { %v3617_v46 = vpop.f32.mrf.mxu3 }
 0xb8a   : > { %v3618_v8 = vadd.f32 %v4221_v28, %v3617_v46 }
 0xb8c   : > { %3631 = vst [vmem:[%s377_s16 + $0x20] sm:$0xff] %v3618_v8 }
 0xb91   : > { %v3607_v58 = vpop.f32.mrf.mxu2  ;;  %v3619_v17 = vpop.f32.mrf.mxu3 }
 0xb92   : > { %v3608_v13 = vadd.f32 %v4221_v28, %v3607_v58  ;;  %v3620_v10 = vadd.f32 %v4221_v28, %v3619_v17 }
 0xb94   : > { %3627 = vst [vmem:[%s377_s16] sm:$0xff] %v3608_v13 }
 0xb95   : > { %3632 = vst [vmem:[%s377_s16 + $0x28] sm:$0xff] %v3620_v10 }
 0xb99   : > { %v3609_v49 = vpop.f32.mrf.mxu2 }
 0xb9a   : > { %v3610_v34 = vadd.f32 %v4221_v28, %v3609_v49 }
 0xb9c   : > { %3628 = vst [vmem:[%s377_s16 + $0x8] sm:$0xff] %v3610_v34 }
 0xbb5   : > { %v3612_v53 = vpop.f32.mrf.mxu2 }
 0xbb6   : > { %v3613_v59 = vadd.f32 %v4221_v28, %v3612_v53 }
 0xbb8   : > { %3629 = vst [vmem:[%s377_s16 + $0x10] sm:$0xff] %v3613_v59 }
 0xbbb   : > { %v3622_v16 = vpop.f32.mrf.mxu3 }
 0xbbc   : > { %v3623_v37 = vadd.f32 %v4221_v28, %v3622_v16 }
 0xbbd   : > { %v3614_v60 = vpop.f32.mrf.mxu2 }
 0xbbe   : > { %3633 = vst [vmem:[%s377_s16 + $0x30] sm:$0xff] %v3623_v37  ;;  %v3615_v2 = vadd.f32 %v4221_v28, %v3614_v60 }
 0xbc0   : > { %3630 = vst [vmem:[%s377_s16 + $0x18] sm:$0xff] %v3615_v2 }
 0xbc3   : > { %v3624_v22 = vpop.f32.mrf.mxu3 }
 0xbc4   : > { %v3625_v42 = vadd.f32 %v4221_v28, %v3624_v22 }
 0xbc6   : > { %3634 = vst [vmem:[%s377_s16 + $0x38] sm:$0xff] %v3625_v42 }
 0xbc7   : > { %4671 = shalt.err (!%p4668_p9)
}
 0xbc8   : > { %s4740_s14 = smov 128  }
 0xbc9   : > { %4134 = dma.vmem_to_hbm [thread:$0]  (%p4873_p13), %s3650_s29, 1024, %s3652_s22, %s3636_s13, %s4740_s14, %s4740_s14, %s4737_s17  }
 0xbca PF: > { %s3666_s16 = sand.u32 1, %s4710_s24   ;;  %p6545_p10 = scmp.ge.s32.totalorder %s4722_s27, 2 }
 0xbcb   : > { %s3667_s20 = scalar_lea.sflag [#allocation5], %s3666_s16 }
 0xbcc   : > { %p4157_p11 = pnand %p6545_p10, %p4878_p4 }
 0xbce   : > { %p4158_p0 = pneg %p4157_p11 }
 0xbd0   : > { %4705 = dma.done.wait (%p4158_p0), %s3667_s20, 1024  }
 0xbd1   : > { %4707 = vsyncadd (%p4158_p0), %s3667_s20, 4294966272  ;;  %p23_p2 = scmp.ge.s32.totalorder %s4853_s23, 4   ;;  %s6546_s24 = smov %s4714_s25 }
 0xbd2   : > { %s6547_s25 = smov %s4718_s26  ;;  %s6548_s26 = smov %s4865_s10 }
 0xbd3   : > { %s6549_s27 = smov %s4853_s23  ;;  %25 = sbr.rel (!%p23_p2) target bundleno = 10 (0xa), region = 117 }
 0xbd8   :  { %3673 = vsyncpa [#allocation4], 1 }
 0xbd9   :  { %3675 = vsyncpa [#allocation4 + $0x1], 1 }
 0xbda   :  { %3676 = vsyncpa [#allocation8], 1 }
 0xbdb   :  { %3677 = vsyncpa [#allocation12], 1 }
 0xbdc   :  { %3678 = vsyncpa [#allocation5], 1 }
 0xbdd   :  { %3680 = vsyncpa [#allocation5 + $0x1], 1 }
 0xbde   :  { %3681 = vsyncpa [#allocation6], 1 }
 0xbdf   :  { %3683 = vsyncpa [#allocation6 + $0x1], 1 }

// kernel: tpu_custom_call.1
= control target key start
LH: loop header
LB: loop body
LE: loop exit
PB: predicated region body
PF: predicated region fallthrough
CT: control target
= control target key end

     0   :  { %s6451_s0 = inlined_call_operand.hbm [shape: bf16[8,16,128], index: 0, kind: input, shape index: {}]   ;;  %s6452_s1 = inlined_call_operand.hbm [shape: bf16[128,384], index: 1, kind: input, shape index: {}]   ;;  %s6453_s2 = inlined_call_operand.hbm [shape: f32[1,384], index: 2, kind: input, shape index: {}]   ;;  %s6454_s3 = inlined_call_operand.vmem [shape: f32[4], index: 3, kind: input, shape index: {}]   ;;  %s6455_s4 = inlined_call_operand.hbm [shape: bf16[4,16,16], index: 4, kind: input, shape index: {}]   ;;  %s6456_s5 = inlined_call_operand.hbm [shape: bf16[128,128], index: 5, kind: input, shape index: {}]   ;;  %s6457_s6 = inlined_call_operand.vmem [shape: f32[1,128], index: 6, kind: input, shape index: {}]   ;;  %s6458_s7 = inlined_call_operand.hbm [shape: f32[8,16,128], index: 7, kind: output, shape index: {}]  }
   0x1   :  { %6478 = sst [smem:[#allocation38_spill]] %s6452_s1 }
   0x2   :  { %12 = vsyncpa [#allocation4], 0 }
   0x3   :  { %14 = vsyncpa [#allocation4 + $0x1], 0 }
   0x4   :  { %15 = vsyncpa [#allocation8], 0 }
   0x5   :  { %16 = vsyncpa [#allocation6], 0 }
   0x6   :  { %17 = vsyncpa [#allocation12], 0 }
   0x7   :  { %18 = vsyncpa [#allocation5], 0 }
   0x8   :  { %20 = vsyncpa [#allocation5 + $0x1], 0  ;;  %s4781_s24 = smov 0   ;;  %s4783_s25 = smov 0  }
   0x9   :  { %s4785_s26 = smov 0   ;;  %s4787_s27 = smov 0  }
   0xa LB: > { %s6479_s1 = sld [smem:[#allocation38_spill]]  ;;  %s4805_s8 = sadd.s32 4294967295, %s4722_s27   ;;  %s4722_s27 = sphi %s4787_s27, %s6549_s27   ;;  %s4718_s26 = sphi %s4785_s26, %s6548_s26   ;;  %s4714_s25 = sphi %s4783_s25, %s6547_s25   ;;  %s4710_s24 = sphi %s4781_s24, %s6546_s24  }
   0xb   : > { %p3776_p0 = scmp.ge.s32.totalorder %s4722_s27, 1  ;;  %p47_p1 = scmp.eq.s32.totalorder %s4805_s8, 0 }
   0xc   : > { %p209_p2 = scmp.lt.s32.totalorder %s4722_s27, 3  ;;  %s4724_s10 = smov [#allocation7]  }
   0xd   : > { %s222_s11 = sshll.u32 %s4724_s10, 4  ;;  %s256_s14 = sshll.u32 %s6455_s4, 4  ;;  %s223_s11 = int_to_ptr.vmem [resolvable:$true] %s222_s11  ;;  %s257_s14 = int_to_ptr.hbm [resolvable:$true] %s256_s14 }
   0xe   : > { %p4810_p3 = pnand %p3776_p0, %p209_p2  ;;  %s4725_s16 = smov [#allocation11]  }
   0xf   : > { %s258_s17 = sshll.u32 %s4725_s16, 4  ;;  %s4726_s18 = smov 192   ;;  %s259_s17 = int_to_ptr.vmem [resolvable:$true] %s258_s17 }
  0x10   : > { %s220_s30 = sshll.u32 %s6479_s1, 4  ;;  %p4136_p4 = pneg %p4810_p3  ;;  %s221_s30 = int_to_ptr.hbm [resolvable:$true] %s220_s30 }
  0x11   : > { %s4727_s19 = smov 12   ;;  %s6459_s20 = smov 64  }
  0x12   : > { %p4822_p6 = pnand %p4136_p4, %p47_p1  ;;  %s6460_s21 = smov 4  }
  0x13   : > { %s235_s28 = sshll.u32 %s6453_s2, 4  ;;  %s4730_s29 = smov [#allocation9]   ;;  %s236_s28 = int_to_ptr.hbm [resolvable:$true] %s235_s28 }
  0x14   : > { %4139 = dma.hbm_to_vmem [thread:$0]  (!%p4822_p6), %s221_s30, 3072, %s223_s11, [#allocation8], %s4726_s18, %s4726_s18, %s4727_s19  }
  0x15   : > { %4148 = dma.hbm_to_vmem [thread:$0]  (!%p4822_p6), %s257_s14, 512, %s259_s17, [#allocation12], %s6459_s20, %s6459_s20, %s6460_s21  }
  0x16   : > { %s237_s10 = sshll.u32 %s4730_s29, 4  ;;  %s247_s12 = sshll.u32 %s6454_s3, 4  ;;  %s238_s10 = int_to_ptr.vmem [resolvable:$true] %s237_s10  ;;  %s248_s12 = int_to_ptr.vmem [resolvable:$true] %s247_s12 }
  0x17   : > { %4142 = dma.hbm_to_vmem [thread:$0]  (!%p4822_p6), %s236_s28, 48, %s238_s10, [#allocation8]  }
  0x18   : > { %s4731_s13 = smov [#allocation10]   ;;  %s270_s17 = sshll.u32 %s6456_s5, 4  ;;  %s271_s17 = int_to_ptr.hbm [resolvable:$true] %s270_s17 }
  0x19   : > { %4145 = dma.vmem_to_smem (!%p4822_p6), %s248_s12, 16, %s4731_s13, [#allocation6]  }
  0x1a   : > { %s4732_s18 = smov [#allocation13]   ;;  %s3775_s22 = sadd.s32 4294967294, %s4722_s27  }
  0x1b   : > { %s272_s19 = sshll.u32 %s4732_s18, 4  ;;  %s4853_s23 = sadd.s32 1, %s4722_s27   ;;  %s273_s19 = int_to_ptr.vmem [resolvable:$true] %s272_s19 }
  0x1c   : > { %4151 = dma.hbm_to_vmem [thread:$0]  (!%p4822_p6), %s271_s17, 1024, %s273_s19, [#allocation12], %s6459_s20, %s6459_s20, %s6460_s21  }
  0x1d   : > { %s33_s28 = sadd.s32 1, %s4718_s26  ;;  %s30_s29 = ssub.s32 %s4722_s27, %s4853_s23 }
  0x1e   : > { %p40_p7 = scmp.ne.s32.totalorder %s4718_s26, %s4714_s25  ;;  %p31_p8 = scmp.eq.s32.totalorder %s30_s29, 0 }
  0x1f   : > { %p41_p9 = scmp.eq.s32.totalorder %s4722_s27, 0  ;;  %p46_p10 = scmp.ne.s32.totalorder %s4714_s25, %s4710_s24 }
  0x20   : > { %p196_p11 = scmp.eq.s32.totalorder %s4805_s8, 1  ;;  %p202_p0 = scmp.eq.s32.totalorder %s3775_s22, 1 }
  0x21   : > { %s4865_s10 = scalar_select %p31_p8, %s4718_s26, %s33_s28  }
  0x22   : > { %p4869_p12 = por %p47_p1, %p46_p10  ;;  %p4873_p13 = por %p196_p11, %p40_p7 }
  0x23   : > { %p42_p2 = por %p41_p9, %p40_p7  ;;  %s289_s11 = sand.u32 1, %s4718_s26  }
  0x24   : > { %p4878_p4 = por %p202_p0, %p46_p10  ;;  %p4165_p6 = scmp.lt.s32.totalorder %s4722_s27, 2 }
  0x25   : > { %s3783_s13 = sshll.u32 %s289_s11, 5  ;;  %s4045_s14 = sshll.u32 %s4722_s27, 5 }
  0x26   : > { %s299_s18 = scalar_lea.hbm %s6451_s0, %s4045_s14  ;;  %s293_s28 = scalar_lea.vmem [#allocation3], %s3783_s13 }
  0x27   : > { %s300_s19 = sshll.u32 %s299_s18, 4  ;;  %s302_s29 = sshll.u32 %s293_s28, 4  ;;  %s301_s19 = int_to_ptr.hbm [resolvable:$true] %s300_s19  ;;  %s303_s29 = int_to_ptr.vmem [resolvable:$true] %s302_s29 }
  0x28   : > { %p4887_p8 = pnand %p4165_p6, %p42_p2  ;;  %s290_s20 = scalar_lea.sflag [#allocation4], %s289_s11 }
  0x29   : > { %s4614_s21 = sshra.s32 %s301_s19, 4  ;;  %s4621_s13 = scalar_lea.hbm %s6451_s0, 64  ;;  %s4615_s21 = int_to_ptr.hbm [resolvable:$true] %s4614_s21 }
  0x2a   : > { %s4616_s1 = scalar_lea.hbm %s4615_s21, 32  ;;  %p4618_p9 = pneg %p4887_p8 }
  0x2b   : > { %p4617_p7 = scmp.ne.s32.totalorder %s4615_s21, %s4616_s1  ;;  %p4622_p0 = scmp.lt.s32.totalorder %s4615_s21, %s6451_s0 }
  0x2c   : > { %p4623_p2 = scmp.lt.s32.totalorder %s4621_s13, %s4616_s1 }
  0x2d   : > { %p4619_p10 = pnand %p4618_p9, %p4617_p7 }
  0x2e   : > { %p4624_p6 = por %p4623_p2, %p4622_p0 }
  0x2f   : > { %p4620_p11 = pneg %p4619_p10 }
  0x31   : > { %p4625_p5 = pnand %p4624_p6, %p4620_p11 }
  0x33   : > { %4628 = shalt.err (!%p4625_p5)
}
  0x34   : > { %s6486_s11 = smov 4   ;;  %s6487_s28 = smov 64  }
  0x35   : > { %4155 = dma.hbm_to_vmem [thread:$0]  (!%p4887_p8), %s301_s19, 512, %s303_s29, %s290_s20, %s6487_s28, %s6487_s28, %s6486_s11  }
  0x36   : > { %314 = sbr.rel (%p4810_p3) target bundleno = 3018 (0xbca), region = 48 }
  0x3b   : > { %s4907_s14 = sand.u32 1, %s4714_s25  }
  0x3c   : > { %s3788_s21 = sshll.u32 %s4907_s14, 5  ;;  %s317_s1 = scalar_lea.sflag [#allocation4], %s4907_s14 }
  0x3d   : > { %s4911_s16 = scalar_lea.vmem [#allocation3], %s3788_s21 }
  0x3e   : > { %4689 = dma.done.wait (%p4869_p12), %s317_s1, 512  }
  0x3f   : > { %4691 = vsyncadd (%p4869_p12), %s317_s1, 4294966784 }
  0x40   : > { %4693 = dma.done.wait (%p47_p1), [#allocation8], 3120  }
  0x41   : > { %4695 = vsyncadd (%p47_p1), [#allocation8], 4294964176 }
  0x42   : > { %4697 = dma.done.wait (%p47_p1), [#allocation6], 16  }
  0x43   : > { %4699 = vsyncadd (%p47_p1), [#allocation6], 4294967280 }
  0x44   : > { %4701 = dma.done.wait (%p47_p1), [#allocation12], 1536  }
  0x45   : > { %4703 = vsyncadd (%p47_p1), [#allocation12], 4294965760 }
  0x46   : > { %351 = sfence }
  0x47   : > { %v3897_v0 = vld [vmem:[#allocation7 + $0xa8] sm:$0xf]  ;;  %v4072_v1 = vld [vmem:[#allocation7 + $0xb0] sm:$0xf0]  ;;  %v4071_v2 = vld [vmem:[#allocation7 + $0xac] sm:$0xf] }
  0x48   : > { %v3898_v3 = vor.u32 %v4072_v1, %v3897_v0  ;;  %v3899_v4 = vld [vmem:[#allocation7 + $0xb4] sm:$0xf0]  ;;  %v3885_v5 = vld [vmem:[#allocation7 + $0x90] sm:$0xf]  ;;  %v4069_v6 = vld [vmem:[#allocation7 + $0x98] sm:$0xf0] }
  0x49   : > { %v3902_v7 = vor.u32 %v4071_v2, %v3899_v4  ;;  %v4068_v8 = vld [vmem:[#allocation7 + $0x94] sm:$0xf]  ;;  %v3887_v9 = vld [vmem:[#allocation7 + $0x9c] sm:$0xf0]  ;;  %v3886_v10 = vor.u32 %v4069_v6, %v3885_v5  ;;  %v3873_v12 = vld [vmem:[#allocation7 + $0x78] sm:$0xf] }
  0x4a   : > { %581 = vmatpush.bf16.msra.mxu0 %v3898_v3  ;;  %v3890_v11 = vor.u32 %v4068_v8, %v3887_v9  ;;  %v4066_v13 = vld [vmem:[#allocation7 + $0x80] sm:$0xf0]  ;;  %v4065_v14 = vld [vmem:[#allocation7 + $0x7c] sm:$0xf]  ;;  %v3875_v15 = vld [vmem:[#allocation7 + $0x84] sm:$0xf0] }
  0x4b   : > { %610 = vmatpush.bf16.msra.mxu1 %v3902_v7  ;;  %v3874_v16 = vor.u32 %v4066_v13, %v3873_v12  ;;  %v3878_v17 = vor.u32 %v4065_v14, %v3875_v15  ;;  %v3861_v18 = vld [vmem:[#allocation7 + $0x60] sm:$0xf]  ;;  %v4063_v19 = vld [vmem:[#allocation7 + $0x68] sm:$0xf0]  ;;  %v4062_v20 = vld [vmem:[#allocation7 + $0x64] sm:$0xf] }
  0x4c   : > { %v3863_v21 = vld [vmem:[#allocation7 + $0x6c] sm:$0xf0]  ;;  %v3862_v22 = vor.u32 %v4063_v19, %v3861_v18  ;;  %v3849_v24 = vld [vmem:[#allocation7 + $0x48] sm:$0xf]  ;;  %v4060_v25 = vld [vmem:[#allocation7 + $0x50] sm:$0xf0] }
  0x4d   : > { %v3866_v23 = vor.u32 %v4062_v20, %v3863_v21  ;;  %v4059_v26 = vld [vmem:[#allocation7 + $0x4c] sm:$0xf]  ;;  %v3851_v27 = vld [vmem:[#allocation7 + $0x54] sm:$0xf0]  ;;  %v3850_v28 = vor.u32 %v4060_v25, %v3849_v24  ;;  %v3837_v30 = vld [vmem:[#allocation7 + $0x30] sm:$0xf] }
  0x4e   : > { %582 = vmatpush.bf16.msra.mxu0 %v3886_v10  ;;  %v3854_v29 = vor.u32 %v4059_v26, %v3851_v27  ;;  %v4057_v31 = vld [vmem:[#allocation7 + $0x38] sm:$0xf0]  ;;  %v4056_v32 = vld [vmem:[#allocation7 + $0x34] sm:$0xf]  ;;  %v3839_v33 = vld [vmem:[#allocation7 + $0x3c] sm:$0xf0] }
  0x4f   : > { %611 = vmatpush.bf16.msra.mxu1 %v3890_v11  ;;  %v3838_v34 = vor.u32 %v4057_v31, %v3837_v30  ;;  %v3842_v35 = vor.u32 %v4056_v32, %v3839_v33  ;;  %v3825_v36 = vld [vmem:[#allocation7 + $0x18] sm:$0xf]  ;;  %v4054_v37 = vld [vmem:[#allocation7 + $0x20] sm:$0xf0]  ;;  %v4053_v38 = vld [vmem:[#allocation7 + $0x1c] sm:$0xf] }
  0x50   : > { %v3827_v39 = vld [vmem:[#allocation7 + $0x24] sm:$0xf0]  ;;  %v3826_v40 = vor.u32 %v4054_v37, %v3825_v36  ;;  %v3813_v42 = vld [vmem:[#allocation7] sm:$0xf]  ;;  %v4051_v43 = vld [vmem:[#allocation7 + $0x8] sm:$0xf0] }
  0x51   : > { %v3830_v41 = vor.u32 %v4053_v38, %v3827_v39  ;;  %v4050_v44 = vld [vmem:[#allocation7 + $0x4] sm:$0xf]  ;;  %v3815_v45 = vld [vmem:[#allocation7 + $0xc] sm:$0xf0]  ;;  %v3814_v46 = vor.u32 %v4051_v43, %v3813_v42  ;;  %v4935_v49 = vld [vmem:[%s4911_s16 + $0x8] sm:$0xff]  ;;  %s4733_s9 = smov 120  }
  0x52   : > { %583 = vmatpush.bf16.msra.mxu0 %v3874_v16  ;;  %v3818_v47 = vor.u32 %v4050_v44, %v3815_v45  ;;  %v4930_v48 = vld [vmem:[%s4911_s16] sm:$0xff]  ;;  %v4940_v50 = vld [vmem:[%s4911_s16 + $0x10] sm:$0xff]  ;;  %v4945_v51 = vld [vmem:[%s4911_s16 + $0x18] sm:$0xff]  ;;  %s4734_s20 = smov 112   ;;  %vm685_vm0 = vcmask 64512   ;;  %s798_s15 = sld [smem:[#allocation10]] }
  0x53   : > { %612 = vmatpush.bf16.msra.mxu1 %v3878_v17  ;;  %v421_v52 = vld [vmem:[#allocation9] sm:$0x7]  ;;  %s3927_s19 = sld [smem:[#allocation10 + $0x1]]  ;;  %s4736_s22 = smov 104  }
  0x54   : > { %v4949_v53 = vperm.slane %v421_v52, 0  ;;  %v4951_v54 = vperm.slane %v421_v52, 1  ;;  %s3948_s29 = sld [smem:[#allocation10 + $0x2]]  ;;  %s4737_s17 = smov 8  }
  0x55   : > { %s3969_s13 = sld [smem:[#allocation10 + $0x3]]  ;;  %s4738_s18 = smov 16  }
  0x56   : > { %584 = vmatpush.bf16.msra.mxu0 %v3862_v22  ;;  %s4739_s11 = smov 24   ;;  %s3794_s28 = sshll.u32 %s4907_s14, 6 }
  0x57   : > { %613 = vmatpush.bf16.msra.mxu1 %v3866_v23  ;;  %s377_s16 = scalar_lea.vmem [#allocation14], %s3794_s28  ;;  %s4664_s21 = scalar_lea.hbm %s6458_s7, 128 }
  0x5a   : > { %585 = vmatpush.bf16.msra.mxu0 %v3850_v28 }
  0x5b   : > { %614 = vmatpush.bf16.msra.mxu1 %v3854_v29 }
  0x5e   : > { %586 = vmatpush.bf16.msra.mxu0 %v3838_v34 }
  0x5f   : > { %615 = vmatpush.bf16.msra.mxu1 %v3842_v35 }
  0x62   : > { %587 = vmatpush.bf16.msra.mxu0 %v3826_v40 }
  0x63   : > { %616 = vmatpush.bf16.msra.mxu1 %v3830_v41 }
  0x66   : > { %588 = vmatpush.bf16.msra.mxu0 %v3814_v46 }
  0x67   : > { %617 = vmatpush.bf16.msra.mxu1 %v3818_v47 }
  0x69   : > { %589 = vmatmul.bf16.vlgmr.msra.gmra.mxu0 %v4930_v48 }
  0x6a   : > { %618 = vmatmul.bf16.vlgmr.msra.gmra.mxu1 %v4930_v48 }
  0x79   : > { %594 = vmatmul.bf16.gmra.mxu0 %v4935_v49 }
  0x7a   : > { %623 = vmatmul.bf16.gmra.mxu1 %v4935_v49 }
  0x89   : > { %599 = vmatmul.bf16.gmra.mxu0 %v4940_v50 }
  0x8a   : > { %628 = vmatmul.bf16.gmra.mxu1 %v4940_v50 }
  0x99   : > { %604 = vmatmul.bf16.gmra.mxu0 %v4945_v51 }
  0x9a   : > { %633 = vmatmul.bf16.gmra.mxu1 %v4945_v51 }
  0xe6   : > { %v590_v55 = vpop.f32.mrf.mxu0 }
  0xe7   : > { %v4954_v56 = vadd.f32 %v590_v55, %v4949_v53  ;;  %v619_v57 = vpop.f32.mrf.mxu1 }
  0xe8   : > { %v4957_v58 = vadd.f32 %v619_v57, %v4951_v54 }
  0xe9   : > { %v4961_v59 = vmul.f32 %v4954_v56, %v4954_v56 }
  0xea   : > { %v4965_v60 = vmul.f32 %v4957_v58, %v4957_v58 }
  0xeb   : > { %6488 = vst [vmem:[#allocation20_spill] sm:$0xff] %v4961_v59  ;;  %1330 = vrot.lane.b32.xlu0 %v4961_v59, %s4733_s9  ;;  %v686_v4 = vsel %vm685_vm0, %v4961_v59, 0.0 }
  0xec   : > { %6489 = vst [vmem:[#allocation21_spill] sm:$0xff] %v4965_v60  ;;  %2212 = vrot.lane.b32.xlu1 %v4965_v60, %s4734_s20  ;;  %1492 = vrot.lane.b32.xlu2 %v4965_v60, %s4733_s9  ;;  %v824_v3 = vsel %vm685_vm0, %v4965_v60, 0.0 }
  0xee   : > { %v592_v63 = vpop.f32.mrf.mxu0 }
  0xef   : > { %v621_v61 = vpop.f32.mrf.mxu1  ;;  %v4985_v1 = vadd.f32 %v592_v63, %v4949_v53 }
  0xf0   : > { %v4974_v62 = vadd.f32 %v621_v61, %v4951_v54 }
  0xf1   : > { %v4989_v2 = vmul.f32 %v4985_v1, %v4985_v1 }
  0xf2   : > { %v4978_v0 = vmul.f32 %v4974_v62, %v4974_v62 }
  0xf3   : > { %2058 = vrot.lane.b32.xlu0 %v4961_v59, %s4734_s20  ;;  %6491 = vst [vmem:[#allocation23_spill] sm:$0xff] %v4989_v2  ;;  %v689_v8 = vsel %vm685_vm0, %v4989_v2, 0.0 }
  0xf4   : > { %6490 = vst [vmem:[#allocation22_spill] sm:$0xff] %v4978_v0  ;;  %2214 = vrot.lane.b32.xlu2 %v4978_v0, %s4734_s20  ;;  %v827_v5 = vsel %vm685_vm0, %v4978_v0, 0.0 }
  0xf6   : > { %v595_v10 = vpop.f32.mrf.mxu0 }
  0xf7   : > { %v624_v6 = vpop.f32.mrf.mxu1  ;;  %v5015_v11 = vadd.f32 %v595_v10, %v4949_v53 }
  0xf8   : > { %v5000_v7 = vadd.f32 %v624_v6, %v4951_v54 }
  0xf9   : > { %v5019_v12 = vmul.f32 %v5015_v11, %v5015_v11 }
  0xfa   : > { %v5006_v9 = vmul.f32 %v5000_v7, %v5000_v7 }
  0xfb   : > { %6493 = vst [vmem:[#allocation25_spill] sm:$0xff] %v5019_v12  ;;  %v692_v19 = vsel %vm685_vm0, %v5019_v12, 0.0 }
  0xfc   : > { %2060 = vrot.lane.b32.xlu2 %v4989_v2, %s4734_s20  ;;  %6492 = vst [vmem:[#allocation24_spill] sm:$0xff] %v5006_v9  ;;  %v830_v17 = vsel %vm685_vm0, %v5006_v9, 0.0 }
  0xfe   : > { %v597_v16 = vpop.f32.mrf.mxu0 }
  0xff   : > { %v626_v13 = vpop.f32.mrf.mxu1  ;;  %v5059_v30 = vadd.f32 %v597_v16, %v4949_v53 }
 0x100   : > { %v5024_v14 = vadd.f32 %v626_v13, %v4951_v54 }
 0x101   : > { %v5066_v32 = vmul.f32 %v5059_v30, %v5059_v30 }
 0x102   : > { %v5028_v15 = vmul.f32 %v5024_v14, %v5024_v14 }
 0x103   : > { %6495 = vst [vmem:[#allocation27_spill] sm:$0xff] %v5066_v32 }
 0x104   : > { %6494 = vst [vmem:[#allocation26_spill] sm:$0xff] %v5028_v15  ;;  %v833_v21 = vsel %vm685_vm0, %v5028_v15, 0.0 }
 0x106   : > { %v600_v18 = vpop.f32.mrf.mxu0 }
 0x107   : > { %v629_v20 = vpop.f32.mrf.mxu1  ;;  %v5039_v22 = vadd.f32 %v600_v18, %v4949_v53 }
 0x108   : > { %v5048_v26 = vadd.f32 %v629_v20, %v4951_v54 }
 0x109   : > { %v5043_v23 = vmul.f32 %v5039_v22, %v5039_v22 }
 0x10a   : > { %v5052_v27 = vmul.f32 %v5048_v26, %v5048_v26 }
 0x10b   : > { %v698_v24 = vsel %vm685_vm0, %v5043_v23, 0.0 }
 0x10c   : > { %v836_v29 = vsel %vm685_vm0, %v5052_v27, 0.0 }
 0x10e   : > { %v602_v40 = vpop.f32.mrf.mxu0 }
 0x10f   : > { %v631_v25 = vpop.f32.mrf.mxu1  ;;  %v5092_v41 = vadd.f32 %v602_v40, %v4949_v53 }
 0x110   : > { %v5062_v31 = vadd.f32 %v631_v25, %v4951_v54 }
 0x111   : > { %v5102_v45 = vmul.f32 %v5092_v41, %v5092_v41 }
 0x112   : > { %v5072_v33 = vmul.f32 %v5062_v31, %v5062_v31 }
 0x113   : > { %6499 = vst [vmem:[#allocation31_spill] sm:$0xff] %v5102_v45 }
 0x114   : > { %6496 = vst [vmem:[#allocation28_spill] sm:$0xff] %v5072_v33 }
 0x116   : > { %825 = vadd.xlane.f32.xlu1 %v824_v3  ;;  %v5108_v18 = vpop.f32.mrf.mxu0 }
 0x117   : > { %v5054_v28 = vpop.f32.mrf.mxu1 }
 0x11d   : > { %687 = vadd.xlane.f32.xlu0 %v686_v4 }
 0x11f   : > { %v636_v35 = vpop.f32.mrf.mxu1 }
 0x120   : > { %v5081_v37 = vadd.f32 %v636_v35, %v4951_v54 }
 0x122   : > { %v5089_v39 = vmul.f32 %v5081_v37, %v5081_v37 }
 0x124   : > { %6497 = vst [vmem:[#allocation29_spill] sm:$0xff] %v5089_v39 }
 0x125   : > { %828 = vadd.xlane.f32.xlu2 %v827_v5 }
 0x12d   : > { %690 = vadd.xlane.f32.xlu2 %v689_v8 }
 0x12f   : > { %1494 = vrot.lane.b32.xlu1 %v4978_v0, %s4733_s9 }
 0x131   : > { %1496 = vrot.lane.b32.xlu0 %v5006_v9, %s4733_s9 }
 0x137   : > { %1332 = vrot.lane.b32.xlu1 %v4989_v2, %s4733_s9 }
 0x145   : > { %1334 = vrot.lane.b32.xlu2 %v5019_v12, %s4733_s9 }
 0x146   : > { %v5076_v36 = vpop.permute.xlu2 %1492 }
 0x14d   : > { %1498 = vrot.lane.b32.xlu2 %v5028_v15, %s4733_s9 }
 0x14e   : > { %v5098_v43 = vpop.permute.xlu2 %2214 }
 0x156   : > { %v5106_v47 = vpop.permute.xlu2 %2060 }
 0x157   : > { %6500 = vst [vmem:[#allocation32_spill] sm:$0xff] %v5106_v47 }
 0x15b   : > { %831 = vadd.xlane.f32.xlu0 %v830_v17 }
 0x15d   : > { %v5074_v34 = vpop.permute.xlu0 %1330 }
 0x15e   : > { %v5083_v38 = vpop.permute.xlu1 %2212 }
 0x161   : > { %693 = vadd.xlane.f32.xlu1 %v692_v19 }
 0x163   : > { %834 = vadd.xlane.f32.xlu0 %v833_v21 }
 0x165   : > { %v5094_v42 = vpop.permute.xlu0 %2058 }
 0x166   : > { %6498 = vst [vmem:[#allocation30_spill] sm:$0xff] %v5094_v42 }
 0x16b   : > { %699 = vadd.xlane.f32.xlu0 %v698_v24 }
 0x176   : > { %837 = vadd.xlane.f32.xlu2 %v836_v29 }
 0x17a   : > { %1336 = vrot.lane.b32.xlu1 %v5066_v32, %s4733_s9 }
 0x17f   : > { %2222 = vrot.lane.b32.xlu0 %v5072_v33, %s4734_s20 }
 0x182   : > { %2218 = vrot.lane.b32.xlu1 %v5028_v15, %s4734_s20 }
 0x187   : > { %1506 = vrot.lane.b32.xlu0 %v5089_v39, %s4733_s9 }
 0x189   : > { %v826_v44 = vpop.xlane.xlu1 %825 }
 0x18a   : > { %v848_v46 = vmax.f32 %v826_v44, 1e-24 }
 0x18c   : > { %4222 = vrsqrt.f32 %v848_v46  ;;  %vm862_vm8 = vweird.f32 %v848_v46 }
 0x18e   : > { %1340 = vrot.lane.b32.xlu2 %v5102_v45, %s4733_s9 }
 0x190   : > { %v688_v52 = vpop.xlane.xlu0 %687 }
 0x191   : > { %v710_v55 = vmax.f32 %v688_v52, 1e-24  ;;  %v839_v52 = vsel %vm685_vm0, %v5072_v33, 0.0 }
 0x192   : > { %v4223_v57 = vpop.eup %4222 }
 0x193   : > { %4224 = vrsqrt.f32 %v710_v55  ;;  %v857_v4 = vmul.f32 %v4223_v57, %v848_v46  ;;  %vm724_vm1 = vweird.f32 %v710_v55  ;;  %vm863_vm4 = vweird.f32 %v4223_v57 }
 0x194   : > { %vm864_vm9 = vmor %vm862_vm8, %vm863_vm4 }
 0x195   : > { %v858_v8 = vmul.f32 %v4223_v57, %v857_v4 }
 0x197   : > { %v859_v19 = vmul.f32 0.5, %v858_v8  ;;  %v607_v8 = vpop.f32.mrf.mxu0 }
 0x198   : > { %v829_v61 = vpop.xlane.xlu2 %828 }
 0x199   : > { %v4225_v63 = vpop.eup %4224  ;;  %v849_v3 = vmax.f32 %v829_v61, 1e-24  ;;  %v860_v25 = vsub.f32 1.5, %v859_v19 }
 0x19a   : > { %v719_v5 = vmul.f32 %v4225_v63, %v710_v55  ;;  %vm725_vm2 = vweird.f32 %v4225_v63 }
 0x19b   : > { %4226 = vrsqrt.f32 %v849_v3  ;;  %vm5110_vm5 = vmor %vm724_vm1, %vm725_vm2  ;;  %vm872_vm6 = vweird.f32 %v849_v3 }
 0x19c   : > { %v720_v6 = vmul.f32 %v4225_v63, %v719_v5  ;;  %v861_v5 = vmul.f32 %v4223_v57, %v860_v25  ;;  %v5125_v25 = vadd.f32 %v607_v8, %v4949_v53 }
 0x19e   : > { %v721_v16 = vmul.f32 0.5, %v720_v6  ;;  %v695_v6 = vsel %vm685_vm0, %v5066_v32, 0.0 }
 0x1a0   : > { %v691_v10 = vpop.xlane.xlu2 %690  ;;  %v722_v24 = vsub.f32 1.5, %v721_v16 }
 0x1a1   : > { %v4227_v13 = vpop.eup %4226  ;;  %v711_v17 = vmax.f32 %v691_v10, 1e-24 }
 0x1a2   : > { %v867_v20 = vmul.f32 %v4227_v13, %v849_v3  ;;  %vm873_vm3 = vweird.f32 %v4227_v13  ;;  %v723_v44 = vmul.f32 %v4225_v63, %v722_v24  ;;  %v5120_v3 = vstv %s798_s15 }
 0x1a3   : > { %4228 = vrsqrt.f32 %v711_v17  ;;  %vm874_vm7 = vmor %vm872_vm6, %vm873_vm3  ;;  %v865_v24 = vsel %vm864_vm9, %v4223_v57, %v861_v5  ;;  %vm734_vm11 = vweird.f32 %v711_v17  ;;  %v5137_v57 = vadd.f32 %v5054_v28, %v4951_v54  ;;  %v5150_v54 = vpop.permute.xlu1 %1494  ;;  %v1497_v8 = vpop.permute.xlu0 %1496 }
 0x1a4   : > { %v868_v21 = vmul.f32 %v4227_v13, %v867_v20  ;;  %v727_v16 = vsel %vm5110_vm5, %v4225_v63, %v723_v44  ;;  %v936_v63 = vmul.f32 %v865_v24, %v4957_v58 }
 0x1a5   : > { %v5148_v5 = vmul.f32 %v5137_v57, %v5137_v57 }
 0x1a6   : > { %v869_v29 = vmul.f32 0.5, %v868_v21  ;;  %v845_v21 = vsel %vm685_vm0, %v5089_v39, 0.0 }
 0x1a7   : > { %6504 = vst [vmem:[#allocation34_spill] sm:$0xff] %v5148_v5 }
 0x1a8   : > { %v870_v35 = vsub.f32 1.5, %v869_v29 }
 0x1a9   : > { %v4229_v40 = vpop.eup %4228 }
 0x1aa   : > { %v729_v61 = vmul.f32 %v4229_v40, %v711_v17  ;;  %v871_v4 = vmul.f32 %v4227_v13, %v870_v35  ;;  %vm735_vm10 = vweird.f32 %v4229_v40  ;;  %v5132_v35 = vmul.f32 %v5125_v25, %v5125_v25 }
 0x1ab   : > { %vm736_vm12 = vmor %vm734_vm11, %vm735_vm10 }
 0x1ac   : > { %v730_v55 = vmul.f32 %v4229_v40, %v729_v61  ;;  %696 = vadd.xlane.f32.xlu1 %v695_v6  ;;  %v875_v10 = vsel %vm874_vm7, %v4227_v13, %v871_v4  ;;  %v800_v13 = vmul.f32 %v5120_v3, %v727_v16  ;;  %6503 = vst [vmem:[#allocation33_spill] sm:$0xff] %v5132_v35  ;;  %v707_v4 = vsel %vm685_vm0, %v5132_v35, 0.0  ;;  %v5161_v16 = vpop.permute.xlu2 %1334 }
 0x1ad   : > { %v937_v19 = vmul.f32 %v875_v10, %v4974_v62  ;;  %v1354_v6 = vsel %vm685_vm0, %v5074_v34, 0.0 }
 0x1ae   : > { %v731_v20 = vmul.f32 0.5, %v730_v55  ;;  %v808_v44 = vmul.f32 %v800_v13, %v4954_v56  ;;  %v1333_v55 = vpop.permute.xlu1 %1332 }
 0x1af   : > { %3907 = vmatpush.xpose.msk.msrb.mxu0 %vm685_vm0, %v937_v19  ;;  %v1357_v10 = vsel %vm685_vm0, %v1333_v55, 0.0 }
 0x1b0   : > { %v732_v46 = vsub.f32 1.5, %v731_v20  ;;  %v1522_v20 = vsel %vm685_vm0, %v1497_v8, 0.0 }
 0x1b1   : > { %846 = vadd.xlane.f32.xlu0 %v845_v21 }
 0x1b2   : > { %v733_v29 = vmul.f32 %v4229_v40, %v732_v46 }
 0x1b3   : > { %3908 = vmatpush.xpose.msk.msrb.mxu0 %vm685_vm0, %v936_v63 }
 0x1b4   : > { %v737_v61 = vsel %vm736_vm12, %v4229_v40, %v733_v29  ;;  %v842_v40 = vsel %vm685_vm0, %v5148_v5, 0.0  ;;  %v1499_v46 = vpop.permute.xlu2 %1498 }
 0x1b5   : > { %v801_v17 = vmul.f32 %v5120_v3, %v737_v61 }
 0x1b6   : > { %3909 = vmatmul.msk.f32.vlgmr.msrb.gmra.mxu0 %vm685_vm0, %v808_v44 }
 0x1b7   : > { %840 = vadd.xlane.f32.xlu2 %v839_v52  ;;  %v809_v28 = vmul.f32 %v801_v17, %v4985_v1  ;;  %v1525_v52 = vsel %vm685_vm0, %v1499_v46, 0.0 }
 0x1b9   : > { %708 = vadd.xlane.f32.xlu0 %v707_v4 }
 0x1be   : > { %3910 = vmatmul.msk.f32.gmra.mxu0 %vm685_vm0, %v809_v28 }
 0x1bf   : > { %843 = vadd.xlane.f32.xlu2 %v842_v40 }
 0x1c1   : > { %1355 = vadd.xlane.f32.xlu0 %v1354_v6 }
 0x1c5   : > { %1500 = vrot.lane.b32.xlu1 %v5052_v27, %s4733_s9 }
 0x1c9   : > { %1358 = vadd.xlane.f32.xlu0 %v1357_v10 }
 0x1cd   : > { %1338 = vrot.lane.b32.xlu1 %v5043_v23, %s4733_s9 }
 0x1ce   : > { %v832_v19 = vpop.xlane.xlu0 %831 }
 0x1cf   : > { %v850_v21 = vmax.f32 %v832_v19, 1e-24 }
 0x1d1   : > { %4230 = vrsqrt.f32 %v850_v21  ;;  %1523 = vadd.xlane.f32.xlu0 %v1522_v20  ;;  %vm882_vm15 = vweird.f32 %v850_v21 }
 0x1d4   : > { %v694_v34 = vpop.xlane.xlu1 %693 }
 0x1d5   : > { %v712_v24 = vmax.f32 %v694_v34, 1e-24  ;;  %1502 = vrot.lane.b32.xlu1 %v5072_v33, %s4733_s9 }
 0x1d6   : > { %v835_v13 = vpop.xlane.xlu0 %834 }
 0x1d7   : > { %v4231_v63 = vpop.eup %4230  ;;  %4232 = vrsqrt.f32 %v712_v24  ;;  %1344 = vrot.lane.b32.xlu2 %v5132_v35, %s4733_s9  ;;  %v851_v29 = vmax.f32 %v835_v13, 1e-24  ;;  %vm744_vm4 = vweird.f32 %v712_v24 }
 0x1d8   : > { %v877_v44 = vmul.f32 %v4231_v63, %v850_v21  ;;  %vm883_vm1 = vweird.f32 %v4231_v63 }
 0x1d9   : > { %4234 = vrsqrt.f32 %v851_v29  ;;  %1526 = vadd.xlane.f32.xlu0 %v1525_v52  ;;  %vm892_vm13 = vweird.f32 %v851_v29  ;;  %vm884_vm5 = vmor %vm882_vm15, %vm883_vm1 }
 0x1da   : > { %v878_v61 = vmul.f32 %v4231_v63, %v877_v44 }
 0x1dc   : > { %v879_v40 = vmul.f32 0.5, %v878_v61 }
 0x1dd   : > { %v4233_v4 = vpop.eup %4232 }
 0x1de   : > { %v739_v17 = vmul.f32 %v4233_v4, %v712_v24  ;;  %v880_v19 = vsub.f32 1.5, %v879_v40  ;;  %vm745_vm2 = vweird.f32 %v4233_v4  ;;  %v701_v24 = vsel %vm685_vm0, %v5102_v45, 0.0 }
 0x1df   : > { %v4235_v28 = vpop.eup %4234  ;;  %vm746_vm6 = vmor %vm744_vm4, %vm745_vm2 }
 0x1e0   : > { %v740_v6 = vmul.f32 %v4233_v4, %v739_v17  ;;  %v887_v8 = vmul.f32 %v4235_v28, %v851_v29  ;;  %vm893_vm14 = vweird.f32 %v4235_v28  ;;  %v881_v52 = vmul.f32 %v4231_v63, %v880_v19 }
 0x1e1   : > { %vm894_vm3 = vmor %vm892_vm13, %vm893_vm14  ;;  %v5190_v19 = vadd.f32 %v5108_v18, %v4949_v53 }
 0x1e2   : > { %v741_v55 = vmul.f32 0.5, %v740_v6  ;;  %v888_v10 = vmul.f32 %v4235_v28, %v887_v8  ;;  %v885_v29 = vsel %vm884_vm5, %v4231_v63, %v881_v52  ;;  %v700_v63 = vpop.xlane.xlu0 %699 }
 0x1e3   : > { %v938_v21 = vmul.f32 %v885_v29, %v5000_v7 }
 0x1e4   : > { %v742_v20 = vsub.f32 1.5, %v741_v55  ;;  %v889_v34 = vmul.f32 0.5, %v888_v10 }
 0x1e6   : > { %v890_v13 = vsub.f32 1.5, %v889_v34  ;;  %v743_v46 = vmul.f32 %v4233_v4, %v742_v20 }
 0x1e8   : > { %v891_v44 = vmul.f32 %v4235_v28, %v890_v13  ;;  %v747_v6 = vsel %vm746_vm6, %v4233_v4, %v743_v46  ;;  %v1516_v4 = vsel %vm685_vm0, %v5076_v36, 0.0  ;;  %v5198_v36 = vmul.f32 %v5190_v19, %v5190_v19 }
 0x1e9   : > { %v802_v40 = vmul.f32 %v5120_v3, %v747_v6  ;;  %v838_v20 = vpop.xlane.xlu2 %837  ;;  %v5200_v13 = vmax.f32 %v700_v63, 1e-24 }
 0x1ea   : > { %v895_v61 = vsel %vm894_vm3, %v4235_v28, %v891_v44  ;;  %6507 = vst [vmem:[#allocation37_spill] sm:$0xff] %v5198_v36  ;;  %v5202_v44 = vmax.f32 %v838_v20, 1e-24 }
 0x1eb   : > { %v939_v17 = vmul.f32 %v895_v61, %v5024_v14  ;;  %v810_v8 = vmul.f32 %v802_v40, %v5015_v11  ;;  %4236 = vrsqrt.f32 %v5200_v13  ;;  %vm764_vm10 = vweird.f32 %v5200_v13 }
 0x1ec   : > { %v5182_v28 = vpop.permute.xlu1 %1336  ;;  %vm902_vm15 = vweird.f32 %v5202_v44 }
 0x1ed   : > { %3911 = vmatpush.xpose.msk.msra.mxu3 %vm685_vm0, %v939_v17 }
 0x1f1   : > { %3912 = vmatpush.xpose.msk.msra.mxu3 %vm685_vm0, %v938_v21  ;;  %v5184_v55 = vpop.permute.xlu0 %2222  ;;  %v5206_v53 = vpop.permute.xlu2 %1340 }
 0x1f2   : > { %6505 = vst [vmem:[#allocation35_spill] sm:$0xff] %v5184_v55  ;;  %v5212_v17 = vpop.eup %4236 }
 0x1f3   : > { %vm765_vm11 = vweird.f32 %v5212_v17 }
 0x1f4   : > { %3913 = vmatmul.msk.f32.vlgmr.msra.gmra.mxu3 %vm685_vm0, %v810_v8  ;;  %v5186_v10 = vpop.permute.xlu1 %2218  ;;  %v759_v8 = vmul.f32 %v5212_v17, %v5200_v13  ;;  %vm5242_vm14 = vmor %vm764_vm10, %vm765_vm11  ;;  %v3869_v13 = vld [vmem:[#allocation7 + $0x68] sm:$0xf] }
 0x1f5   : > { %6506 = vst [vmem:[#allocation36_spill] sm:$0xff] %v5186_v10 }
 0x1f6   : > { %v760_v15 = vmul.f32 %v5212_v17, %v759_v8 }
 0x1f8   : > { %v761_v10 = vmul.f32 0.5, %v760_v15 }
 0x1f9   : > { %v5194_v34 = vpop.permute.xlu0 %1506 }
 0x1fa   : > { %v762_v45 = vsub.f32 1.5, %v761_v10 }
 0x1ff   : > { %702 = vadd.xlane.f32.xlu1 %v701_v24 }
 0x200   : > { %1517 = vadd.xlane.f32.xlu2 %v1516_v4 }
 0x218   : > { %1504 = vrot.lane.b32.xlu1 %v5148_v5, %s4733_s9 }
 0x21f   : > { %v697_v46 = vpop.xlane.xlu1 %696 }
 0x220   : > { %v713_v52 = vmax.f32 %v697_v46, 1e-24  ;;  %1342 = vrot.lane.b32.xlu1 %v5198_v36, %s4733_s9 }
 0x222   : > { %4238 = vrsqrt.f32 %v713_v52  ;;  %vm754_vm8 = vweird.f32 %v713_v52 }
 0x223   : > { %4240 = vrsqrt.f32 %v5202_v44 }
 0x224   : > { %v847_v18 = vpop.xlane.xlu0 %846 }
 0x225   : > { %v5210_v61 = vmax.f32 %v847_v18, 1e-24 }
 0x227   : > { %4242 = vrsqrt.f32 %v5210_v61  ;;  %vm932_vm2 = vweird.f32 %v5210_v61 }
 0x228   : > { %v4239_v6 = vpop.eup %4238 }
 0x229   : > { %v749_v29 = vmul.f32 %v4239_v6, %v713_v52  ;;  %v5215_v40 = vpop.eup %4240  ;;  %vm755_vm7 = vweird.f32 %v4239_v6  ;;  %v4070_v52 = vld [vmem:[#allocation7 + $0xa0] sm:$0xf0] }
 0x22a   : > { %v841_v21 = vpop.xlane.xlu2 %840  ;;  %v897_v20 = vmul.f32 %v5215_v40, %v5202_v44  ;;  %vm756_vm9 = vmor %vm754_vm8, %vm755_vm7  ;;  %vm903_vm1 = vweird.f32 %v5215_v40 }
 0x22b   : > { %v750_v24 = vmul.f32 %v4239_v6, %v749_v29  ;;  %v853_v4 = vmax.f32 %v841_v21, 1e-24  ;;  %v3905_v29 = vld [vmem:[#allocation7 + $0xb0] sm:$0xf]  ;;  %v4073_v21 = vld [vmem:[#allocation7 + $0xb8] sm:$0xf0]  ;;  %vm5259_vm5 = vmor %vm902_vm15, %vm903_vm1 }
 0x22c   : > { %v898_v60 = vmul.f32 %v5215_v40, %v897_v20  ;;  %v3906_v55 = vor.u32 %v4073_v21, %v3905_v29 }
 0x22d   : > { %v5219_v63 = vpop.eup %4242  ;;  %v751_v46 = vmul.f32 0.5, %v750_v24  ;;  %4244 = vrsqrt.f32 %v853_v4  ;;  %vm912_vm12 = vweird.f32 %v853_v4 }
 0x22e   : > { %v927_v18 = vmul.f32 %v5219_v63, %v5210_v61  ;;  %639 = vmatpush.bf16.msra.mxu2 %v3906_v55  ;;  %vm933_vm3 = vweird.f32 %v5219_v63  ;;  %v3833_v61 = vld [vmem:[#allocation7 + $0x20] sm:$0xf] }
 0x22f   : > { %v752_v2 = vsub.f32 1.5, %v751_v46  ;;  %v899_v46 = vmul.f32 0.5, %v898_v60  ;;  %v3881_v60 = vld [vmem:[#allocation7 + $0x80] sm:$0xf]  ;;  %vm5266_vm6 = vmor %vm932_vm2, %vm933_vm3 }
 0x230   : > { %v928_v0 = vmul.f32 %v5219_v63, %v927_v18 }
 0x231   : > { %v753_v33 = vmul.f32 %v4239_v6, %v752_v2  ;;  %v3893_v2 = vld [vmem:[#allocation7 + $0x98] sm:$0xf] }
 0x232   : > { %v844_v59 = vpop.xlane.xlu2 %843  ;;  %v929_v20 = vmul.f32 0.5, %v928_v0  ;;  %v3894_v21 = vor.u32 %v4070_v52, %v3893_v2  ;;  %v4067_v0 = vld [vmem:[#allocation7 + $0x88] sm:$0xf0] }
 0x233   : > { %v4245_v24 = vpop.eup %4244  ;;  %v5228_v47 = vmax.f32 %v844_v59, 1e-24  ;;  %v757_v42 = vsel %vm756_vm9, %v4239_v6, %v753_v33  ;;  %v900_v33 = vsub.f32 1.5, %v899_v46  ;;  %v3882_v55 = vor.u32 %v4067_v0, %v3881_v60  ;;  %v4064_v46 = vld [vmem:[#allocation7 + $0x70] sm:$0xf0] }
 0x234   : > { %v907_v5 = vmul.f32 %v4245_v24, %v853_v4  ;;  %v803_v8 = vmul.f32 %v5120_v3, %v757_v42  ;;  %vm913_vm13 = vweird.f32 %v4245_v24  ;;  %v930_v42 = vsub.f32 1.5, %v929_v20  ;;  %640 = vmatpush.bf16.msra.mxu2 %v3894_v21  ;;  %v3857_v0 = vld [vmem:[#allocation7 + $0x50] sm:$0xf] }
 0x235   : > { %4246 = vrsqrt.f32 %v5228_v47  ;;  %v763_v6 = vmul.f32 %v5212_v17, %v762_v45  ;;  %vm5253_vm4 = vmor %vm912_vm12, %vm913_vm13  ;;  %v901_v52 = vmul.f32 %v5215_v40, %v900_v33  ;;  %vm922_vm7 = vweird.f32 %v5228_v47  ;;  %v4058_v45 = vld [vmem:[#allocation7 + $0x40] sm:$0xf0] }
 0x236   : > { %v908_v39 = vmul.f32 %v4245_v24, %v907_v5  ;;  %v811_v29 = vmul.f32 %v803_v8, %v5059_v30  ;;  %v931_v44 = vmul.f32 %v5219_v63, %v930_v42  ;;  %v4061_v42 = vld [vmem:[#allocation7 + $0x58] sm:$0xf0] }
 0x237   : > { %v1501_v18 = vpop.permute.xlu1 %1500  ;;  %v767_v4 = vsel %vm5242_vm14, %v5212_v17, %v763_v6  ;;  %v905_v17 = vsel %vm5259_vm5, %v5215_v40, %v901_v52  ;;  %v3845_v40 = vld [vmem:[#allocation7 + $0x38] sm:$0xf] }
 0x238   : > { %v909_v59 = vmul.f32 0.5, %v908_v39  ;;  %v1528_v15 = vsel %vm685_vm0, %v1501_v18, 0.0  ;;  %3914 = vmatmul.msk.f32.gmra.mxu3 %vm685_vm0, %v811_v29  ;;  %641 = vmatpush.bf16.msra.mxu2 %v3882_v55  ;;  %v3870_v18 = vor.u32 %v4064_v46, %v3869_v13  ;;  %v804_v6 = vmul.f32 %v5120_v3, %v767_v4  ;;  %v4052_v29 = vld [vmem:[#allocation7 + $0x10] sm:$0xf0] }
 0x239   : > { %1529 = vadd.xlane.f32.xlu0 %v1528_v15 }
 0x23a   : > { %v910_v5 = vsub.f32 1.5, %v909_v59 }
 0x23b   : > { %v4247_v10 = vpop.eup %4246 }
 0x23c   : > { %v917_v8 = vmul.f32 %v4247_v10, %v5228_v47  ;;  %v911_v2 = vmul.f32 %v4245_v24, %v910_v5  ;;  %vm923_vm8 = vweird.f32 %v4247_v10  ;;  %v935_v5 = vsel %vm5266_vm6, %v5219_v63, %v931_v44  ;;  %642 = vmatpush.bf16.msra.mxu2 %v3870_v18  ;;  %v4055_v18 = vld [vmem:[#allocation7 + $0x28] sm:$0xf0] }
 0x23d   : > { %vm924_vm9 = vmor %vm922_vm7, %vm923_vm8  ;;  %v943_v13 = vmul.f32 %v935_v5, %v5081_v37  ;;  %v1537_v47 = vsel %vm685_vm0, %v5194_v34, 0.0  ;;  %v3846_v44 = vor.u32 %v4058_v45, %v3845_v40  ;;  %v3834_v4 = vor.u32 %v4055_v18, %v3833_v61  ;;  %v3821_v34 = vld [vmem:[#allocation7 + $0x8] sm:$0xf] }
 0x23e   : > { %v918_v20 = vmul.f32 %v4247_v10, %v917_v8  ;;  %v915_v59 = vsel %vm5253_vm4, %v4245_v24, %v911_v2  ;;  %v3858_v24 = vor.u32 %v4061_v42, %v3857_v0  ;;  %v940_v8 = vmul.f32 %v905_v17, %v5048_v26  ;;  %v5308_v17 = vpop.permute.xlu2 %1344 }
 0x23f   : > { %v1339_v21 = vpop.permute.xlu1 %1338  ;;  %v941_v60 = vmul.f32 %v915_v59, %v5062_v31  ;;  %v812_v2 = vmul.f32 %v804_v6, %v5039_v22  ;;  %v1519_v59 = vsel %vm685_vm0, %v5150_v54, 0.0  ;;  %v5310_v54 = vpop.xlane.xlu0 %708 }
 0x240   : > { %v919_v15 = vmul.f32 0.5, %v918_v20  ;;  %v1366_v33 = vsel %vm685_vm0, %v1339_v21, 0.0  ;;  %643 = vmatpush.bf16.msra.mxu2 %v3858_v24  ;;  %v3822_v21 = vor.u32 %v4052_v29, %v3821_v34 }
 0x241   : > { %1367 = vadd.xlane.f32.xlu0 %v1366_v33  ;;  %3915 = vmatpush.xpose.msk.msrb.mxu3 %vm685_vm0, %v941_v60  ;;  %v1363_v33 = vsel %vm685_vm0, %v5182_v28, 0.0  ;;  %v1369_v60 = vsel %vm685_vm0, %v5206_v53, 0.0 }
 0x242   : > { %v920_v55 = vsub.f32 1.5, %v919_v15  ;;  %v1360_v15 = vsel %vm685_vm0, %v5161_v16, 0.0 }
 0x244   : > { %v921_v39 = vmul.f32 %v4247_v10, %v920_v55  ;;  %644 = vmatpush.bf16.msra.mxu2 %v3846_v44 }
 0x245   : > { %3916 = vmatpush.xpose.msk.msrb.mxu3 %vm685_vm0, %v940_v8 }
 0x246   : > { %v925_v63 = vsel %vm924_vm9, %v4247_v10, %v921_v39  ;;  %v704_v10 = vsel %vm685_vm0, %v5198_v36, 0.0 }
 0x247   : > { %v1503_v46 = vpop.permute.xlu1 %1502  ;;  %v942_v52 = vmul.f32 %v925_v63, %v5137_v57  ;;  %v1356_v16 = vpop.xlane.xlu0 %1355 }
 0x248   : > { %v1531_v20 = vsel %vm685_vm0, %v1503_v46, 0.0  ;;  %3917 = vmatmul.msk.f32.vlgmr.msrb.gmra.mxu3 %vm685_vm0, %v812_v2  ;;  %645 = vmatpush.bf16.msra.mxu2 %v3834_v4  ;;  %v1378_v55 = vmax.f32 %v1356_v16, 1e-24  ;;  %v1375_v16 = vsel %vm685_vm0, %v5308_v17, 0.0 }
 0x249   : > { %3919 = vmatpush.xpose.msk.msra.mxu3 %vm685_vm0, %v943_v13  ;;  %1532 = vadd.xlane.f32.xlu2 %v1531_v20 }
 0x24a   : > { %1538 = vadd.xlane.f32.xlu0 %v1537_v47  ;;  %705 = vadd.xlane.f32.xlu1 %v704_v10  ;;  %vm1392_vm2 = vweird.f32 %v1378_v55 }
 0x24c   : > { %646 = vmatpush.bf16.msra.mxu2 %v3822_v21 }
 0x24d   : > { %3920 = vmatpush.xpose.msk.msra.mxu3 %vm685_vm0, %v942_v52 }
 0x24f   : > { %647 = vmatmul.bf16.vlgmr.msra.gmra.mxu2 %v4930_v48  ;;  %v1359_v8 = vpop.xlane.xlu0 %1358 }
 0x250   : > { %v1379_v63 = vmax.f32 %v1359_v8, 1e-24 }
 0x252   : > { %1520 = vadd.xlane.f32.xlu1 %v1519_v59  ;;  %vm1402_vm5 = vweird.f32 %v1379_v63 }
 0x25a   : > { %1361 = vadd.xlane.f32.xlu1 %v1360_v15 }
 0x25f   : > { %652 = vmatmul.bf16.gmra.mxu2 %v4935_v49 }
 0x262   : > { %1364 = vadd.xlane.f32.xlu1 %v1363_v33 }
 0x26a   : > { %1370 = vadd.xlane.f32.xlu1 %v1369_v60 }
 0x26f   : > { %657 = vmatmul.bf16.gmra.mxu2 %v4940_v50 }
 0x272   : > { %v703_v0 = vpop.xlane.xlu1 %702 }
 0x273   : > { %v715_v48 = vmax.f32 %v703_v0, 1e-24  ;;  %v1518_v42 = vpop.xlane.xlu2 %1517 }
 0x274   : > { %v1540_v5 = vmax.f32 %v1518_v42, 1e-24 }
 0x275   : > { %4248 = vrsqrt.f32 %v715_v48  ;;  %vm774_vm12 = vweird.f32 %v715_v48 }
 0x276   : > { %4250 = vrsqrt.f32 %v1540_v5  ;;  %vm1554_vm14 = vweird.f32 %v1540_v5 }
 0x277   : > { %4252 = vrsqrt.f32 %v1378_v55 }
 0x278   : > { %4254 = vrsqrt.f32 %v1379_v63 }
 0x27b   : > { %v4249_v28 = vpop.eup %4248 }
 0x27c   : > { %v4251_v49 = vpop.eup %4250  ;;  %v769_v24 = vmul.f32 %v4249_v28, %v715_v48  ;;  %vm775_vm10 = vweird.f32 %v4249_v28 }
 0x27d   : > { %v1549_v6 = vmul.f32 %v4251_v49, %v1540_v5  ;;  %vm1555_vm11 = vweird.f32 %v4251_v49  ;;  %v4253_v47 = vpop.eup %4252  ;;  %vm776_vm13 = vmor %vm774_vm12, %vm775_vm10  ;;  %v1524_v5 = vpop.xlane.xlu0 %1523 }
 0x27e   : > { %v770_v53 = vmul.f32 %v4249_v28, %v769_v24  ;;  %vm1556_vm15 = vmor %vm1554_vm14, %vm1555_vm11  ;;  %v1387_v10 = vmul.f32 %v4253_v47, %v1378_v55  ;;  %v4255_v21 = vpop.eup %4254  ;;  %vm1393_vm1 = vweird.f32 %v4253_v47  ;;  %v5323_v24 = vstv %s3927_s19 }
 0x27f   : > { %v1550_v39 = vmul.f32 %v4251_v49, %v1549_v6  ;;  %662 = vmatmul.bf16.gmra.mxu2 %v4945_v51  ;;  %v1397_v59 = vmul.f32 %v4255_v21, %v1379_v63  ;;  %vm1394_vm3 = vmor %vm1392_vm2, %vm1393_vm1  ;;  %vm1403_vm4 = vweird.f32 %v4255_v21 }
 0x280   : > { %v771_v40 = vmul.f32 0.5, %v770_v53  ;;  %v1388_v29 = vmul.f32 %v4253_v47, %v1387_v10  ;;  %vm1404_vm6 = vmor %vm1402_vm5, %vm1403_vm4 }
 0x281   : > { %v1551_v45 = vmul.f32 0.5, %v1550_v39  ;;  %v1398_v0 = vmul.f32 %v4255_v21, %v1397_v59 }
 0x282   : > { %v772_v13 = vsub.f32 1.5, %v771_v40  ;;  %v1389_v51 = vmul.f32 0.5, %v1388_v29 }
 0x283   : > { %v1552_v46 = vsub.f32 1.5, %v1551_v45  ;;  %v1399_v42 = vmul.f32 0.5, %v1398_v0 }
 0x284   : > { %v773_v2 = vmul.f32 %v4249_v28, %v772_v13  ;;  %v1390_v60 = vsub.f32 1.5, %v1389_v51 }
 0x285   : > { %v1553_v50 = vmul.f32 %v4251_v49, %v1552_v46  ;;  %v1527_v8 = vpop.xlane.xlu0 %1526  ;;  %v717_v46 = vmax.f32 %v5310_v54, 1e-24 }
 0x286   : > { %v777_v52 = vsel %vm776_vm13, %v4249_v28, %v773_v2  ;;  %v1391_v48 = vmul.f32 %v4253_v47, %v1390_v60  ;;  %v1400_v28 = vsub.f32 1.5, %v1399_v42  ;;  %v5346_v0 = vmax.f32 %v1527_v8, 1e-24 }
 0x287   : > { %v1557_v44 = vsel %vm1556_vm15, %v4251_v49, %v1553_v50  ;;  %v805_v20 = vmul.f32 %v5120_v3, %v777_v52  ;;  %v5332_v52 = vmax.f32 %v1524_v5, 1e-24  ;;  %vm794_vm11 = vweird.f32 %v717_v46 }
 0x288   : > { %v1628_v61 = vmul.f32 %v1557_v44, %v4957_v58  ;;  %v1395_v49 = vsel %vm1394_vm3, %v4253_v47, %v1391_v48  ;;  %v1401_v53 = vmul.f32 %v4255_v21, %v1400_v28 }
 0x289   : > { %v813_v18 = vmul.f32 %v805_v20, %v5092_v41  ;;  %v1468_v6 = vmul.f32 %v5323_v24, %v1395_v49  ;;  %vm1574_vm3 = vweird.f32 %v5332_v52 }
 0x28a   : > { %v1505_v4 = vpop.permute.xlu1 %1504  ;;  %1649 = vrot.lane.b32.xlu0 %v1628_v61, %s4733_s9  ;;  %v1405_v55 = vsel %vm1404_vm6, %v4255_v21, %v1401_v53 }
 0x28b   : > { %3918 = vmatmul.msk.f32.gmra.mxu3 %vm685_vm0, %v813_v18  ;;  %v1534_v34 = vsel %vm685_vm0, %v1505_v4, 0.0  ;;  %v1476_v39 = vmul.f32 %v1468_v6, %v4954_v56  ;;  %v1469_v40 = vmul.f32 %v5323_v24, %v1405_v55 }
 0x28c   : > { %1535 = vadd.xlane.f32.xlu1 %v1534_v34 }
 0x28d   : > { %v1477_v17 = vmul.f32 %v1469_v40, %v4985_v1 }
 0x292   : > { %v1343_v15 = vpop.permute.xlu1 %1342 }
 0x293   : > { %v1372_v33 = vsel %vm685_vm0, %v1343_v15, 0.0 }
 0x294   : > { %1373 = vadd.xlane.f32.xlu2 %v1372_v33 }
 0x29c   : > { %1376 = vadd.xlane.f32.xlu2 %v1375_v16 }
 0x2a5   : > { %1643 = vrot.lane.b32.xlu1 %v1476_v39, %s4733_s9 }
 0x2ac   : > { %v1530_v45 = vpop.xlane.xlu0 %1529 }
 0x2ad   : > { %v1544_v13 = vmax.f32 %v1530_v45, 1e-24  ;;  %1645 = vrot.lane.b32.xlu1 %v1477_v17, %s4733_s9 }
 0x2af   : > { %4256 = vrsqrt.f32 %v1544_v13  ;;  %vm1594_vm8 = vweird.f32 %v1544_v13 }
 0x2b0   : > { %4258 = vrsqrt.f32 %v717_v46 }
 0x2b1   : > { %4260 = vrsqrt.f32 %v5332_v52 }
 0x2b4   : > { %v1368_v18 = vpop.xlane.xlu0 %1367 }
 0x2b5   : > { %v4257_v2 = vpop.eup %4256  ;;  %v5338_v29 = vmax.f32 %v1368_v18, 1e-24 }
 0x2b6   : > { %v1589_v63 = vmul.f32 %v4257_v2, %v1544_v13  ;;  %vm1595_vm7 = vweird.f32 %v4257_v2  ;;  %v5334_v10 = vpop.eup %4258 }
 0x2b7   : > { %vm1596_vm9 = vmor %vm1594_vm8, %vm1595_vm7  ;;  %v789_v54 = vmul.f32 %v5334_v10, %v717_v46  ;;  %v5343_v15 = vpop.eup %4260  ;;  %vm795_vm12 = vweird.f32 %v5334_v10 }
 0x2b8   : > { %v1590_v47 = vmul.f32 %v4257_v2, %v1589_v63  ;;  %v1569_v5 = vmul.f32 %v5343_v15, %v5332_v52  ;;  %vm5363_vm15 = vmor %vm794_vm11, %vm795_vm12  ;;  %vm1575_vm5 = vweird.f32 %v5343_v15  ;;  %vm1432_vm11 = vweird.f32 %v5338_v29 }
 0x2b9   : > { %v790_v51 = vmul.f32 %v5334_v10, %v789_v54  ;;  %vm5390_vm6 = vmor %vm1574_vm3, %vm1575_vm5 }
 0x2ba   : > { %v1591_v50 = vmul.f32 0.5, %v1590_v47  ;;  %v1570_v55 = vmul.f32 %v5343_v15, %v1569_v5 }
 0x2bb   : > { %v791_v42 = vmul.f32 0.5, %v790_v51 }
 0x2bc   : > { %v1592_v44 = vsub.f32 1.5, %v1591_v50  ;;  %v1571_v50 = vmul.f32 0.5, %v1570_v55 }
 0x2bd   : > { %v706_v20 = vpop.xlane.xlu1 %705  ;;  %v792_v6 = vsub.f32 1.5, %v791_v42 }
 0x2be   : > { %v716_v61 = vmax.f32 %v706_v20, 1e-24  ;;  %v1593_v4 = vmul.f32 %v4257_v2, %v1592_v44 }
 0x2bf   : > { %v793_v47 = vmul.f32 %v5334_v10, %v792_v6 }
 0x2c0   : > { %4262 = vrsqrt.f32 %v716_v61  ;;  %v1597_v34 = vsel %vm1596_vm9, %v4257_v2, %v1593_v4  ;;  %vm784_vm13 = vweird.f32 %v716_v61 }
 0x2c1   : > { %v1632_v21 = vmul.f32 %v1597_v34, %v5048_v26  ;;  %4264 = vrsqrt.f32 %v5338_v29 }
 0x2c3   : > { %1735 = vrot.lane.b32.xlu1 %v1632_v21, %s4733_s9 }
 0x2c5   : > { %v1521_v59 = vpop.xlane.xlu1 %1520 }
 0x2c6   : > { %v1541_v33 = vmax.f32 %v1521_v59, 1e-24  ;;  %v4263_v60 = vpop.eup %4262  ;;  %v1572_v59 = vsub.f32 1.5, %v1571_v50 }
 0x2c7   : > { %v779_v48 = vmul.f32 %v4263_v60, %v716_v61  ;;  %v5350_v28 = vpop.eup %4264  ;;  %vm785_vm10 = vweird.f32 %v4263_v60 }
 0x2c8   : > { %4266 = vrsqrt.f32 %v1541_v33  ;;  %v1427_v17 = vmul.f32 %v5350_v28, %v5338_v29  ;;  %vm786_vm14 = vmor %vm784_vm13, %vm785_vm10  ;;  %vm1564_vm2 = vweird.f32 %v1541_v33  ;;  %vm1433_vm8 = vweird.f32 %v5350_v28 }
 0x2c9   : > { %v780_v16 = vmul.f32 %v4263_v60, %v779_v48  ;;  %4268 = vrsqrt.f32 %v5346_v0  ;;  %v797_v48 = vsel %vm5363_vm15, %v5334_v10, %v793_v47  ;;  %vm1434_vm12 = vmor %vm1432_vm11, %vm1433_vm8 }
 0x2ca   : > { %v1428_v20 = vmul.f32 %v5350_v28, %v1427_v17  ;;  %v807_v10 = vmul.f32 %v5120_v3, %v797_v48  ;;  %v4478_v17 = vld [vmem:[#allocation9] sm:$0x7] }
 0x2cb   : > { %v781_v49 = vmul.f32 0.5, %v780_v16 }
 0x2cc   : > { %v1429_v42 = vmul.f32 0.5, %v1428_v20  ;;  %v815_v46 = vmul.f32 %v807_v10, %v5125_v25 }
 0x2cd   : > { %v1362_v53 = vpop.xlane.xlu1 %1361  ;;  %v782_v40 = vsub.f32 1.5, %v781_v49 }
 0x2ce   : > { %v4267_v39 = vpop.eup %4266  ;;  %v5354_v8 = vmax.f32 %v1362_v53, 1e-24 }
 0x2cf   : > { %v1559_v45 = vmul.f32 %v4267_v39, %v1541_v33  ;;  %v783_v13 = vmul.f32 %v4263_v60, %v782_v40  ;;  %v5360_v63 = vpop.eup %4268  ;;  %vm1565_vm1 = vweird.f32 %v4267_v39  ;;  %v1573_v40 = vmul.f32 %v5343_v15, %v1572_v59 }
 0x2d0   : > { %4270 = vrsqrt.f32 %v5354_v8  ;;  %v1579_v61 = vmul.f32 %v5360_v63, %v5346_v0  ;;  %vm1566_vm4 = vmor %vm1564_vm2, %vm1565_vm1  ;;  %vm1412_vm9 = vweird.f32 %v5354_v8  ;;  %vm1585_vm13 = vweird.f32 %v5360_v63 }
 0x2d1   : > { %v1560_v2 = vmul.f32 %v4267_v39, %v1559_v45  ;;  %v787_v44 = vsel %vm786_vm14, %v4263_v60, %v783_v13  ;;  %v5386_v45 = vperm.slane %v4478_v17, 2  ;;  %v1430_v13 = vsub.f32 1.5, %v1429_v42 }
 0x2d2   : > { %v806_v18 = vmul.f32 %v5120_v3, %v787_v44  ;;  %v1580_v49 = vmul.f32 %v5360_v63, %v1579_v61  ;;  %v648_v55 = vpop.f32.mrf.mxu2  ;;  %v1577_v52 = vsel %vm5390_vm6, %v5343_v15, %v1573_v40  ;;  %vm1584_vm14 = vweird.f32 %v5346_v0 }
 0x2d3   : > { %v1561_v4 = vmul.f32 0.5, %v1560_v2  ;;  %v649_v3 = vadd.f32 %v648_v55, %v5386_v45  ;;  %v1630_v15 = vmul.f32 %v1577_v52, %v5000_v7  ;;  %vm1586_vm15 = vmor %vm1584_vm14, %vm1585_vm13 }
 0x2d4   : > { %v814_v21 = vmul.f32 %v806_v18, %v5190_v19 }
 0x2d5   : > { %v1562_v54 = vsub.f32 1.5, %v1561_v4  ;;  %v1365_v34 = vpop.xlane.xlu1 %1364  ;;  %v1431_v4 = vmul.f32 %v5350_v28, %v1430_v13 }
 0x2d6   : > { %v4271_v51 = vpop.eup %4270  ;;  %v5372_v60 = vmax.f32 %v1365_v34, 1e-24  ;;  %3921 = vmatmul.msk.f32.vlgmr.msra.gmra.mxu3 %vm685_vm0, %v814_v21  ;;  %v1185_v34 = vpack.c.bf16 %v649_v3, %v649_v3 }
 0x2d7   : > { %v1407_v5 = vmul.f32 %v4271_v51, %v5354_v8  ;;  %v1563_v16 = vmul.f32 %v4267_v39, %v1562_v54  ;;  %vm1413_vm7 = vweird.f32 %v4271_v51 }
 0x2d8   : > { %4272 = vrsqrt.f32 %v5372_v60  ;;  %vm1414_vm10 = vmor %vm1412_vm9, %vm1413_vm7  ;;  %v1200_v29 = vunpack.c.l.b16 %v1185_v34  ;;  %vm1422_vm2 = vweird.f32 %v5372_v60  ;;  %vm1088_vm7 = vcmask 130048  }
 0x2d9   : > { %v1408_v6 = vmul.f32 %v4271_v51, %v1407_v5  ;;  %v1567_v53 = vsel %vm1566_vm4, %v4267_v39, %v1563_v16  ;;  %v1581_v39 = vmul.f32 0.5, %v1580_v49  ;;  %v1435_v49 = vsel %vm1434_vm12, %v5350_v28, %v1431_v4 }
 0x2da   : > { %v1629_v33 = vmul.f32 %v1567_v53, %v4974_v62  ;;  %v650_v42 = vpop.f32.mrf.mxu2 }
 0x2db   : > { %v1409_v2 = vmul.f32 0.5, %v1408_v6  ;;  %v1582_v21 = vsub.f32 1.5, %v1581_v39  ;;  %v651_v5 = vadd.f32 %v650_v42, %v5386_v45 }
 0x2dc   : > { %1651 = vrot.lane.b32.xlu2 %v1629_v33, %s4733_s9  ;;  %v1472_v33 = vmul.f32 %v5323_v24, %v1435_v49 }
 0x2dd   : > { %v1410_v50 = vsub.f32 1.5, %v1409_v2  ;;  %v1371_v44 = vpop.xlane.xlu1 %1370  ;;  %v1186_v53 = vpack.c.bf16 %v651_v5, %v651_v5  ;;  %v1583_v10 = vmul.f32 %v5360_v63, %v1582_v21 }
 0x2de   : > { %v4273_v20 = vpop.eup %4272  ;;  %v1383_v18 = vmax.f32 %v1371_v44, 1e-24  ;;  %3922 = vmatmul.msk.f32.gmra.mxu3 %vm685_vm0, %v815_v46  ;;  %v1480_v39 = vmul.f32 %v1472_v33, %v5039_v22 }
 0x2df   : > { %v1411_v61 = vmul.f32 %v4271_v51, %v1410_v50  ;;  %v1417_v54 = vmul.f32 %v4273_v20, %v5372_v60  ;;  %v1201_v40 = vunpack.c.l.b16 %v1186_v53  ;;  %vm1423_vm1 = vweird.f32 %v4273_v20 }
 0x2e0   : > { %4274 = vrsqrt.f32 %v1383_v18  ;;  %v1587_v47 = vsel %vm1586_vm15, %v5360_v63, %v1583_v10  ;;  %vm1424_vm3 = vmor %vm1422_vm2, %vm1423_vm1  ;;  %vm1442_vm5 = vweird.f32 %v1383_v18 }
 0x2e1   : > { %v1418_v59 = vmul.f32 %v4273_v20, %v1417_v54  ;;  %v1415_v48 = vsel %vm1414_vm10, %v4271_v51, %v1411_v61  ;;  %v5419_v17 = vpack.c.b16 %v1201_v40, %v1200_v29  ;;  %v1631_v0 = vmul.f32 %v1587_v47, %v5024_v14  ;;  %v977_v29 = vpop.f32.mrf.mxu0  ;;  %v4089_v47 = vld [vmem:[#allocation11] sm:$0xff]  }
 0x2e2   : > { %v1470_v8 = vmul.f32 %v5323_v24, %v1415_v48  ;;  %v653_v3 = vpop.f32.mrf.mxu2 }
 0x2e3   : > { %v1419_v16 = vmul.f32 0.5, %v1418_v59  ;;  %1214 = vmatpush.bf16.msrb.mxu3 %v5419_v17  ;;  %v654_v54 = vadd.f32 %v653_v3, %v5386_v45  ;;  %v1539_v3 = vpop.xlane.xlu0 %1538 }
 0x2e4   : > { %1692 = vrot.lane.b32.xlu2 %v1630_v15, %s4733_s9  ;;  %v1478_v6 = vmul.f32 %v1470_v8, %v5015_v11  ;;  %v1533_v8 = vpop.xlane.xlu2 %1532 }
 0x2e5   : > { %v1420_v51 = vsub.f32 1.5, %v1419_v16  ;;  %v5441_v33 = vmax.f32 %v1533_v8, 1e-24 }
 0x2e6   : > { %v4275_v55 = vpop.eup %4274  ;;  %1686 = vrot.lane.b32.xlu0 %v1478_v6, %s4733_s9 }
 0x2e7   : > { %v1437_v28 = vmul.f32 %v4275_v55, %v1383_v18  ;;  %v1421_v13 = vmul.f32 %v4273_v20, %v1420_v51  ;;  %vm1443_vm4 = vweird.f32 %v4275_v55  ;;  %vm1604_vm12 = vweird.f32 %v5441_v33 }
 0x2e8   : > { %vm1444_vm6 = vmor %vm1442_vm5, %vm1443_vm4 }
 0x2e9   : > { %v1438_v2 = vmul.f32 %v4275_v55, %v1437_v28  ;;  %v1425_v46 = vsel %vm1424_vm3, %v4273_v20, %v1421_v13  ;;  %v1187_v20 = vpack.c.bf16 %v654_v54, %v654_v54 }
 0x2ea   : > { %v1471_v63 = vmul.f32 %v5323_v24, %v1425_v46  ;;  %v655_v61 = vpop.f32.mrf.mxu2  ;;  %v5450_v46 = vmax.f32 %v1539_v3, 1e-24 }
 0x2eb   : > { %v1439_v50 = vmul.f32 0.5, %v1438_v2  ;;  %v656_v18 = vadd.f32 %v655_v61, %v5386_v45  ;;  %v1228_v48 = vunpack.c.l.b16 %v1187_v20 }
 0x2ec   : > { %1729 = vrot.lane.b32.xlu2 %v1480_v39, %s4733_s9  ;;  %v1479_v34 = vmul.f32 %v1471_v63, %v5059_v30  ;;  %v5447_v39 = vunpack.c.h.bf16 %v4089_v47  ;;  %vm1624_vm14 = vweird.f32 %v5450_v46 }
 0x2ed   : > { %v1440_v44 = vsub.f32 1.5, %v1439_v50  ;;  %v1188_v42 = vpack.c.bf16 %v656_v18, %v656_v18 }
 0x2ee   : > { %1694 = vrot.lane.b32.xlu0 %v1631_v0, %s4733_s9 }
 0x2ef   : > { %v1441_v52 = vmul.f32 %v4275_v55, %v1440_v44  ;;  %v1229_v15 = vunpack.c.l.b16 %v1188_v42  ;;  %v980_v44 = vpop.f32.mrf.mxu0 }
 0x2f0   : > { %v5455_v61 = vadd.f32 %v5447_v39, %v980_v44 }
 0x2f1   : > { %v1445_v4 = vsel %vm1444_vm6, %v4275_v55, %v1441_v52  ;;  %v5436_v5 = vpack.c.b16 %v1229_v15, %v1228_v48 }
 0x2f2   : > { %v1473_v60 = vmul.f32 %v5323_v24, %v1445_v4  ;;  %v658_v59 = vpop.f32.mrf.mxu2  ;;  %v1092_v42 = vsel %vm1088_vm7, %v5455_v61, -inf }
 0x2f3   : > { %v659_v16 = vadd.f32 %v658_v59, %v5386_v45  ;;  %1242 = vmatpush.bf16.msra.mxu3 %v5436_v5 }
 0x2f4   : > { %v1481_v21 = vmul.f32 %v1473_v60, %v5092_v41 }
 0x2f5   : > { %v1189_v53 = vpack.c.bf16 %v659_v16, %v659_v16 }
 0x2f6   : > { %1688 = vrot.lane.b32.xlu0 %v1479_v34, %s4733_s9  ;;  %1731 = vrot.lane.b32.xlu1 %v1481_v21, %s4733_s9 }
 0x2f7   : > { %v1256_v10 = vunpack.c.l.b16 %v1189_v53 }
 0x2fa   : > { %v660_v49 = vpop.f32.mrf.mxu2 }
 0x2fb   : > { %v661_v6 = vadd.f32 %v660_v49, %v5386_v45 }
 0x2fd   : > { %v1190_v51 = vpack.c.bf16 %v661_v6, %v661_v6  ;;  %v5466_v6 = vunpack.c.l.bf16 %v4089_v47 }
 0x2ff   : > { %v1257_v55 = vunpack.c.l.b16 %v1190_v51  ;;  %v1536_v50 = vpop.xlane.xlu1 %1535 }
 0x300   : > { %v5452_v52 = vmax.f32 %v1536_v50, 1e-24 }
 0x301   : > { %v5443_v13 = vpack.c.b16 %v1257_v55, %v1256_v10 }
 0x302   : > { %v663_v2 = vpop.f32.mrf.mxu2  ;;  %vm1614_vm3 = vweird.f32 %v5452_v52 }
 0x303   : > { %1270 = vmatpush.bf16.msra.mxu0 %v5443_v13  ;;  %v664_v0 = vadd.f32 %v663_v2, %v5386_v45  ;;  %v5472_v2 = vadd.f32 %v5466_v6, %v977_v29 }
 0x305   : > { %v1191_v60 = vpack.c.bf16 %v664_v0, %v664_v0 }
 0x307   : > { %v1374_v40 = vpop.xlane.xlu2 %1373  ;;  %v1284_v15 = vunpack.c.l.b16 %v1191_v60 }
 0x308   : > { %v1384_v28 = vmax.f32 %v1374_v40, 1e-24 }
 0x30a   : > { %4276 = vrsqrt.f32 %v1384_v28  ;;  %v665_v21 = vpop.f32.mrf.mxu2  ;;  %vm1452_vm9 = vweird.f32 %v1384_v28 }
 0x30b   : > { %4278 = vrsqrt.f32 %v5441_v33  ;;  %v666_v18 = vadd.f32 %v665_v21, %v5386_v45  ;;  %v1089_v21 = vsel %vm1088_vm7, %v5472_v2, -inf }
 0x30c   : > { %4280 = vrsqrt.f32 %v5450_v46 }
 0x30d   : > { %4282 = vrsqrt.f32 %v5452_v52  ;;  %v1192_v8 = vpack.c.bf16 %v666_v18, %v666_v18 }
 0x30f   : > { %v1377_v63 = vpop.xlane.xlu2 %1376  ;;  %v1285_v49 = vunpack.c.l.b16 %v1192_v8 }
 0x310   : > { %v4277_v4 = vpop.eup %4276  ;;  %v5458_v20 = vmax.f32 %v1377_v63, 1e-24 }
 0x311   : > { %v4279_v54 = vpop.eup %4278  ;;  %v1447_v34 = vmul.f32 %v4277_v4, %v1384_v28  ;;  %vm1453_vm8 = vweird.f32 %v4277_v4  ;;  %v5468_v10 = vpack.c.b16 %v1285_v49, %v1284_v15 }
 0x312   : > { %v1599_v48 = vmul.f32 %v4279_v54, %v5441_v33  ;;  %4284 = vrsqrt.f32 %v5458_v20  ;;  %v4281_v45 = vpop.eup %4280  ;;  %vm1454_vm10 = vmor %vm1452_vm9, %vm1453_vm8  ;;  %vm1605_vm11 = vweird.f32 %v4279_v54  ;;  %vm1462_vm6 = vweird.f32 %v5458_v20 }
 0x313   : > { %v1448_v59 = vmul.f32 %v4277_v4, %v1447_v34  ;;  %v4283_v55 = vpop.eup %4282  ;;  %1298 = vmatpush.bf16.msrb.mxu1 %v5468_v10  ;;  %v1619_v3 = vmul.f32 %v4281_v45, %v5450_v46  ;;  %vm1606_vm13 = vmor %vm1604_vm12, %vm1605_vm11  ;;  %vm1625_vm15 = vweird.f32 %v4281_v45 }
 0x314   : > { %v1600_v51 = vmul.f32 %v4279_v54, %v1599_v48  ;;  %v1609_v44 = vmul.f32 %v4283_v55, %v5452_v52  ;;  %vm1626_vm1 = vmor %vm1624_vm14, %vm1625_vm15  ;;  %vm1615_vm2 = vweird.f32 %v4283_v55 }
 0x315   : > { %v1449_v16 = vmul.f32 0.5, %v1448_v59  ;;  %1093 = vmax.xlane.f32.xlu2 %v1092_v42  ;;  %v1620_v34 = vmul.f32 %v4281_v45, %v1619_v3  ;;  %vm1616_vm5 = vmor %vm1614_vm3, %vm1615_vm2 }
 0x316   : > { %v1601_v0 = vmul.f32 0.5, %v1600_v51  ;;  %v1610_v29 = vmul.f32 %v4283_v55, %v1609_v44 }
 0x317   : > { %v1450_v53 = vsub.f32 1.5, %v1449_v16 }
 0x318   : > { %v4285_v47 = vpop.eup %4284  ;;  %v1602_v18 = vsub.f32 1.5, %v1601_v0  ;;  %v1611_v48 = vmul.f32 0.5, %v1610_v29 }
 0x319   : > { %v1451_v40 = vmul.f32 %v4277_v4, %v1450_v53  ;;  %v1457_v28 = vmul.f32 %v4285_v47, %v5458_v20  ;;  %vm1463_vm4 = vweird.f32 %v4285_v47 }
 0x31a   : > { %v1603_v42 = vmul.f32 %v4279_v54, %v1602_v18  ;;  %v1612_v16 = vsub.f32 1.5, %v1611_v48  ;;  %vm1464_vm8 = vmor %vm1462_vm6, %vm1463_vm4 }
 0x31b   : > { %v1455_v50 = vsel %vm1454_vm10, %v4277_v4, %v1451_v40  ;;  %v1621_v4 = vmul.f32 0.5, %v1620_v34  ;;  %v1458_v59 = vmul.f32 %v4285_v47, %v1457_v28 }
 0x31c   : > { %v1474_v63 = vmul.f32 %v5323_v24, %v1455_v50  ;;  %v1607_v49 = vsel %vm1606_vm13, %v4279_v54, %v1603_v42  ;;  %v1613_v3 = vmul.f32 %v4283_v55, %v1612_v16 }
 0x31d   : > { %v1622_v15 = vsub.f32 1.5, %v1621_v4  ;;  %v1459_v8 = vmul.f32 0.5, %v1458_v59  ;;  %v1633_v51 = vmul.f32 %v1607_v49, %v5062_v31  ;;  %v5537_v49 = vpop.permute.xlu1 %1643 }
 0x31e   : > { %v1482_v60 = vmul.f32 %v1474_v63, %v5190_v19  ;;  %v1617_v0 = vsel %vm1616_vm5, %v4283_v55, %v1613_v3 }
 0x31f   : > { %v1460_v53 = vsub.f32 1.5, %v1459_v8  ;;  %v1623_v40 = vmul.f32 %v4281_v45, %v1622_v15  ;;  %v1634_v54 = vmul.f32 %v1617_v0, %v5137_v57 }
 0x320   : > { %1090 = vmax.xlane.f32.xlu0 %v1089_v21  ;;  %1772 = vrot.lane.b32.xlu1 %v1482_v60, %s4733_s9  ;;  %v1650_v60 = vpop.permute.xlu0 %1649 }
 0x321   : > { %v1461_v33 = vmul.f32 %v4285_v47, %v1460_v53  ;;  %v1627_v50 = vsel %vm1626_vm1, %v4281_v45, %v1623_v40  ;;  %v1012_v45 = vpop.f32.mrf.mxu3 }
 0x322   : > { %v1635_v46 = vmul.f32 %v1627_v50, %v5081_v37  ;;  %v5502_v21 = vadd.f32 %v5466_v6, %v1012_v45 }
 0x323   : > { %v1465_v44 = vsel %vm1464_vm8, %v4285_v47, %v1461_v33  ;;  %v2239_v47 = vsel %vm685_vm0, %v5098_v43, 0.0 }
 0x324   : > { %v1475_v52 = vmul.f32 %v5323_v24, %v1465_v44  ;;  %v2236_v24 = vsel %vm685_vm0, %v5083_v38, 0.0  ;;  %v1095_v4 = vsel %vm1088_vm7, %v5502_v21, -inf  ;;  %v6521_v44 = vld [vmem:[#allocation29_spill] sm:$0xff] }
 0x325   : > { %v5543_v40 = vpop.permute.xlu1 %1645 }
 0x326   : > { %v1483_v55 = vmul.f32 %v1475_v52, %v5125_v25 }
 0x328   : > { %2062 = vrot.lane.b32.xlu1 %v5019_v12, %s4734_s20 }
 0x329   : > { %v1015_v20 = vpop.f32.mrf.mxu3 }
 0x32a   : > { %v5512_v59 = vadd.f32 %v5447_v39, %v1015_v20 }
 0x32c   : > { %v1098_v42 = vsel %vm1088_vm7, %v5512_v59, -inf }
 0x32d   : > { %1737 = vrot.lane.b32.xlu2 %v1633_v51, %s4733_s9 }
 0x331   : > { %v1047_v34 = vpop.f32.mrf.mxu3 }
 0x332   : > { %v5515_v43 = vadd.f32 %v5466_v6, %v1047_v34 }
 0x334   : > { %1780 = vrot.lane.b32.xlu0 %v1635_v46, %s4733_s9  ;;  %v1101_v38 = vsel %vm1088_vm7, %v5515_v43, -inf  ;;  %v6520_v46 = vld [vmem:[#allocation31_spill] sm:$0xff] }
 0x335   : > { %1778 = vrot.lane.b32.xlu2 %v1634_v54, %s4733_s9  ;;  %v1736_v50 = vpop.permute.xlu1 %1735 }
 0x336   : > { %v1652_v63 = vpop.permute.xlu2 %1651 }
 0x337   : > { %3928 = vmatpush.xpose.msk.msra.mxu1 %vm685_vm0, %v1652_v63 }
 0x339   : > { %v1050_v28 = vpop.f32.mrf.mxu3 }
 0x33a   : > { %v5555_v63 = vadd.f32 %v5447_v39, %v1050_v28  ;;  %v6523_v28 = vld [vmem:[#allocation30_spill] sm:$0xff] }
 0x33b   : > { %3929 = vmatpush.xpose.msk.msra.mxu1 %vm685_vm0, %v1650_v60 }
 0x33c   : > { %1774 = vrot.lane.b32.xlu0 %v1483_v55, %s4733_s9  ;;  %v1104_v45 = vsel %vm1088_vm7, %v5555_v63, -inf  ;;  %v6522_v55 = vld [vmem:[#allocation34_spill] sm:$0xff] }
 0x33e   : > { %v5523_v15 = vpop.permute.xlu2 %1692 }
 0x352   : > { %2240 = vadd.xlane.f32.xlu1 %v2239_v47 }
 0x358   : > { %v5525_v8 = vpop.permute.xlu0 %1686 }
 0x359   : > { %v1082_v18 = vpop.f32.mrf.mxu3 }
 0x35a   : > { %2237 = vadd.xlane.f32.xlu1 %v2236_v24  ;;  %v5507_v29 = vadd.f32 %v5466_v6, %v1082_v18  ;;  %v5533_v6 = vpop.permute.xlu2 %1729  ;;  %v2082_v24 = vsel %vm685_vm0, %v6523_v28, 0.0 }
 0x35c   : > { %v1107_v48 = vsel %vm1088_vm7, %v5507_v29, -inf }
 0x35e   : > { %1096 = vmax.xlane.f32.xlu2 %v1095_v4  ;;  %v6524_v4 = vld [vmem:[#allocation32_spill] sm:$0xff] }
 0x360   : > { %v5535_v16 = vpop.permute.xlu0 %1694 }
 0x361   : > { %v1085_v60 = vpop.f32.mrf.mxu3 }
 0x362   : > { %1108 = vmax.xlane.f32.xlu1 %v1107_v48  ;;  %v5566_v20 = vadd.f32 %v5447_v39, %v1085_v60  ;;  %v2085_v48 = vsel %vm685_vm0, %v6524_v4, 0.0 }
 0x364   : > { %v1110_v34 = vsel %vm1088_vm7, %v5566_v20, -inf }
 0x366   : > { %1102 = vmax.xlane.f32.xlu2 %v1101_v38  ;;  %1099 = vmax.xlane.f32.xlu0 %v1098_v42 }
 0x368   : > { %v5541_v51 = vpop.permute.xlu0 %1688  ;;  %v5579_v38 = vpop.permute.xlu1 %1731 }
 0x37a   : > { %2220 = vrot.lane.b32.xlu0 %v5052_v27, %s4734_s20 }
 0x37b   : > { %2072 = vrot.lane.b32.xlu1 %v5132_v35, %s4734_s20 }
 0x37e   : > { %2216 = vrot.lane.b32.xlu2 %v5006_v9, %s4734_s20 }
 0x386   : > { %2066 = vrot.lane.b32.xlu2 %v5043_v23, %s4734_s20 }
 0x388   : > { %v1094_v53 = vpop.xlane.xlu2 %1093 }
 0x389   : > { %v1114_v47 = vsub.f32 %v5455_v61, %v1094_v53 }
 0x38b   : > { %v1123_v18 = vmul.f32 1.442695, %v1114_v47 }
 0x38e   : > { %2064 = vrot.lane.b32.xlu2 %v5066_v32, %s4734_s20 }
 0x390   : > { %v1738_v3 = vpop.permute.xlu2 %1737 }
 0x391   : > { %3936 = vmatpush.xpose.msk.msrb.mxu0 %vm685_vm0, %v1738_v3 }
 0x392   : > { %v5585_v61 = vpop.permute.xlu1 %1772 }
 0x393   : > { %v1091_v33 = vpop.xlane.xlu0 %1090 }
 0x394   : > { %v1113_v0 = vsub.f32 %v5472_v2, %v1091_v33 }
 0x395   : > { %3937 = vmatpush.xpose.msk.msrb.mxu0 %vm685_vm0, %v1736_v50 }
 0x396   : > { %2068 = vrot.lane.b32.xlu2 %v6520_v46, %s4734_s20  ;;  %v1121_v54 = vmul.f32 1.442695, %v1113_v0 }
 0x398   : > { %4286 = vpow2.f32 %v1121_v54  ;;  %v5587_v53 = vpop.permute.xlu2 %1778 }
 0x399   : > { %4288 = vpow2.f32 %v1123_v18 }
 0x39a   : > { %v2063_v54 = vpop.permute.xlu1 %2062 }
 0x39b   : > { %v2088_v60 = vsel %vm685_vm0, %v2063_v54, 0.0 }
 0x39e   : > { %2226 = vrot.lane.b32.xlu2 %v6521_v44, %s4734_s20  ;;  %v5557_v52 = vpop.eup %4286 }
 0x39f   : > { %v1137_v2 = vsel %vm1088_vm7, %v5557_v52, 0.0  ;;  %v5577_v39 = vpop.eup %4288 }
 0x3a0   : > { %v1140_v42 = vsel %vm1088_vm7, %v5577_v39, 0.0 }
 0x3a4   : > { %1105 = vmax.xlane.f32.xlu0 %v1104_v45 }
 0x3a5   : > { %1138 = vadd.xlane.f32.xlu1 %v1137_v2 }
 0x3a6   : > { %2224 = vrot.lane.b32.xlu2 %v6522_v55, %s4734_s20  ;;  %v5583_v3 = vpop.permute.xlu0 %1780 }
 0x3ac   : > { %1111 = vmax.xlane.f32.xlu0 %v1110_v34 }
 0x3ae   : > { %2070 = vrot.lane.b32.xlu2 %v5198_v36, %s4734_s20  ;;  %v5589_v33 = vpop.permute.xlu0 %1774 }
 0x3b4   : > { %2083 = vadd.xlane.f32.xlu0 %v2082_v24 }
 0x3bc   : > { %2086 = vadd.xlane.f32.xlu0 %v2085_v48 }
 0x3c4   : > { %1141 = vadd.xlane.f32.xlu0 %v1140_v42 }
 0x3d1   : > { %v1097_v50 = vpop.xlane.xlu2 %1096 }
 0x3d2   : > { %v1115_v0 = vsub.f32 %v5502_v21, %v1097_v50 }
 0x3d4   : > { %v1125_v45 = vmul.f32 1.442695, %v1115_v0 }
 0x3d6   : > { %4290 = vpow2.f32 %v1125_v45 }
 0x3d7   : > { %2089 = vadd.xlane.f32.xlu2 %v2088_v60  ;;  %v5612_v60 = vpop.xlane.xlu1 %2240 }
 0x3d9   : > { %v1103_v2 = vpop.xlane.xlu2 %1102  ;;  %v1100_v34 = vpop.xlane.xlu0 %1099 }
 0x3da   : > { %v1117_v47 = vsub.f32 %v5515_v43, %v1103_v2  ;;  %v1116_v28 = vsub.f32 %v5512_v59, %v1100_v34 }
 0x3dc   : > { %v5595_v24 = vpop.eup %4290  ;;  %v1129_v18 = vmul.f32 1.442695, %v1117_v47  ;;  %v1127_v4 = vmul.f32 1.442695, %v1116_v28 }
 0x3dd   : > { %v1143_v48 = vsel %vm1088_vm7, %v5595_v24, 0.0 }
 0x3de   : > { %4292 = vpow2.f32 %v1129_v18  ;;  %1144 = vadd.xlane.f32.xlu0 %v1143_v48 }
 0x3df   : > { %4294 = vpow2.f32 %v1127_v4  ;;  %v2238_v28 = vpop.xlane.xlu1 %2237 }
 0x3e0   : > { %v2260_v18 = vmax.f32 %v2238_v28, 1e-24 }
 0x3e1   : > { %v5599_v21 = vpop.permute.xlu2 %2216 }
 0x3e2   : > { %4296 = vrsqrt.f32 %v2260_v18  ;;  %vm2274_vm10 = vweird.f32 %v2260_v18 }
 0x3e4   : > { %v5601_v42 = vpop.eup %4292 }
 0x3e5   : > { %v5603_v50 = vpop.eup %4294  ;;  %v1149_v43 = vsel %vm1088_vm7, %v5601_v42, 0.0 }
 0x3e6   : > { %1150 = vadd.xlane.f32.xlu0 %v1149_v43  ;;  %v1146_v59 = vsel %vm1088_vm7, %v5603_v50, 0.0 }
 0x3e7   : > { %1147 = vadd.xlane.f32.xlu1 %v1146_v59  ;;  %v1109_v36 = vpop.xlane.xlu1 %1108 }
 0x3e8   : > { %v4297_v43 = vpop.eup %4296 }
 0x3e9   : > { %v2067_v0 = vpop.permute.xlu2 %2066  ;;  %vm2275_vm9 = vweird.f32 %v4297_v43 }
 0x3ea   : > { %v2094_v54 = vsel %vm685_vm0, %v2067_v0, 0.0  ;;  %v2269_v0 = vmul.f32 %v4297_v43, %v2260_v18  ;;  %vm2276_vm11 = vmor %vm2274_vm10, %vm2275_vm9  ;;  %vm668_vm10 = vcmask 1043712  }
 0x3eb   : > { %2095 = vadd.xlane.f32.xlu2 %v2094_v54 }
 0x3ec   : > { %v5618_v59 = vpop.permute.xlu0 %2220  ;;  %v2270_v54 = vmul.f32 %v4297_v43, %v2269_v0 }
 0x3f1   : > { %v5610_v45 = vpop.permute.xlu2 %2064 }
 0x3f9   : > { %v2069_v2 = vpop.permute.xlu2 %2068 }
 0x3fa   : > { %v2097_v34 = vsel %vm685_vm0, %v2069_v2, 0.0  ;;  %v2271_v2 = vmul.f32 0.5, %v2270_v54 }
 0x3fb   : > { %2098 = vadd.xlane.f32.xlu2 %v2097_v34  ;;  %v1119_v34 = vsub.f32 %v5507_v29, %v1109_v36  ;;  %v2073_v36 = vpop.permute.xlu1 %2072 }
 0x3fc   : > { %v2272_v28 = vsub.f32 1.5, %v2271_v2 }
 0x3fd   : > { %v1133_v35 = vmul.f32 1.442695, %v1119_v34  ;;  %v2242_v34 = vsel %vm685_vm0, %v5599_v21, 0.0 }
 0x3fe   : > { %v2273_v12 = vmul.f32 %v4297_v43, %v2272_v28  ;;  %v6525_v28 = vld [vmem:[#allocation36_spill] sm:$0xff] }
 0x401   : > { %v5615_v47 = vpop.permute.xlu2 %2226 }
 0x409   : > { %v2225_v4 = vpop.permute.xlu2 %2224 }
 0x40a   : > { %v2254_v48 = vsel %vm685_vm0, %v2225_v4, 0.0 }
 0x40b   : > { %2255 = vadd.xlane.f32.xlu2 %v2254_v48 }
 0x417   : > { %v1106_v55 = vpop.xlane.xlu0 %1105 }
 0x418   : > { %v1118_v32 = vsub.f32 %v5555_v63, %v1106_v55 }
 0x41a   : > { %v1131_v44 = vmul.f32 1.442695, %v1118_v32  ;;  %v2277_v32 = vsel %vm2276_vm11, %v4297_v43, %v2273_v12  ;;  %v1139_v12 = vpop.xlane.xlu1 %1138 }
 0x41c   : > { %4298 = vpow2.f32 %v1131_v44 }
 0x41d   : > { %4300 = vpow2.f32 %v1133_v35  ;;  %v2348_v35 = vmul.f32 %v2277_v32, %v4957_v58 }
 0x41f   : > { %v1112_v46 = vpop.xlane.xlu0 %1111 }
 0x420   : > { %v1120_v4 = vsub.f32 %v5566_v20, %v1112_v46 }
 0x422   : > { %v5623_v48 = vpop.eup %4298  ;;  %v1135_v9 = vmul.f32 1.442695, %v1120_v4  ;;  %v2245_v4 = vsel %vm685_vm0, %v6525_v28, 0.0 }
 0x423   : > { %1914 = vrot.lane.b32.xlu2 %v5419_v17, %s4733_s9  ;;  %v1152_v63 = vsel %vm1088_vm7, %v5623_v48, 0.0  ;;  %v5629_v46 = vpop.eup %4300 }
 0x424   : > { %4302 = vpow2.f32 %v1135_v9  ;;  %1153 = vadd.xlane.f32.xlu1 %v1152_v63  ;;  %v1155_v20 = vsel %vm1088_vm7, %v5629_v46, 0.0 }
 0x427   : > { %v2084_v29 = vpop.xlane.xlu0 %2083 }
 0x428   : > { %v2106_v44 = vmax.f32 %v2084_v29, 1e-24 }
 0x42a   : > { %v5632_v55 = vpop.eup %4302  ;;  %4304 = vrsqrt.f32 %v2106_v44  ;;  %vm2120_vm13 = vweird.f32 %v2106_v44 }
 0x42b   : > { %2369 = vrot.lane.b32.xlu2 %v2348_v35, %s4734_s20  ;;  %v1158_v9 = vsel %vm1088_vm7, %v5632_v55, 0.0  ;;  %4306 = vrcp.f32 %v1139_v12  ;;  %v2103_v12 = vsel %vm685_vm0, %v2073_v36, 0.0 }
 0x42c   : > { %1156 = vadd.xlane.f32.xlu1 %v1155_v20  ;;  %1159 = vadd.xlane.f32.xlu0 %v1158_v9  ;;  %v5645_v9 = vstv %s3948_s29  ;;  %s3649_s29 = sshll.u32 %s377_s16, 4  ;;  %s3650_s29 = int_to_ptr.vmem [resolvable:$true] %s3649_s29 }
 0x42f   : > { %v2087_v18 = vpop.xlane.xlu0 %2086 }
 0x430   : > { %v4305_v43 = vpop.eup %4304  ;;  %v2107_v2 = vmax.f32 %v2087_v18, 1e-24  ;;  %v6526_v18 = vld [vmem:[#allocation35_spill] sm:$0xff] }
 0x431   : > { %v2115_v0 = vmul.f32 %v4305_v43, %v2106_v44  ;;  %vm2121_vm12 = vweird.f32 %v4305_v43  ;;  %v4307_v35 = vpop.eup %4306 }
 0x432   : > { %4308 = vrsqrt.f32 %v2107_v2  ;;  %vm2122_vm14 = vmor %vm2120_vm13, %vm2121_vm12  ;;  %v1169_v21 = vmul.f32 %v4307_v35, %v5557_v52  ;;  %vm2130_vm1 = vweird.f32 %v2107_v2 }
 0x433   : > { %v2116_v54 = vmul.f32 %v4305_v43, %v2115_v0  ;;  %1964 = vrot.lane.b32.xlu2 %v5443_v13, %s4733_s9  ;;  %v2251_v0 = vsel %vm685_vm0, %v6526_v18, 0.0 }
 0x434   : > { %2243 = vadd.xlane.f32.xlu1 %v2242_v34  ;;  %2246 = vadd.xlane.f32.xlu0 %v2245_v4  ;;  %v1177_v44 = vpack.c.bf16 %v1169_v21, %v1169_v21  ;;  %v2091_v21 = vsel %vm685_vm0, %v5610_v45, 0.0 }
 0x435   : > { %v2117_v63 = vmul.f32 0.5, %v2116_v54 }
 0x436   : > { %v1195_v36 = vunpack.c.l.b16 %v1177_v44 }
 0x437   : > { %v2118_v32 = vsub.f32 1.5, %v2117_v63  ;;  %v1142_v29 = vpop.xlane.xlu0 %1141 }
 0x438   : > { %4310 = vrcp.f32 %v1142_v29  ;;  %v4309_v28 = vpop.eup %4308 }
 0x439   : > { %v2119_v20 = vmul.f32 %v4305_v43, %v2118_v32  ;;  %v2125_v29 = vmul.f32 %v4309_v28, %v2107_v2  ;;  %vm2131_vm15 = vweird.f32 %v4309_v28 }
 0x43a   : > { %vm2132_vm2 = vmor %vm2130_vm1, %vm2131_vm15 }
 0x43b   : > { %v2123_v34 = vsel %vm2122_vm14, %v4305_v43, %v2119_v20  ;;  %v2248_v43 = vsel %vm685_vm0, %v5618_v59, 0.0  ;;  %v2126_v20 = vmul.f32 %v4309_v28, %v2125_v29  ;;  %v2071_v59 = vpop.permute.xlu2 %2070 }
 0x43c   : > { %2104 = vadd.xlane.f32.xlu1 %v2103_v12  ;;  %2252 = vadd.xlane.f32.xlu0 %v2251_v0  ;;  %v2196_v54 = vmul.f32 %v5645_v9, %v2123_v34  ;;  %v2100_v29 = vsel %vm685_vm0, %v2071_v59, 0.0 }
 0x43d   : > { %v2127_v18 = vmul.f32 0.5, %v2126_v20 }
 0x43e   : > { %v4311_v4 = vpop.eup %4310  ;;  %v2204_v63 = vmul.f32 %v2196_v54, %v4954_v56 }
 0x43f   : > { %v1170_v32 = vmul.f32 %v4311_v4, %v5577_v39  ;;  %v2261_v39 = vmax.f32 %v5612_v60, 1e-24  ;;  %v2128_v0 = vsub.f32 1.5, %v2127_v18 }
 0x440   : > { %2363 = vrot.lane.b32.xlu2 %v2204_v63, %s4734_s20 }
 0x441   : > { %v1178_v52 = vpack.c.bf16 %v1170_v32, %v1170_v32  ;;  %4312 = vrsqrt.f32 %v2261_v39  ;;  %v2129_v34 = vmul.f32 %v4309_v28, %v2128_v0  ;;  %vm2284_vm4 = vweird.f32 %v2261_v39 }
 0x443   : > { %v1196_v35 = vunpack.c.l.b16 %v1178_v52  ;;  %v2133_v60 = vsel %vm2132_vm2, %v4309_v28, %v2129_v34 }
 0x444   : > { %2249 = vadd.xlane.f32.xlu0 %v2248_v43  ;;  %v2197_v63 = vmul.f32 %v5645_v9, %v2133_v60 }
 0x445   : > { %v1197_v12 = vpack.c.b16 %v1196_v35, %v1195_v36 }
 0x447   : > { %3923 = vmatmul.msk.bf16.vlgmr.msrb.gmra.mxu3 %vm1088_vm7, %v1197_v12  ;;  %v4313_v4 = vpop.eup %4312 }
 0x448   : > { %3932 = vmatpush.xpose.msk.msrb.mxu3 %vm685_vm0, %v5535_v16  ;;  %v2257_v16 = vsel %vm685_vm0, %v5615_v47, 0.0  ;;  %v2205_v47 = vmul.f32 %v2197_v63, %v4985_v1  ;;  %vm2285_vm3 = vweird.f32 %v4313_v4 }
 0x449   : > { %vm2286_vm5 = vmor %vm2284_vm4, %vm2285_vm3 }
 0x44a   : > { %v5669_v45 = vpop.xlane.xlu2 %2089 }
 0x44c   : > { %3933 = vmatpush.xpose.msk.msrb.mxu3 %vm685_vm0, %v5523_v15  ;;  %2092 = vadd.xlane.f32.xlu0 %v2091_v21  ;;  %v2279_v15 = vmul.f32 %v4313_v4, %v2261_v39 }
 0x44e   : > { %v2280_v2 = vmul.f32 %v4313_v4, %v2279_v15 }
 0x450   : > { %v2281_v36 = vmul.f32 0.5, %v2280_v2 }
 0x451   : > { %v1145_v54 = vpop.xlane.xlu0 %1144 }
 0x452   : > { %4314 = vrcp.f32 %v1145_v54  ;;  %v2282_v18 = vsub.f32 1.5, %v2281_v36 }
 0x454   : > { %2258 = vadd.xlane.f32.xlu0 %v2257_v16  ;;  %v2283_v54 = vmul.f32 %v4313_v4, %v2282_v18 }
 0x455   : > { %1939 = vrot.lane.b32.xlu1 %v5436_v5, %s4733_s9 }
 0x458   : > { %v4315_v32 = vpop.eup %4314 }
 0x459   : > { %v1171_v28 = vmul.f32 %v4315_v32, %v5595_v24  ;;  %v2287_v24 = vsel %vm2286_vm5, %v4313_v4, %v2283_v54 }
 0x45a   : > { %v1148_v44 = vpop.xlane.xlu1 %1147 }
 0x45b   : > { %4316 = vrcp.f32 %v1148_v44  ;;  %v1179_v20 = vpack.c.bf16 %v1171_v28, %v1171_v28 }
 0x45c   : > { %2101 = vadd.xlane.f32.xlu0 %v2100_v29 }
 0x45d   : > { %2365 = vrot.lane.b32.xlu1 %v2205_v47, %s4734_s20  ;;  %v1223_v0 = vunpack.c.l.b16 %v1179_v20 }
 0x45e   : > { %v2096_v52 = vpop.xlane.xlu2 %2095 }
 0x45f   : > { %v2110_v35 = vmax.f32 %v2096_v52, 1e-24  ;;  %v1151_v52 = vpop.xlane.xlu0 %1150 }
 0x461   : > { %v4317_v43 = vpop.eup %4316  ;;  %4318 = vrsqrt.f32 %v2110_v35  ;;  %vm2160_vm8 = vweird.f32 %v2110_v35 }
 0x462   : > { %v1172_v12 = vmul.f32 %v4317_v43, %v5603_v50  ;;  %v2349_v50 = vmul.f32 %v2287_v24, %v4974_v62  ;;  %4320 = vrcp.f32 %v1151_v52 }
 0x464   : > { %v1180_v21 = vpack.c.bf16 %v1172_v12, %v1172_v12 }
 0x466   : > { %v1224_v34 = vunpack.c.l.b16 %v1180_v21 }
 0x467   : > { %v4319_v59 = vpop.eup %4318 }
 0x468   : > { %v1225_v16 = vpack.c.b16 %v1224_v34, %v1223_v0  ;;  %v2155_v60 = vmul.f32 %v4319_v59, %v2110_v35  ;;  %vm2161_vm6 = vweird.f32 %v4319_v59  ;;  %v4321_v35 = vpop.eup %4320 }
 0x469   : > { %vm2162_vm9 = vmor %vm2160_vm8, %vm2161_vm6  ;;  %v1173_v43 = vmul.f32 %v4321_v35, %v5601_v42 }
 0x46a   : > { %v2156_v15 = vmul.f32 %v4319_v59, %v2155_v60  ;;  %3924 = vmatmul.msk.bf16.vlgmr.msra.gmra.mxu3 %vm1088_vm7, %v1225_v16 }
 0x46b   : > { %v1181_v18 = vpack.c.bf16 %v1173_v43, %v1173_v43 }
 0x46c   : > { %v2157_v63 = vmul.f32 0.5, %v2156_v15 }
 0x46e   : > { %v2158_v44 = vsub.f32 1.5, %v2157_v63  ;;  %v2099_v47 = vpop.xlane.xlu2 %2098 }
 0x470   : > { %v2159_v32 = vmul.f32 %v4319_v59, %v2158_v44  ;;  %2371 = vrot.lane.b32.xlu0 %v2349_v50, %s4734_s20 }
 0x472   : > { %v2163_v2 = vsel %vm2162_vm9, %v4319_v59, %v2159_v32 }
 0x473   : > { %v2200_v29 = vmul.f32 %v5645_v9, %v2163_v2  ;;  %v5698_v2 = vmax.f32 %v2099_v47, 1e-24 }
 0x475   : > { %v2208_v39 = vmul.f32 %v2200_v29, %v5039_v22 }
 0x477   : > { %2449 = vrot.lane.b32.xlu2 %v2208_v39, %s4734_s20 }
 0x47a   : > { %3934 = vmatmul.msk.f32.vlgmr.msrb.gmra.mxu3 %vm685_vm0, %v5525_v8 }
 0x47e   : > { %v5685_v4 = vpop.xlane.xlu2 %2255 }
 0x482   : > { %3935 = vmatmul.msk.f32.gmra.mxu3 %vm685_vm0, %v5541_v51  ;;  %v1251_v51 = vunpack.c.l.b16 %v1181_v18 }
 0x486   : > { %v1915_v28 = vpop.permute.xlu2 %1914 }
 0x487   : > { %1927 = vmatpush.bf16.msrb.mxu2 %v1915_v28 }
 0x48e   : > { %v5690_v20 = vpop.permute.xlu2 %2369 }
 0x496   : > { %v1965_v60 = vpop.permute.xlu2 %1964 }
 0x497   : > { %v1154_v36 = vpop.xlane.xlu1 %1153 }
 0x498   : > { %4322 = vrcp.f32 %v1154_v36 }
 0x49e   : > { %v4323_v12 = vpop.eup %4322 }
 0x49f   : > { %v1174_v8 = vmul.f32 %v4323_v12, %v5623_v48  ;;  %v1157_v21 = vpop.xlane.xlu1 %1156  ;;  %v1160_v0 = vpop.xlane.xlu0 %1159 }
 0x4a0   : > { %4324 = vrcp.f32 %v1157_v21 }
 0x4a1   : > { %v1182_v34 = vpack.c.bf16 %v1174_v8, %v1174_v8  ;;  %4326 = vrcp.f32 %v1160_v0  ;;  %v5717_v8 = vmax.f32 %v5669_v45, 1e-24 }
 0x4a3   : > { %v1252_v59 = vunpack.c.l.b16 %v1182_v34 }
 0x4a5   : > { %v1253_v54 = vpack.c.b16 %v1252_v59, %v1251_v51 }
 0x4a6   : > { %v4325_v16 = vpop.eup %4324 }
 0x4a7   : > { %v4327_v15 = vpop.eup %4326  ;;  %v1175_v24 = vmul.f32 %v4325_v16, %v5629_v46  ;;  %v2244_v42 = vpop.xlane.xlu1 %2243  ;;  %3925 = vmatmul.msk.bf16.vlgmr.msra.gmra.mxu0 %vm1088_vm7, %v1253_v54 }
 0x4a8   : > { %v2247_v63 = vpop.xlane.xlu0 %2246  ;;  %v1176_v44 = vmul.f32 %v4327_v15, %v5632_v55  ;;  %1977 = vmatpush.bf16.msra.mxu0 %v1965_v60  ;;  %v5696_v32 = vmax.f32 %v2244_v42, 1e-24  ;;  %v4735_v55 = vmov 0  }
 0x4a9   : > { %v2263_v48 = vmax.f32 %v2247_v63, 1e-24  ;;  %v1183_v50 = vpack.c.bf16 %v1175_v24, %v1175_v24  ;;  %669 = vst.msk [vmem:[#allocation2] sm:$0xf] %vm668_vm10, %v4735_v55 }
 0x4aa   : > { %v1184_v29 = vpack.c.bf16 %v1176_v44, %v1176_v44  ;;  %670 = vst.msk [vmem:[#allocation2 + $0x4] sm:$0xf] %vm668_vm10, %v4735_v55  ;;  %vm2294_vm9 = vweird.f32 %v5696_v32 }
 0x4ab   : > { %4328 = vrsqrt.f32 %v2263_v48  ;;  %v1279_v39 = vunpack.c.l.b16 %v1183_v50  ;;  %671 = vst.msk [vmem:[#allocation2 + $0x8] sm:$0xf] %vm668_vm10, %v4735_v55  ;;  %vm2304_vm12 = vweird.f32 %v2263_v48 }
 0x4ac   : > { %v1280_v28 = vunpack.c.l.b16 %v1184_v29  ;;  %4330 = vrsqrt.f32 %v5696_v32  ;;  %672 = vst.msk [vmem:[#allocation2 + $0xc] sm:$0xf] %vm668_vm10, %v4735_v55 }
 0x4ad   : > { %4332 = vrsqrt.f32 %v5698_v2  ;;  %673 = vst.msk [vmem:[#allocation2 + $0x10] sm:$0xf] %vm668_vm10, %v4735_v55 }
 0x4ae   : > { %v1281_v46 = vpack.c.b16 %v1280_v28, %v1279_v39  ;;  %674 = vst.msk [vmem:[#allocation2 + $0x14] sm:$0xf] %vm668_vm10, %v4735_v55 }
 0x4af   : > { %v2105_v52 = vpop.xlane.xlu1 %2104  ;;  %675 = vst.msk [vmem:[#allocation2 + $0x18] sm:$0xf] %vm668_vm10, %v4735_v55 }
 0x4b0   : > { %v2253_v36 = vpop.xlane.xlu0 %2252  ;;  %v5703_v35 = vmax.f32 %v2105_v52, 1e-24  ;;  %3926 = vmatmul.msk.bf16.vlgmr.msrb.gmra.mxu1 %vm1088_vm7, %v1281_v46  ;;  %676 = vst.msk [vmem:[#allocation2 + $0x1c] sm:$0xf] %vm668_vm10, %v4735_v55 }
 0x4b1   : > { %v5706_v47 = vmax.f32 %v2253_v36, 1e-24  ;;  %v4329_v43 = vpop.eup %4328  ;;  %3940 = vmatpush.xpose.msk.msrb.mxu1 %vm685_vm0, %v5583_v3 }
 0x4b2   : > { %v2299_v12 = vmul.f32 %v4329_v43, %v2263_v48  ;;  %4334 = vrsqrt.f32 %v5703_v35  ;;  %v5714_v18 = vpop.eup %4330  ;;  %vm2305_vm11 = vweird.f32 %v4329_v43  ;;  %vm2190_vm1 = vweird.f32 %v5703_v35 }
 0x4b3   : > { %4336 = vrsqrt.f32 %v5706_v47  ;;  %v5721_v21 = vpop.eup %4332  ;;  %v2289_v3 = vmul.f32 %v5714_v18, %v5696_v32  ;;  %vm2306_vm13 = vmor %vm2304_vm12, %vm2305_vm11  ;;  %vm2324_vm3 = vweird.f32 %v5706_v47  ;;  %vm2295_vm5 = vweird.f32 %v5714_v18 }
 0x4b4   : > { %v2300_v0 = vmul.f32 %v4329_v43, %v2299_v12  ;;  %4338 = vrsqrt.f32 %v5717_v8  ;;  %v2165_v45 = vmul.f32 %v5721_v21, %v5698_v2  ;;  %vm2171_vm8 = vweird.f32 %v5721_v21  ;;  %vm5788_vm11 = vmor %vm2294_vm9, %vm2295_vm5 }
 0x4b5   : > { %3941 = vmatpush.xpose.msk.msrb.mxu1 %vm685_vm0, %v5587_v53  ;;  %v5736_v53 = vmax.f32 %v5685_v4, 1e-24  ;;  %v2290_v24 = vmul.f32 %v5714_v18, %v2289_v3 }
 0x4b6   : > { %v2301_v34 = vmul.f32 0.5, %v2300_v0  ;;  %v2166_v4 = vmul.f32 %v5721_v21, %v2165_v45 }
 0x4b7   : > { %3938 = vmatmul.msk.f32.vlgmr.msrb.gmra.mxu0 %vm685_vm0, %v5533_v6  ;;  %v2291_v28 = vmul.f32 0.5, %v2290_v24  ;;  %vm2334_vm5 = vweird.f32 %v5736_v53 }
 0x4b8   : > { %v2250_v51 = vpop.xlane.xlu0 %2249  ;;  %v4335_v59 = vpop.eup %4334  ;;  %v2302_v54 = vsub.f32 1.5, %v2301_v34  ;;  %v2167_v12 = vmul.f32 0.5, %v2166_v4 }
 0x4b9   : > { %v5738_v16 = vmax.f32 %v2250_v51, 1e-24  ;;  %v4337_v60 = vpop.eup %4336  ;;  %v2185_v15 = vmul.f32 %v4335_v59, %v5703_v35  ;;  %vm2191_vm14 = vweird.f32 %v4335_v59 }
 0x4ba   : > { %v2319_v42 = vmul.f32 %v4337_v60, %v5706_v47  ;;  %v2303_v6 = vmul.f32 %v4329_v43, %v2302_v54  ;;  %v5746_v29 = vpop.eup %4338  ;;  %vm2325_vm15 = vweird.f32 %v4337_v60  ;;  %vm2192_vm2 = vmor %vm2190_vm1, %vm2191_vm14  ;;  %v2168_v24 = vsub.f32 1.5, %v2167_v12 }
 0x4bb   : > { %4340 = vrsqrt.f32 %v5738_v16  ;;  %v2186_v63 = vmul.f32 %v4335_v59, %v2185_v15  ;;  %v2135_v3 = vmul.f32 %v5746_v29, %v5717_v8  ;;  %vm2326_vm4 = vmor %vm2324_vm3, %vm2325_vm15  ;;  %vm2314_vm10 = vweird.f32 %v5738_v16 }
 0x4bc   : > { %4342 = vrsqrt.f32 %v5736_v53  ;;  %v2320_v44 = vmul.f32 %v4337_v60, %v2319_v42  ;;  %v2307_v50 = vsel %vm2306_vm13, %v4329_v43, %v2303_v6  ;;  %vm1313_vm13 = vcmask 60416  }
 0x4bd   : > { %v2187_v48 = vmul.f32 0.5, %v2186_v63  ;;  %v2351_v39 = vmul.f32 %v2307_v50, %v5024_v14  ;;  %vm2170_vm14 = vweird.f32 %v5698_v2  ;;  %vm2141_vm1 = vweird.f32 %v5746_v29 }
 0x4be   : > { %v2321_v46 = vmul.f32 0.5, %v2320_v44  ;;  %v2136_v44 = vmul.f32 %v5746_v29, %v2135_v3  ;;  %vm5801_vm15 = vmor %vm2170_vm14, %vm2171_vm8 }
 0x4bf   : > { %v2188_v52 = vsub.f32 1.5, %v2187_v48  ;;  %2414 = vrot.lane.b32.xlu1 %v2351_v39, %s4734_s20  ;;  %3939 = vmatmul.msk.f32.gmra.mxu0 %vm685_vm0, %v5579_v38  ;;  %v2292_v38 = vsub.f32 1.5, %v2291_v28  ;;  %v2169_v39 = vmul.f32 %v5721_v21, %v2168_v24 }
 0x4c0   : > { %v2093_v36 = vpop.xlane.xlu0 %2092  ;;  %v2322_v0 = vsub.f32 1.5, %v2321_v46  ;;  %3930 = vmatmul.msk.f32.vlgmr.msra.gmra.mxu1 %vm685_vm0, %v5537_v49  ;;  %v2137_v32 = vmul.f32 0.5, %v2136_v44 }
 0x4c1   : > { %v4341_v55 = vpop.eup %4340  ;;  %v5754_v43 = vmax.f32 %v2093_v36, 1e-24  ;;  %v2189_v34 = vmul.f32 %v4335_v59, %v2188_v52  ;;  %v2293_v50 = vmul.f32 %v5714_v18, %v2292_v38 }
 0x4c2   : > { %v2309_v45 = vmul.f32 %v4341_v55, %v5738_v16  ;;  %v5760_v51 = vpop.eup %4342  ;;  %v2323_v49 = vmul.f32 %v4337_v60, %v2322_v0  ;;  %vm2315_vm6 = vweird.f32 %v4341_v55  ;;  %v2138_v2 = vsub.f32 1.5, %v2137_v32 }
 0x4c3   : > { %4344 = vrsqrt.f32 %v5754_v43  ;;  %v2193_v15 = vsel %vm2192_vm2, %v4335_v59, %v2189_v34  ;;  %v2329_v35 = vmul.f32 %v5760_v51, %v5736_v53  ;;  %v2297_v3 = vsel %vm5788_vm11, %v5714_v18, %v2293_v50  ;;  %vm2316_vm12 = vmor %vm2314_vm10, %vm2315_vm6 }
 0x4c4   : > { %v2310_v54 = vmul.f32 %v4341_v55, %v2309_v45  ;;  %v2327_v42 = vsel %vm2326_vm4, %v4337_v60, %v2323_v49  ;;  %v2203_v6 = vmul.f32 %v5645_v9, %v2193_v15  ;;  %v2350_v18 = vmul.f32 %v2297_v3, %v5000_v7 }
 0x4c5   : > { %v2353_v4 = vmul.f32 %v2327_v42, %v5062_v31  ;;  %v2330_v46 = vmul.f32 %v5760_v51, %v2329_v35  ;;  %v6531_v42 = vld [vmem:[#allocation20_spill] sm:$0xff]  ;;  %v2139_v35 = vmul.f32 %v5746_v29, %v2138_v2  ;;  %vm2140_vm2 = vweird.f32 %v5717_v8 }
 0x4c6   : > { %v2311_v63 = vmul.f32 0.5, %v2310_v54  ;;  %v2211_v47 = vmul.f32 %v2203_v6, %v5125_v25  ;;  %v2173_v54 = vsel %vm5801_vm15, %v5721_v21, %v2169_v39  ;;  %vm2142_vm3 = vmor %vm2140_vm2, %vm2141_vm1  ;;  %vm2335_vm4 = vweird.f32 %v5760_v51 }
 0x4c7   : > { %2457 = vrot.lane.b32.xlu1 %v2353_v4, %s4734_s20  ;;  %v1940_v28 = vpop.permute.xlu1 %1939  ;;  %v2331_v49 = vmul.f32 0.5, %v2330_v46  ;;  %v2201_v21 = vmul.f32 %v5645_v9, %v2173_v54  ;;  %v2143_v39 = vsel %vm2142_vm3, %v5746_v29, %v2139_v35  ;;  %vm2336_vm6 = vmor %vm2334_vm5, %vm2335_vm4  ;;  %vm2150_vm9 = vweird.f32 %v5754_v43  ;;  %v6534_v35 = vld [vmem:[#allocation21_spill] sm:$0xff] }
 0x4c8   : > { %v2312_v48 = vsub.f32 1.5, %v2311_v63  ;;  %v2259_v59 = vpop.xlane.xlu0 %2258  ;;  %3931 = vmatmul.msk.f32.gmra.mxu1 %vm685_vm0, %v5543_v40  ;;  %2494 = vrot.lane.b32.xlu2 %v2211_v47, %s4734_s20 }
 0x4c9   : > { %v5774_v60 = vpop.eup %4344  ;;  %v5784_v52 = vmax.f32 %v2259_v59, 1e-24  ;;  %1952 = vmatpush.bf16.msra.mxu3 %v1940_v28  ;;  %v2332_v6 = vsub.f32 1.5, %v2331_v49  ;;  %v2198_v28 = vmul.f32 %v5645_v9, %v2143_v39 }
 0x4ca   : > { %v2313_v12 = vmul.f32 %v4341_v55, %v2312_v48  ;;  %v2145_v40 = vmul.f32 %v5774_v60, %v5754_v43  ;;  %v1216_v0 = vpop.f32.mrf.mxu3  ;;  %vm2151_vm8 = vweird.f32 %v5774_v60 }
 0x4cb   : > { %v1305_v16 = vpack.c.bf16 %v1216_v0, %v1216_v0  ;;  %4346 = vrsqrt.f32 %v5784_v52  ;;  %v2333_v50 = vmul.f32 %v5760_v51, %v2332_v6  ;;  %vm2152_vm10 = vmor %vm2150_vm9, %vm2151_vm8  ;;  %v2206_v32 = vmul.f32 %v2198_v28, %v5015_v11 }
 0x4cc   : > { %v2317_v34 = vsel %vm2316_vm12, %v4341_v55, %v2313_v12  ;;  %v2146_v55 = vmul.f32 %v5774_v60, %v2145_v40  ;;  %vm2344_vm12 = vweird.f32 %v5784_v52 }
 0x4cd   : > { %v2352_v38 = vmul.f32 %v2317_v34, %v5048_v26  ;;  %1314 = vst.msk [vmem:[#allocation2] sm:$0xf] %vm1313_vm13, %v1305_v16  ;;  %v2337_v46 = vsel %vm2336_vm6, %v5760_v51, %v2333_v50 }
 0x4ce   : > { %v2147_v63 = vmul.f32 0.5, %v2146_v55  ;;  %v2354_v53 = vmul.f32 %v2337_v46, %v5137_v57 }
 0x4cf   : > { %2455 = vrot.lane.b32.xlu0 %v2352_v38, %s4734_s20  ;;  %2412 = vrot.lane.b32.xlu1 %v2350_v18, %s4734_s20  ;;  %v6532_v38 = vld [vmem:[#allocation22_spill] sm:$0xff]  ;;  %v5876_v28 = vpop.permute.xlu1 %2365 }
 0x4d0   : > { %v2102_v15 = vpop.xlane.xlu0 %2101  ;;  %3942 = vmatmul.msk.f32.vlgmr.msrb.gmra.mxu1 %vm685_vm0, %v5585_v61  ;;  %2778 = vrot.lane.b32.xlu2 %v6531_v42, %s4736_s22  ;;  %v2209_v61 = vmul.f32 %v2201_v21, %v5092_v41  ;;  %v2148_v48 = vsub.f32 1.5, %v2147_v63  ;;  %v4093_v63 = vld [vmem:[#allocation11 + $0x8] sm:$0xff]  }
 0x4d1   : > { %v2112_v24 = vmax.f32 %v2102_v15, 1e-24  ;;  %v4347_v44 = vpop.eup %4346  ;;  %v6533_v15 = vld [vmem:[#allocation28_spill] sm:$0xff]  ;;  %v4094_v50 = vunpack.c.l.bf16 %v4093_v63 }
 0x4d2   : > { %v1218_v4 = vpop.f32.mrf.mxu3  ;;  %v2339_v59 = vmul.f32 %v4347_v44, %v5784_v52  ;;  %v2149_v36 = vmul.f32 %v5774_v60, %v2148_v48  ;;  %vm2345_vm11 = vweird.f32 %v4347_v44 }
 0x4d3   : > { %4348 = vrsqrt.f32 %v2112_v24  ;;  %v1306_v47 = vpack.c.bf16 %v1218_v4, %v1218_v4  ;;  %vm2346_vm14 = vmor %vm2344_vm12, %vm2345_vm11  ;;  %vm2180_vm1 = vweird.f32 %v2112_v24  ;;  %v4095_v4 = vunpack.c.h.bf16 %v4093_v63 }
 0x4d4   : > { %v2340_v12 = vmul.f32 %v4347_v44, %v2339_v59 }
 0x4d5   : > { %1315 = vst.msk [vmem:[#allocation2 + $0x4] sm:$0xf] %vm1313_vm13, %v1306_v47 }
 0x4d6   : > { %v2341_v40 = vmul.f32 0.5, %v2340_v12 }
 0x4d7   : > { %2451 = vrot.lane.b32.xlu0 %v2209_v61, %s4734_s20  ;;  %1989 = vrot.lane.b32.xlu1 %v5468_v10, %s4733_s9  ;;  %v6535_v61 = vld [vmem:[#allocation23_spill] sm:$0xff]  ;;  %s4087_s9 = sshll.u32 %s4805_s8, 6 }
 0x4d8   : > { %3943 = vmatmul.msk.f32.gmra.mxu1 %vm685_vm0, %v5589_v33  ;;  %v2153_v33 = vsel %vm2152_vm10, %v5774_v60, %v2149_v36  ;;  %v2342_v3 = vsub.f32 1.5, %v2341_v40  ;;  %s3648_s19 = scalar_lea.hbm %s6458_s7, %s4087_s9 }
 0x4d9   : > { %v4349_v8 = vpop.eup %4348  ;;  %v2199_v51 = vmul.f32 %v5645_v9, %v2153_v33 }
 0x4da   : > { %v2175_v29 = vmul.f32 %v4349_v8, %v2112_v24  ;;  %v2343_v49 = vmul.f32 %v4347_v44, %v2342_v3  ;;  %vm2181_vm15 = vweird.f32 %v4349_v8 }
 0x4db   : > { %v2207_v43 = vmul.f32 %v2199_v51, %v5059_v30  ;;  %vm2182_vm2 = vmor %vm2180_vm1, %vm2181_vm15 }
 0x4dc   : > { %v2176_v0 = vmul.f32 %v4349_v8, %v2175_v29  ;;  %v2347_v18 = vsel %vm2346_vm14, %v4347_v44, %v2343_v49 }
 0x4dd   : > { %v2355_v2 = vmul.f32 %v2347_v18, %v5081_v37 }
 0x4de   : > { %v2177_v16 = vmul.f32 0.5, %v2176_v0 }
 0x4df   : > { %2498 = vrot.lane.b32.xlu0 %v2354_v53, %s4734_s20  ;;  %2406 = vrot.lane.b32.xlu1 %v2206_v32, %s4734_s20 }
 0x4e0   : > { %v2178_v45 = vsub.f32 1.5, %v2177_v16 }
 0x4e2   : > { %v2372_v34 = vpop.permute.xlu0 %2371  ;;  %v2179_v60 = vmul.f32 %v4349_v8, %v2178_v45 }
 0x4e3   : > { %3949 = vmatpush.xpose.msk.msra.mxu2 %vm685_vm0, %v2372_v34 }
 0x4e4   : > { %v2183_v42 = vsel %vm2182_vm2, %v4349_v8, %v2179_v60 }
 0x4e7   : > { %2934 = vrot.lane.b32.xlu0 %v6532_v38, %s4736_s22  ;;  %2408 = vrot.lane.b32.xlu1 %v2207_v43, %s4734_s20 }
 0x4e8   : > { %3950 = vmatpush.xpose.msk.msra.mxu2 %vm685_vm0, %v5690_v20  ;;  %v2202_v20 = vmul.f32 %v5645_v9, %v2183_v42 }
 0x4ea   : > { %v2210_v21 = vmul.f32 %v2202_v20, %v5190_v19 }
 0x4ed   : > { %v1244_v54 = vpop.f32.mrf.mxu3 }
 0x4ee   : > { %v1307_v55 = vpack.c.bf16 %v1244_v54, %v1244_v54 }
 0x4ef   : > { %2942 = vrot.lane.b32.xlu0 %v6533_v15, %s4736_s22  ;;  %2500 = vrot.lane.b32.xlu1 %v2355_v2, %s4734_s20 }
 0x4f0   : > { %1316 = vst.msk [vmem:[#allocation2 + $0x8] sm:$0xf] %vm1313_vm13, %v1307_v55 }
 0x4f5   : > { %v1246_v52 = vpop.f32.mrf.mxu3 }
 0x4f6   : > { %v1308_v6 = vpack.c.bf16 %v1246_v52, %v1246_v52 }
 0x4f7   : > { %2492 = vrot.lane.b32.xlu1 %v2210_v21, %s4734_s20 }
 0x4f8   : > { %1317 = vst.msk [vmem:[#allocation2 + $0xc] sm:$0xf] %vm1313_vm13, %v1308_v6 }
 0x4fd   : > { %v1721_v24 = vpop.f32.mrf.mxu3 }
 0x4fe   : > { %v5871_v48 = vadd.f32 %v4094_v50, %v1721_v24 }
 0x4ff   : > { %2932 = vrot.lane.b32.xlu1 %v6534_v35, %s4736_s22 }
 0x500   : > { %v1819_v59 = vsel %vm1088_vm7, %v5871_v48, -inf }
 0x505   : > { %v1724_v44 = vpop.f32.mrf.mxu3 }
 0x506   : > { %v5865_v47 = vadd.f32 %v4095_v4, %v1724_v44  ;;  %v5913_v44 = vpop.permute.xlu2 %2363 }
 0x507   : > { %2780 = vrot.lane.b32.xlu1 %v6535_v61, %s4736_s22 }
 0x508   : > { %v1822_v9 = vsel %vm1088_vm7, %v5865_v47, -inf }
 0x509   : > { %1823 = vmax.xlane.f32.xlu2 %v1822_v9 }
 0x519   : > { %1820 = vmax.xlane.f32.xlu0 %v1819_v59 }
 0x524   : > { %v1272_v39 = vpop.f32.mrf.mxu0 }
 0x525   : > { %v1309_v8 = vpack.c.bf16 %v1272_v39, %v1272_v39 }
 0x527   : > { %1318 = vst.msk [vmem:[#allocation2 + $0x10] sm:$0xf] %vm1313_vm13, %v1309_v8 }
 0x52c   : > { %v1274_v46 = vpop.f32.mrf.mxu0 }
 0x52d   : > { %v1310_v36 = vpack.c.bf16 %v1274_v46, %v1274_v46  ;;  %v1300_v12 = vpop.f32.mrf.mxu1 }
 0x52e   : > { %v1311_v29 = vpack.c.bf16 %v1300_v12, %v1300_v12 }
 0x52f   : > { %1319 = vst.msk [vmem:[#allocation2 + $0x14] sm:$0xf] %vm1313_vm13, %v1310_v36 }
 0x530   : > { %1320 = vst.msk [vmem:[#allocation2 + $0x18] sm:$0xf] %vm1313_vm13, %v1311_v29 }
 0x531   : > { %v2415_v53 = vpop.permute.xlu1 %2414 }
 0x532   : > { %3953 = vmatpush.xpose.msk.msrb.mxu3 %vm685_vm0, %v2415_v53 }
 0x534   : > { %v1764_v32 = vpop.f32.mrf.mxu0 }
 0x535   : > { %v1302_v40 = vpop.f32.mrf.mxu1  ;;  %v5881_v0 = vadd.f32 %v4094_v50, %v1764_v32 }
 0x536   : > { %v1312_v33 = vpack.c.bf16 %v1302_v40, %v1302_v40 }
 0x537   : > { %v1825_v51 = vsel %vm1088_vm7, %v5881_v0, -inf }
 0x538   : > { %1826 = vmax.xlane.f32.xlu1 %v1825_v51  ;;  %1321 = vst.msk [vmem:[#allocation2 + $0x1c] sm:$0xf] %vm1313_vm13, %v1312_v33 }
 0x539   : > { %v2458_v3 = vpop.permute.xlu1 %2457 }
 0x53a   : > { %3957 = vmatpush.xpose.msk.msrb.mxu0 %vm685_vm0, %v2458_v3 }
 0x53c   : > { %v1767_v16 = vpop.f32.mrf.mxu0 }
 0x53d   : > { %v1678_v34 = vpop.f32.mrf.mxu1  ;;  %v5887_v43 = vadd.f32 %v4095_v4, %v1767_v16 }
 0x53e   : > { %v5889_v45 = vadd.f32 %v4094_v50, %v1678_v34 }
 0x53f   : > { %v1828_v38 = vsel %vm1088_vm7, %v5887_v43, -inf }
 0x540   : > { %1829 = vmax.xlane.f32.xlu0 %v1828_v38  ;;  %v1813_v49 = vsel %vm1088_vm7, %v5889_v45, -inf }
 0x541   : > { %v2456_v60 = vpop.permute.xlu0 %2455  ;;  %v2413_v18 = vpop.permute.xlu1 %2412  ;;  %1814 = vmax.xlane.f32.xlu1 %v1813_v49 }
 0x542   : > { %3958 = vmatpush.xpose.msk.msrb.mxu0 %vm685_vm0, %v2456_v60  ;;  %3954 = vmatpush.xpose.msk.msrb.mxu3 %vm685_vm0, %v2413_v18 }
 0x545   : > { %v1681_v54 = vpop.f32.mrf.mxu1 }
 0x546   : > { %v5897_v2 = vadd.f32 %v4095_v4, %v1681_v54 }
 0x548   : > { %v1816_v55 = vsel %vm1088_vm7, %v5897_v2, -inf }
 0x549   : > { %v1990_v15 = vpop.permute.xlu1 %1989  ;;  %1817 = vmax.xlane.f32.xlu0 %v1816_v55  ;;  %v5915_v61 = vpop.permute.xlu0 %2451 }
 0x54a   : > { %2002 = vmatpush.bf16.msra.mxu1 %v1990_v15 }
 0x54d   : > { %v1807_v42 = vpop.f32.mrf.mxu1 }
 0x54e   : > { %v5901_v20 = vadd.f32 %v4094_v50, %v1807_v42  ;;  %v5917_v50 = vpop.permute.xlu2 %2449 }
 0x550   : > { %v1831_v52 = vsel %vm1088_vm7, %v5901_v20, -inf }
 0x551   : > { %1832 = vmax.xlane.f32.xlu2 %v1831_v52  ;;  %v5905_v21 = vpop.permute.xlu1 %2406  ;;  %v2499_v59 = vpop.permute.xlu0 %2498 }
 0x555   : > { %v1810_v6 = vpop.f32.mrf.mxu1 }
 0x556   : > { %v5907_v24 = vadd.f32 %v4095_v4, %v1810_v6  ;;  %v5921_v4 = vpop.permute.xlu2 %2494 }
 0x558   : > { %v1834_v35 = vsel %vm1088_vm7, %v5907_v24, -inf }
 0x559   : > { %1835 = vmax.xlane.f32.xlu0 %v1834_v35  ;;  %v5911_v63 = vpop.permute.xlu1 %2408  ;;  %v5925_v8 = vpop.permute.xlu0 %2934 }
 0x55e   : > { %v5923_v39 = vpop.permute.xlu2 %2778 }
 0x561   : > { %v2501_v9 = vpop.permute.xlu1 %2500  ;;  %v5928_v29 = vpop.permute.xlu0 %2942 }
 0x562   : > { %3961 = vmatpush.xpose.msk.msrb.mxu1 %vm685_vm0, %v2501_v9 }
 0x566   : > { %3962 = vmatpush.xpose.msk.msrb.mxu1 %vm685_vm0, %v2499_v59 }
 0x569   : > { %v5935_v3 = vpop.permute.xlu1 %2492 }
 0x571   : > { %v2933_v34 = vpop.permute.xlu1 %2932 }
 0x579   : > { %v5941_v38 = vpop.permute.xlu1 %2780 }
 0x57c   : > { %v1824_v46 = vpop.xlane.xlu2 %1823 }
 0x57d   : > { %v1840_v36 = vsub.f32 %v5865_v47, %v1824_v46 }
 0x57f   : > { %v1851_v12 = vmul.f32 1.442695, %v1840_v36 }
 0x581   : > { %4350 = vpow2.f32 %v1851_v12 }
 0x587   : > { %v5930_v53 = vpop.eup %4350 }
 0x588   : > { %v1870_v32 = vsel %vm1088_vm7, %v5930_v53, 0.0 }
 0x589   : > { %1871 = vadd.xlane.f32.xlu1 %v1870_v32 }
 0x58c   : > { %v1821_v40 = vpop.xlane.xlu0 %1820 }
 0x58d   : > { %v1839_v33 = vsub.f32 %v5871_v48, %v1821_v40 }
 0x58f   : > { %v1849_v51 = vmul.f32 1.442695, %v1839_v33 }
 0x591   : > { %4352 = vpow2.f32 %v1849_v51 }
 0x597   : > { %v5937_v16 = vpop.eup %4352 }
 0x598   : > { %v1867_v47 = vsel %vm1088_vm7, %v5937_v16, 0.0 }
 0x599   : > { %1868 = vadd.xlane.f32.xlu0 %v1867_v47 }
 0x5ab   : > { %v1827_v49 = vpop.xlane.xlu1 %1826 }
 0x5ac   : > { %v1841_v60 = vsub.f32 %v5881_v0, %v1827_v49 }
 0x5ae   : > { %v1853_v18 = vmul.f32 1.442695, %v1841_v60 }
 0x5b0   : > { %4354 = vpow2.f32 %v1853_v18 }
 0x5b3   : > { %v1830_v54 = vpop.xlane.xlu0 %1829 }
 0x5b4   : > { %v1815_v48 = vpop.xlane.xlu1 %1814  ;;  %v1842_v55 = vsub.f32 %v5887_v43, %v1830_v54 }
 0x5b5   : > { %v1837_v15 = vsub.f32 %v5889_v45, %v1815_v48  ;;  %v6536_v45 = vld [vmem:[#allocation26_spill] sm:$0xff]  ;;  %v2802_v48 = vsel %vm685_vm0, %v5923_v39, 0.0 }
 0x5b6   : > { %v5946_v42 = vpop.eup %4354  ;;  %v1855_v52 = vmul.f32 1.442695, %v1842_v55 }
 0x5b7   : > { %v1845_v6 = vmul.f32 1.442695, %v1837_v15  ;;  %v1873_v35 = vsel %vm1088_vm7, %v5946_v42, 0.0 }
 0x5b8   : > { %4356 = vpow2.f32 %v1855_v52  ;;  %1874 = vadd.xlane.f32.xlu0 %v1873_v35  ;;  %v2971_v35 = vsel %vm685_vm0, %v5928_v29, 0.0  ;;  %v6540_v29 = vld [vmem:[#allocation33_spill] sm:$0xff] }
 0x5b9   : > { %4358 = vpow2.f32 %v1845_v6 }
 0x5bc   : > { %v1818_v46 = vpop.xlane.xlu0 %1817 }
 0x5bd   : > { %v1838_v36 = vsub.f32 %v5897_v2, %v1818_v46 }
 0x5be   : > { %v5950_v9 = vpop.eup %4356 }
 0x5bf   : > { %v5952_v0 = vpop.eup %4358  ;;  %v1876_v59 = vsel %vm1088_vm7, %v5950_v9, 0.0  ;;  %v1847_v12 = vmul.f32 1.442695, %v1838_v36 }
 0x5c0   : > { %v1861_v43 = vsel %vm1088_vm7, %v5952_v0, 0.0  ;;  %1877 = vadd.xlane.f32.xlu1 %v1876_v59  ;;  %v6537_v59 = vld [vmem:[#allocation25_spill] sm:$0xff] }
 0x5c1   : > { %1862 = vadd.xlane.f32.xlu2 %v1861_v43  ;;  %4360 = vpow2.f32 %v1847_v12  ;;  %v6538_v12 = vld [vmem:[#allocation24_spill] sm:$0xff] }
 0x5c4   : > { %v1833_v32 = vpop.xlane.xlu2 %1832 }
 0x5c5   : > { %v1843_v40 = vsub.f32 %v5901_v20, %v1833_v32  ;;  %v6541_v32 = vld [vmem:[#allocation29_spill] sm:$0xff] }
 0x5c7   : > { %v1857_v51 = vmul.f32 1.442695, %v1843_v40  ;;  %v5967_v49 = vpop.eup %4360 }
 0x5c8   : > { %v1864_v60 = vsel %vm1088_vm7, %v5967_v49, 0.0 }
 0x5c9   : > { %4362 = vpow2.f32 %v1857_v51 }
 0x5cc   : > { %2940 = vrot.lane.b32.xlu0 %v5052_v27, %s4736_s22  ;;  %v1836_v33 = vpop.xlane.xlu0 %1835 }
 0x5cd   : > { %v1844_v47 = vsub.f32 %v5907_v24, %v1836_v33  ;;  %v2956_v24 = vsel %vm685_vm0, %v2933_v34, 0.0  ;;  %v6543_v33 = vld [vmem:[#allocation34_spill] sm:$0xff] }
 0x5cf   : > { %v1859_v27 = vmul.f32 1.442695, %v1844_v47 }
 0x5d1   : > { %4364 = vpow2.f32 %v1859_v27 }
 0x5d9   : > { %2938 = vrot.lane.b32.xlu2 %v6536_v45, %s4736_s22  ;;  %2786 = vrot.lane.b32.xlu1 %v5043_v23, %s4736_s22  ;;  %v5971_v23 = vpop.eup %4362 }
 0x5da   : > { %v1879_v2 = vsel %vm1088_vm7, %v5971_v23, 0.0  ;;  %v5975_v18 = vpop.eup %4364 }
 0x5db   : > { %v1882_v20 = vsel %vm1088_vm7, %v5975_v18, 0.0 }
 0x5f6   : > { %1865 = vadd.xlane.f32.xlu0 %v1864_v60 }
 0x5fc   : > { %v1872_v54 = vpop.xlane.xlu1 %1871 }
 0x5fd   : > { %4366 = vrcp.f32 %v1872_v54 }
 0x5fe   : > { %1880 = vadd.xlane.f32.xlu0 %v1879_v2 }
 0x602   : > { %1883 = vadd.xlane.f32.xlu2 %v1882_v20  ;;  %v6544_v20 = vld [vmem:[#allocation37_spill] sm:$0xff] }
 0x603   : > { %2957 = vadd.xlane.f32.xlu1 %v2956_v24  ;;  %v4367_v15 = vpop.eup %4366 }
 0x604   : > { %v1896_v52 = vmul.f32 %v4367_v15, %v5930_v53  ;;  %v6539_v53 = vld [vmem:[#allocation31_spill] sm:$0xff] }
 0x606   : > { %v1904_v34 = vpack.c.bf16 %v1896_v52, %v1896_v52 }
 0x608   : > { %v1937_v46 = vunpack.c.l.b16 %v1904_v34 }
 0x60b   : > { %2803 = vadd.xlane.f32.xlu1 %v2802_v48 }
 0x60c   : > { %v1869_v55 = vpop.xlane.xlu0 %1868 }
 0x60d   : > { %4368 = vrcp.f32 %v1869_v55 }
 0x612   : > { %2782 = vrot.lane.b32.xlu0 %v6537_v59, %s4736_s22 }
 0x613   : > { %v4369_v6 = vpop.eup %4368  ;;  %2972 = vadd.xlane.f32.xlu1 %v2971_v35  ;;  %v2959_v35 = vsel %vm685_vm0, %v5925_v8, 0.0 }
 0x614   : > { %v1895_v43 = vmul.f32 %v4369_v6, %v5937_v16  ;;  %v6542_v16 = vld [vmem:[#allocation27_spill] sm:$0xff] }
 0x616   : > { %v1903_v45 = vpack.c.bf16 %v1895_v43, %v1895_v43  ;;  %v2805_v43 = vsel %vm685_vm0, %v5941_v38, 0.0 }
 0x618   : > { %v1936_v39 = vunpack.c.l.b16 %v1903_v45 }
 0x61a   : > { %v1938_v36 = vpack.c.b16 %v1937_v46, %v1936_v39  ;;  %2936 = vrot.lane.b32.xlu2 %v6538_v12, %s4736_s22  ;;  %2788 = vrot.lane.b32.xlu0 %v6539_v53, %s4736_s22 }
 0x61c   : > { %3945 = vmatmul.msk.bf16.vlgmr.msra.gmra.mxu3 %vm1088_vm7, %v1938_v36 }
 0x622   : > { %2792 = vrot.lane.b32.xlu2 %v6540_v29, %s4736_s22  ;;  %2946 = vrot.lane.b32.xlu0 %v6541_v32, %s4736_s22 }
 0x62a   : > { %2784 = vrot.lane.b32.xlu0 %v6542_v16, %s4736_s22 }
 0x62b   : > { %v1875_v40 = vpop.xlane.xlu0 %1874 }
 0x62c   : > { %3955 = vmatmul.msk.f32.vlgmr.msrb.gmra.mxu3 %vm685_vm0, %v5905_v21  ;;  %4370 = vrcp.f32 %v1875_v40 }
 0x632   : > { %2944 = vrot.lane.b32.xlu0 %v6543_v33, %s4736_s22  ;;  %v4371_v47 = vpop.eup %4370 }
 0x633   : > { %v1878_v51 = vpop.xlane.xlu1 %1877  ;;  %v1897_v60 = vmul.f32 %v4371_v47, %v5946_v42 }
 0x634   : > { %3956 = vmatmul.msk.f32.gmra.mxu3 %vm685_vm0, %v5911_v63  ;;  %v1863_v27 = vpop.xlane.xlu2 %1862  ;;  %4372 = vrcp.f32 %v1878_v51 }
 0x635   : > { %v1905_v24 = vpack.c.bf16 %v1897_v60, %v1897_v60  ;;  %4374 = vrcp.f32 %v1863_v27 }
 0x637   : > { %v1961_v15 = vunpack.c.l.b16 %v1905_v24 }
 0x63a   : > { %v4373_v2 = vpop.eup %4372  ;;  %2790 = vrot.lane.b32.xlu0 %v6544_v20, %s4736_s22 }
 0x63b   : > { %v1898_v21 = vmul.f32 %v4373_v2, %v5950_v9  ;;  %v4375_v34 = vpop.eup %4374 }
 0x63c   : > { %v2939_v54 = vpop.permute.xlu2 %2938  ;;  %v1893_v45 = vmul.f32 %v4375_v34, %v5952_v0 }
 0x63d   : > { %v1906_v48 = vpack.c.bf16 %v1898_v21, %v1898_v21  ;;  %v2965_v55 = vsel %vm685_vm0, %v2939_v54, 0.0 }
 0x63e   : > { %2966 = vadd.xlane.f32.xlu1 %v2965_v55  ;;  %v2941_v9 = vpop.permute.xlu0 %2940 }
 0x63f   : > { %v1962_v52 = vunpack.c.l.b16 %v1906_v48  ;;  %v2968_v36 = vsel %vm685_vm0, %v2941_v9, 0.0 }
 0x641   : > { %v1963_v63 = vpack.c.b16 %v1962_v52, %v1961_v15 }
 0x643   : > { %3946 = vmatmul.msk.bf16.vlgmr.msra.gmra.mxu0 %vm1088_vm7, %v1963_v63 }
 0x64b   : > { %v2787_v6 = vpop.permute.xlu1 %2786 }
 0x64c   : > { %v2814_v42 = vsel %vm685_vm0, %v2787_v6, 0.0 }
 0x64d   : > { %2815 = vadd.xlane.f32.xlu1 %v2814_v42 }
 0x653   : > { %3959 = vmatmul.msk.f32.vlgmr.msrb.gmra.mxu0 %vm685_vm0, %v5917_v50  ;;  %v1901_v50 = vpack.c.bf16 %v1893_v45, %v1893_v45 }
 0x655   : > { %v1911_v12 = vunpack.c.l.b16 %v1901_v50 }
 0x65b   : > { %3960 = vmatmul.msk.f32.gmra.mxu0 %vm685_vm0, %v5915_v61 }
 0x664   : > { %2960 = vadd.xlane.f32.xlu0 %v2959_v35 }
 0x669   : > { %v1866_v59 = vpop.xlane.xlu0 %1865 }
 0x66a   : > { %4376 = vrcp.f32 %v1866_v59 }
 0x66c   : > { %2806 = vadd.xlane.f32.xlu0 %v2805_v43 }
 0x670   : > { %v4377_v46 = vpop.eup %4376 }
 0x671   : > { %v1894_v39 = vmul.f32 %v4377_v46, %v5967_v49  ;;  %v1881_v61 = vpop.xlane.xlu0 %1880 }
 0x672   : > { %4378 = vrcp.f32 %v1881_v61 }
 0x673   : > { %v1902_v8 = vpack.c.bf16 %v1894_v39, %v1894_v39 }
 0x674   : > { %2969 = vadd.xlane.f32.xlu0 %v2968_v36 }
 0x675   : > { %v1912_v53 = vunpack.c.l.b16 %v1902_v8  ;;  %v1884_v29 = vpop.xlane.xlu2 %1883 }
 0x676   : > { %4380 = vrcp.f32 %v1884_v29  ;;  %v2958_v54 = vpop.xlane.xlu1 %2957 }
 0x677   : > { %v1913_v32 = vpack.c.b16 %v1912_v53, %v1911_v12  ;;  %v2980_v36 = vmax.f32 %v2958_v54, 1e-24 }
 0x678   : > { %v4379_v16 = vpop.eup %4378 }
 0x679   : > { %v1899_v38 = vmul.f32 %v4379_v16, %v5971_v23  ;;  %3944 = vmatmul.msk.bf16.vlgmr.msrb.gmra.mxu2 %vm1088_vm7, %v1913_v32  ;;  %vm2994_vm14 = vweird.f32 %v2980_v36 }
 0x67b   : > { %v1907_v40 = vpack.c.bf16 %v1899_v38, %v1899_v38 }
 0x67c   : > { %v4381_v0 = vpop.eup %4380 }
 0x67d   : > { %v1900_v49 = vmul.f32 %v4381_v0, %v5975_v18  ;;  %v2937_v33 = vpop.permute.xlu2 %2936  ;;  %v1986_v27 = vunpack.c.l.b16 %v1907_v40 }
 0x67e   : > { %v2962_v51 = vsel %vm685_vm0, %v2937_v33, 0.0  ;;  %v2804_v15 = vpop.xlane.xlu1 %2803 }
 0x67f   : > { %v1908_v47 = vpack.c.bf16 %v1900_v49, %v1900_v49  ;;  %2963 = vadd.xlane.f32.xlu0 %v2962_v51  ;;  %v2826_v53 = vmax.f32 %v2804_v15, 1e-24 }
 0x681   : > { %v1987_v60 = vunpack.c.l.b16 %v1908_v47  ;;  %vm2840_vm2 = vweird.f32 %v2826_v53 }
 0x683   : > { %v1988_v2 = vpack.c.b16 %v1987_v60, %v1986_v27 }
 0x684   : > { %v2783_v20 = vpop.permute.xlu0 %2782 }
 0x685   : > { %3947 = vmatmul.msk.bf16.vlgmr.msra.gmra.mxu1 %vm1088_vm7, %v1988_v2  ;;  %v2808_v24 = vsel %vm685_vm0, %v2783_v20, 0.0  ;;  %v2793_v9 = vpop.permute.xlu2 %2792 }
 0x686   : > { %2809 = vadd.xlane.f32.xlu1 %v2808_v24 }
 0x689   : > { %3951 = vmatmul.msk.f32.vlgmr.msra.gmra.mxu2 %vm685_vm0, %v5913_v44 }
 0x68c   : > { %v2789_v23 = vpop.permute.xlu0 %2788 }
 0x68d   : > { %v2817_v18 = vsel %vm685_vm0, %v2789_v23, 0.0 }
 0x68e   : > { %2818 = vadd.xlane.f32.xlu0 %v2817_v18 }
 0x691   : > { %3952 = vmatmul.msk.f32.gmra.mxu2 %vm685_vm0, %v5876_v28  ;;  %v2973_v28 = vpop.xlane.xlu1 %2972 }
 0x692   : > { %v2985_v60 = vmax.f32 %v2973_v28, 1e-24 }
 0x694   : > { %v2947_v21 = vpop.permute.xlu0 %2946 }
 0x695   : > { %3963 = vmatmul.msk.f32.vlgmr.msrb.gmra.mxu1 %vm685_vm0, %v5935_v3  ;;  %v2977_v48 = vsel %vm685_vm0, %v2947_v21, 0.0 }
 0x696   : > { %2978 = vadd.xlane.f32.xlu1 %v2977_v48 }
 0x69c   : > { %v2785_v55 = vpop.permute.xlu0 %2784 }
 0x69d   : > { %3964 = vmatmul.msk.f32.gmra.mxu1 %vm685_vm0, %v5921_v4  ;;  %v2811_v44 = vsel %vm685_vm0, %v2785_v55, 0.0  ;;  %v2823_v4 = vsel %vm685_vm0, %v2793_v9, 0.0 }
 0x69e   : > { %2812 = vadd.xlane.f32.xlu0 %v2811_v44 }
 0x6a4   : > { %v2945_v52 = vpop.permute.xlu0 %2944 }
 0x6a5   : > { %v2974_v63 = vsel %vm685_vm0, %v2945_v52, 0.0 }
 0x6a6   : > { %2975 = vadd.xlane.f32.xlu1 %v2974_v63 }
 0x6ac   : > { %v2791_v6 = vpop.permute.xlu0 %2790 }
 0x6ad   : > { %v2820_v42 = vsel %vm685_vm0, %v2791_v6, 0.0  ;;  %v6051_v6 = vstv %s3969_s13  ;;  %s3636_s13 = scalar_lea.sflag [#allocation5], %s4907_s14 }
 0x6ae   : > { %2821 = vadd.xlane.f32.xlu2 %v2820_v42 }
 0x6b1   : > { %v2967_v3 = vpop.xlane.xlu1 %2966 }
 0x6b2   : > { %v2983_v35 = vmax.f32 %v2967_v3, 1e-24  ;;  %2684 = vrot.lane.b32.xlu0 %v5443_v13, %s4734_s20 }
 0x6b4   : > { %4382 = vrsqrt.f32 %v2983_v35  ;;  %vm3024_vm3 = vweird.f32 %v2983_v35 }
 0x6b6   : > { %2824 = vadd.xlane.f32.xlu2 %v2823_v4 }
 0x6ba   : > { %v4383_v59 = vpop.eup %4382 }
 0x6bb   : > { %v3019_v34 = vmul.f32 %v4383_v59, %v2983_v35  ;;  %vm3025_vm13 = vweird.f32 %v4383_v59 }
 0x6bc   : > { %vm3026_vm4 = vmor %vm3024_vm3, %vm3025_vm13 }
 0x6bd   : > { %v3020_v43 = vmul.f32 %v4383_v59, %v3019_v34 }
 0x6bf   : > { %v3021_v45 = vmul.f32 0.5, %v3020_v43 }
 0x6c1   : > { %v3022_v46 = vsub.f32 1.5, %v3021_v45 }
 0x6c3   : > { %v3023_v50 = vmul.f32 %v4383_v59, %v3022_v46 }
 0x6c5   : > { %v3027_v39 = vsel %vm3026_vm4, %v4383_v59, %v3023_v50  ;;  %vm3044_vm4 = vweird.f32 %v2985_v60 }
 0x6c6   : > { %v3071_v61 = vmul.f32 %v3027_v39, %v5024_v14 }
 0x6c8   : > { %3134 = vrot.lane.b32.xlu0 %v3071_v61, %s4736_s22 }
 0x6ce   : > { %2634 = vrot.lane.b32.xlu2 %v5419_v17, %s4734_s20 }
 0x6d7   : > { %v2961_v8 = vpop.xlane.xlu0 %2960 }
 0x6d8   : > { %v2981_v12 = vmax.f32 %v2961_v8, 1e-24 }
 0x6da   : > { %4384 = vrsqrt.f32 %v2981_v12  ;;  %vm3004_vm6 = vweird.f32 %v2981_v12 }
 0x6db   : > { %4386 = vrsqrt.f32 %v2980_v36 }
 0x6dc   : > { %4388 = vrsqrt.f32 %v2826_v53 }
 0x6df   : > { %v2807_v29 = vpop.xlane.xlu0 %2806 }
 0x6e0   : > { %v4385_v32 = vpop.eup %4384  ;;  %v2827_v16 = vmax.f32 %v2807_v29, 1e-24 }
 0x6e1   : > { %v4387_v38 = vpop.eup %4386  ;;  %v2999_v0 = vmul.f32 %v4385_v32, %v2981_v12  ;;  %vm3005_vm5 = vweird.f32 %v4385_v32  ;;  %v6064_v12 = vpop.f32.mrf.mxu3 }
 0x6e2   : > { %4390 = vrsqrt.f32 %v2827_v16  ;;  %v2989_v14 = vmul.f32 %v4387_v38, %v2980_v36  ;;  %v4389_v33 = vpop.eup %4388  ;;  %vm3006_vm8 = vmor %vm3004_vm6, %vm3005_vm5  ;;  %vm2850_vm10 = vweird.f32 %v2827_v16  ;;  %vm2995_vm12 = vweird.f32 %v4387_v38 }
 0x6e3   : > { %v3000_v40 = vmul.f32 %v4385_v32, %v2999_v0  ;;  %v2835_v2 = vmul.f32 %v4389_v33, %v2826_v53  ;;  %4392 = vrsqrt.f32 %v2985_v60  ;;  %vm2996_vm15 = vmor %vm2994_vm14, %vm2995_vm12  ;;  %vm2841_vm1 = vweird.f32 %v4389_v33  ;;  %v4097_v0 = vld [vmem:[#allocation11 + $0x10] sm:$0xff]  }
 0x6e4   : > { %v2990_v27 = vmul.f32 %v4387_v38, %v2989_v14  ;;  %vm2842_vm13 = vmor %vm2840_vm2, %vm2841_vm1 }
 0x6e5   : > { %v3001_v49 = vmul.f32 0.5, %v3000_v40  ;;  %v2836_v48 = vmul.f32 %v4389_v33, %v2835_v2 }
 0x6e6   : > { %v2991_v54 = vmul.f32 0.5, %v2990_v27 }
 0x6e7   : > { %v3002_v51 = vsub.f32 1.5, %v3001_v49  ;;  %v2837_v52 = vmul.f32 0.5, %v2836_v48  ;;  %v4098_v49 = vunpack.c.l.bf16 %v4097_v0 }
 0x6e8   : > { %v4391_v47 = vpop.eup %4390  ;;  %v2992_v15 = vsub.f32 1.5, %v2991_v54 }
 0x6e9   : > { %v3003_v20 = vmul.f32 %v4385_v32, %v3002_v51  ;;  %v2845_v24 = vmul.f32 %v4391_v47, %v2827_v16  ;;  %vm2851_vm9 = vweird.f32 %v4391_v47  ;;  %v4393_v28 = vpop.eup %4392  ;;  %v6070_v16 = vpop.f32.mrf.mxu0 }
 0x6ea   : > { %vm2852_vm11 = vmor %vm2850_vm10, %vm2851_vm9  ;;  %v2993_v9 = vmul.f32 %v4387_v38, %v2992_v15  ;;  %v3039_v35 = vmul.f32 %v4393_v28, %v2985_v60  ;;  %vm3045_vm3 = vweird.f32 %v4393_v28  ;;  %v6089_v60 = vpop.xlane.xlu1 %2815  ;;  %v6105_v15 = vunpack.c.h.bf16 %v4097_v0 }
 0x6eb   : > { %v3007_v23 = vsel %vm3006_vm8, %v4385_v32, %v3003_v20  ;;  %v2846_v18 = vmul.f32 %v4391_v47, %v2845_v24  ;;  %vm3046_vm5 = vmor %vm3044_vm4, %vm3045_vm3 }
 0x6ec   : > { %v3069_v21 = vmul.f32 %v3007_v23, %v4974_v62  ;;  %v2838_v62 = vsub.f32 1.5, %v2837_v52  ;;  %v2997_v59 = vsel %vm2996_vm15, %v4387_v38, %v2993_v9  ;;  %v3040_v43 = vmul.f32 %v4393_v28, %v3039_v35  ;;  %v6073_v38 = vpop.f32.mrf.mxu3 }
 0x6ed   : > { %v2847_v55 = vmul.f32 0.5, %v2846_v18  ;;  %v3068_v45 = vmul.f32 %v2997_v59, %v4957_v58 }
 0x6ee   : > { %3091 = vrot.lane.b32.xlu1 %v3069_v21, %s4736_s22  ;;  %v2839_v34 = vmul.f32 %v4389_v33, %v2838_v62  ;;  %v3041_v50 = vmul.f32 0.5, %v3040_v43 }
 0x6ef   : > { %v2848_v44 = vsub.f32 1.5, %v2847_v55 }
 0x6f0   : > { %v2843_v46 = vsel %vm2842_vm13, %v4389_v33, %v2839_v34  ;;  %v3042_v61 = vsub.f32 1.5, %v3041_v50 }
 0x6f1   : > { %v2849_v63 = vmul.f32 %v4391_v47, %v2848_v44  ;;  %v2916_v39 = vmul.f32 %v6051_v6, %v2843_v46  ;;  %v6081_v14 = vpop.f32.mrf.mxu0 }
 0x6f2   : > { %v3043_v8 = vmul.f32 %v4393_v28, %v3042_v61 }
 0x6f3   : > { %v2853_v42 = vsel %vm2852_vm11, %v4391_v47, %v2849_v63  ;;  %v2924_v36 = vmul.f32 %v2916_v39, %v4954_v56 }
 0x6f4   : > { %v2917_v3 = vmul.f32 %v6051_v6, %v2853_v42  ;;  %v3047_v58 = vsel %vm3046_vm5, %v4393_v28, %v3043_v8  ;;  %v2441_v33 = vpop.f32.mrf.mxu3 }
 0x6f5   : > { %v3073_v32 = vmul.f32 %v3047_v58, %v5062_v31  ;;  %v6083_v51 = vadd.f32 %v4098_v49, %v2441_v33 }
 0x6f6   : > { %2659 = vrot.lane.b32.xlu1 %v5436_v5, %s4734_s20  ;;  %v2925_v4 = vmul.f32 %v2917_v3, %v4985_v1  ;;  %v6061_v1 = vpop.xlane.xlu0 %2969 }
 0x6f7   : > { %v2539_v2 = vsel %vm1088_vm7, %v6083_v51, -inf }
 0x6f8   : > { %3085 = vrot.lane.b32.xlu2 %v2925_v4, %s4736_s22 }
 0x6f9   : > { %v2484_v20 = vpop.f32.mrf.mxu0  ;;  %v6099_v54 = vpop.xlane.xlu1 %2809 }
 0x6fa   : > { %v6095_v23 = vadd.f32 %v4098_v49, %v2484_v20 }
 0x6fc   : > { %v6067_v53 = vpop.f32.mrf.mxu2  ;;  %v2545_v48 = vsel %vm1088_vm7, %v6095_v23, -inf  ;;  %v2444_v59 = vpop.f32.mrf.mxu3 }
 0x6fe   : > { %3089 = vrot.lane.b32.xlu1 %v3068_v45, %s4736_s22  ;;  %v2964_v29 = vpop.xlane.xlu0 %2963  ;;  %v6117_v45 = vadd.f32 %v6105_v15, %v2444_v59 }
 0x6ff   : > { %v2982_v52 = vmax.f32 %v2964_v29, 1e-24  ;;  %v2984_v29 = vmax.f32 %v6061_v1, 1e-24 }
 0x700   : > { %v2542_v39 = vsel %vm1088_vm7, %v6117_v45, -inf }
 0x701   : > { %4394 = vrsqrt.f32 %v2982_v52  ;;  %v2487_v61 = vpop.f32.mrf.mxu0  ;;  %vm3014_vm8 = vweird.f32 %v2982_v52  ;;  %vm3034_vm15 = vweird.f32 %v2984_v29 }
 0x702   : > { %v6087_v47 = vpop.f32.mrf.mxu1  ;;  %v6122_v58 = vadd.f32 %v6105_v15, %v2487_v61 }
 0x704   : > { %v6077_v40 = vpop.f32.mrf.mxu2  ;;  %v2548_v33 = vsel %vm1088_vm7, %v6122_v58, -inf }
 0x706   : > { %3083 = vrot.lane.b32.xlu1 %v2924_v36, %s4736_s22  ;;  %v6075_v56 = vpop.xlane.xlu0 %2818 }
 0x707   : > { %v4395_v4 = vpop.eup %4394 }
 0x708   : > { %v3009_v34 = vmul.f32 %v4395_v4, %v2982_v52  ;;  %vm3015_vm6 = vweird.f32 %v4395_v4 }
 0x709   : > { %v2979_v28 = vpop.xlane.xlu1 %2978  ;;  %vm3016_vm9 = vmor %vm3014_vm8, %vm3015_vm6 }
 0x70a   : > { %v6097_v21 = vpop.f32.mrf.mxu1  ;;  %v2987_v62 = vmax.f32 %v2979_v28, 1e-24  ;;  %v3010_v46 = vmul.f32 %v4395_v4, %v3009_v34 }
 0x70c   : > { %v2398_v27 = vpop.f32.mrf.mxu2  ;;  %4396 = vrsqrt.f32 %v2987_v62  ;;  %v3011_v36 = vmul.f32 0.5, %v3010_v46  ;;  %vm3064_vm11 = vweird.f32 %v2987_v62 }
 0x70d   : > { %4398 = vrsqrt.f32 %v2984_v29 }
 0x70e   : > { %3177 = vrot.lane.b32.xlu1 %v3073_v32, %s4736_s22  ;;  %v3012_v32 = vsub.f32 1.5, %v3011_v36 }
 0x711   : > { %v6085_v31 = vpop.xlane.xlu0 %2812 }
 0x712   : > { %v2527_v3 = vpop.f32.mrf.mxu1  ;;  %v4397_v50 = vpop.eup %4396 }
 0x713   : > { %v6112_v35 = vadd.f32 %v4098_v49, %v2527_v3  ;;  %v3059_v8 = vmul.f32 %v4397_v50, %v2987_v62  ;;  %v4399_v28 = vpop.eup %4398  ;;  %vm3065_vm10 = vweird.f32 %v4397_v50 }
 0x714   : > { %v2401_v55 = vpop.f32.mrf.mxu2  ;;  %v3029_v3 = vmul.f32 %v4399_v28, %v2984_v29  ;;  %vm3066_vm12 = vmor %vm3064_vm11, %vm3065_vm10  ;;  %vm3035_vm14 = vweird.f32 %v4399_v28 }
 0x715   : > { %v6108_v63 = vadd.f32 %v6105_v15, %v2401_v55  ;;  %v2551_v43 = vsel %vm1088_vm7, %v6112_v35, -inf  ;;  %v3060_v0 = vmul.f32 %v4397_v50, %v3059_v8  ;;  %vm3036_vm1 = vmor %vm3034_vm15, %vm3035_vm14 }
 0x716   : > { %2709 = vrot.lane.b32.xlu1 %v5468_v10, %s4734_s20  ;;  %v3030_v52 = vmul.f32 %v4399_v28, %v3029_v3 }
 0x717   : > { %v2536_v42 = vsel %vm1088_vm7, %v6108_v63, -inf  ;;  %v3061_v20 = vmul.f32 0.5, %v3060_v0 }
 0x719   : > { %v3062_v55 = vsub.f32 1.5, %v3061_v20 }
 0x71a   : > { %v2530_v29 = vpop.f32.mrf.mxu1 }
 0x721   : > { %v6093_v24 = vpop.xlane.xlu2 %2821  ;;  %2540 = vmax.xlane.f32.xlu2 %v2539_v2  ;;  %v3013_v2 = vmul.f32 %v4395_v4, %v3012_v32 }
 0x724   : > { %v2685_v18 = vpop.permute.xlu0 %2684 }
 0x725   : > { %2697 = vmatpush.bf16.msra.mxu0 %v2685_v18  ;;  %v6127_v18 = vadd.f32 %v4098_v49, %v2398_v27  ;;  %v3031_v27 = vmul.f32 0.5, %v3030_v52 }
 0x727   : > { %v2533_v1 = vsel %vm1088_vm7, %v6127_v18, -inf  ;;  %v3032_v34 = vsub.f32 1.5, %v3031_v27 }
 0x729   : > { %v6103_v44 = vpop.xlane.xlu2 %2824  ;;  %2546 = vmax.xlane.f32.xlu2 %v2545_v48  ;;  %v3017_v48 = vsel %vm3016_vm9, %v4395_v4, %v3013_v2  ;;  %v6134_v4 = vpop.xlane.xlu1 %2975 }
 0x731   : > { %v2635_v9 = vpop.permute.xlu2 %2634  ;;  %2537 = vmax.xlane.f32.xlu2 %v2536_v42  ;;  %v3070_v42 = vmul.f32 %v3017_v48, %v5000_v7 }
 0x732   : > { %2647 = vmatpush.bf16.msrb.mxu2 %v2635_v9  ;;  %v3063_v9 = vmul.f32 %v4397_v50, %v3062_v55 }
 0x734   : > { %v3067_v59 = vsel %vm3066_vm12, %v4397_v50, %v3063_v9  ;;  %v2832_v9 = vmax.f32 %v6093_v24, 1e-24 }
 0x735   : > { %v3075_v49 = vmul.f32 %v3067_v59, %v5081_v37 }
 0x736   : > { %vm2900_vm13 = vweird.f32 %v2832_v9 }
 0x739   : > { %2552 = vmax.xlane.f32.xlu2 %v2551_v43  ;;  %v3033_v43 = vmul.f32 %v4399_v28, %v3032_v34 }
 0x73a   : > { %v3135_v50 = vpop.permute.xlu0 %3134 }
 0x73b   : > { %v3037_v46 = vsel %vm3036_vm1, %v4399_v28, %v3033_v43 }
 0x73c   : > { %v3072_v62 = vmul.f32 %v3037_v46, %v5048_v26  ;;  %v6148_v26 = vadd.f32 %v6105_v15, %v2530_v29 }
 0x73e   : > { %v2554_v0 = vsel %vm1088_vm7, %v6148_v26, -inf }
 0x740   : > { %2543 = vmax.xlane.f32.xlu1 %v2542_v39 }
 0x748   : > { %2549 = vmax.xlane.f32.xlu1 %v2548_v33 }
 0x750   : > { %2534 = vmax.xlane.f32.xlu1 %v2533_v1 }
 0x751   : > { %3132 = vrot.lane.b32.xlu2 %v3070_v42, %s4736_s22 }
 0x752   : > { %v6145_v32 = vpop.permute.xlu2 %3085 }
 0x759   : > { %3220 = vrot.lane.b32.xlu2 %v3075_v49, %s4736_s22 }
 0x760   : > { %v3092_v7 = vpop.permute.xlu1 %3091 }
 0x761   : > { %3970 = vmatpush.xpose.msk.msra.mxu2 %vm685_vm0, %v3092_v7 }
 0x768   : > { %v2660_v39 = vpop.permute.xlu1 %2659 }
 0x769   : > { %2672 = vmatpush.bf16.msra.mxu3 %v2660_v39  ;;  %3175 = vrot.lane.b32.xlu1 %v3072_v62, %s4736_s22 }
 0x76d   : > { %3974 = vmatpush.xpose.msk.msrb.mxu3 %vm685_vm0, %v3135_v50 }
 0x770   : > { %v3090_v37 = vpop.permute.xlu1 %3089 }
 0x771   : > { %3971 = vmatpush.xpose.msk.msra.mxu2 %vm685_vm0, %v3090_v37 }
 0x778   : > { %v6142_v61 = vpop.permute.xlu1 %3083 }
 0x780   : > { %v3178_v36 = vpop.permute.xlu1 %3177 }
 0x781   : > { %3978 = vmatpush.xpose.msk.msrb.mxu0 %vm685_vm0, %v3178_v36 }
 0x788   : > { %v2710_v8 = vpop.permute.xlu1 %2709 }
 0x789   : > { %2722 = vmatpush.bf16.msra.mxu1 %v2710_v8 }
 0x793   : > { %2555 = vmax.xlane.f32.xlu1 %v2554_v0 }
 0x794   : > { %v2541_v33 = vpop.xlane.xlu2 %2540 }
 0x795   : > { %v2559_v2 = vsub.f32 %v6083_v51, %v2541_v33  ;;  %v6180_v33 = vmax.f32 %v6089_v60, 1e-24 }
 0x797   : > { %v2569_v20 = vmul.f32 1.442695, %v2559_v2  ;;  %vm2880_vm9 = vweird.f32 %v6180_v33 }
 0x799   : > { %4400 = vpow2.f32 %v2569_v20 }
 0x79c   : > { %v2547_v48 = vpop.xlane.xlu2 %2546 }
 0x79d   : > { %v2561_v55 = vsub.f32 %v6095_v23, %v2547_v48 }
 0x79f   : > { %v6154_v28 = vpop.eup %4400  ;;  %v2573_v1 = vmul.f32 1.442695, %v2561_v55 }
 0x7a0   : > { %v2587_v42 = vsel %vm1088_vm7, %v6154_v28, 0.0 }
 0x7a1   : > { %4402 = vpow2.f32 %v2573_v1  ;;  %2588 = vadd.xlane.f32.xlu0 %v2587_v42 }
 0x7a2   : > { %4404 = vrsqrt.f32 %v2832_v9 }
 0x7a4   : > { %v2538_v15 = vpop.xlane.xlu2 %2537 }
 0x7a5   : > { %v2558_v29 = vsub.f32 %v6108_v63, %v2538_v15 }
 0x7a7   : > { %v6158_v3 = vpop.eup %4402  ;;  %v2567_v20 = vmul.f32 1.442695, %v2558_v29 }
 0x7a8   : > { %v2593_v51 = vsel %vm1088_vm7, %v6158_v3, 0.0  ;;  %v4405_v49 = vpop.eup %4404 }
 0x7a9   : > { %2594 = vadd.xlane.f32.xlu0 %v2593_v51  ;;  %v2895_v34 = vmul.f32 %v4405_v49, %v2832_v9  ;;  %vm2901_vm2 = vweird.f32 %v4405_v49 }
 0x7aa   : > { %vm2902_vm3 = vmor %vm2900_vm13, %vm2901_vm2 }
 0x7ab   : > { %v2896_v62 = vmul.f32 %v4405_v49, %v2895_v34 }
 0x7ac   : > { %v2553_v52 = vpop.xlane.xlu2 %2552 }
 0x7ad   : > { %v2563_v23 = vsub.f32 %v6112_v35, %v2553_v52  ;;  %v6171_v35 = vmax.f32 %v6099_v54, 1e-24  ;;  %v2897_v37 = vmul.f32 0.5, %v2896_v62 }
 0x7af   : > { %v2577_v59 = vmul.f32 1.442695, %v2563_v23  ;;  %v2898_v2 = vsub.f32 1.5, %v2897_v37  ;;  %vm2860_vm5 = vweird.f32 %v6171_v35 }
 0x7b1   : > { %4406 = vpow2.f32 %v2577_v59  ;;  %v2899_v1 = vmul.f32 %v4405_v49, %v2898_v2 }
 0x7b3   : > { %v2544_v27 = vpop.xlane.xlu1 %2543  ;;  %v2903_v52 = vsel %vm2902_vm3, %v4405_v49, %v2899_v1 }
 0x7b4   : > { %v2560_v43 = vsub.f32 %v6117_v45, %v2544_v27  ;;  %v3133_v7 = vpop.permute.xlu2 %3132  ;;  %v2922_v27 = vmul.f32 %v6051_v6, %v2903_v52 }
 0x7b5   : > { %3975 = vmatpush.xpose.msk.msrb.mxu3 %vm685_vm0, %v3133_v7 }
 0x7b6   : > { %v2571_v46 = vmul.f32 1.442695, %v2560_v43  ;;  %v2930_v62 = vmul.f32 %v2922_v27, %v5190_v19 }
 0x7b7   : > { %v6166_v24 = vpop.eup %4406 }
 0x7b8   : > { %4408 = vpow2.f32 %v2571_v46  ;;  %v2599_v39 = vsel %vm1088_vm7, %v6166_v24, 0.0 }
 0x7b9   : > { %2600 = vadd.xlane.f32.xlu2 %v2599_v39  ;;  %4410 = vrsqrt.f32 %v6171_v35 }
 0x7bb   : > { %v2550_v50 = vpop.xlane.xlu1 %2549 }
 0x7bc   : > { %v2562_v36 = vsub.f32 %v6122_v58, %v2550_v50  ;;  %v3221_v45 = vpop.permute.xlu2 %3220  ;;  %v6185_v58 = vmax.f32 %v6085_v31, 1e-24  ;;  %v6194_v31 = vmax.f32 %v6075_v56, 1e-24 }
 0x7bd   : > { %3982 = vmatpush.xpose.msk.msrb.mxu1 %vm685_vm0, %v3221_v45  ;;  %v2986_v45 = vmax.f32 %v6134_v4, 1e-24 }
 0x7be   : > { %v6176_v8 = vpop.eup %4408  ;;  %v2575_v0 = vmul.f32 1.442695, %v2562_v36  ;;  %vm2870_vm12 = vweird.f32 %v6185_v58  ;;  %vm2890_vm1 = vweird.f32 %v6194_v31 }
 0x7bf   : > { %v2590_v54 = vsel %vm1088_vm7, %v6176_v8, 0.0  ;;  %v4411_v48 = vpop.eup %4410  ;;  %vm3054_vm3 = vweird.f32 %v2986_v45 }
 0x7c0   : > { %4412 = vpow2.f32 %v2575_v0  ;;  %2591 = vadd.xlane.f32.xlu1 %v2590_v54  ;;  %v2855_v42 = vmul.f32 %v4411_v48, %v6171_v35  ;;  %vm2861_vm4 = vweird.f32 %v4411_v48 }
 0x7c1   : > { %4414 = vrsqrt.f32 %v6180_v33  ;;  %vm2862_vm6 = vmor %vm2860_vm5, %vm2861_vm4 }
 0x7c2   : > { %4416 = vrsqrt.f32 %v6185_v58  ;;  %v2856_v23 = vmul.f32 %v4411_v48, %v2855_v42 }
 0x7c3   : > { %v2535_v55 = vpop.xlane.xlu1 %2534  ;;  %4418 = vpow2.f32 %v2567_v20 }
 0x7c4   : > { %v2557_v63 = vsub.f32 %v6127_v18, %v2535_v55  ;;  %v2857_v43 = vmul.f32 0.5, %v2856_v23 }
 0x7c6   : > { %v6190_v60 = vpop.eup %4412  ;;  %v2565_v15 = vmul.f32 1.442695, %v2557_v63  ;;  %v2858_v37 = vsub.f32 1.5, %v2857_v43 }
 0x7c7   : > { %v2596_v51 = vsel %vm1088_vm7, %v6190_v60, 0.0  ;;  %v4415_v18 = vpop.eup %4414 }
 0x7c8   : > { %4420 = vpow2.f32 %v2565_v15  ;;  %2597 = vadd.xlane.f32.xlu1 %v2596_v51  ;;  %v4417_v59 = vpop.eup %4416  ;;  %v2875_v34 = vmul.f32 %v4415_v18, %v6180_v33  ;;  %v2859_v54 = vmul.f32 %v4411_v48, %v2858_v37  ;;  %vm2881_vm8 = vweird.f32 %v4415_v18 }
 0x7c9   : > { %4422 = vrsqrt.f32 %v6194_v31  ;;  %v6200_v9 = vpop.eup %4418  ;;  %v2865_v7 = vmul.f32 %v4417_v59, %v6185_v58  ;;  %vm2882_vm10 = vmor %vm2880_vm9, %vm2881_vm8  ;;  %vm2871_vm11 = vweird.f32 %v4417_v59  ;;  %vm2769_vm9 = vcmask 191616  }
 0x7ca   : > { %v2584_v46 = vsel %vm1088_vm7, %v6200_v9, 0.0  ;;  %v2876_v39 = vmul.f32 %v4415_v18, %v2875_v34  ;;  %4424 = vrsqrt.f32 %v2986_v45  ;;  %v2863_v19 = vsel %vm2862_vm6, %v4411_v48, %v2859_v54  ;;  %vm2872_vm14 = vmor %vm2870_vm12, %vm2871_vm11 }
 0x7cb   : > { %v2866_v36 = vmul.f32 %v4417_v59, %v2865_v7  ;;  %v2918_v51 = vmul.f32 %v6051_v6, %v2863_v19 }
 0x7cc   : > { %v2877_v29 = vmul.f32 0.5, %v2876_v39 }
 0x7cd   : > { %v2867_v2 = vmul.f32 0.5, %v2866_v36  ;;  %v2926_v48 = vmul.f32 %v2918_v51, %v5015_v11 }
 0x7ce   : > { %v6203_v56 = vpop.eup %4420  ;;  %v2878_v20 = vsub.f32 1.5, %v2877_v29 }
 0x7cf   : > { %v2581_v49 = vsel %vm1088_vm7, %v6203_v56, 0.0  ;;  %v4423_v50 = vpop.eup %4422  ;;  %v2868_v1 = vsub.f32 1.5, %v2867_v2 }
 0x7d0   : > { %2582 = vadd.xlane.f32.xlu0 %v2581_v49  ;;  %2585 = vadd.xlane.f32.xlu1 %v2584_v46  ;;  %v2885_v0 = vmul.f32 %v4423_v50, %v6194_v31  ;;  %v2879_v42 = vmul.f32 %v4415_v18, %v2878_v20  ;;  %v4425_v4 = vpop.eup %4424  ;;  %vm2891_vm15 = vweird.f32 %v4423_v50 }
 0x7d1   : > { %3212 = vrot.lane.b32.xlu2 %v2930_v62, %s4736_s22  ;;  %v2869_v52 = vmul.f32 %v4417_v59, %v2868_v1  ;;  %v3049_v35 = vmul.f32 %v4425_v4, %v2986_v45  ;;  %vm2892_vm2 = vmor %vm2890_vm1, %vm2891_vm15  ;;  %vm3055_vm13 = vweird.f32 %v4425_v4 }
 0x7d2   : > { %v2886_v55 = vmul.f32 %v4423_v50, %v2885_v0  ;;  %v2883_v23 = vsel %vm2882_vm10, %v4415_v18, %v2879_v42  ;;  %vm3056_vm4 = vmor %vm3054_vm3, %vm3055_vm13 }
 0x7d3   : > { %v2920_v34 = vmul.f32 %v6051_v6, %v2883_v23  ;;  %v2873_v43 = vsel %vm2872_vm14, %v4417_v59, %v2869_v52  ;;  %v3050_v49 = vmul.f32 %v4425_v4, %v3049_v35 }
 0x7d4   : > { %v2887_v15 = vmul.f32 0.5, %v2886_v55  ;;  %v2919_v33 = vmul.f32 %v6051_v6, %v2873_v43 }
 0x7d5   : > { %v2928_v18 = vmul.f32 %v2920_v34, %v5039_v22  ;;  %v3051_v58 = vmul.f32 0.5, %v3050_v49 }
 0x7d6   : > { %v2888_v27 = vsub.f32 1.5, %v2887_v15  ;;  %v2927_v11 = vmul.f32 %v2919_v33, %v5059_v30  ;;  %v2833_v30 = vmax.f32 %v6103_v44, 1e-24 }
 0x7d7   : > { %v3052_v62 = vsub.f32 1.5, %v3051_v58 }
 0x7d8   : > { %v2889_v7 = vmul.f32 %v4423_v50, %v2888_v27  ;;  %4426 = vrsqrt.f32 %v2833_v30  ;;  %vm2910_vm6 = vweird.f32 %v2833_v30 }
 0x7d9   : > { %v3053_v37 = vmul.f32 %v4425_v4, %v3052_v62 }
 0x7da   : > { %v2893_v46 = vsel %vm2892_vm2, %v4423_v50, %v2889_v7 }
 0x7db   : > { %v3176_v63 = vpop.permute.xlu1 %3175  ;;  %v2921_v59 = vmul.f32 %v6051_v6, %v2893_v46  ;;  %v3057_v22 = vsel %vm3056_vm4, %v4425_v4, %v3053_v37 }
 0x7dc   : > { %3979 = vmatpush.xpose.msk.msrb.mxu0 %vm685_vm0, %v3176_v63  ;;  %v3074_v31 = vmul.f32 %v3057_v22, %v5137_v57 }
 0x7dd   : > { %v2929_v39 = vmul.f32 %v2921_v59, %v5092_v41 }
 0x7de   : > { %v4427_v0 = vpop.eup %4426 }
 0x7df   : > { %v2905_v41 = vmul.f32 %v4427_v0, %v2833_v30  ;;  %vm2911_vm5 = vweird.f32 %v4427_v0 }
 0x7e0   : > { %vm2912_vm8 = vmor %vm2910_vm6, %vm2911_vm5 }
 0x7e1   : > { %v2906_v54 = vmul.f32 %v4427_v0, %v2905_v41 }
 0x7e3   : > { %v2907_v45 = vmul.f32 0.5, %v2906_v54 }
 0x7e4   : > { %3126 = vrot.lane.b32.xlu0 %v2926_v48, %s4736_s22 }
 0x7e5   : > { %v2908_v57 = vsub.f32 1.5, %v2907_v45 }
 0x7e7   : > { %v2909_v55 = vmul.f32 %v4427_v0, %v2908_v57 }
 0x7e9   : > { %3169 = vrot.lane.b32.xlu1 %v2928_v18, %s4736_s22  ;;  %v2913_v44 = vsel %vm2912_vm8, %v4427_v0, %v2909_v55 }
 0x7ec   : > { %3128 = vrot.lane.b32.xlu0 %v2927_v11, %s4736_s22 }
 0x7f1   : > { %3171 = vrot.lane.b32.xlu1 %v2929_v39, %s4736_s22 }
 0x7f9   : > { %3218 = vrot.lane.b32.xlu1 %v3074_v31, %s4736_s22 }
 0x806   : > { %v2556_v50 = vpop.xlane.xlu1 %2555 }
 0x807   : > { %v2564_v36 = vsub.f32 %v6148_v26, %v2556_v50  ;;  %v2923_v26 = vmul.f32 %v6051_v6, %v2913_v44 }
 0x809   : > { %v2579_v29 = vmul.f32 1.442695, %v2564_v36  ;;  %v2931_v19 = vmul.f32 %v2923_v26, %v5125_v25 }
 0x80b   : > { %4428 = vpow2.f32 %v2579_v29 }
 0x811   : > { %v6235_v2 = vpop.eup %4428 }
 0x812   : > { %v2602_v20 = vsel %vm1088_vm7, %v6235_v2, 0.0 }
 0x814   : > { %v2589_v1 = vpop.xlane.xlu0 %2588 }
 0x815   : > { %4430 = vrcp.f32 %v2589_v1 }
 0x816   : > { %2603 = vadd.xlane.f32.xlu0 %v2602_v20 }
 0x81b   : > { %v4431_v15 = vpop.eup %4430 }
 0x81c   : > { %v2595_v63 = vpop.xlane.xlu0 %2594  ;;  %v2615_v4 = vmul.f32 %v4431_v15, %v6154_v28 }
 0x81e   : > { %v2623_v52 = vpack.c.bf16 %v2615_v4, %v2615_v4 }
 0x820   : > { %v2656_v25 = vunpack.c.l.b16 %v2623_v52 }
 0x82a   : > { %3214 = vrot.lane.b32.xlu0 %v2931_v19, %s4736_s22 }
 0x82c   : > { %v2601_v0 = vpop.xlane.xlu2 %2600 }
 0x833   : > { %v2592_v42 = vpop.xlane.xlu1 %2591 }
 0x834   : > { %4432 = vrcp.f32 %v2592_v42 }
 0x835   : > { %4434 = vrcp.f32 %v2595_v63 }
 0x83a   : > { %v4433_v51 = vpop.eup %4432 }
 0x83b   : > { %v2616_v23 = vmul.f32 %v4433_v51, %v6176_v8  ;;  %v2598_v27 = vpop.xlane.xlu1 %2597  ;;  %v4435_v35 = vpop.eup %4434 }
 0x83c   : > { %4436 = vrcp.f32 %v2598_v27  ;;  %v2617_v48 = vmul.f32 %v4435_v35, %v6158_v3 }
 0x83d   : > { %v2624_v6 = vpack.c.bf16 %v2616_v23, %v2616_v23 }
 0x83e   : > { %v2625_v49 = vpack.c.bf16 %v2617_v48, %v2617_v48 }
 0x83f   : > { %v2657_v34 = vunpack.c.l.b16 %v2624_v6 }
 0x840   : > { %v2681_v8 = vunpack.c.l.b16 %v2625_v49 }
 0x841   : > { %v2658_v43 = vpack.c.b16 %v2657_v34, %v2656_v25 }
 0x842   : > { %v4437_v7 = vpop.eup %4436 }
 0x843   : > { %v2618_v33 = vmul.f32 %v4437_v7, %v6190_v60  ;;  %v2586_v18 = vpop.xlane.xlu1 %2585  ;;  %3966 = vmatmul.msk.bf16.vlgmr.msra.gmra.mxu3 %vm1088_vm7, %v2658_v43  ;;  %v2583_v28 = vpop.xlane.xlu0 %2582 }
 0x844   : > { %4438 = vrcp.f32 %v2586_v18 }
 0x845   : > { %v2626_v46 = vpack.c.bf16 %v2618_v33, %v2618_v33  ;;  %4440 = vrcp.f32 %v2583_v28 }
 0x846   : > { %4442 = vrcp.f32 %v2601_v0 }
 0x847   : > { %v2682_v58 = vunpack.c.l.b16 %v2626_v46 }
 0x849   : > { %v2683_v11 = vpack.c.b16 %v2682_v58, %v2681_v8 }
 0x84a   : > { %v4439_v59 = vpop.eup %4438 }
 0x84b   : > { %v4441_v62 = vpop.eup %4440  ;;  %v2614_v3 = vmul.f32 %v4439_v59, %v6200_v9  ;;  %3967 = vmatmul.msk.bf16.vlgmr.msra.gmra.mxu0 %vm1088_vm7, %v2683_v11 }
 0x84c   : > { %v2613_v39 = vmul.f32 %v4441_v62, %v6203_v56  ;;  %v4443_v54 = vpop.eup %4442 }
 0x84d   : > { %v2622_v37 = vpack.c.bf16 %v2614_v3, %v2614_v3  ;;  %v2619_v45 = vmul.f32 %v4443_v54, %v6166_v24  ;;  %v4101_v24 = vld [vmem:[#allocation11 + $0x18] sm:$0xff]  }
 0x84e   : > { %v2621_v60 = vpack.c.bf16 %v2613_v39, %v2613_v39  ;;  %v4102_v15 = vunpack.c.l.bf16 %v4101_v24  ;;  %v4103_v27 = vunpack.c.h.bf16 %v4101_v24 }
 0x84f   : > { %v2632_v22 = vunpack.c.l.b16 %v2622_v37  ;;  %v2627_v57 = vpack.c.bf16 %v2619_v45, %v2619_v45 }
 0x850   : > { %v2631_v31 = vunpack.c.l.b16 %v2621_v60 }
 0x851   : > { %v2706_v44 = vunpack.c.l.b16 %v2627_v57 }
 0x852   : > { %v2633_v30 = vpack.c.b16 %v2632_v22, %v2631_v31 }
 0x854   : > { %3965 = vmatmul.msk.bf16.vlgmr.msrb.gmra.mxu2 %vm1088_vm7, %v2633_v30 }
 0x856   : > { %v3127_v50 = vpop.permute.xlu0 %3126 }
 0x857   : > { %3976 = vmatmul.msk.f32.vlgmr.msrb.gmra.mxu3 %vm685_vm0, %v3127_v50 }
 0x85b   : > { %v3170_v36 = vpop.permute.xlu1 %3169 }
 0x85c   : > { %3980 = vmatmul.msk.f32.vlgmr.msrb.gmra.mxu0 %vm685_vm0, %v3170_v36 }
 0x85e   : > { %v3129_v29 = vpop.permute.xlu0 %3128 }
 0x85f   : > { %3977 = vmatmul.msk.f32.gmra.mxu3 %vm685_vm0, %v3129_v29 }
 0x863   : > { %v3172_v9 = vpop.permute.xlu1 %3171 }
 0x864   : > { %3972 = vmatmul.msk.f32.vlgmr.msra.gmra.mxu2 %vm685_vm0, %v6142_v61  ;;  %3981 = vmatmul.msk.f32.gmra.mxu0 %vm685_vm0, %v3172_v9 }
 0x86b   : > { %v3219_v56 = vpop.permute.xlu1 %3218 }
 0x86c   : > { %3973 = vmatmul.msk.f32.gmra.mxu2 %vm685_vm0, %v6145_v32  ;;  %3983 = vmatpush.xpose.msk.msrb.mxu1 %vm685_vm0, %v3219_v56  ;;  %v3213_v32 = vpop.permute.xlu2 %3212 }
 0x889   : > { %v2604_v41 = vpop.xlane.xlu0 %2603 }
 0x88a   : > { %4444 = vrcp.f32 %v2604_v41 }
 0x890   : > { %v4445_v20 = vpop.eup %4444 }
 0x891   : > { %v2620_v55 = vmul.f32 %v4445_v20, %v6235_v2 }
 0x893   : > { %v2628_v61 = vpack.c.bf16 %v2620_v55, %v2620_v55 }
 0x895   : > { %v2707_v26 = vunpack.c.l.b16 %v2628_v61 }
 0x897   : > { %v2708_v19 = vpack.c.b16 %v2707_v26, %v2706_v44 }
 0x899   : > { %3968 = vmatmul.msk.bf16.vlgmr.msra.gmra.mxu1 %vm1088_vm7, %v2708_v19 }
 0x89c   : > { %v3215_v1 = vpop.permute.xlu0 %3214 }
 0x8a9   : > { %3984 = vmatmul.msk.f32.vlgmr.msrb.gmra.mxu1 %vm685_vm0, %v3213_v32 }
 0x8b1   : > { %3985 = vmatmul.msk.f32.gmra.mxu1 %vm685_vm0, %v3215_v1  ;;  %vm2049_vm0 = vcmask 126016  }
 0x8c6   : > { %v6269_v4 = vpop.f32.mrf.mxu3 }
 0x8c8   : > { %v6265_v63 = vpop.f32.mrf.mxu0 }
 0x8ce   : > { %v6276_v6 = vpop.f32.mrf.mxu3 }
 0x8d0   : > { %v6267_v42 = vpop.f32.mrf.mxu0 }
 0x8d7   : > { %v6271_v2 = vpop.f32.mrf.mxu2 }
 0x8d9   : > { %v3204_v51 = vpop.f32.mrf.mxu0 }
 0x8da   : > { %v3205_v52 = vadd.f32 %v4102_v15, %v3204_v51  ;;  %v3161_v49 = vpop.f32.mrf.mxu3 }
 0x8db   : > { %v3162_v18 = vadd.f32 %v4102_v15, %v3161_v49 }
 0x8dc   : > { %v3265_v23 = vsel %vm1088_vm7, %v3205_v52, -inf }
 0x8dd   : > { %3266 = vmax.xlane.f32.xlu0 %v3265_v23  ;;  %v3259_v58 = vsel %vm1088_vm7, %v3162_v18, -inf }
 0x8df   : > { %v6274_v35 = vpop.f32.mrf.mxu2 }
 0x8e1   : > { %v3207_v25 = vpop.f32.mrf.mxu0 }
 0x8e2   : > { %v3208_v48 = vadd.f32 %v4103_v27, %v3207_v25  ;;  %v3164_v11 = vpop.f32.mrf.mxu3 }
 0x8e3   : > { %v3165_v59 = vadd.f32 %v4103_v27, %v3164_v11 }
 0x8e4   : > { %v3268_v34 = vsel %vm1088_vm7, %v3208_v48, -inf }
 0x8e5   : > { %3269 = vmax.xlane.f32.xlu2 %v3268_v34  ;;  %v3262_v62 = vsel %vm1088_vm7, %v3165_v59, -inf }
 0x8e7   : > { %v3118_v43 = vpop.f32.mrf.mxu2 }
 0x8e8   : > { %v3119_v7 = vadd.f32 %v4102_v15, %v3118_v43 }
 0x8ea   : > { %v3253_v33 = vsel %vm1088_vm7, %v3119_v7, -inf }
 0x8eb   : > { %3254 = vmax.xlane.f32.xlu1 %v3253_v33 }
 0x8ef   : > { %v3121_v28 = vpop.f32.mrf.mxu2 }
 0x8f0   : > { %v3122_v46 = vadd.f32 %v4103_v27, %v3121_v28 }
 0x8f2   : > { %v3256_v8 = vsel %vm1088_vm7, %v3122_v46, -inf }
 0x8f3   : > { %3257 = vmax.xlane.f32.xlu2 %v3256_v8  ;;  %3260 = vmax.xlane.f32.xlu1 %v3259_v58  ;;  %v2013_v58 = vpack.c.bf16 %v6070_v16, %v6070_v16 }
 0x8fb   : > { %3263 = vmax.xlane.f32.xlu2 %v3262_v62 }
 0x916   : > { %v6283_v3 = vpop.f32.mrf.mxu1 }
 0x91e   : > { %v6285_v39 = vpop.f32.mrf.mxu1 }
 0x926   : > { %v3247_v37 = vpop.f32.mrf.mxu1 }
 0x927   : > { %v3248_v60 = vadd.f32 %v4102_v15, %v3247_v37  ;;  %v2734_v37 = vpack.c.bf16 %v6267_v42, %v6267_v42  ;;  %v2010_v42 = vpack.c.bf16 %v6077_v40, %v6077_v40  ;;  %v2733_v40 = vpack.c.bf16 %v6265_v63, %v6265_v63 }
 0x929   : > { %v3271_v22 = vsel %vm1088_vm7, %v3248_v60, -inf }
 0x92a   : > { %3272 = vmax.xlane.f32.xlu0 %v3271_v22  ;;  %v2730_v22 = vpack.c.bf16 %v6274_v35, %v6274_v35  ;;  %v2016_v35 = vpack.c.bf16 %v6097_v21, %v6097_v21 }
 0x92e   : > { %v3250_v31 = vpop.f32.mrf.mxu1 }
 0x92f   : > { %v3251_v30 = vadd.f32 %v4103_v27, %v3250_v31 }
 0x931   : > { %v3274_v50 = vsel %vm1088_vm7, %v3251_v30, -inf }
 0x932   : > { %3275 = vmax.xlane.f32.xlu1 %v3274_v50 }
 0x950   : > { %v3267_v36 = vpop.xlane.xlu0 %3266 }
 0x951   : > { %v3281_v29 = vsub.f32 %v3205_v52, %v3267_v36 }
 0x953   : > { %v3293_v9 = vmul.f32 1.442695, %v3281_v29 }
 0x955   : > { %4446 = vpow2.f32 %v3293_v9 }
 0x958   : > { %v3270_v56 = vpop.xlane.xlu2 %3269 }
 0x959   : > { %v3282_v0 = vsub.f32 %v3208_v48, %v3270_v56 }
 0x95b   : > { %v6289_v41 = vpop.eup %4446  ;;  %v3295_v54 = vmul.f32 1.442695, %v3282_v0 }
 0x95c   : > { %v3313_v45 = vsel %vm1088_vm7, %v6289_v41, 0.0 }
 0x95d   : > { %4448 = vpow2.f32 %v3295_v54  ;;  %3314 = vadd.xlane.f32.xlu1 %v3313_v45 }
 0x95e   : > { %v3255_v20 = vpop.xlane.xlu1 %3254 }
 0x95f   : > { %v3277_v57 = vsub.f32 %v3119_v7, %v3255_v20 }
 0x961   : > { %v3285_v55 = vmul.f32 1.442695, %v3277_v57 }
 0x963   : > { %v6293_v61 = vpop.eup %4448  ;;  %4450 = vpow2.f32 %v3285_v55 }
 0x964   : > { %v3316_v44 = vsel %vm1088_vm7, %v6293_v61, 0.0 }
 0x965   : > { %3317 = vadd.xlane.f32.xlu2 %v3316_v44 }
 0x966   : > { %v3258_v26 = vpop.xlane.xlu2 %3257  ;;  %v3261_v19 = vpop.xlane.xlu1 %3260 }
 0x967   : > { %v3278_v32 = vsub.f32 %v3122_v46, %v3258_v26  ;;  %v3279_v1 = vsub.f32 %v3162_v18, %v3261_v19  ;;  %v2009_v18 = vpack.c.bf16 %v6067_v53, %v6067_v53 }
 0x969   : > { %v6297_v24 = vpop.eup %4450  ;;  %v3287_v15 = vmul.f32 1.442695, %v3278_v32  ;;  %v3289_v51 = vmul.f32 1.442695, %v3279_v1 }
 0x96a   : > { %v3301_v52 = vsel %vm1088_vm7, %v6297_v24, 0.0 }
 0x96b   : > { %4452 = vpow2.f32 %v3287_v15 }
 0x96c   : > { %4454 = vpow2.f32 %v3289_v51 }
 0x96d   : > { %3302 = vadd.xlane.f32.xlu2 %v3301_v52 }
 0x96e   : > { %v3264_v23 = vpop.xlane.xlu2 %3263 }
 0x96f   : > { %v3280_v27 = vsub.f32 %v3165_v59, %v3264_v23  ;;  %v2729_v59 = vpack.c.bf16 %v6271_v2, %v6271_v2  ;;  %v2732_v2 = vpack.c.bf16 %v6276_v6, %v6276_v6 }
 0x971   : > { %v6301_v25 = vpop.eup %4452  ;;  %v3291_v48 = vmul.f32 1.442695, %v3280_v27 }
 0x972   : > { %v6303_v34 = vpop.eup %4454  ;;  %v3304_v43 = vsel %vm1088_vm7, %v6301_v25, 0.0 }
 0x973   : > { %4456 = vpow2.f32 %v3291_v48  ;;  %3305 = vadd.xlane.f32.xlu0 %v3304_v43  ;;  %v3307_v7 = vsel %vm1088_vm7, %v6303_v34, 0.0 }
 0x974   : > { %3308 = vadd.xlane.f32.xlu1 %v3307_v7 }
 0x979   : > { %v6309_v49 = vpop.eup %4456 }
 0x97a   : > { %v3310_v33 = vsel %vm1088_vm7, %v6309_v49, 0.0 }
 0x97b   : > { %3311 = vadd.xlane.f32.xlu2 %v3310_v33 }
 0x987   : > { %3354 = vrot.lane.b32.xlu0 %v5419_v17, %s4736_s22 }
 0x98d   : > { %3404 = vrot.lane.b32.xlu1 %v5443_v13, %s4736_s22 }
 0x995   : > { %3429 = vrot.lane.b32.xlu1 %v5468_v10, %s4736_s22 }
 0x99d   : > { %2025 = vrot.lane.b32.xlu1 %v2009_v18, %s4737_s17  ;;  %v3273_v28 = vpop.xlane.xlu0 %3272 }
 0x99e   : > { %v3283_v46 = vsub.f32 %v3248_v60, %v3273_v28  ;;  %v2015_v60 = vpack.c.bf16 %v6087_v47, %v6087_v47  ;;  %v2011_v47 = vpack.c.bf16 %v6064_v12, %v6064_v12  ;;  %v2735_v12 = vpack.c.bf16 %v6283_v3, %v6283_v3 }
 0x9a0   : > { %v3297_v8 = vmul.f32 1.442695, %v3283_v46 }
 0x9a2   : > { %4458 = vpow2.f32 %v3297_v8 }
 0x9a5   : > { %2033 = vrot.lane.b32.xlu1 %v2013_v58, %s4737_s17  ;;  %v3276_v17 = vpop.xlane.xlu1 %3275 }
 0x9a6   : > { %v3284_v13 = vsub.f32 %v3251_v30, %v3276_v17  ;;  %v2731_v30 = vpack.c.bf16 %v6269_v4, %v6269_v4 }
 0x9a8   : > { %v6325_v11 = vpop.eup %4458  ;;  %v3299_v10 = vmul.f32 1.442695, %v3284_v13 }
 0x9a9   : > { %v3319_v53 = vsel %vm1088_vm7, %v6325_v11, 0.0 }
 0x9aa   : > { %4460 = vpow2.f32 %v3299_v10  ;;  %3320 = vadd.xlane.f32.xlu2 %v3319_v53 }
 0x9ad   : > { %2745 = vrot.lane.b32.xlu1 %v2729_v59, %s4738_s18 }
 0x9b0   : > { %v6332_v62 = vpop.eup %4460 }
 0x9b1   : > { %v3322_v16 = vsel %vm1088_vm7, %v6332_v62, 0.0 }
 0x9b2   : > { %3323 = vadd.xlane.f32.xlu0 %v3322_v16 }
 0x9b5   : > { %2755 = vrot.lane.b32.xlu1 %v2734_v37, %s4738_s18 }
 0x9bd   : > { %2037 = vrot.lane.b32.xlu1 %v2015_v60, %s4737_s17 }
 0x9c2   : > { %3379 = vrot.lane.b32.xlu2 %v5436_v5, %s4736_s22  ;;  %v2014_v5 = vpack.c.bf16 %v6081_v14, %v6081_v14  ;;  %v2012_v14 = vpack.c.bf16 %v6073_v38, %v6073_v38  ;;  %s3651_s22 = sshll.u32 %s3648_s19, 4  ;;  %s3652_s22 = int_to_ptr.hbm [resolvable:$true] %s3651_s22 }
 0x9c5   : > { %2751 = vrot.lane.b32.xlu1 %v2732_v2, %s4738_s18 }
 0x9c6   : > { %2747 = vrot.lane.b32.xlu0 %v2730_v22, %s4738_s18 }
 0x9ca   : > { %2027 = vrot.lane.b32.xlu2 %v2010_v42, %s4737_s17 }
 0x9ce   : > { %2029 = vrot.lane.b32.xlu0 %v2011_v47, %s4737_s17 }
 0x9d0   : > { %v3315_v63 = vpop.xlane.xlu1 %3314 }
 0x9d2   : > { %2035 = vrot.lane.b32.xlu2 %v2014_v5, %s4737_s17 }
 0x9d6   : > { %2039 = vrot.lane.b32.xlu0 %v2016_v35, %s4737_s17 }
 0x9d8   : > { %v3318_v6 = vpop.xlane.xlu2 %3317 }
 0x9da   : > { %2753 = vrot.lane.b32.xlu2 %v2733_v40, %s4738_s18 }
 0x9de   : > { %2757 = vrot.lane.b32.xlu0 %v2735_v12, %s4738_s18 }
 0x9e0   : > { %v3303_v31 = vpop.xlane.xlu2 %3302 }
 0x9e2   : > { %2031 = vrot.lane.b32.xlu2 %v2012_v14, %s4737_s17 }
 0x9e6   : > { %v3306_v21 = vpop.xlane.xlu0 %3305 }
 0x9e7   : > { %4462 = vrcp.f32 %v3306_v21  ;;  %v3309_v45 = vpop.xlane.xlu1 %3308 }
 0x9e8   : > { %4464 = vrcp.f32 %v3303_v31 }
 0x9e9   : > { %4466 = vrcp.f32 %v3318_v6 }
 0x9ea   : > { %2749 = vrot.lane.b32.xlu2 %v2731_v30, %s4738_s18  ;;  %4468 = vrcp.f32 %v3315_v63 }
 0x9ed   : > { %v4463_v50 = vpop.eup %4462 }
 0x9ee   : > { %v4465_v3 = vpop.eup %4464  ;;  %v3334_v36 = vmul.f32 %v4463_v50, %v6301_v25 }
 0x9ef   : > { %v3333_v38 = vmul.f32 %v4465_v3, %v6297_v24  ;;  %v4467_v29 = vpop.eup %4466 }
 0x9f0   : > { %v3342_v9 = vpack.c.bf16 %v3334_v36, %v3334_v36  ;;  %v4469_v56 = vpop.eup %4468  ;;  %v3338_v0 = vmul.f32 %v4467_v29, %v6293_v61 }
 0x9f1   : > { %v3341_v54 = vpack.c.bf16 %v3333_v38, %v3333_v38  ;;  %v3337_v4 = vmul.f32 %v4469_v56, %v6289_v41  ;;  %v3312_v41 = vpop.xlane.xlu2 %3311  ;;  %v2736_v38 = vpack.c.bf16 %v6285_v39, %v6285_v39  ;;  %v4083_v39 = vld [vmem:[#allocation13 + $0x28] sm:$0xff] }
 0x9f2   : > { %v3352_v20 = vunpack.c.l.b16 %v3342_v9  ;;  %v3346_v57 = vpack.c.bf16 %v3338_v0, %v3338_v0  ;;  %4470 = vrcp.f32 %v3312_v41 }
 0x9f3   : > { %v3351_v55 = vunpack.c.l.b16 %v3341_v54  ;;  %v3345_v26 = vpack.c.bf16 %v3337_v4, %v3337_v4  ;;  %4472 = vrcp.f32 %v3309_v45 }
 0x9f4   : > { %v3402_v32 = vunpack.c.l.b16 %v3346_v57 }
 0x9f5   : > { %v3353_v19 = vpack.c.b16 %v3352_v20, %v3351_v55  ;;  %v3401_v1 = vunpack.c.l.b16 %v3345_v26  ;;  %v4085_v55 = vld [vmem:[#allocation13 + $0x38] sm:$0xff]  ;;  %v4082_v26 = vld [vmem:[#allocation13 + $0x20] sm:$0xff] }
 0x9f7   : > { %v3403_v15 = vpack.c.b16 %v3402_v32, %v3401_v1  ;;  %v4080_v32 = vld [vmem:[#allocation13 + $0x10] sm:$0xff] }
 0x9f8   : > { %v4471_v23 = vpop.eup %4470 }
 0x9f9   : > { %v3355_v44 = vpop.permute.xlu0 %3354  ;;  %v4473_v27 = vpop.eup %4472  ;;  %v3336_v25 = vmul.f32 %v4471_v23, %v6309_v49 }
 0x9fa   : > { %3367 = vmatpush.bf16.msrb.mxu2 %v3355_v44  ;;  %v3335_v48 = vmul.f32 %v4473_v27, %v6303_v34  ;;  %v4084_v44 = vld [vmem:[#allocation13 + $0x30] sm:$0xff] }
 0x9fb   : > { %v3344_v7 = vpack.c.bf16 %v3336_v25, %v3336_v25 }
 0x9fc   : > { %v3343_v18 = vpack.c.bf16 %v3335_v48, %v3335_v48 }
 0x9fd   : > { %3986 = vmatmul.msk.bf16.vlgmr.msrb.gmra.mxu2 %vm1088_vm7, %v3353_v19  ;;  %v3377_v28 = vunpack.c.l.b16 %v3344_v7  ;;  %v4081_v19 = vld [vmem:[#allocation13 + $0x18] sm:$0xff] }
 0x9fe   : > { %v3376_v46 = vunpack.c.l.b16 %v3343_v18  ;;  %3598 = vmatpush.bf16.msra.mxu2 %v4085_v55 }
 0x9ff   : > { %v3405_v24 = vpop.permute.xlu1 %3404 }
 0xa00   : > { %3417 = vmatpush.bf16.msra.mxu0 %v3405_v24  ;;  %v3378_v13 = vpack.c.b16 %v3377_v28, %v3376_v46  ;;  %v4079_v24 = vld [vmem:[#allocation13 + $0x8] sm:$0xff]  ;;  %v4221_v28 = vld [vmem:[%s6457_s6] ss:$0 sm:$0xff] }
 0xa02   : > { %3599 = vmatpush.bf16.msra.mxu2 %v4084_v44 }
 0xa03   : > { %3988 = vmatmul.msk.bf16.vlgmr.msra.gmra.mxu0 %vm1088_vm7, %v3403_v15  ;;  %v4078_v15 = vld [vmem:[#allocation13] sm:$0xff] }
 0xa06   : > { %3600 = vmatpush.bf16.msra.mxu2 %v4083_v39 }
 0xa07   : > { %v3430_v61 = vpop.permute.xlu1 %3429 }
 0xa08   : > { %3442 = vmatpush.bf16.msra.mxu1 %v3430_v61 }
 0xa0a   : > { %3601 = vmatpush.bf16.msra.mxu2 %v4082_v26 }
 0xa0e   : > { %3602 = vmatpush.bf16.msra.mxu2 %v4081_v19 }
 0xa0f   : > { %v2026_v51 = vpop.permute.xlu1 %2025 }
 0xa10   : > { %2050 = vst.msk [vmem:[#allocation2] sm:$0xf] %vm2049_vm0, %v2026_v51 }
 0xa12   : > { %3603 = vmatpush.bf16.msra.mxu2 %v4080_v32 }
 0xa16   : > { %3604 = vmatpush.bf16.msra.mxu2 %v4079_v24 }
 0xa17   : > { %v2034_v52 = vpop.permute.xlu1 %2033 }
 0xa18   : > { %2054 = vst.msk [vmem:[#allocation2 + $0x10] sm:$0xf] %vm2049_vm0, %v2034_v52 }
 0xa1a   : > { %3605 = vmatpush.bf16.msra.mxu2 %v4078_v15 }
 0xa1d   : > { %v3321_v43 = vpop.xlane.xlu2 %3320 }
 0xa1e   : > { %4474 = vrcp.f32 %v3321_v43 }
 0xa1f   : > { %v2746_v33 = vpop.permute.xlu1 %2745 }
 0xa20   : > { %2770 = vst.msk [vmem:[#allocation2] sm:$0xf] %vm2769_vm9, %v2746_v33 }
 0xa24   : > { %v4475_v17 = vpop.eup %4474 }
 0xa25   : > { %v3380_v8 = vpop.permute.xlu2 %3379  ;;  %v3324_v58 = vpop.xlane.xlu0 %3323  ;;  %v3339_v49 = vmul.f32 %v4475_v17, %v6325_v11 }
 0xa26   : > { %4476 = vrcp.f32 %v3324_v58  ;;  %3392 = vmatpush.bf16.msra.mxu3 %v3380_v8 }
 0xa27   : > { %v2756_v10 = vpop.permute.xlu1 %2755  ;;  %v3347_v53 = vpack.c.bf16 %v3339_v49, %v3339_v49 }
 0xa29   : > { %3987 = vmatmul.msk.bf16.vlgmr.msra.gmra.mxu3 %vm1088_vm7, %v3378_v13  ;;  %v3426_v2 = vunpack.c.l.b16 %v3347_v53 }
 0xa2a   : > { %4104 = vmatpush.bf16.msrb.mxu3 %v4085_v55 }
 0xa2c   : > { %v4477_v34 = vpop.eup %4476 }
 0xa2d   : > { %v3340_v59 = vmul.f32 %v4477_v34, %v6332_v62  ;;  %v2028_v16 = vpop.permute.xlu2 %2027 }
 0xa2e   : > { %2051 = vst.msk [vmem:[#allocation2 + $0x4] sm:$0xf] %vm2049_vm0, %v2028_v16  ;;  %4105 = vmatpush.bf16.msrb.mxu3 %v4084_v44 }
 0xa2f   : > { %v3348_v37 = vpack.c.bf16 %v3340_v59, %v3340_v59  ;;  %v2038_v60 = vpop.permute.xlu1 %2037 }
 0xa30   : > { %2056 = vst.msk [vmem:[#allocation2 + $0x18] sm:$0xf] %vm2049_vm0, %v2038_v60 }
 0xa31   : > { %v3427_v22 = vunpack.c.l.b16 %v3348_v37 }
 0xa32   : > { %4106 = vmatpush.bf16.msrb.mxu3 %v4083_v39 }
 0xa33   : > { %v3428_v42 = vpack.c.b16 %v3427_v22, %v3426_v2 }
 0xa35   : > { %v2036_v47 = vpop.permute.xlu2 %2035  ;;  %3989 = vmatmul.msk.bf16.vlgmr.msra.gmra.mxu1 %vm1088_vm7, %v3428_v42  ;;  %vm3489_vm7 = vcmask 257216  }
 0xa36   : > { %2055 = vst.msk [vmem:[#allocation2 + $0x14] sm:$0xf] %vm2049_vm0, %v2036_v47  ;;  %4107 = vmatpush.bf16.msrb.mxu3 %v4082_v26 }
 0xa37   : > { %2775 = vst.msk [vmem:[#allocation2 + $0x14] sm:$0xf] %vm2769_vm9, %v2756_v10  ;;  %v2752_v40 = vpop.permute.xlu1 %2751 }
 0xa38   : > { %v2748_v11 = vpop.permute.xlu0 %2747 }
 0xa39   : > { %2771 = vst.msk [vmem:[#allocation2 + $0x4] sm:$0xf] %vm2769_vm9, %v2748_v11 }
 0xa3a   : > { %4108 = vmatpush.bf16.msrb.mxu3 %v4081_v19 }
 0xa3d   : > { %v2754_v62 = vpop.permute.xlu2 %2753 }
 0xa3e   : > { %2774 = vst.msk [vmem:[#allocation2 + $0x10] sm:$0xf] %vm2769_vm9, %v2754_v62  ;;  %4109 = vmatpush.bf16.msrb.mxu3 %v4080_v32 }
 0xa40   : > { %v2030_v5 = vpop.permute.xlu0 %2029 }
 0xa41   : > { %2052 = vst.msk [vmem:[#allocation2 + $0x8] sm:$0xf] %vm2049_vm0, %v2030_v5 }
 0xa42   : > { %4110 = vmatpush.bf16.msrb.mxu3 %v4079_v24 }
 0xa45   : > { %v2032_v35 = vpop.permute.xlu2 %2031 }
 0xa46   : > { %2053 = vst.msk [vmem:[#allocation2 + $0xc] sm:$0xf] %vm2049_vm0, %v2032_v35  ;;  %4111 = vmatpush.bf16.msrb.mxu3 %v4078_v15 }
 0xa47   : > { %2773 = vst.msk [vmem:[#allocation2 + $0xc] sm:$0xf] %vm2769_vm9, %v2752_v40 }
 0xa48   : > { %v2040_v6 = vpop.permute.xlu0 %2039 }
 0xa49   : > { %2057 = vst.msk [vmem:[#allocation2 + $0x1c] sm:$0xf] %vm2049_vm0, %v2040_v6 }
 0xa4d   : > { %v2750_v12 = vpop.permute.xlu2 %2749 }
 0xa4e   : > { %2772 = vst.msk [vmem:[#allocation2 + $0x8] sm:$0xf] %vm2769_vm9, %v2750_v12 }
 0xa50   : > { %v2758_v14 = vpop.permute.xlu0 %2757 }
 0xa51   : > { %2776 = vst.msk [vmem:[#allocation2 + $0x18] sm:$0xf] %vm2769_vm9, %v2758_v14 }
 0xa80   : > { %v3419_v31 = vpop.f32.mrf.mxu0  ;;  %v3369_v30 = vpop.f32.mrf.mxu2 }
 0xa81   : > { %v3453_v21 = vpack.c.bf16 %v3419_v31, %v3419_v31  ;;  %v3449_v50 = vpack.c.bf16 %v3369_v30, %v3369_v30 }
 0xa83   : > { %3473 = vrot.lane.b32.xlu2 %v3453_v21, %s4739_s11 }
 0xa88   : > { %v3421_v63 = vpop.f32.mrf.mxu0  ;;  %v3371_v36 = vpop.f32.mrf.mxu2 }
 0xa89   : > { %v3454_v3 = vpack.c.bf16 %v3421_v63, %v3421_v63  ;;  %v3450_v29 = vpack.c.bf16 %v3371_v36, %v3371_v36 }
 0xa8b   : > { %3475 = vrot.lane.b32.xlu1 %v3454_v3, %s4739_s11  ;;  %3465 = vrot.lane.b32.xlu2 %v3449_v50, %s4739_s11 }
 0xa93   : > { %2759 = vrot.lane.b32.xlu2 %v2736_v38, %s4738_s18  ;;  %3467 = vrot.lane.b32.xlu1 %v3450_v29, %s4739_s11  ;;  %s4658_s18 = sshra.s32 %s3652_s22, 4  ;;  %s4659_s18 = int_to_ptr.hbm [resolvable:$true] %s4658_s18 }
 0xa94   : > { %s4660_s8 = scalar_lea.hbm %s4659_s18, 64  ;;  %p4665_p12 = scmp.lt.s32.totalorder %s4659_s18, %s6458_s7 }
 0xa95   : > { %p4661_p1 = scmp.ne.s32.totalorder %s4659_s18, %s4660_s8  ;;  %p4666_p8 = scmp.lt.s32.totalorder %s4664_s21, %s4660_s8 }
 0xa97   : > { %p4662_p3 = pnand %p4661_p1, %p4873_p13  ;;  %p4667_p7 = por %p4666_p8, %p4665_p12 }
 0xa99   : > { %p4663_p5 = pneg %p4662_p3 }
 0xa9b   : > { %p4668_p9 = pnand %p4667_p7, %p4663_p5 }
 0xaac   : > { %v3394_v9 = vpop.f32.mrf.mxu3 }
 0xaad   : > { %v3451_v56 = vpack.c.bf16 %v3394_v9, %v3394_v9 }
 0xaaf   : > { %3469 = vrot.lane.b32.xlu1 %v3451_v56, %s4739_s11 }
 0xab2   : > { %v3444_v0 = vpop.f32.mrf.mxu1 }
 0xab3   : > { %v3455_v54 = vpack.c.bf16 %v3444_v0, %v3444_v0 }
 0xab4   : > { %v3396_v4 = vpop.f32.mrf.mxu3 }
 0xab5   : > { %v3452_v45 = vpack.c.bf16 %v3396_v4, %v3396_v4  ;;  %3477 = vrot.lane.b32.xlu2 %v3455_v54, %s4739_s11 }
 0xab7   : > { %3471 = vrot.lane.b32.xlu0 %v3452_v45, %s4739_s11 }
 0xaba   : > { %v3446_v20 = vpop.f32.mrf.mxu1 }
 0xabb   : > { %v3456_v57 = vpack.c.bf16 %v3446_v20, %v3446_v20 }
 0xabd   : > { %3479 = vrot.lane.b32.xlu1 %v3456_v57, %s4739_s11 }
 0xadd   : > { %v3474_v1 = vpop.permute.xlu2 %3473 }
 0xade   : > { %3494 = vst.msk [vmem:[#allocation2 + $0x10] sm:$0xf] %vm3489_vm7, %v3474_v1 }
 0xae5   : > { %v3466_v61 = vpop.permute.xlu2 %3465 }
 0xae6   : > { %3490 = vst.msk [vmem:[#allocation2] sm:$0xf] %vm3489_vm7, %v3466_v61 }
 0xaed   : > { %v2760_v41 = vpop.permute.xlu2 %2759 }
 0xaee   : > { %2777 = vst.msk [vmem:[#allocation2 + $0x1c] sm:$0xf] %vm2769_vm9, %v2760_v41 }
 0xafd   : > { %v3476_v51 = vpop.permute.xlu1 %3475 }
 0xafe   : > { %3495 = vst.msk [vmem:[#allocation2 + $0x14] sm:$0xf] %vm3489_vm7, %v3476_v51 }
 0xb05   : > { %v3468_v52 = vpop.permute.xlu1 %3467  ;;  %v4076_v23 = vld [vmem:[#allocation2 + $0x10] sm:$0xff] }
 0xb06   : > { %3491 = vst.msk [vmem:[#allocation2 + $0x4] sm:$0xf] %vm3489_vm7, %v3468_v52  ;;  %3616 = vmatmul.bf16.vlgmr.msrb.gmra.mxu3 %v4076_v23 }
 0xb0d   : > { %v4074_v27 = vld [vmem:[#allocation2] sm:$0xff] }
 0xb0e   : > { %3606 = vmatmul.bf16.vlgmr.msra.gmra.mxu2 %v4074_v27 }
 0xb0f   : > { %v3478_v25 = vpop.permute.xlu2 %3477 }
 0xb10   : > { %3496 = vst.msk [vmem:[#allocation2 + $0x18] sm:$0xf] %vm3489_vm7, %v3478_v25 }
 0xb21   : > { %v3470_v48 = vpop.permute.xlu1 %3469 }
 0xb22   : > { %3492 = vst.msk [vmem:[#allocation2 + $0x8] sm:$0xf] %vm3489_vm7, %v3470_v48 }
 0xb29   : > { %v3472_v43 = vpop.permute.xlu0 %3471 }
 0xb2a   : > { %3493 = vst.msk [vmem:[#allocation2 + $0xc] sm:$0xf] %vm3489_vm7, %v3472_v43 }
 0xb2f   : > { %v3480_v7 = vpop.permute.xlu1 %3479 }
 0xb30   : > { %3497 = vst.msk [vmem:[#allocation2 + $0x1c] sm:$0xf] %vm3489_vm7, %v3480_v7 }
 0xb31   : > { %v4075_v33 = vld [vmem:[#allocation2 + $0x8] sm:$0xff] }
 0xb32   : > { %3611 = vmatmul.bf16.gmra.mxu2 %v4075_v33 }
 0xb37   : > { %v4077_v18 = vld [vmem:[#allocation2 + $0x18] sm:$0xff] }
 0xb38   : > { %3621 = vmatmul.bf16.gmra.mxu3 %v4077_v18 }
 0xb89   : > { %v3617_v46 = vpop.f32.mrf.mxu3 }
 0xb8a   : > { %v3618_v8 = vadd.f32 %v4221_v28, %v3617_v46 }
 0xb8c   : > { %3631 = vst [vmem:[%s377_s16 + $0x20] sm:$0xff] %v3618_v8 }
 0xb91   : > { %v3607_v58 = vpop.f32.mrf.mxu2  ;;  %v3619_v17 = vpop.f32.mrf.mxu3 }
 0xb92   : > { %v3608_v13 = vadd.f32 %v4221_v28, %v3607_v58  ;;  %v3620_v10 = vadd.f32 %v4221_v28, %v3619_v17 }
 0xb94   : > { %3627 = vst [vmem:[%s377_s16] sm:$0xff] %v3608_v13 }
 0xb95   : > { %3632 = vst [vmem:[%s377_s16 + $0x28] sm:$0xff] %v3620_v10 }
 0xb99   : > { %v3609_v49 = vpop.f32.mrf.mxu2 }
 0xb9a   : > { %v3610_v34 = vadd.f32 %v4221_v28, %v3609_v49 }
 0xb9c   : > { %3628 = vst [vmem:[%s377_s16 + $0x8] sm:$0xff] %v3610_v34 }
 0xbb5   : > { %v3612_v53 = vpop.f32.mrf.mxu2 }
 0xbb6   : > { %v3613_v59 = vadd.f32 %v4221_v28, %v3612_v53 }
 0xbb8   : > { %3629 = vst [vmem:[%s377_s16 + $0x10] sm:$0xff] %v3613_v59 }
 0xbbb   : > { %v3622_v16 = vpop.f32.mrf.mxu3 }
 0xbbc   : > { %v3623_v37 = vadd.f32 %v4221_v28, %v3622_v16 }
 0xbbd   : > { %v3614_v60 = vpop.f32.mrf.mxu2 }
 0xbbe   : > { %3633 = vst [vmem:[%s377_s16 + $0x30] sm:$0xff] %v3623_v37  ;;  %v3615_v2 = vadd.f32 %v4221_v28, %v3614_v60 }
 0xbc0   : > { %3630 = vst [vmem:[%s377_s16 + $0x18] sm:$0xff] %v3615_v2 }
 0xbc3   : > { %v3624_v22 = vpop.f32.mrf.mxu3 }
 0xbc4   : > { %v3625_v42 = vadd.f32 %v4221_v28, %v3624_v22 }
 0xbc6   : > { %3634 = vst [vmem:[%s377_s16 + $0x38] sm:$0xff] %v3625_v42 }
 0xbc7   : > { %4671 = shalt.err (!%p4668_p9)
}
 0xbc8   : > { %s4740_s14 = smov 128  }
 0xbc9   : > { %4134 = dma.vmem_to_hbm [thread:$0]  (%p4873_p13), %s3650_s29, 1024, %s3652_s22, %s3636_s13, %s4740_s14, %s4740_s14, %s4737_s17  }
 0xbca PF: > { %s3666_s16 = sand.u32 1, %s4710_s24   ;;  %p6545_p10 = scmp.ge.s32.totalorder %s4722_s27, 2 }
 0xbcb   : > { %s3667_s20 = scalar_lea.sflag [#allocation5], %s3666_s16 }
 0xbcc   : > { %p4157_p11 = pnand %p6545_p10, %p4878_p4 }
 0xbce   : > { %p4158_p0 = pneg %p4157_p11 }
 0xbd0   : > { %4705 = dma.done.wait (%p4158_p0), %s3667_s20, 1024  }
 0xbd1   : > { %4707 = vsyncadd (%p4158_p0), %s3667_s20, 4294966272  ;;  %p23_p2 = scmp.ge.s32.totalorder %s4853_s23, 4   ;;  %s6546_s24 = smov %s4714_s25 }
 0xbd2   : > { %s6547_s25 = smov %s4718_s26  ;;  %s6548_s26 = smov %s4865_s10 }
 0xbd3   : > { %s6549_s27 = smov %s4853_s23  ;;  %25 = sbr.rel (!%p23_p2) target bundleno = 10 (0xa), region = 117 }
 0xbd8   :  { %3673 = vsyncpa [#allocation4], 1 }
 0xbd9   :  { %3675 = vsyncpa [#allocation4 + $0x1], 1 }
 0xbda   :  { %3676 = vsyncpa [#allocation8], 1 }
 0xbdb   :  { %3677 = vsyncpa [#allocation12], 1 }
 0xbdc   :  { %3678 = vsyncpa [#allocation5], 1 }
 0xbdd   :  { %3680 = vsyncpa [#allocation5 + $0x1], 1 }
 0xbde   :  { %3681 = vsyncpa [#allocation6], 1 }
 0xbdf   :  { %3683 = vsyncpa [#allocation6 + $0x1], 1 }

</bundles_post_ra>
